<compile_context>
chip_gen: v7x
topology: tpu7x:2x2x1
jax: 0.10.0
libtpu: 0.0.40
codegen_flags: <defaults>
</compile_context>

<pallas_src>
import jax
import jax.numpy as jnp
import numpy as np
from jax.experimental import pallas as pl
from jax.experimental.pallas import tpu as pltpu


def _round_up(x, m):
    return (x + m - 1) // m * m


# ---------------------------------------------------------------------------
# Kernel
# ---------------------------------------------------------------------------
def _decoder_step_kernel(emb_ref, h_ref, c_ref, enc_ref, eproj_ref,
                         wa_h_ref, v_ref, w_gates_ref, b_gates_ref,
                         wfc_ref, bfc_ref,
                         pred_ref, hout_ref, cout_ref,
                         h_scr, ctx_scr):
    Hp = h_ref.shape[-1]

    # Attention + LSTM cell run once per batch tile (on the first O tile);
    # results are carried across the O loop in VMEM scratch.
    @pl.when(pl.program_id(1) == 0)
    def _attention_and_lstm():
        emb = emb_ref[...]                       # (TB, Ep)
        h = h_ref[...]                           # (TB, Hp)
        c = c_ref[...]                           # (TB, Hp)
        enc = enc_ref[...]                       # (TB, S, Hp)

        # --- Bahdanau attention (encoder projection + bias precomputed) ----
        h_proj = jnp.dot(h, wa_h_ref[...], preferred_element_type=jnp.float32)
        energy = jnp.tanh(h_proj[:, None, :] + eproj_ref[...])          # (TB,S,Hp)
        scores = jnp.sum(energy * v_ref[...][None, :, :], axis=-1)      # (TB,S)
        scores = scores - jnp.max(scores, axis=-1, keepdims=True)
        exp_s = jnp.exp(scores)
        inv_denom = pl.reciprocal(jnp.sum(exp_s, axis=-1, keepdims=True))
        attn = exp_s * inv_denom                                        # (TB,S)

        # context: VPU multiply + sublane (S) reduction per batch row.
        ctx = jnp.sum(attn[:, :, None] * enc, axis=1)                   # (TB,Hp)

        # --- fused LSTM cell: one matmul for all four gates -----------------
        x_cat = jnp.concatenate([emb, ctx, h], axis=-1)                 # (TB,Ep+2Hp)
        gates = (jnp.dot(x_cat, w_gates_ref[...],
                         preferred_element_type=jnp.float32)
                 + b_gates_ref[...])                                    # (TB,4Hp)
        i_g = jax.nn.sigmoid(gates[:, 0 * Hp:1 * Hp])
        f_g = jax.nn.sigmoid(gates[:, 1 * Hp:2 * Hp])
        g_g = jnp.tanh(gates[:, 2 * Hp:3 * Hp])
        o_g = jax.nn.sigmoid(gates[:, 3 * Hp:4 * Hp])
        c_new = f_g * c + i_g * g_g
        h_new = o_g * jnp.tanh(c_new)

        h_scr[...] = h_new
        ctx_scr[...] = ctx
        hout_ref[...] = h_new.astype(hout_ref.dtype)
        cout_ref[...] = c_new.astype(cout_ref.dtype)

    # --- FC head: one lane-dense O tile per grid step -----------------------
    hc = jnp.concatenate([h_scr[...], ctx_scr[...]], axis=-1)           # (TB,2Hp)
    pred_ref[...] = (jnp.dot(hc, wfc_ref[...], preferred_element_type=jnp.float32)
                     + bfc_ref[...]).astype(pred_ref.dtype)


# ---------------------------------------------------------------------------
# One-time parameter preparation (hoisted out of the decode loop)
# ---------------------------------------------------------------------------
def prepare_params(params):
    f32 = jnp.float32
    emb_matrix = jnp.asarray(params['embedding'], f32)     # (V, E)
    E = emb_matrix.shape[1]
    H = params['att_w'].shape[0]
    O = params['fc_w'].shape[0]

    Hp = _round_up(H, 128)
    Ep = _round_up(E, 128)
    Op = _round_up(O, 128)
    TO = max(t for t in (512, 256, 128) if Op % t == 0)    # lane-dense FC tile

    # Attention Linear(2H -> H), input order [h ; enc].
    wa = jnp.asarray(params['att_w'], f32)                 # (H, 2H)
    wa_h = jnp.zeros((Hp, Hp), f32).at[:H, :H].set(wa[:, :H].T)
    wa_e = jnp.zeros((Hp, Hp), f32).at[:H, :H].set(wa[:, H:].T)
    ba = jnp.zeros((Hp,), f32).at[:H].set(jnp.asarray(params['att_b'], f32))
    v = jnp.zeros((1, Hp), f32).at[0, :H].set(jnp.asarray(params['v_w'], f32)[0])

    # Fused LSTM gates: rows = [emb(Ep) ; ctx(Hp) ; h(Hp)], gate-major columns
    # padded per gate so every gate slice starts at a 128-aligned lane offset.
    wih = jnp.asarray(params['lstm_w_ih'], f32)            # (4H, E+H), input [emb ; ctx]
    whh = jnp.asarray(params['lstm_w_hh'], f32)            # (4H, H)
    b_sum = (jnp.asarray(params['lstm_b_ih'], f32)
             + jnp.asarray(params['lstm_b_hh'], f32))      # fold the two biases
    w_gates = jnp.zeros((Ep + 2 * Hp, 4 * Hp), f32)
    b_gates = jnp.zeros((1, 4 * Hp), f32)
    for g in range(4):                                     # gate order i, f, g, o
        rows = slice(g * H, (g + 1) * H)
        cols = slice(g * Hp, g * Hp + H)
        w_gates = w_gates.at[:E, cols].set(wih[rows, :E].T)
        w_gates = w_gates.at[Ep:Ep + H, cols].set(wih[rows, E:].T)
        w_gates = w_gates.at[Ep + Hp:Ep + Hp + H, cols].set(whh[rows, :].T)
        b_gates = b_gates.at[0, cols].set(b_sum[rows])

    # Fused FC: rows = [h_new(Hp) ; ctx(Hp)], padded output columns.
    wfc = jnp.asarray(params['fc_w'], f32)                 # (O, 2H)
    wfc_big = jnp.zeros((2 * Hp, Op), f32)
    wfc_big = wfc_big.at[:H, :O].set(wfc[:, :H].T)
    wfc_big = wfc_big.at[Hp:Hp + H, :O].set(wfc[:, H:].T)
    bfc = jnp.zeros((1, Op), f32).at[0, :O].set(jnp.asarray(params['fc_b'], f32))

    return {'embedding': emb_matrix, 'wa_h': wa_h, 'wa_e': wa_e, 'ba': ba, 'v': v,
            'w_gates': w_gates, 'b_gates': b_gates, 'wfc': wfc_big, 'bfc': bfc,
            'dims': {'E': E, 'H': H, 'O': O, 'Ep': Ep, 'Hp': Hp, 'Op': Op, 'TO': TO}}


def precompute_encoder(prep, encoder_outputs):
    """Per-sequence, step-invariant work: pad encoder outputs and hoist
    enc @ W_e + b_a out of the per-step kernel."""
    d = prep['dims']
    H, Hp = d['H'], d['Hp']
    B, S, _ = encoder_outputs.shape
    Bp = _round_up(max(B, 1), 8)
    enc_p = jnp.zeros((Bp, S, Hp), jnp.float32).at[:B, :, :H].set(
        encoder_outputs.astype(jnp.float32))
    eproj = jnp.einsum('bsh,hk->bsk', enc_p, prep['wa_e'],
                       preferred_element_type=jnp.float32) + prep['ba'][None, None, :]
    return enc_p, eproj


# ---------------------------------------------------------------------------
# Per-decode-step wrapper (one pallas_call)
# ---------------------------------------------------------------------------
def decoder_step(prep, enc_p, eproj, x, hidden, cell):
    d = prep['dims']
    E, H, O = d['E'], d['H'], d['O']
    Ep, Hp, Op, TO = d['Ep'], d['Hp'], d['Op'], d['TO']

    B = int(x.shape[0])
    Bp, S, _ = enc_p.shape
    TB = 8                                   # sublane-aligned batch tile
    assert Bp % TB == 0

    # Embedding gather is plain-JAX glue (no clean in-kernel equivalent).
    embedded = jnp.take(prep['embedding'], x, axis=0)                    # (B, E)
    emb_p = jnp.zeros((Bp, Ep), jnp.float32).at[:B, :E].set(embedded)
    h_p = jnp.zeros((Bp, Hp), jnp.float32).at[:B, :H].set(hidden[-1].astype(jnp.float32))
    c_p = jnp.zeros((Bp, Hp), jnp.float32).at[:B, :H].set(cell[-1].astype(jnp.float32))

    flops = 2 * Bp * (Hp * Hp + S * Hp + (Ep + 2 * Hp) * 4 * Hp + 2 * Hp * Op)
    transcendentals = Bp * (S * Hp + S + 6 * Hp)
    bytes_accessed = 4 * (emb_p.size + h_p.size + c_p.size + enc_p.size + eproj.size
                          + prep['wa_h'].size + prep['v'].size + prep['w_gates'].size
                          + prep['b_gates'].size + prep['wfc'].size + prep['bfc'].size
                          + Bp * Op + 2 * Bp * Hp)
    cost = pl.CostEstimate(flops=flops, transcendentals=transcendentals,
                           bytes_accessed=bytes_accessed)

    grid_spec = pltpu.PrefetchScalarGridSpec(
        num_scalar_prefetch=0,
        grid=(Bp // TB, Op // TO),
        in_specs=[
            pl.BlockSpec((TB, Ep), lambda b, o: (b, 0)),                 # emb
            pl.BlockSpec((TB, Hp), lambda b, o: (b, 0)),                 # h
            pl.BlockSpec((TB, Hp), lambda b, o: (b, 0)),                 # c
            pl.BlockSpec((TB, S, Hp), lambda b, o: (b, 0, 0)),           # enc
            pl.BlockSpec((TB, S, Hp), lambda b, o: (b, 0, 0)),           # eproj (+bias)
            pl.BlockSpec((Hp, Hp), lambda b, o: (0, 0)),                 # wa_h
            pl.BlockSpec((1, Hp), lambda b, o: (0, 0)),                  # v row
            pl.BlockSpec((Ep + 2 * Hp, 4 * Hp), lambda b, o: (0, 0)),    # fused gate W
            pl.BlockSpec((1, 4 * Hp), lambda b, o: (0, 0)),              # fused gate bias
            pl.BlockSpec((2 * Hp, TO), lambda b, o: (0, o)),             # FC W tile
            pl.BlockSpec((1, TO), lambda b, o: (0, o)),                  # FC bias tile
        ],
        out_specs=(
            pl.BlockSpec((TB, TO), lambda b, o: (b, o)),                 # pred
            pl.BlockSpec((TB, Hp), lambda b, o: (b, 0)),                 # h_new
            pl.BlockSpec((TB, Hp), lambda b, o: (b, 0)),                 # c_new
        ),
        scratch_shapes=[pltpu.VMEM((TB, Hp), jnp.float32),               # h_new carry
                        pltpu.VMEM((TB, Hp), jnp.float32)],              # ctx carry
    )

    pred_p, h_new_p, c_new_p = pl.pallas_call(
        _decoder_step_kernel,
        out_shape=(jax.ShapeDtypeStruct((Bp, Op), jnp.float32),
                   jax.ShapeDtypeStruct((Bp, Hp), jnp.float32),
                   jax.ShapeDtypeStruct((Bp, Hp), jnp.float32)),
        grid_spec=grid_spec,
        input_output_aliases={1: 1, 2: 2},   # carry h/c state in place
        compiler_params=pltpu.CompilerParams(
            dimension_semantics=("parallel", "arbitrary")),
        cost_estimate=cost,
    )(emb_p, h_p, c_p, enc_p, eproj,
      prep['wa_h'], prep['v'], prep['w_gates'], prep['b_gates'],
      prep['wfc'], prep['bfc'])

    pred = pred_p[:B, :O]
    h_new = h_new_p[:B, :H]
    c_new = c_new_p[:B, :H]
    # PyTorch returns (num_layers, B, H) hidden / cell.
    return pred, h_new[None, :, :], c_new[None, :, :]


def decoder_with_attention_forward(params, x, hidden, cell, encoder_outputs):
    """Signature-compatible convenience wrapper (prep + encoder proj + one step)."""
    prep = prepare_params(params)
    enc_p, eproj = precompute_encoder(prep, encoder_outputs)
    return decoder_step(prep, enc_p, eproj, x, hidden, cell)


# ---------------------------------------------------------------------------
# Pure-JAX reference (mirror of the PyTorch forward)
# ---------------------------------------------------------------------------
def reference_forward(params, x, hidden, cell, encoder_outputs):
    emb = params['embedding'][x]
    h = hidden[-1]
    c = cell[-1]
    B, S, H = encoder_outputs.shape
    hid_rep = jnp.repeat(h[:, None, :], S, axis=1)
    cat = jnp.concatenate([hid_rep, encoder_outputs], axis=2)
    energy = jnp.tanh(cat @ params['att_w'].T + params['att_b'])
    scores = (energy @ params['v_w'].T)[..., 0]
    attn = jax.nn.softmax(scores, axis=1)
    ctx = jnp.einsum('bs,bsh->bh', attn, encoder_outputs)
    rnn_in = jnp.concatenate([emb, ctx], axis=1)
    gates = (rnn_in @ params['lstm_w_ih'].T + params['lstm_b_ih']
             + h @ params['lstm_w_hh'].T + params['lstm_b_hh'])
    i_g = jax.nn.sigmoid(gates[:, :H])
    f_g = jax.nn.sigmoid(gates[:, H:2 * H])
    g_g = jnp.tanh(gates[:, 2 * H:3 * H])
    o_g = jax.nn.sigmoid(gates[:, 3 * H:])
    c_new = f_g * c + i_g * g_g
    h_new = o_g * jnp.tanh(c_new)
    pred = (jnp.concatenate([h_new, ctx], axis=1) @ params['fc_w'].T + params['fc_b'])
    return pred, h_new[None], c_new[None]


if __name__ == "__main__":
    # Use high-precision f32 matmuls everywhere (kernel dots and reference dots)
    # so the numerical comparison below is tight and robust.
    jax.config.update("jax_default_matmul_precision", "highest")

    B, S, H, E, O, VOCAB = 2, 8, 32, 16, 10, 20

    key = jax.random.PRNGKey(0)
    ks = jax.random.split(key, 16)

    def init(k, shape, scale=0.1):
        return jax.random.normal(k, shape, dtype=jnp.float32) * scale

    params = {
        'embedding': init(ks[0], (VOCAB, E)),
        'att_w':     init(ks[1], (H, 2 * H)),
        'att_b':     init(ks[2], (H,)),
        'v_w':       init(ks[3], (1, H)),
        'lstm_w_ih': init(ks[4], (4 * H, E + H)),
        'lstm_b_ih': init(ks[5], (4 * H,)),
        'lstm_w_hh': init(ks[6], (4 * H, H)),
        'lstm_b_hh': init(ks[7], (4 * H,)),
        'fc_w':      init(ks[8], (O, 2 * H)),
        'fc_b':      init(ks[9], (O,)),
    }

    x = jax.random.randint(ks[10], (B,), 0, VOCAB)
    hidden = init(ks[11], (1, B, H), scale=0.5)
    cell = init(ks[12], (1, B, H), scale=0.5)
    encoder_outputs = init(ks[13], (B, S, H), scale=0.5)

    # One-time prep (hoisted out of the decode loop) + per-sequence encoder proj.
    prep = prepare_params(params)
    enc_p, eproj = precompute_encoder(prep, encoder_outputs)

    # Decode step 1.
    pred, h_new, c_new = decoder_step(prep, enc_p, eproj, x, hidden, cell)
    jax.block_until_ready((pred, h_new, c_new))

    pred_exp, h_exp, c_exp = reference_forward(params, x, hidden, cell, encoder_outputs)

    rtol, atol = 2e-2, 2e-3
    np.testing.assert_allclose(np.asarray(pred), np.asarray(pred_exp), rtol=rtol, atol=atol)
    np.testing.assert_allclose(np.asarray(h_new), np.asarray(h_exp), rtol=rtol, atol=atol)
    np.testing.assert_allclose(np.asarray(c_new), np.asarray(c_exp), rtol=rtol, atol=atol)

    # Decode step 2 — exercises reuse of the prepared weights / encoder projection.
    pred2, h2, c2 = decoder_step(prep, enc_p, eproj, x, h_new, c_new)
    jax.block_until_ready((pred2, h2, c2))
    pred2_exp, h2_exp, c2_exp = reference_forward(params, x, h_exp, c_exp, encoder_outputs)
    np.testing.assert_allclose(np.asarray(pred2), np.asarray(pred2_exp), rtol=rtol, atol=atol)
    np.testing.assert_allclose(np.asarray(h2), np.asarray(h2_exp), rtol=rtol, atol=atol)
    np.testing.assert_allclose(np.asarray(c2), np.asarray(c2_exp), rtol=rtol, atol=atol)

    print("KERNEL_OK")
</pallas_src>

<mosaic_0001>
module attributes {stable_mosaic.version = 11 : i64} {
  func.func @_decoder_step_kernel(%arg0: i32, %arg1: i32, %arg2: memref<8x128xf32, #tpu.memory_space<vmem>>, %arg3: memref<8x128xf32, #tpu.memory_space<vmem>>, %arg4: memref<8x128xf32, #tpu.memory_space<vmem>>, %arg5: memref<8x8x128xf32, #tpu.memory_space<vmem>>, %arg6: memref<8x8x128xf32, #tpu.memory_space<vmem>>, %arg7: memref<128x128xf32, #tpu.memory_space<vmem>>, %arg8: memref<1x128xf32, #tpu.memory_space<vmem>>, %arg9: memref<384x512xf32, #tpu.memory_space<vmem>>, %arg10: memref<1x512xf32, #tpu.memory_space<vmem>>, %arg11: memref<256x128xf32, #tpu.memory_space<vmem>>, %arg12: memref<1x128xf32, #tpu.memory_space<vmem>>, %arg13: memref<8x128xf32, #tpu.memory_space<vmem>>, %arg14: memref<8x128xf32, #tpu.memory_space<vmem>>, %arg15: memref<8x128xf32, #tpu.memory_space<vmem>>, %arg16: memref<8x128xf32, #tpu.memory_space<vmem>>, %arg17: memref<8x128xf32, #tpu.memory_space<vmem>>) attributes {dimension_semantics = [#tpu.dimension_semantics<parallel>, #tpu.dimension_semantics<arbitrary>], iteration_bounds = array<i64: 1, 1>, scalar_prefetch = 0 : i64, scratch_operands = 2 : i64, tpu.core_type = #tpu.core_type<tc>, window_params = [{transform_indices = @transform_0, window_bounds = array<i64: 8, 128>}, {transform_indices = @transform_1, window_bounds = array<i64: 8, 128>}, {transform_indices = @transform_2, window_bounds = array<i64: 8, 128>}, {transform_indices = @transform_3, window_bounds = array<i64: 8, 8, 128>}, {transform_indices = @transform_4, window_bounds = array<i64: 8, 8, 128>}, {pipeline_mode = #tpu.pipeline_mode<synchronous>, transform_indices = @transform_5, window_bounds = array<i64: 128, 128>}, {pipeline_mode = #tpu.pipeline_mode<synchronous>, transform_indices = @transform_6, window_bounds = array<i64: 1, 128>}, {pipeline_mode = #tpu.pipeline_mode<synchronous>, transform_indices = @transform_7, window_bounds = array<i64: 384, 512>}, {pipeline_mode = #tpu.pipeline_mode<synchronous>, transform_indices = @transform_8, window_bounds = array<i64: 1, 512>}, {transform_indices = @transform_9, window_bounds = array<i64: 256, 128>}, {transform_indices = @transform_10, window_bounds = array<i64: 1, 128>}, {transform_indices = @transform_11, window_bounds = array<i64: 8, 128>}, {transform_indices = @transform_12, window_bounds = array<i64: 8, 128>}, {transform_indices = @transform_13, window_bounds = array<i64: 8, 128>}]} {
    %c0_i32 = arith.constant 0 : i32
    %0 = arith.cmpi eq, %arg1, %c0_i32 : i32
    %1 = arith.extui %0 : i1 to i32
    %c0_i32_0 = arith.constant 0 : i32
    %2 = arith.cmpi ne, %1, %c0_i32_0 : i32
    scf.if %2 {
      %c0_10 = arith.constant 0 : index
      %c0_11 = arith.constant 0 : index
      %12 = vector.load %arg2[%c0_10, %c0_11] : memref<8x128xf32, #tpu.memory_space<vmem>>, vector<8x128xf32>
      %c0_12 = arith.constant 0 : index
      %c0_13 = arith.constant 0 : index
      %13 = vector.load %arg3[%c0_12, %c0_13] : memref<8x128xf32, #tpu.memory_space<vmem>>, vector<8x128xf32>
      %c0_14 = arith.constant 0 : index
      %c0_15 = arith.constant 0 : index
      %14 = vector.load %arg4[%c0_14, %c0_15] : memref<8x128xf32, #tpu.memory_space<vmem>>, vector<8x128xf32>
      %c0_16 = arith.constant 0 : index
      %c0_17 = arith.constant 0 : index
      %c0_18 = arith.constant 0 : index
      %15 = vector.load %arg5[%c0_16, %c0_17, %c0_18] : memref<8x8x128xf32, #tpu.memory_space<vmem>>, vector<8x8x128xf32>
      %c0_19 = arith.constant 0 : index
      %c0_20 = arith.constant 0 : index
      %16 = vector.load %arg7[%c0_19, %c0_20] : memref<128x128xf32, #tpu.memory_space<vmem>>, vector<128x128xf32>
      %cst_21 = arith.constant dense<0.000000e+00> : vector<8x128xf32>
      %17 = tpu.matmul %13, %16, %cst_21 {dimension_numbers = #tpu.dot_dimension_numbers<[1], [0], [0], [1], [0, 0, 1, 1], [], []>, precision = #tpu.contract_precision<fp32>} : vector<8x128xf32>, vector<128x128xf32>, vector<8x128xf32> -> vector<8x128xf32>
      %18 = vector.shape_cast %17 : vector<8x128xf32> to vector<8x1x128xf32>
      %c0_22 = arith.constant 0 : index
      %c0_23 = arith.constant 0 : index
      %c0_24 = arith.constant 0 : index
      %19 = vector.load %arg6[%c0_22, %c0_23, %c0_24] : memref<8x8x128xf32, #tpu.memory_space<vmem>>, vector<8x8x128xf32>
      %20 = vector.broadcast %18 : vector<8x1x128xf32> to vector<8x8x128xf32>
      %21 = arith.addf %20, %19 : vector<8x8x128xf32>
      %22 = math.tanh %21 : vector<8x8x128xf32>
      %c0_25 = arith.constant 0 : index
      %c0_26 = arith.constant 0 : index
      %23 = vector.load %arg8[%c0_25, %c0_26] : memref<1x128xf32, #tpu.memory_space<vmem>>, vector<1x128xf32>
      %24 = vector.shape_cast %23 : vector<1x128xf32> to vector<1x1x128xf32>
      %25 = vector.broadcast %24 : vector<1x1x128xf32> to vector<8x8x128xf32>
      %26 = arith.mulf %22, %25 : vector<8x8x128xf32>
      %cst_27 = arith.constant dense<0.000000e+00> : vector<8x8xf32>
      %27 = vector.multi_reduction <add>, %26, %cst_27 [2] : vector<8x8x128xf32> to vector<8x8xf32>
      %cst_28 = arith.constant dense<0xFF800000> : vector<8xf32>
      %28 = vector.multi_reduction <maximumf>, %27, %cst_28 [1] : vector<8x8xf32> to vector<8xf32>
      %29 = vector.shape_cast %28 : vector<8xf32> to vector<8x1xf32>
      %30 = vector.broadcast %29 : vector<8x1xf32> to vector<8x8xf32>
      %31 = arith.subf %27, %30 : vector<8x8xf32>
      %32 = math.exp %31 : vector<8x8xf32>
      %cst_29 = arith.constant dense<0.000000e+00> : vector<8xf32>
      %33 = vector.multi_reduction <add>, %32, %cst_29 [1] : vector<8x8xf32> to vector<8xf32>
      %34 = vector.shape_cast %33 : vector<8xf32> to vector<8x1xf32>
      %35 = tpu.reciprocal %34 : vector<8x1xf32> -> vector<8x1xf32>
      %36 = vector.broadcast %35 : vector<8x1xf32> to vector<8x8xf32>
      %37 = arith.mulf %32, %36 : vector<8x8xf32>
      %38 = vector.shape_cast %37 : vector<8x8xf32> to vector<8x8x1xf32>
      %39 = vector.broadcast %38 : vector<8x8x1xf32> to vector<8x8x128xf32>
      %40 = arith.mulf %39, %15 : vector<8x8x128xf32>
      %cst_30 = arith.constant dense<0.000000e+00> : vector<8x128xf32>
      %41 = vector.multi_reduction <add>, %40, %cst_30 [1] : vector<8x8x128xf32> to vector<8x128xf32>
      %42 = tpu.concatenate %12, %41, %13 in 1 : vector<8x128xf32>, vector<8x128xf32>, vector<8x128xf32> -> vector<8x384xf32>
      %c0_31 = arith.constant 0 : index
      %c0_32 = arith.constant 0 : index
      %43 = vector.load %arg9[%c0_31, %c0_32] : memref<384x512xf32, #tpu.memory_space<vmem>>, vector<384x512xf32>
      %cst_33 = arith.constant dense<0.000000e+00> : vector<8x512xf32>
      %44 = tpu.matmul %42, %43, %cst_33 {dimension_numbers = #tpu.dot_dimension_numbers<[1], [0], [0], [1], [0, 0, 1, 1], [], []>, precision = #tpu.contract_precision<fp32>} : vector<8x384xf32>, vector<384x512xf32>, vector<8x512xf32> -> vector<8x512xf32>
      %c0_34 = arith.constant 0 : index
      %c0_35 = arith.constant 0 : index
      %45 = vector.load %arg10[%c0_34, %c0_35] : memref<1x512xf32, #tpu.memory_space<vmem>>, vector<1x512xf32>
      %46 = vector.broadcast %45 : vector<1x512xf32> to vector<8x512xf32>
      %47 = arith.addf %44, %46 : vector<8x512xf32>
      %48 = vector.extract_strided_slice %47 {offsets = [0, 0], sizes = [8, 128], strides = [1, 1]} : vector<8x512xf32> to vector<8x128xf32>
      %49 = arith.negf %48 : vector<8x128xf32>
      %50 = math.exp %49 : vector<8x128xf32>
      %cst_36 = arith.constant 1.000000e+00 : f32
      %51 = vector.broadcast %cst_36 : f32 to vector<8x128xf32>
      %52 = arith.addf %51, %50 : vector<8x128xf32>
      %53 = arith.divf %51, %52 : vector<8x128xf32>
      %54 = vector.extract_strided_slice %47 {offsets = [0, 128], sizes = [8, 128], strides = [1, 1]} : vector<8x512xf32> to vector<8x128xf32>
      %55 = arith.negf %54 : vector<8x128xf32>
      %56 = math.exp %55 : vector<8x128xf32>
      %cst_37 = arith.constant 1.000000e+00 : f32
      %57 = vector.broadcast %cst_37 : f32 to vector<8x128xf32>
      %58 = arith.addf %57, %56 : vector<8x128xf32>
      %59 = arith.divf %57, %58 : vector<8x128xf32>
      %60 = vector.extract_strided_slice %47 {offsets = [0, 256], sizes = [8, 128], strides = [1, 1]} : vector<8x512xf32> to vector<8x128xf32>
      %61 = math.tanh %60 : vector<8x128xf32>
      %62 = vector.extract_strided_slice %47 {offsets = [0, 384], sizes = [8, 128], strides = [1, 1]} : vector<8x512xf32> to vector<8x128xf32>
      %63 = arith.negf %62 : vector<8x128xf32>
      %64 = math.exp %63 : vector<8x128xf32>
      %cst_38 = arith.constant 1.000000e+00 : f32
      %65 = vector.broadcast %cst_38 : f32 to vector<8x128xf32>
      %66 = arith.addf %65, %64 : vector<8x128xf32>
      %67 = arith.divf %65, %66 : vector<8x128xf32>
      %68 = arith.mulf %59, %14 : vector<8x128xf32>
      %69 = arith.mulf %53, %61 : vector<8x128xf32>
      %70 = arith.addf %68, %69 : vector<8x128xf32>
      %71 = math.tanh %70 : vector<8x128xf32>
      %72 = arith.mulf %67, %71 : vector<8x128xf32>
      %c0_39 = arith.constant 0 : index
      %c0_40 = arith.constant 0 : index
      %73 = vector.load %arg16[%c0_39, %c0_40] : memref<8x128xf32, #tpu.memory_space<vmem>>, vector<8x128xf32>
      tpu.vector_store %arg16[%c0_39, %c0_40], %72 {strides = array<i32>} : memref<8x128xf32, #tpu.memory_space<vmem>>, vector<8x128xf32>,
      %c0_41 = arith.constant 0 : index
      %c0_42 = arith.constant 0 : index
      %74 = vector.load %arg17[%c0_41, %c0_42] : memref<8x128xf32, #tpu.memory_space<vmem>>, vector<8x128xf32>
      tpu.vector_store %arg17[%c0_41, %c0_42], %41 {strides = array<i32>} : memref<8x128xf32, #tpu.memory_space<vmem>>, vector<8x128xf32>,
      %c0_43 = arith.constant 0 : index
      %c0_44 = arith.constant 0 : index
      %75 = vector.load %arg14[%c0_43, %c0_44] : memref<8x128xf32, #tpu.memory_space<vmem>>, vector<8x128xf32>
      tpu.vector_store %arg14[%c0_43, %c0_44], %72 {strides = array<i32>} : memref<8x128xf32, #tpu.memory_space<vmem>>, vector<8x128xf32>,
      %c0_45 = arith.constant 0 : index
      %c0_46 = arith.constant 0 : index
      %76 = vector.load %arg15[%c0_45, %c0_46] : memref<8x128xf32, #tpu.memory_space<vmem>>, vector<8x128xf32>
      tpu.vector_store %arg15[%c0_45, %c0_46], %70 {strides = array<i32>} : memref<8x128xf32, #tpu.memory_space<vmem>>, vector<8x128xf32>,
    } else {
    }
    %c0 = arith.constant 0 : index
    %c0_1 = arith.constant 0 : index
    %3 = vector.load %arg16[%c0, %c0_1] : memref<8x128xf32, #tpu.memory_space<vmem>>, vector<8x128xf32>
    %c0_2 = arith.constant 0 : index
    %c0_3 = arith.constant 0 : index
    %4 = vector.load %arg17[%c0_2, %c0_3] : memref<8x128xf32, #tpu.memory_space<vmem>>, vector<8x128xf32>
    %5 = tpu.concatenate %3, %4 in 1 : vector<8x128xf32>, vector<8x128xf32> -> vector<8x256xf32>
    %c0_4 = arith.constant 0 : index
    %c0_5 = arith.constant 0 : index
    %6 = vector.load %arg11[%c0_4, %c0_5] : memref<256x128xf32, #tpu.memory_space<vmem>>, vector<256x128xf32>
    %cst = arith.constant dense<0.000000e+00> : vector<8x128xf32>
    %7 = tpu.matmul %5, %6, %cst {dimension_numbers = #tpu.dot_dimension_numbers<[1], [0], [0], [1], [0, 0, 1, 1], [], []>, precision = #tpu.contract_precision<fp32>} : vector<8x256xf32>, vector<256x128xf32>, vector<8x128xf32> -> vector<8x128xf32>
    %c0_6 = arith.constant 0 : index
    %c0_7 = arith.constant 0 : index
    %8 = vector.load %arg12[%c0_6, %c0_7] : memref<1x128xf32, #tpu.memory_space<vmem>>, vector<1x128xf32>
    %9 = vector.broadcast %8 : vector<1x128xf32> to vector<8x128xf32>
    %10 = arith.addf %7, %9 : vector<8x128xf32>
    %c0_8 = arith.constant 0 : index
    %c0_9 = arith.constant 0 : index
    %11 = vector.load %arg13[%c0_8, %c0_9] : memref<8x128xf32, #tpu.memory_space<vmem>>, vector<8x128xf32>
    tpu.vector_store %arg13[%c0_8, %c0_9], %10 {strides = array<i32>} : memref<8x128xf32, #tpu.memory_space<vmem>>, vector<8x128xf32>,
    return
  }
  func.func @transform_0(%arg0: i32, %arg1: i32) -> (i32, i32) {
    %c0_i32 = arith.constant 0 : i32
    %c0_i32_0 = arith.constant 0 : i32
    return %arg0, %c0_i32 : i32, i32
  }
  func.func @transform_1(%arg0: i32, %arg1: i32) -> (i32, i32) {
    %c0_i32 = arith.constant 0 : i32
    %c0_i32_0 = arith.constant 0 : i32
    return %arg0, %c0_i32 : i32, i32
  }
  func.func @transform_2(%arg0: i32, %arg1: i32) -> (i32, i32) {
    %c0_i32 = arith.constant 0 : i32
    %c0_i32_0 = arith.constant 0 : i32
    return %arg0, %c0_i32 : i32, i32
  }
  func.func @transform_3(%arg0: i32, %arg1: i32) -> (i32, i32, i32) {
    %c0_i32 = arith.constant 0 : i32
    %c0_i32_0 = arith.constant 0 : i32
    %c0_i32_1 = arith.constant 0 : i32
    return %arg0, %c0_i32, %c0_i32_0 : i32, i32, i32
  }
  func.func @transform_4(%arg0: i32, %arg1: i32) -> (i32, i32, i32) {
    %c0_i32 = arith.constant 0 : i32
    %c0_i32_0 = arith.constant 0 : i32
    %c0_i32_1 = arith.constant 0 : i32
    return %arg0, %c0_i32, %c0_i32_0 : i32, i32, i32
  }
  func.func @transform_5(%arg0: i32, %arg1: i32) -> (i32, i32) {
    %c0_i32 = arith.constant 0 : i32
    %c0_i32_0 = arith.constant 0 : i32
    %c0_i32_1 = arith.constant 0 : i32
    return %c0_i32, %c0_i32_0 : i32, i32
  }
  func.func @transform_6(%arg0: i32, %arg1: i32) -> (i32, i32) {
    %c0_i32 = arith.constant 0 : i32
    %c0_i32_0 = arith.constant 0 : i32
    %c0_i32_1 = arith.constant 0 : i32
    return %c0_i32, %c0_i32_0 : i32, i32
  }
  func.func @transform_7(%arg0: i32, %arg1: i32) -> (i32, i32) {
    %c0_i32 = arith.constant 0 : i32
    %c0_i32_0 = arith.constant 0 : i32
    %c0_i32_1 = arith.constant 0 : i32
    return %c0_i32, %c0_i32_0 : i32, i32
  }
  func.func @transform_8(%arg0: i32, %arg1: i32) -> (i32, i32) {
    %c0_i32 = arith.constant 0 : i32
    %c0_i32_0 = arith.constant 0 : i32
    %c0_i32_1 = arith.constant 0 : i32
    return %c0_i32, %c0_i32_0 : i32, i32
  }
  func.func @transform_9(%arg0: i32, %arg1: i32) -> (i32, i32) {
    %c0_i32 = arith.constant 0 : i32
    %c0_i32_0 = arith.constant 0 : i32
    return %c0_i32, %arg1 : i32, i32
  }
  func.func @transform_10(%arg0: i32, %arg1: i32) -> (i32, i32) {
    %c0_i32 = arith.constant 0 : i32
    %c0_i32_0 = arith.constant 0 : i32
    return %c0_i32, %arg1 : i32, i32
  }
  func.func @transform_11(%arg0: i32, %arg1: i32) -> (i32, i32) {
    %c0_i32 = arith.constant 0 : i32
    return %arg0, %arg1 : i32, i32
  }
  func.func @transform_12(%arg0: i32, %arg1: i32) -> (i32, i32) {
    %c0_i32 = arith.constant 0 : i32
    %c0_i32_0 = arith.constant 0 : i32
    return %arg0, %c0_i32 : i32, i32
  }
  func.func @transform_13(%arg0: i32, %arg1: i32) -> (i32, i32) {
    %c0_i32 = arith.constant 0 : i32
    %c0_i32_0 = arith.constant 0 : i32
    return %arg0, %c0_i32 : i32, i32
  }
}

</mosaic_0001>

<bundles_post_ra>
// kernel: tpu_custom_call.1
= control target key start
LH: loop header
LB: loop body
LE: loop exit
PB: predicated region body
PF: predicated region fallthrough
CT: control target
= control target key end

     0   :  { %19 = vsyncpa [#allocation5], 0  ;;  %s12960_s0 = inlined_call_operand.vmem [shape: f32[8,128], index: 0, kind: input, shape index: {}]   ;;  %s12961_s1 = inlined_call_operand.hbm [shape: f32[8,128], index: 1, kind: input, shape index: {}, may-alias: {1,12}]   ;;  %s12962_s2 = inlined_call_operand.hbm [shape: f32[8,128], index: 2, kind: input, shape index: {}, may-alias: {2,13}]   ;;  %s12963_s3 = inlined_call_operand.hbm [shape: f32[8,8,128], index: 3, kind: input, shape index: {}]   ;;  %s12964_s4 = inlined_call_operand.hbm [shape: f32[8,8,128], index: 4, kind: input, shape index: {}]   ;;  %s12965_s5 = inlined_call_operand.hbm [shape: f32[128,128], index: 5, kind: input, shape index: {}]   ;;  %s12966_s6 = inlined_call_operand.vmem [shape: f32[1,128], index: 6, kind: input, shape index: {}]   ;;  %s12967_s7 = inlined_call_operand.hbm [shape: f32[384,512], index: 7, kind: input, shape index: {}]   ;;  %s12968_s8 = inlined_call_operand.vmem [shape: f32[1,512], index: 8, kind: input, shape index: {}]   ;;  %s12969_s9 = inlined_call_operand.hbm [shape: f32[256,128], index: 9, kind: input, shape index: {}]   ;;  %s12970_s10 = inlined_call_operand.vmem [shape: f32[1,128], index: 10, kind: input, shape index: {}]   ;;  %s12971_s11 = inlined_call_operand.hbm [shape: f32[8,128], index: 11, kind: output, shape index: {0}]   ;;  %s12972_s12 = inlined_call_operand.hbm [shape: f32[8,128], index: 12, kind: output, shape index: {1}, may-alias: {1,12}]   ;;  %s12973_s13 = inlined_call_operand.hbm [shape: f32[8,128], index: 13, kind: output, shape index: {2}, may-alias: {2,13}]  }
   0x1   :  { %20 = vsyncpa [#allocation8], 0 }
   0x2   :  { %21 = vsyncpa [#allocation11], 0 }
   0x3   :  { %22 = vsyncpa [#allocation14], 0 }
   0x4   :  { %23 = vsyncpa [#allocation6], 0 }
   0x5   :  { %24 = vsyncpa [#allocation18], 0  ;;  %s9159_s25 = smov [#allocation7]   ;;  %s8927_s29 = scalar_lea.hbm %s12962_s2, 128 }
   0x6   :  { %s43_s26 = sshll.u32 %s9159_s25, 4  ;;  %p8928_p0 = scmp.ne.s32.totalorder %s12962_s2, %s8927_s29  ;;  %s44_s26 = int_to_ptr.vmem [resolvable:$true] %s43_s26 }
   0x7   :  { %p8931_p1 = scmp.lt.u32.totalorder %s8927_s29, %s12962_s2 }
   0x9   :  { %p8933_p2 = pnand %p8931_p1, %p8928_p0 }
   0xb   :  { %8936 = shalt.err (!%p8933_p2)
}
   0xc   :  { %s8937_s17 = scalar_lea.vmem %s44_s26, 128  ;;  %p8942_p4 = scmp.lt.s32.totalorder %s44_s26, %s44_s26 }
   0xd   :  { %p8938_p3 = scmp.ne.s32.totalorder %s44_s26, %s8937_s17  ;;  %p8943_p5 = scmp.lt.s32.totalorder %s8937_s17, %s8937_s17 }
   0xf   :  { %p8944_p6 = por %p8943_p5, %p8942_p4 }
  0x11   :  { %p8945_p7 = pnand %p8944_p6, %p8938_p3 }
  0x13   :  { %8948 = shalt.err (!%p8945_p7)
}
  0x14   :  { %46 = dma.hbm_to_vmem [thread:$0]  %s12962_s2, 128, %s44_s26, [#allocation8]  }
  0x15   :  { %s9160_s20 = smov [#allocation10]   ;;  %s9161_s22 = smov [#allocation13]  }
  0x16   :  { %s64_s21 = sshll.u32 %s9160_s20, 4  ;;  %s90_s23 = sshll.u32 %s9161_s22, 4  ;;  %s65_s21 = int_to_ptr.vmem [resolvable:$true] %s64_s21  ;;  %s91_s23 = int_to_ptr.vmem [resolvable:$true] %s90_s23 }
  0x17   :  { %s8949_s27 = scalar_lea.hbm %s12964_s4, 1024 }
  0x18   :  { %p8950_p8 = scmp.ne.s32.totalorder %s12964_s4, %s8949_s27  ;;  %p8953_p9 = scmp.lt.u32.totalorder %s8949_s27, %s12964_s4 }
  0x1a   :  { %p8955_p10 = pnand %p8953_p9, %p8950_p8 }
  0x1c   :  { %8958 = shalt.err (!%p8955_p10)
}
  0x1d   :  { %s8959_s2 = scalar_lea.vmem %s65_s21, 1024  ;;  %p8964_p12 = scmp.lt.s32.totalorder %s65_s21, %s65_s21 }
  0x1e   :  { %p8960_p11 = scmp.ne.s32.totalorder %s65_s21, %s8959_s2  ;;  %p8965_p13 = scmp.lt.s32.totalorder %s8959_s2, %s8959_s2 }
  0x20   :  { %p8966_p0 = por %p8965_p13, %p8964_p12 }
  0x22   :  { %p8967_p1 = pnand %p8966_p0, %p8960_p11 }
  0x24   :  { %8970 = shalt.err (!%p8967_p1)
}
  0x25   :  { %s9162_s26 = smov 128   ;;  %s9163_s15 = smov 8  }
  0x26   :  { %70 = dma.hbm_to_vmem [thread:$0]  %s12964_s4, 1024, %s65_s21, [#allocation11], %s9162_s26, %s9162_s26, %s9163_s15  }
  0x27   :  { %s8971_s20 = scalar_lea.hbm %s12967_s7, 24576 }
  0x28   :  { %p8972_p2 = scmp.ne.s32.totalorder %s12967_s7, %s8971_s20  ;;  %p8975_p3 = scmp.lt.u32.totalorder %s8971_s20, %s12967_s7 }
  0x2a   :  { %p8977_p4 = pnand %p8975_p3, %p8972_p2 }
  0x2c   :  { %8980 = shalt.err (!%p8977_p4)
}
  0x2d   :  { %s8981_s28 = scalar_lea.vmem %s91_s23, 24576  ;;  %p8986_p6 = scmp.lt.s32.totalorder %s91_s23, %s91_s23 }
  0x2e   :  { %p8982_p5 = scmp.ne.s32.totalorder %s91_s23, %s8981_s28  ;;  %p8987_p7 = scmp.lt.s32.totalorder %s8981_s28, %s8981_s28 }
  0x30   :  { %p8988_p8 = por %p8987_p7, %p8986_p6 }
  0x32   :  { %p8989_p9 = pnand %p8988_p8, %p8982_p5 }
  0x34   :  { %8992 = shalt.err (!%p8989_p9)
}
  0x35   :  { %s9164_s4 = smov 512   ;;  %s9165_s21 = smov 32  }
  0x36   :  { %96 = dma.hbm_to_vmem [thread:$0]  %s12967_s7, 24576, %s91_s23, [#allocation14], %s9164_s4, %s9164_s4, %s9165_s21  }
  0x37   :  { %s9166_s14 = smov [#allocation4]   ;;  %s9167_s16 = smov [#allocation9]  }
  0x38   :  { %s33_s2 = sshll.u32 %s9166_s14, 4  ;;  %s52_s17 = sshll.u32 %s9167_s16, 4  ;;  %s34_s2 = int_to_ptr.vmem [resolvable:$true] %s33_s2  ;;  %s53_s17 = int_to_ptr.vmem [resolvable:$true] %s52_s17 }
  0x39   :  { %s8993_s20 = scalar_lea.hbm %s12961_s1, 128 }
  0x3a   :  { %p8994_p10 = scmp.ne.s32.totalorder %s12961_s1, %s8993_s20  ;;  %p8997_p11 = scmp.lt.u32.totalorder %s8993_s20, %s12961_s1 }
  0x3c   :  { %p8999_p12 = pnand %p8997_p11, %p8994_p10 }
  0x3e   :  { %9002 = shalt.err (!%p8999_p12)
}
  0x3f   :  { %s9003_s7 = scalar_lea.vmem %s34_s2, 128  ;;  %p9008_p0 = scmp.lt.s32.totalorder %s34_s2, %s34_s2 }
  0x40   :  { %p9004_p13 = scmp.ne.s32.totalorder %s34_s2, %s9003_s7  ;;  %p9009_p1 = scmp.lt.s32.totalorder %s9003_s7, %s9003_s7 }
  0x42   :  { %p9010_p2 = por %p9009_p1, %p9008_p0 }
  0x44   :  { %p9011_p3 = pnand %p9010_p2, %p9004_p13 }
  0x46   :  { %9014 = shalt.err (!%p9011_p3)
}
  0x47   :  { %36 = dma.hbm_to_vmem [thread:$0]  %s12961_s1, 128, %s34_s2, [#allocation5]  }
  0x48   :  { %s9015_s29 = scalar_lea.hbm %s12963_s3, 1024 }
  0x49   :  { %p9016_p4 = scmp.ne.s32.totalorder %s12963_s3, %s9015_s29  ;;  %p9019_p5 = scmp.lt.u32.totalorder %s9015_s29, %s12963_s3 }
  0x4b   :  { %p9021_p6 = pnand %p9019_p5, %p9016_p4 }
  0x4d   :  { %9024 = shalt.err (!%p9021_p6)
}
  0x4e   :  { %s9025_s19 = scalar_lea.vmem %s53_s17, 1024  ;;  %p9030_p8 = scmp.lt.s32.totalorder %s53_s17, %s53_s17 }
  0x4f   :  { %p9026_p7 = scmp.ne.s32.totalorder %s53_s17, %s9025_s19  ;;  %p9031_p9 = scmp.lt.s32.totalorder %s9025_s19, %s9025_s19 }
  0x51   :  { %p9032_p10 = por %p9031_p9, %p9030_p8 }
  0x53   :  { %p9033_p11 = pnand %p9032_p10, %p9026_p7 }
  0x55   :  { %9036 = shalt.err (!%p9033_p11)
}
  0x56   :  { %58 = dma.hbm_to_vmem [thread:$0]  %s12963_s3, 1024, %s53_s17, [#allocation8], %s9162_s26, %s9162_s26, %s9163_s15  }
  0x57   :  { %s9168_s20 = smov [#allocation12]   ;;  %s9169_s24 = smov [#allocation15]  }
  0x58   :  { %s76_s22 = sshll.u32 %s9168_s20, 4  ;;  %s104_s25 = sshll.u32 %s9169_s24, 4  ;;  %s77_s22 = int_to_ptr.vmem [resolvable:$true] %s76_s22  ;;  %s105_s25 = int_to_ptr.vmem [resolvable:$true] %s104_s25 }
  0x59   :  { %s9037_s23 = scalar_lea.hbm %s12965_s5, 2048 }
  0x5a   :  { %p9038_p12 = scmp.ne.s32.totalorder %s12965_s5, %s9037_s23  ;;  %p9041_p13 = scmp.lt.u32.totalorder %s9037_s23, %s12965_s5 }
  0x5c   :  { %p9043_p0 = pnand %p9041_p13, %p9038_p12 }
  0x5e   :  { %9046 = shalt.err (!%p9043_p0)
}
  0x5f   :  { %s9047_s3 = scalar_lea.vmem %s77_s22, 2048  ;;  %p9052_p2 = scmp.lt.s32.totalorder %s77_s22, %s77_s22 }
  0x60   :  { %p9048_p1 = scmp.ne.s32.totalorder %s77_s22, %s9047_s3  ;;  %p9053_p3 = scmp.lt.s32.totalorder %s9047_s3, %s9047_s3 }
  0x62   :  { %p9054_p4 = por %p9053_p3, %p9052_p2 }
  0x64   :  { %p9055_p5 = pnand %p9054_p4, %p9048_p1 }
  0x66   :  { %9058 = shalt.err (!%p9055_p5)
}
  0x67   :  { %82 = dma.hbm_to_vmem [thread:$0]  %s12965_s5, 2048, %s77_s22, [#allocation11], %s9162_s26, %s9162_s26, %s9163_s15  }
  0x68   :  { %s9059_s18 = scalar_lea.hbm %s12969_s9, 4096 }
  0x69   :  { %p9060_p6 = scmp.ne.s32.totalorder %s12969_s9, %s9059_s18  ;;  %p9063_p7 = scmp.lt.u32.totalorder %s9059_s18, %s12969_s9 }
  0x6b   :  { %p9065_p8 = pnand %p9063_p7, %p9060_p6 }
  0x6d   :  { %9068 = shalt.err (!%p9065_p8)
}
  0x6e   :  { %s9069_s24 = scalar_lea.vmem %s105_s25, 4096  ;;  %p9074_p10 = scmp.lt.s32.totalorder %s105_s25, %s105_s25 }
  0x6f   :  { %p9070_p9 = scmp.ne.s32.totalorder %s105_s25, %s9069_s24  ;;  %p9075_p11 = scmp.lt.s32.totalorder %s9069_s24, %s9069_s24 }
  0x71   :  { %p9076_p12 = por %p9075_p11, %p9074_p10 }
  0x73   :  { %p9077_p13 = pnand %p9076_p12, %p9070_p9 }
  0x75   :  { %9080 = shalt.err (!%p9077_p13)
}
  0x76   :  { %110 = dma.hbm_to_vmem [thread:$0]  %s12969_s9, 4096, %s105_s25, [#allocation14], %s9162_s26, %s9162_s26, %s9163_s15  }
  0x77   :  { %9147 = dma.done.wait [#allocation5], 128  }
  0x78   :  { %9148 = vsyncadd [#allocation5], 4294967168 }
  0x79   :  { %9149 = dma.done.wait [#allocation8], 1152  }
  0x7a   :  { %9150 = vsyncadd [#allocation8], 4294966144 }
  0x7b   :  { %9151 = dma.done.wait [#allocation11], 3072  }
  0x7c   :  { %9152 = vsyncadd [#allocation11], 4294964224 }
  0x7d   :  { %9153 = dma.done.wait [#allocation14], 28672  }
  0x7e   :  { %9154 = vsyncadd [#allocation14], 4294938624  ;;  %v9170_v0 = vmov 0.0|0.0   ;;  %vm9171_vm0 = vmmov 0   ;;  %v12974_v1 = vmov 0.0   ;;  %v149_v2 = vld [vmem:[#allocation12] sm:$0xff] }
  0x7f   :  { %7310 = vmatprep.subr.bf16.mxu0 %v9170_v0  ;;  %7132 = vmatprep.mubr.msk.f32.mxu0 %vm9171_vm0, %v12974_v1  ;;  %v150_v3 = vld [vmem:[#allocation12 + $0x8] sm:$0xff]  ;;  %v151_v4 = vld [vmem:[#allocation12 + $0x10] sm:$0xff]  ;;  %v166_v5 = vand.u32 4294901760, %v149_v2  ;;  %v152_v7 = vld [vmem:[#allocation12 + $0x18] sm:$0xff]  ;;  %vm993_vm1 = vcmask 1041409   ;;  %vm995_vm2 = vcmask 1042434  }
  0x80   :  { %v169_v6 = vand.u32 4294901760, %v150_v3  ;;  %v172_v8 = vand.u32 4294901760, %v151_v4  ;;  %v175_v9 = vand.u32 4294901760, %v152_v7  ;;  %v153_v10 = vld [vmem:[#allocation12 + $0x20] sm:$0xff]  ;;  %v154_v11 = vld [vmem:[#allocation12 + $0x28] sm:$0xff]  ;;  %v155_v16 = vld [vmem:[#allocation12 + $0x30] sm:$0xff] }
  0x81   :  { %v178_v14 = vand.u32 4294901760, %v153_v10  ;;  %v181_v15 = vand.u32 4294901760, %v154_v11  ;;  %v156_v17 = vld [vmem:[#allocation12 + $0x38] sm:$0xff]  ;;  %v184_v19 = vand.u32 4294901760, %v155_v16  ;;  %v157_v21 = vld [vmem:[#allocation12 + $0x40] sm:$0xff]  ;;  %v158_v22 = vld [vmem:[#allocation12 + $0x48] sm:$0xff]  ;;  %v9357_v24 = vsub.f32 %v149_v2, %v166_v5 }
  0x82   :  { %v9347_v12 = vpack.c.bf16 %v169_v6, %v166_v5  ;;  %v9350_v13 = vpack.c.bf16 %v175_v9, %v172_v8  ;;  %v187_v20 = vand.u32 4294901760, %v156_v17  ;;  %v139_v23 = vld [vmem:[#allocation4] sm:$0xff]  ;;  %v9359_v25 = vsub.f32 %v150_v3, %v169_v6  ;;  %v160_v30 = vld [vmem:[#allocation12 + $0x58] sm:$0xff]  ;;  %v161_v32 = vld [vmem:[#allocation12 + $0x60] sm:$0xff]  ;;  %s9175_s7 = smov [#allocation17]  }
  0x83   :  { %v9354_v18 = vpack.c.bf16 %v181_v15, %v178_v14  ;;  %v190_v27 = vand.u32 4294901760, %v157_v21  ;;  %v193_v28 = vand.u32 4294901760, %v158_v22  ;;  %v159_v29 = vld [vmem:[#allocation12 + $0x50] sm:$0xff]  ;;  %v9365_v31 = vand.u32 4294901760, %v139_v23  ;;  %v162_v35 = vld [vmem:[#allocation12 + $0x68] sm:$0xff]  ;;  %v164_v37 = vld [vmem:[#allocation12 + $0x78] sm:$0xff] }
  0x84   :  { %7312 = vmatpush3.bf16.msra.mxu0 %v9347_v12  ;;  %v9362_v26 = vpack.c.bf16 %v187_v20, %v184_v19  ;;  %v9367_v33 = vsub.f32 %v151_v4, %v172_v8  ;;  %v196_v34 = vand.u32 4294901760, %v159_v29  ;;  %v163_v36 = vld [vmem:[#allocation12 + $0x70] sm:$0xff]  ;;  %v199_v39 = vand.u32 4294901760, %v160_v30  ;;  %s6754_s23 = sshll.u32 %s9175_s7, 4  ;;  %s6755_s23 = int_to_ptr.vmem [resolvable:$true] %s6754_s23 }
  0x85   :  { %7313 = vmatprep.subr.bf16.mxu0 %v9170_v0  ;;  %13663 = vst [vmem:[#allocation26_spill] sm:$0xff] %v9365_v31  ;;  %v9370_v38 = vpack.c.bf16 %v193_v28, %v190_v27  ;;  %v259_v40 = vand.u32 4294901760, %v9357_v24  ;;  %v266_v41 = vand.u32 4294901760, %v9359_v25  ;;  %v9374_v42 = vsub.f32 %v152_v7, %v175_v9  ;;  %s9081_s28 = scalar_lea.vmem %s6755_s23, 128  ;;  %p9086_p1 = scmp.lt.s32.totalorder %s6755_s23, %s6755_s23 }
  0x86   :  { %v9376_v43 = vsub.f32 %v153_v10, %v178_v14  ;;  %v9378_v44 = vsub.f32 %v154_v11, %v181_v15  ;;  %v9382_v45 = vsub.f32 %v139_v23, %v9365_v31  ;;  %v202_v46 = vand.u32 4294901760, %v161_v32  ;;  %p9082_p0 = scmp.ne.s32.totalorder %s6755_s23, %s9081_s28  ;;  %p9087_p2 = scmp.lt.s32.totalorder %s9081_s28, %s9081_s28 }
  0x87   :  { %v205_v47 = vand.u32 4294901760, %v162_v35  ;;  %v208_v48 = vand.u32 4294901760, %v163_v36  ;;  %v211_v49 = vand.u32 4294901760, %v164_v37  ;;  %v9384_v50 = vsub.f32 %v155_v16, %v184_v19 }
  0x88   :  { %7315 = vmatpush3.bf16.msra.mxu0 %v9350_v13  ;;  %13664 = vst [vmem:[#allocation27_spill] sm:$0xff] %v9382_v45  ;;  %v9386_v51 = vsub.f32 %v156_v17, %v187_v20  ;;  %v9388_v52 = vsub.f32 %v157_v21, %v190_v27  ;;  %v273_v53 = vand.u32 4294901760, %v9367_v33  ;;  %v9392_v54 = vsub.f32 %v158_v22, %v193_v28  ;;  %p9088_p3 = por %p9087_p2, %p9086_p1 }
  0x89   :  { %7316 = vmatprep.subr.bf16.mxu0 %v9170_v0  ;;  %v9394_v55 = vpack.c.bf16 %v199_v39, %v196_v34  ;;  %v260_v56 = vsub.f32 %v9357_v24, %v259_v40  ;;  %v267_v57 = vsub.f32 %v9359_v25, %v266_v41  ;;  %v9399_v58 = vsub.f32 %v159_v29, %v196_v34 }
  0x8a   :  { %v9401_v59 = vsub.f32 %v160_v30, %v199_v39  ;;  %v9403_v60 = vsub.f32 %v161_v32, %v202_v46  ;;  %v9406_v61 = vand.u32 4294901760, %v9382_v45  ;;  %v9408_v62 = vpack.c.bf16 %v205_v47, %v202_v46  ;;  %p9089_p4 = pnand %p9088_p3, %p9082_p0 }
  0x8b   :  { %v9410_v63 = vsub.f32 %v162_v35, %v205_v47  ;;  %v9412_v2 = vpack.c.bf16 %v211_v49, %v208_v48  ;;  %v9414_v3 = vsub.f32 %v163_v36, %v208_v48  ;;  %v9416_v4 = vsub.f32 %v164_v37, %v211_v49 }
  0x8c   :  { %7318 = vmatpush3.bf16.msra.mxu0 %v9354_v18  ;;  %13665 = vst [vmem:[#allocation28_spill] sm:$0xff] %v9406_v61  ;;  %v274_v5 = vsub.f32 %v9367_v33, %v273_v53  ;;  %v280_v6 = vand.u32 4294901760, %v9374_v42  ;;  %v287_v7 = vand.u32 4294901760, %v9376_v43  ;;  %v261_v8 = vand.u32 4294901760, %v260_v56 }
  0x8d   :  { %7319 = vmatprep.subr.bf16.mxu0 %v9170_v0  ;;  %v268_v9 = vand.u32 4294901760, %v267_v57  ;;  %v294_v10 = vand.u32 4294901760, %v9378_v44  ;;  %v301_v11 = vand.u32 4294901760, %v9384_v50  ;;  %v249_v14 = vsub.f32 %v9382_v45, %v9406_v61 }
  0x8e   :  { %v308_v15 = vand.u32 4294901760, %v9386_v51  ;;  %v315_v16 = vand.u32 4294901760, %v9388_v52  ;;  %v322_v17 = vand.u32 4294901760, %v9392_v54  ;;  %v329_v19 = vand.u32 4294901760, %v9399_v58 }
  0x8f   :  { %v336_v20 = vand.u32 4294901760, %v9401_v59  ;;  %v343_v21 = vand.u32 4294901760, %v9403_v60  ;;  %v350_v22 = vand.u32 4294901760, %v9410_v63  ;;  %v357_v23 = vand.u32 4294901760, %v9414_v3 }
  0x90   :  { %7321 = vmatpush3.bf16.msra.mxu0 %v9362_v26  ;;  %v364_v27 = vand.u32 4294901760, %v9416_v4  ;;  %v9436_v28 = vpack.c.bf16 %v266_v41, %v259_v40  ;;  %v9438_v29 = vpack.c.bf16 %v280_v6, %v273_v53  ;;  %v281_v30 = vsub.f32 %v9374_v42, %v280_v6 }
  0x91   :  { %7322 = vmatprep.subr.bf16.mxu0 %v9170_v0  ;;  %v9442_v32 = vpack.c.bf16 %v294_v10, %v287_v7  ;;  %v9444_v34 = vpack.c.bf16 %v308_v15, %v301_v11  ;;  %v9446_v35 = vpack.c.bf16 %v322_v17, %v315_v16  ;;  %v9449_v36 = vpack.c.bf16 %v336_v20, %v329_v19 }
  0x92   :  { %v9451_v37 = vpack.c.bf16 %v350_v22, %v343_v21  ;;  %v9453_v39 = vpack.c.bf16 %v364_v27, %v357_v23  ;;  %v9455_v40 = vand.u32 4294901760, %v249_v14  ;;  %v275_v41 = vand.u32 4294901760, %v274_v5 }
  0x93   :  { %v7335_v46 = vpack.c.bf16 %v268_v9, %v261_v8  ;;  %v282_v47 = vand.u32 4294901760, %v281_v30  ;;  %v288_v48 = vsub.f32 %v9376_v43, %v287_v7  ;;  %v295_v49 = vsub.f32 %v9378_v44, %v294_v10 }
  0x94   :  { %7324 = vmatpush3.bf16.msra.mxu0 %v9370_v38  ;;  %13666 = vst [vmem:[#allocation29_spill] sm:$0xff] %v9455_v40  ;;  %v302_v53 = vsub.f32 %v9384_v50, %v301_v11  ;;  %v309_v5 = vsub.f32 %v9386_v51, %v308_v15  ;;  %v316_v7 = vsub.f32 %v9388_v52, %v315_v16  ;;  %vm997_vm3 = vcmask 1043459  }
  0x95   :  { %7325 = vmatprep.subr.bf16.mxu0 %v9170_v0  ;;  %v7338_v56 = vpack.c.bf16 %v282_v47, %v275_v41  ;;  %v289_v57 = vand.u32 4294901760, %v288_v48  ;;  %v296_v6 = vand.u32 4294901760, %v295_v49  ;;  %v323_v14 = vsub.f32 %v9392_v54, %v322_v17 }
  0x96   :  { %v303_v9 = vand.u32 4294901760, %v302_v53  ;;  %v310_v10 = vand.u32 4294901760, %v309_v5  ;;  %v317_v11 = vand.u32 4294901760, %v316_v7  ;;  %v330_v15 = vsub.f32 %v9399_v58, %v329_v19 }
  0x97   :  { %v7341_v8 = vpack.c.bf16 %v296_v6, %v289_v57  ;;  %v324_v41 = vand.u32 4294901760, %v323_v14  ;;  %v344_v16 = vsub.f32 %v9403_v60, %v343_v21  ;;  %v351_v17 = vsub.f32 %v9410_v63, %v350_v22 }
  0x98   :  { %7327 = vmatpush3.bf16.msra.mxu0 %v9394_v55  ;;  %v7344_v30 = vpack.c.bf16 %v310_v10, %v303_v9  ;;  %v331_v48 = vand.u32 4294901760, %v330_v15  ;;  %v358_v19 = vsub.f32 %v9414_v3, %v357_v23  ;;  %v7359_v7 = vpack.c.bf16 %v9359_v25, %v9357_v24  ;;  %v860_v10 = vld [vmem:[#allocation10 + $0x20] sm:$0xff] }
  0x99   :  { %7328 = vmatprep.subr.bf16.mxu0 %v9170_v0  ;;  %v7347_v47 = vpack.c.bf16 %v324_v41, %v317_v11  ;;  %v345_v53 = vand.u32 4294901760, %v344_v16  ;;  %v352_v57 = vand.u32 4294901760, %v351_v17  ;;  %v7362_v23 = vpack.c.bf16 %v9374_v42, %v9367_v33  ;;  %v861_v16 = vld [vmem:[#allocation10 + $0x28] sm:$0xff] }
  0x9a   :  { %v359_v6 = vand.u32 4294901760, %v358_v19  ;;  %v7368_v24 = vpack.c.bf16 %v9386_v51, %v9384_v50  ;;  %v7371_v25 = vpack.c.bf16 %v9392_v54, %v9388_v52  ;;  %v7374_v33 = vpack.c.bf16 %v9401_v59, %v9399_v58  ;;  %v6783_v19 = vld [vmem:[%s12966_s6] ss:$0 sm:$0xff] }
  0x9b   :  { %v7353_v21 = vpack.c.bf16 %v352_v57, %v345_v53  ;;  %v7377_v42 = vpack.c.bf16 %v9410_v63, %v9403_v60  ;;  %v863_v57 = vld [vmem:[#allocation10 + $0x38] sm:$0xff]  ;;  %vm999_vm4 = vcmask 1044484   ;;  %vm1001_vm5 = vcmask 1045509  }
  0x9c   :  { %7330 = vmatpush3.bf16.msra.mxu0 %v9408_v62  ;;  %vm1003_vm6 = vcmask 1046534   ;;  %vm1005_vm7 = vcmask 1047559   ;;  %vm1008_vm8 = vcmask 64512  }
  0x9d   :  { %7331 = vmatprep.subr.bf16.mxu0 %v9170_v0 }
  0xa0   :  { %7333 = vmatpush3.bf16.msra.mxu0 %v9412_v2 }
  0xa1   :  { %7334 = vmatprep.subr.bf16.mxu0 %v9170_v0 }
  0xa3   :  { %7133 = vmatmul.mubr.f32.vlgmr.msra.gmra.mrb[0].mxu0 %v9455_v40 }
  0xa4   :  { %7336 = vmatpush3.bf16.msra.mxu0 %v7335_v46  ;;  %7167 = vmatprep.mubr.msk.f32.mxu0 %vm9171_vm0, %v12974_v1  ;;  %v337_v46 = vsub.f32 %v9401_v59, %v336_v20  ;;  %v365_v20 = vsub.f32 %v9416_v4, %v364_v27  ;;  %v7365_v27 = vpack.c.bf16 %v9378_v44, %v9376_v43 }
  0xa5   :  { %7337 = vmatprep.subr.bf16.mxu0 %v9170_v0  ;;  %v7380_v43 = vpack.c.bf16 %v9416_v4, %v9414_v3  ;;  %v856_v3 = vld [vmem:[#allocation10] sm:$0xff] }
  0xa6   :  { %v338_v49 = vand.u32 4294901760, %v337_v46  ;;  %v366_v5 = vand.u32 4294901760, %v365_v20 }
  0xa8   :  { %7339 = vmatpush3.bf16.msra.mxu0 %v7338_v56  ;;  %v7350_v56 = vpack.c.bf16 %v338_v49, %v331_v48  ;;  %v7356_v22 = vpack.c.bf16 %v366_v5, %v359_v6  ;;  %v862_v49 = vld [vmem:[#allocation10 + $0x30] sm:$0xff] }
  0xa9   :  { %7340 = vmatprep.subr.bf16.mxu0 %v9170_v0 }
  0xac   :  { %7342 = vmatpush3.bf16.msra.mxu0 %v7341_v8 }
  0xad   :  { %7343 = vmatprep.subr.bf16.mxu0 %v9170_v0 }
  0xb0   :  { %7345 = vmatpush3.bf16.msra.mxu0 %v7344_v30 }
  0xb1   :  { %7346 = vmatprep.subr.bf16.mxu0 %v9170_v0 }
  0xb4   :  { %7348 = vmatpush3.bf16.msra.mxu0 %v7347_v47 }
  0xb5   :  { %7349 = vmatprep.subr.bf16.mxu0 %v9170_v0 }
  0xb8   :  { %7351 = vmatpush3.bf16.msra.mxu0 %v7350_v56 }
  0xb9   :  { %7352 = vmatprep.subr.bf16.mxu0 %v9170_v0 }
  0xbc   :  { %7354 = vmatpush3.bf16.msra.mxu0 %v7353_v21 }
  0xbd   :  { %7355 = vmatprep.subr.bf16.mxu0 %v9170_v0 }
  0xc0   :  { %7357 = vmatpush3.bf16.msra.mxu0 %v7356_v22 }
  0xc1   :  { %7358 = vmatprep.subr.bf16.mxu0 %v9170_v0 }
  0xc3   :  { %7168 = vmatmul.mubr.f32.vlgmr.msra.gmra.mrb[0].mxu0 %v9365_v31 }
  0xc4   :  { %7360 = vmatpush3.bf16.msra.mxu0 %v7359_v7  ;;  %7202 = vmatprep.mubr.msk.f32.mxu0 %vm9171_vm0, %v12974_v1 }
  0xc5   :  { %7361 = vmatprep.subr.bf16.mxu0 %v9170_v0 }
  0xc8   :  { %7363 = vmatpush3.bf16.msra.mxu0 %v7362_v23 }
  0xc9   :  { %7364 = vmatprep.subr.bf16.mxu0 %v9170_v0 }
  0xcc   :  { %7366 = vmatpush3.bf16.msra.mxu0 %v7365_v27 }
  0xcd   :  { %7367 = vmatprep.subr.bf16.mxu0 %v9170_v0 }
  0xd0   :  { %7369 = vmatpush3.bf16.msra.mxu0 %v7368_v24 }
  0xd1   :  { %7370 = vmatprep.subr.bf16.mxu0 %v9170_v0 }
  0xd4   :  { %7372 = vmatpush3.bf16.msra.mxu0 %v7371_v25 }
  0xd5   :  { %7373 = vmatprep.subr.bf16.mxu0 %v9170_v0 }
  0xd8   :  { %7375 = vmatpush3.bf16.msra.mxu0 %v7374_v33 }
  0xd9   :  { %7376 = vmatprep.subr.bf16.mxu0 %v9170_v0 }
  0xdc   :  { %7378 = vmatpush3.bf16.msra.mxu0 %v7377_v42 }
  0xdd   :  { %7379 = vmatprep.subr.bf16.mxu0 %v9170_v0 }
  0xe0   :  { %7381 = vmatpush3.bf16.msra.mxu0 %v7380_v43 }
  0xe1   :  { %7382 = vmatprep.subr.bf16.mxu0 %v9170_v0 }
  0xe3   :  { %7203 = vmatmul.mubr.f32.vlgmr.msra.gmra.mrb[0].mxu0 %v9382_v45 }
  0xe4   :  { %7384 = vmatpush3.bf16.msra.mxu0 %v9347_v12  ;;  %7237 = vmatprep.mubr.msk.f32.mxu0 %vm9171_vm0, %v12974_v1 }
  0xe5   :  { %7385 = vmatprep.subr.bf16.mxu0 %v9170_v0 }
  0xe8   :  { %7387 = vmatpush3.bf16.msra.mxu0 %v9350_v13 }
  0xe9   :  { %7388 = vmatprep.subr.bf16.mxu0 %v9170_v0 }
  0xec   :  { %7390 = vmatpush3.bf16.msra.mxu0 %v9354_v18 }
  0xed   :  { %7391 = vmatprep.subr.bf16.mxu0 %v9170_v0 }
  0xf0   :  { %7393 = vmatpush3.bf16.msra.mxu0 %v9362_v26 }
  0xf1   :  { %7394 = vmatprep.subr.bf16.mxu0 %v9170_v0 }
  0xf4   :  { %7396 = vmatpush3.bf16.msra.mxu0 %v9370_v38 }
  0xf5   :  { %7397 = vmatprep.subr.bf16.mxu0 %v9170_v0 }
  0xf8   :  { %7399 = vmatpush3.bf16.msra.mxu0 %v9394_v55 }
  0xf9   :  { %7400 = vmatprep.subr.bf16.mxu0 %v9170_v0 }
  0xfc   :  { %7402 = vmatpush3.bf16.msra.mxu0 %v9408_v62 }
  0xfd   :  { %7403 = vmatprep.subr.bf16.mxu0 %v9170_v0 }
 0x100   :  { %7405 = vmatpush3.bf16.msra.mxu0 %v9412_v2 }
 0x101   :  { %7406 = vmatprep.subr.bf16.mxu0 %v9170_v0 }
 0x103   :  { %7238 = vmatmul.mubr.f32.vlgmr.msra.gmra.mrb[0].mxu0 %v9406_v61  ;;  %v1343_v61 = vld [vmem:[#allocation13 + $0xe8] sm:$0xff] }
 0x104   :  { %7408 = vmatpush3.bf16.msra.mxu0 %v9436_v28  ;;  %7272 = vmatprep.mubr.msk.f32.mxu0 %vm9171_vm0, %v12974_v1 }
 0x105   :  { %7409 = vmatprep.subr.bf16.mxu0 %v9170_v0 }
 0x108   :  { %7411 = vmatpush3.bf16.msra.mxu0 %v9438_v29 }
 0x109   :  { %7412 = vmatprep.subr.bf16.mxu0 %v9170_v0 }
 0x10c   :  { %7414 = vmatpush3.bf16.msra.mxu0 %v9442_v32  ;;  %v857_v32 = vld [vmem:[#allocation10 + $0x8] sm:$0xff] }
 0x10d   :  { %7415 = vmatprep.subr.bf16.mxu0 %v9170_v0 }
 0x110   :  { %7417 = vmatpush3.bf16.msra.mxu0 %v9444_v34  ;;  %v858_v34 = vld [vmem:[#allocation10 + $0x10] sm:$0xff] }
 0x111   :  { %7418 = vmatprep.subr.bf16.mxu0 %v9170_v0 }
 0x114   :  { %7420 = vmatpush3.bf16.msra.mxu0 %v9446_v35 }
 0x115   :  { %7421 = vmatprep.subr.bf16.mxu0 %v9170_v0 }
 0x118   :  { %7423 = vmatpush3.bf16.msra.mxu0 %v9449_v36 }
 0x119   :  { %7424 = vmatprep.subr.bf16.mxu0 %v9170_v0 }
 0x11c   :  { %7426 = vmatpush3.bf16.msra.mxu0 %v9451_v37  ;;  %v859_v37 = vld [vmem:[#allocation10 + $0x18] sm:$0xff] }
 0x11d   :  { %7427 = vmatprep.subr.bf16.mxu0 %v9170_v0 }
 0x120   :  { %7429 = vmatpush3.bf16.msra.mxu0 %v9453_v39 }
 0x121   :  { %7430 = vmatprep.subr.bf16.mxu0 %v9170_v0 }
 0x123   :  { %7273 = vmatmul.mubr.f32.vlgmr.msra.gmra.mrb[0].mxu0 %v9365_v31 }
 0x124   :  { %7432 = vmatpush3.bf16.msra.mxu0 %v9347_v12  ;;  %7307 = vmatprep.mubr.msk.f32.mxu0 %vm9171_vm0, %v12974_v1  ;;  %v9173_v12 = vmov 1966171168  }
 0x125   :  { %7433 = vmatprep.subr.bf16.mxu0 %v9170_v0 }
 0x128   :  { %7435 = vmatpush3.bf16.msra.mxu0 %v9350_v13  ;;  %v809_v13 = vunpack.c.l.s4 %v9173_v12 }
 0x129   :  { %7436 = vmatprep.subr.bf16.mxu0 %v9170_v0 }
 0x12c   :  { %7438 = vmatpush3.bf16.msra.mxu0 %v9354_v18  ;;  %v811_v18 = vlaneseq }
 0x12d   :  { %7439 = vmatprep.subr.bf16.mxu0 %v9170_v0 }
 0x130   :  { %7441 = vmatpush3.bf16.msra.mxu0 %v9362_v26  ;;  %v810_v26 = vunpack.c.0.s8 %v809_v13 }
 0x131   :  { %7442 = vmatprep.subr.bf16.mxu0 %v9170_v0 }
 0x134   :  { %7444 = vmatpush3.bf16.msra.mxu0 %v9370_v38  ;;  %v9567_v38 = vshrl.u32 %v811_v18, 7 }
 0x135   :  { %7445 = vmatprep.subr.bf16.mxu0 %v9170_v0 }
 0x136   :  { %v813_v44 = vsub.s32 %v810_v26, %v9567_v38 }
 0x138   :  { %7447 = vmatpush3.bf16.msra.mxu0 %v9394_v55  ;;  %v9571_v55 = vsub.s32 0, %v9567_v38 }
 0x139   :  { %7448 = vmatprep.subr.bf16.mxu0 %v9170_v0 }
 0x13a   :  { %13667 = vst [vmem:[#allocation30_spill] sm:$0xff] %v9571_v55 }
 0x13c   :  { %7450 = vmatpush3.bf16.msra.mxu0 %v9408_v62 }
 0x13d   :  { %7451 = vmatprep.subr.bf16.mxu0 %v9170_v0 }
 0x140   :  { %7453 = vmatpush3.bf16.msra.mxu0 %v9412_v2 }
 0x143   :  { %7308 = vmatmul.mubr.f32.vlgmr.msra.gmra.mrb[0].mxu0 %v9365_v31  ;;  %v1338_v31 = vld [vmem:[#allocation13 + $0xc0] sm:$0xff] }
 0x144   :  { %v1554_v40 = vand.u32 4294901760, %v1338_v31 }
 0x216   :  { %v802_v50 = vpop.f32.mrb[0].mxu0 }
 0x217   :  { %v807_v51 = vcombine.high %v802_v50, %v802_v50  ;;  %v814_v52 = vrot.slane %v802_v50, %v813_v44  ;;  %v7309_v54 = vpop.f32.mrb[1].mxu0  ;;  %v960_v50 = vand.u32 127, %v811_v18 }
 0x219   :  { %v821_v0 = vrot.slane %v807_v51, %v813_v44  ;;  %v822_v58 = vcombine.high %v814_v52, %v814_v52  ;;  %v830_v59 = vrot.slane %v814_v52, %v813_v44  ;;  %v9586_v52 = vsub.s32 %v960_v50, %v9567_v38 }
 0x21b   :  { %v823_v60 = vcombine.high %v821_v0, %v821_v0  ;;  %v837_v62 = vrot.slane %v821_v0, %v813_v44  ;;  %v844_v63 = vrot.slane %v822_v58, %v813_v44  ;;  %v852_v2 = vcombine.high %v830_v59, %v830_v59 }
 0x21c   :  { %v867_v4 = vrot.slane %v830_v59, %v9571_v55 }
 0x21d   :  { %v851_v28 = vrot.slane %v823_v60, %v813_v44  ;;  %v854_v29 = vcombine.high %v844_v63, %v844_v63  ;;  %v871_v35 = vrot.slane %v844_v63, %v9571_v55  ;;  %v853_v36 = vcombine.high %v837_v62, %v837_v62 }
 0x21e   :  { %v875_v39 = vrot.slane %v852_v2, %v9571_v55  ;;  %v883_v8 = vrot.slane %v837_v62, %v9571_v55  ;;  %v904_v9 = vadd.f32 %v867_v4, %v856_v3 }
 0x21f   :  { %v879_v14 = vrot.slane %v854_v29, %v9571_v55  ;;  %v905_v11 = vadd.f32 %v871_v35, %v857_v32  ;;  %v855_v41 = vcombine.high %v851_v28, %v851_v28  ;;  %v887_v15 = vrot.slane %v851_v28, %v9571_v55 }
 0x220   :  { %v906_v30 = vadd.f32 %v875_v39, %v858_v34  ;;  %8877 = vtanh.f32 %v904_v9  ;;  %v891_v47 = vrot.slane %v853_v36, %v9571_v55  ;;  %v908_v48 = vadd.f32 %v883_v8, %v860_v10 }
 0x221   :  { %v907_v46 = vadd.f32 %v879_v14, %v859_v37  ;;  %8879 = vtanh.f32 %v905_v11  ;;  %v895_v17 = vrot.slane %v855_v41, %v9571_v55  ;;  %v909_v53 = vadd.f32 %v887_v15, %v861_v16 }
 0x222   :  { %8881 = vtanh.f32 %v906_v30  ;;  %v910_v56 = vadd.f32 %v891_v47, %v862_v49  ;;  %v9174_v11 = vmov 0   ;;  %v9605_v30 = vsub.s32 1, %v9567_v38 }
 0x223   :  { %8883 = vtanh.f32 %v907_v46  ;;  %v911_v20 = vadd.f32 %v895_v17, %v863_v57  ;;  %8876 = vset.pattern.permute.xlu0 %v9174_v11  ;;  %8875 = vset.pattern.permute.xlu1 %v9174_v11  ;;  %v9608_v41 = vsub.s32 2, %v9567_v38  ;;  %v9611_v15 = vsub.s32 3, %v9567_v38 }
 0x224   :  { %8885 = vtanh.f32 %v908_v48  ;;  %13668 = vst [vmem:[#allocation31_spill] sm:$0xff] %v9605_v30  ;;  %v12979_v49 = vsub.s32 4, %v9567_v38 }
 0x225   :  { %8887 = vtanh.f32 %v909_v53  ;;  %13669 = vst [vmem:[#allocation32_spill] sm:$0xff] %v9608_v41  ;;  %13670 = vst [vmem:[#allocation33_spill] sm:$0xff] %v9611_v15 }
 0x226   :  { %8889 = vtanh.f32 %v910_v56 }
 0x227   :  { %8891 = vtanh.f32 %v911_v20 }
 0x22a   :  { %v8878_v21 = vpop.eup %8877 }
 0x22b   :  { %v927_v6 = vmul.f32 %v8878_v21, %v6783_v19  ;;  %v8880_v5 = vpop.eup %8879  ;;  %v12978_v21 = vsub.s32 5, %v9567_v38 }
 0x22c   :  { %v8882_v22 = vpop.eup %8881  ;;  %v928_v27 = vmul.f32 %v8880_v5, %v6783_v19 }
 0x22d   :  { %935 = vadd.xlane.f32.xlu0 %v927_v6  ;;  %v929_v7 = vmul.f32 %v8882_v22, %v6783_v19  ;;  %v8884_v23 = vpop.eup %8883 }
 0x22e   :  { %v8886_v24 = vpop.eup %8885  ;;  %v930_v25 = vmul.f32 %v8884_v23, %v6783_v19 }
 0x22f   :  { %939 = vadd.xlane.f32.xlu1 %v929_v7  ;;  %v8888_v33 = vpop.eup %8887  ;;  %v931_v42 = vmul.f32 %v8886_v24, %v6783_v19  ;;  %v12977_v7 = vsub.s32 6, %v9567_v38 }
 0x230   :  { %v8890_v43 = vpop.eup %8889  ;;  %v932_v12 = vmul.f32 %v8888_v33, %v6783_v19 }
 0x231   :  { %937 = vadd.xlane.f32.xlu0 %v928_v27  ;;  %v8892_v13 = vpop.eup %8891  ;;  %v933_v26 = vmul.f32 %v8890_v43, %v6783_v19 }
 0x232   :  { %v934_v44 = vmul.f32 %v8892_v13, %v6783_v19 }
 0x233   :  { %941 = vadd.xlane.f32.xlu1 %v930_v25  ;;  %v12976_v25 = vsub.s32 7, %v9567_v38 }
 0x235   :  { %943 = vadd.xlane.f32.xlu0 %v931_v42 }
 0x237   :  { %945 = vadd.xlane.f32.xlu1 %v932_v12 }
 0x239   :  { %947 = vadd.xlane.f32.xlu0 %v933_v26 }
 0x23b   :  { %949 = vadd.xlane.f32.xlu1 %v934_v44 }
 0x2ba   :  { %v936_v51 = vpop.xlane.xlu0 %935 }
 0x2bb   :  { %v964_v58 = vrot.slane %v936_v51, %v9586_v52 }
 0x2bc   :  { %v940_v54 = vpop.xlane.xlu1 %939 }
 0x2bd   :  { %v972_v60 = vrot.slane %v940_v54, %v9586_v52 }
 0x2be   :  { %v938_v0 = vpop.xlane.xlu0 %937 }
 0x2bf   :  { %v968_v59 = vrot.slane %v938_v0, %v9586_v52 }
 0x2c0   :  { %v942_v63 = vpop.xlane.xlu1 %941 }
 0x2c1   :  { %v994_v62 = vsel %vm993_vm1, %v968_v59, %v964_v58  ;;  %v976_v2 = vrot.slane %v942_v63, %v9586_v52 }
 0x2c2   :  { %v996_v18 = vsel %vm995_vm2, %v972_v60, %v994_v62  ;;  %v944_v3 = vpop.xlane.xlu0 %943 }
 0x2c3   :  { %v980_v4 = vrot.slane %v944_v3, %v9586_v52  ;;  %v998_v28 = vsel %vm997_vm3, %v976_v2, %v996_v18 }
 0x2c4   :  { %v946_v32 = vpop.xlane.xlu1 %945 }
 0x2c5   :  { %v1000_v29 = vsel %vm999_vm4, %v980_v4, %v998_v28  ;;  %v984_v34 = vrot.slane %v946_v32, %v9586_v52 }
 0x2c6   :  { %v948_v35 = vpop.xlane.xlu0 %947 }
 0x2c7   :  { %v988_v36 = vrot.slane %v948_v35, %v9586_v52  ;;  %v1002_v37 = vsel %vm1001_vm5, %v984_v34, %v1000_v29 }
 0x2c8   :  { %v950_v39 = vpop.xlane.xlu1 %949 }
 0x2c9   :  { %v1004_v8 = vsel %vm1003_vm6, %v988_v36, %v1002_v37  ;;  %v992_v9 = vrot.slane %v950_v39, %v9586_v52 }
 0x2cb   :  { %v1006_v10 = vsel %vm1005_vm7, %v992_v9, %v1004_v8 }
 0x2cc   :  { %v1009_v14 = vsel %vm1008_vm8, %v1006_v10, -inf }
 0x2cd   :  { %1010 = vmax.xlane.f32.xlu0 %v1009_v14 }
 0x35a   :  { %v1011_v46 = vpop.xlane.xlu0 %1010 }
 0x35b   :  { %v1016_v16 = vrot.slane %v1011_v46, %v9571_v55  ;;  %v1020_v47 = vrot.slane %v1011_v46, %v9605_v30  ;;  %v1024_v48 = vrot.slane %v1011_v46, %v9608_v41  ;;  %v1028_v17 = vrot.slane %v1011_v46, %v9611_v15 }
 0x35c   :  { %v1032_v6 = vrot.slane %v1011_v46, %v12979_v49  ;;  %v1036_v23 = vrot.slane %v1011_v46, %v12978_v21  ;;  %v1040_v33 = vrot.slane %v1011_v46, %v12977_v7  ;;  %v1044_v26 = vrot.slane %v1011_v46, %v12976_v25 }
 0x35d   :  { %v1053_v53 = vsub.f32 %v936_v51, %v1016_v16  ;;  %v1054_v56 = vsub.f32 %v938_v0, %v1020_v47  ;;  %v1055_v57 = vsub.f32 %v940_v54, %v1024_v48  ;;  %v1056_v5 = vsub.f32 %v942_v63, %v1028_v17 }
 0x35e   :  { %v1057_v27 = vsub.f32 %v944_v3, %v1032_v6  ;;  %v1058_v42 = vsub.f32 %v946_v32, %v1036_v23  ;;  %v1059_v44 = vsub.f32 %v948_v35, %v1040_v33  ;;  %v1060_v54 = vsub.f32 %v950_v39, %v1044_v26  ;;  %v1317_v6 = vld [vmem:[#allocation13 + $0x18] sm:$0xff]  ;;  %v1318_v33 = vld [vmem:[#allocation13 + $0x20] sm:$0xff] }
 0x35f   :  { %v1061_v19 = vmul.f32 1.442695, %v1053_v53  ;;  %v1063_v20 = vmul.f32 1.442695, %v1054_v56  ;;  %v1065_v22 = vmul.f32 1.442695, %v1055_v57 }
 0x360   :  { %v1067_v24 = vmul.f32 1.442695, %v1056_v5  ;;  %v1069_v43 = vmul.f32 1.442695, %v1057_v27  ;;  %v1071_v50 = vmul.f32 1.442695, %v1058_v42 }
 0x361   :  { %8893 = vpow2.f32 %v1061_v19  ;;  %v1073_v0 = vmul.f32 1.442695, %v1059_v44  ;;  %v1075_v59 = vmul.f32 1.442695, %v1060_v54  ;;  %v1315_v19 = vld [vmem:[#allocation13 + $0x8] sm:$0xff]  ;;  %v1321_v23 = vld [vmem:[#allocation13 + $0x38] sm:$0xff] }
 0x362   :  { %8895 = vpow2.f32 %v1063_v20  ;;  %v1319_v20 = vld [vmem:[#allocation13 + $0x28] sm:$0xff]  ;;  %v1528_v5 = vand.u32 4294901760, %v1315_v19  ;;  %v3667_v27 = vand.u32 4294901760, %v1317_v6  ;;  %v3671_v42 = vand.u32 4294901760, %v1321_v23  ;;  %v1320_v44 = vld [vmem:[#allocation13 + $0x30] sm:$0xff] }
 0x363   :  { %8897 = vpow2.f32 %v1065_v22  ;;  %v1532_v22 = vand.u32 4294901760, %v1319_v20  ;;  %v1534_v26 = vand.u32 4294901760, %v1318_v33 }
 0x364   :  { %8899 = vpow2.f32 %v1067_v24  ;;  %v1314_v24 = vld [vmem:[#allocation13] sm:$0xff] }
 0x365   :  { %8901 = vpow2.f32 %v1069_v43  ;;  %v1530_v43 = vand.u32 4294901760, %v1314_v24  ;;  %v9669_v54 = vpack.c.bf16 %v1532_v22, %v1528_v5 }
 0x366   :  { %8903 = vpow2.f32 %v1071_v50  ;;  %v1323_v50 = vld [vmem:[#allocation13 + $0x48] sm:$0xff] }
 0x367   :  { %8905 = vpow2.f32 %v1073_v0  ;;  %13671 = vst [vmem:[#allocation34_spill] sm:$0xff] %v9669_v54  ;;  %v9671_v0 = vsub.f32 %v1315_v19, %v1528_v5  ;;  %7455 = vmatprep.subr.bf16.mxu1 %v9669_v54  ;;  %v1331_v19 = vld [vmem:[#allocation13 + $0x88] sm:$0xff] }
 0x368   :  { %8907 = vpow2.f32 %v1075_v59  ;;  %v9673_v59 = vsub.f32 %v1319_v20, %v1532_v22  ;;  %v1335_v20 = vld [vmem:[#allocation13 + $0xa8] sm:$0xff] }
 0x369   :  { %13672 = vst [vmem:[#allocation35_spill] sm:$0xff] %v9671_v0 }
 0x36a   :  { %13673 = vst [vmem:[#allocation36_spill] sm:$0xff] %v9673_v59 }
 0x36b   :  { %v9627_v12 = vpop.eup %8893 }
 0x36c   :  { %v9629_v13 = vpop.eup %8895  ;;  %1086 = vperm.xlu1 %8875, %v9627_v12  }
 0x36d   :  { %1089 = vperm.xlu0 %8876, %v9629_v13   ;;  %v9635_v51 = vpop.eup %8897 }
 0x36e   :  { %v9638_v58 = vpop.eup %8899 }
 0x36f   :  { %v9641_v60 = vpop.eup %8901 }
 0x370   :  { %1092 = vperm.xlu1 %8875, %v9635_v51   ;;  %v9644_v62 = vpop.eup %8903 }
 0x371   :  { %v9647_v63 = vpop.eup %8905 }
 0x372   :  { %v9650_v18 = vpop.eup %8907 }
 0x374   :  { %1095 = vperm.xlu1 %8875, %v9638_v58  }
 0x378   :  { %1098 = vperm.xlu1 %8875, %v9641_v60  }
 0x37c   :  { %1101 = vperm.xlu1 %8875, %v9644_v62  }
 0x380   :  { %1104 = vperm.xlu1 %8875, %v9647_v63  }
 0x384   :  { %1107 = vperm.xlu1 %8875, %v9650_v18  }
 0x3eb   :  { %v1087_v2 = vpop.permute.xlu1 %1086 }
 0x3ec   :  { %v1090_v29 = vpop.permute.xlu0 %1089  ;;  %v1112_v35 = vrot.slane %v1087_v2, %v9586_v52  ;;  %v9675_v2 = vsub.f32 %v1317_v6, %v3667_v27  ;;  %v1333_v6 = vld [vmem:[#allocation13 + $0x98] sm:$0xff] }
 0x3ed   :  { %v1116_v34 = vrot.slane %v1090_v29, %v9586_v52  ;;  %v9677_v29 = vpack.c.bf16 %v3671_v42, %v3667_v27 }
 0x3ee   :  { %13674 = vst [vmem:[#allocation37_spill] sm:$0xff] %v9675_v2 }
 0x3ef   :  { %v1093_v3 = vpop.permute.xlu1 %1092  ;;  %v1141_v9 = vsel %vm993_vm1, %v1116_v34, %v1112_v35  ;;  %13675 = vst [vmem:[#allocation38_spill] sm:$0xff] %v9677_v29  ;;  %v9681_v34 = vpack.c.bf16 %v1534_v26, %v1530_v43  ;;  %v9683_v35 = vsub.f32 %v1314_v24, %v1530_v43  ;;  %8031 = vmatprep.subr.bf16.mxu0 %v9677_v29  ;;  %v1337_v24 = vld [vmem:[#allocation13 + $0xb8] sm:$0xff] }
 0x3f0   :  { %v1120_v36 = vrot.slane %v1093_v3, %v9586_v52  ;;  %v1327_v3 = vld [vmem:[#allocation13 + $0x68] sm:$0xff]  ;;  %v9779_v29 = vld [vmem:[#allocation13 + $0x118] sm:$0xff] }
 0x3f1   :  { %13677 = vst [vmem:[#allocation40_spill] sm:$0xff] %v9681_v34  ;;  %13678 = vst [vmem:[#allocation41_spill] sm:$0xff] %v9683_v35  ;;  %7457 = vmatpush1.bf16.msra.mxu1 %v9681_v34  ;;  %v9777_v34 = vld [vmem:[#allocation13 + $0x128] sm:$0xff] }
 0x3f2   :  { %v1142_v14 = vsel %vm995_vm2, %v1120_v36, %v1141_v9  ;;  %v1322_v36 = vld [vmem:[#allocation13 + $0x40] sm:$0xff]  ;;  %v1536_v9 = vand.u32 4294901760, %v1323_v50 }
 0x3f3   :  { %v1096_v4 = vpop.permute.xlu1 %1095 }
 0x3f4   :  { %v1124_v37 = vrot.slane %v1096_v4, %v9586_v52  ;;  %v1325_v4 = vld [vmem:[#allocation13 + $0x58] sm:$0xff] }
 0x3f6   :  { %v1143_v46 = vsel %vm997_vm3, %v1124_v37, %v1142_v14  ;;  %v9686_v37 = vsub.f32 %v1318_v33, %v1534_v26  ;;  %v1540_v14 = vand.u32 4294901760, %v1327_v3 }
 0x3f7   :  { %v1099_v28 = vpop.permute.xlu1 %1098 }
 0x3f8   :  { %v1128_v39 = vrot.slane %v1099_v28, %v9586_v52  ;;  %v1329_v28 = vld [vmem:[#allocation13 + $0x78] sm:$0xff]  ;;  %13679 = vst [vmem:[#allocation42_spill] sm:$0xff] %v9686_v37  ;;  %v9698_v5 = vpack.c.bf16 %v1540_v14, %v1536_v9  ;;  %v9700_v22 = vsub.f32 %v1327_v3, %v1540_v14  ;;  %v3683_v3 = vand.u32 4294901760, %v1333_v6  ;;  %v1334_v14 = vld [vmem:[#allocation13 + $0xa0] sm:$0xff] }
 0x3fa   :  { %v1144_v16 = vsel %vm999_vm4, %v1128_v39, %v1143_v46  ;;  %v3679_v46 = vand.u32 4294901760, %v1329_v28  ;;  %13684 = vst [vmem:[#allocation47_spill] sm:$0xff] %v9698_v5  ;;  %13685 = vst [vmem:[#allocation48_spill] sm:$0xff] %v9700_v22  ;;  %7459 = vmatprep.subr.bf16.mxu1 %v9698_v5 }
 0x3fb   :  { %v1102_v32 = vpop.permute.xlu1 %1101 }
 0x3fc   :  { %v1132_v10 = vrot.slane %v1102_v32, %v9586_v52  ;;  %v9679_v32 = vsub.f32 %v1321_v23, %v3671_v42  ;;  %v9707_v33 = vsub.f32 %v1329_v28, %v3679_v46  ;;  %v3687_v28 = vand.u32 4294901760, %v1337_v24 }
 0x3fe   :  { %v1145_v48 = vsel %vm1001_vm5, %v1132_v10, %v1144_v16  ;;  %13676 = vst [vmem:[#allocation39_spill] sm:$0xff] %v9679_v32  ;;  %v1326_v10 = vld [vmem:[#allocation13 + $0x60] sm:$0xff]  ;;  %v1538_v16 = vand.u32 4294901760, %v1322_v36  ;;  %13688 = vst [vmem:[#allocation51_spill] sm:$0xff] %v9707_v33 }
 0x3ff   :  { %v1105_v8 = vpop.permute.xlu1 %1104  ;;  %v1542_v42 = vand.u32 4294901760, %v1326_v10 }
 0x400   :  { %v1136_v11 = vrot.slane %v1105_v8, %v9586_v52  ;;  %v3673_v8 = vand.u32 4294901760, %v1320_v44  ;;  %v9709_v43 = vsub.f32 %v1322_v36, %v1538_v16  ;;  %v1332_v36 = vld [vmem:[#allocation13 + $0x90] sm:$0xff] }
 0x402   :  { %v1146_v53 = vsel %vm1003_vm6, %v1136_v11, %v1145_v48  ;;  %v3675_v11 = vand.u32 4294901760, %v1325_v4  ;;  %v1328_v48 = vld [vmem:[#allocation13 + $0x70] sm:$0xff]  ;;  %13689 = vst [vmem:[#allocation52_spill] sm:$0xff] %v9709_v43 }
 0x403   :  { %v1108_v47 = vpop.permute.xlu1 %1107  ;;  %v1368_v43 = vld [vmem:[#allocation13 + $0x1b0] sm:$0xff] }
 0x404   :  { %v1140_v17 = vrot.slane %v1108_v47, %v9586_v52  ;;  %v1316_v52 = vld [vmem:[#allocation13 + $0x10] sm:$0xff]  ;;  %v9702_v23 = vpack.c.bf16 %v3679_v46, %v3675_v11  ;;  %v9704_v27 = vsub.f32 %v1325_v4, %v3675_v11  ;;  %v9713_v4 = vpack.c.bf16 %v1542_v42, %v1538_v16 }
 0x405   :  { %v3669_v39 = vand.u32 4294901760, %v1316_v52  ;;  %v1324_v47 = vld [vmem:[#allocation13 + $0x50] sm:$0xff] }
 0x406   :  { %v1147_v56 = vsel %vm1005_vm7, %v1140_v17, %v1146_v53  ;;  %13686 = vst [vmem:[#allocation49_spill] sm:$0xff] %v9702_v23  ;;  %13687 = vst [vmem:[#allocation50_spill] sm:$0xff] %v9704_v27  ;;  %v3677_v26 = vand.u32 4294901760, %v1324_v47  ;;  %v1336_v11 = vld [vmem:[#allocation13 + $0xb0] sm:$0xff]  ;;  %7461 = vmatpush1.bf16.msra.mxu1 %v9713_v4 }
 0x407   :  { %v1149_v57 = vsel %vm1008_vm8, %v1147_v56, 0.0  ;;  %v9690_v17 = vpack.c.bf16 %v3673_v8, %v3669_v39  ;;  %v9692_v53 = vsub.f32 %v1316_v52, %v3669_v39  ;;  %v9694_v56 = vsub.f32 %v1320_v44, %v3673_v8  ;;  %v1330_v39 = vld [vmem:[#allocation13 + $0x80] sm:$0xff]  ;;  %13690 = vst [vmem:[#allocation53_spill] sm:$0xff] %v9713_v4 }
 0x408   :  { %1150 = vadd.xlane.f32.xlu1 %v1149_v57  ;;  %v9696_v57 = vsub.f32 %v1323_v50, %v1536_v9  ;;  %v3681_v52 = vand.u32 4294901760, %v1328_v48  ;;  %v1544_v44 = vand.u32 4294901760, %v1331_v19  ;;  %v1548_v50 = vand.u32 4294901760, %v1335_v20 }
 0x409   :  { %13680 = vst [vmem:[#allocation43_spill] sm:$0xff] %v9690_v17  ;;  %13681 = vst [vmem:[#allocation44_spill] sm:$0xff] %v9692_v53  ;;  %8033 = vmatpush1.bf16.msra.mxu0 %v9690_v17  ;;  %v9715_v8 = vsub.f32 %v1326_v10, %v1542_v42  ;;  %v9717_v9 = vsub.f32 %v1324_v47, %v3677_v26  ;;  %v9730_v10 = vpack.c.bf16 %v3687_v28, %v3683_v3 }
 0x40a   :  { %13682 = vst [vmem:[#allocation45_spill] sm:$0xff] %v9694_v56  ;;  %13683 = vst [vmem:[#allocation46_spill] sm:$0xff] %v9696_v57  ;;  %8035 = vmatprep.subr.bf16.mxu0 %v9702_v23  ;;  %v9719_v46 = vpack.c.bf16 %v3681_v52, %v3677_v26  ;;  %v9721_v1 = vsub.f32 %v1328_v48, %v3681_v52  ;;  %v9723_v25 = vpack.c.bf16 %v1548_v50, %v1544_v44 }
 0x40b   :  { %13691 = vst [vmem:[#allocation54_spill] sm:$0xff] %v9715_v8  ;;  %13692 = vst [vmem:[#allocation55_spill] sm:$0xff] %v9717_v9  ;;  %v9725_v7 = vsub.f32 %v1331_v19, %v1544_v44  ;;  %v9728_v16 = vsub.f32 %v1335_v20, %v1548_v50  ;;  %v9732_v47 = vsub.f32 %v1333_v6, %v3683_v3  ;;  %v1546_v48 = vand.u32 4294901760, %v1330_v39  ;;  %v1366_v9 = vld [vmem:[#allocation13 + $0x1a0] sm:$0xff]  ;;  %v1364_v8 = vld [vmem:[#allocation13 + $0x190] sm:$0xff] }
 0x40c   :  { %13693 = vst [vmem:[#allocation56_spill] sm:$0xff] %v9719_v46  ;;  %13694 = vst [vmem:[#allocation57_spill] sm:$0xff] %v9721_v1  ;;  %v9734_v42 = vsub.f32 %v1337_v24, %v3687_v28  ;;  %7463 = vmatprep.subr.bf16.mxu1 %v9723_v25  ;;  %v1550_v26 = vand.u32 4294901760, %v1334_v14  ;;  %v3685_v52 = vand.u32 4294901760, %v1332_v36  ;;  %v3689_v21 = vand.u32 4294901760, %v1336_v11 }
 0x40d   :  { %13695 = vst [vmem:[#allocation58_spill] sm:$0xff] %v9723_v25  ;;  %13696 = vst [vmem:[#allocation59_spill] sm:$0xff] %v9725_v7  ;;  %8037 = vmatpush1.bf16.msra.mxu0 %v9719_v46  ;;  %v9741_v20 = vsub.f32 %v1330_v39, %v1546_v48  ;;  %v13711_v4 = vsub.s32 7, %v9567_v38 }
 0x40e   :  { %13697 = vst [vmem:[#allocation60_spill] sm:$0xff] %v9728_v16  ;;  %13698 = vst [vmem:[#allocation61_spill] sm:$0xff] %v9730_v10  ;;  %8039 = vmatprep.subr.bf16.mxu0 %v9730_v10  ;;  %v9739_v19 = vpack.c.bf16 %v1550_v26, %v1546_v48  ;;  %v9743_v44 = vsub.f32 %v1334_v14, %v1550_v26  ;;  %v9745_v6 = vpack.c.bf16 %v3689_v21, %v3685_v52 }
 0x40f   :  { %13699 = vst [vmem:[#allocation62_spill] sm:$0xff] %v9732_v47  ;;  %13700 = vst [vmem:[#allocation63_spill] sm:$0xff] %v9734_v42  ;;  %v9747_v24 = vsub.f32 %v1332_v36, %v3685_v52  ;;  %v9749_v50 = vsub.f32 %v1336_v11, %v3689_v21  ;;  %v13707_v11 = vsub.s32 4, %v9567_v38  ;;  %v1339_v52 = vld [vmem:[#allocation13 + $0xc8] sm:$0xff]  ;;  %v9835_v42 = vld [vmem:[#allocation13 + $0x158] sm:$0xff] }
 0x410   :  { %13701 = vst [vmem:[#allocation64_spill] sm:$0xff] %v9739_v19  ;;  %13702 = vst [vmem:[#allocation65_spill] sm:$0xff] %v9741_v20  ;;  %7465 = vmatpush1.bf16.msra.mxu1 %v9739_v19  ;;  %v1344_v19 = vld [vmem:[#allocation13 + $0xf0] sm:$0xff]  ;;  %v9833_v20 = vld [vmem:[#allocation13 + $0x168] sm:$0xff] }
 0x411   :  { %13703 = vst [vmem:[#allocation66_spill] sm:$0xff] %v9743_v44  ;;  %13704 = vst [vmem:[#allocation67_spill] sm:$0xff] %v9745_v6  ;;  %8041 = vmatpush1.bf16.msra.mxu0 %v9745_v6  ;;  %v9847_v47 = vld [vmem:[#allocation13 + $0x140] sm:$0xff] }
 0x412   :  { %13705 = vst [vmem:[#allocation68_spill] sm:$0xff] %v9747_v24  ;;  %13706 = vst [vmem:[#allocation69_spill] sm:$0xff] %v9749_v50  ;;  %v9801_v50 = vld [vmem:[#allocation13 + $0x130] sm:$0xff] }
 0x495   :  { %v1151_v3 = vpop.xlane.xlu1 %1150 }
 0x496   :  { %8909 = vrcp.f32 %v1151_v3  ;;  %v1341_v3 = vld [vmem:[#allocation13 + $0xd8] sm:$0xff] }
 0x4a0   :  { %v8910_v28 = vpop.eup %8909 }
 0x4a1   :  { %v1157_v49 = vrot.slane %v8910_v28, %v9571_v55  ;;  %v1161_v14 = vrot.slane %v8910_v28, %v9605_v30  ;;  %v1165_v36 = vrot.slane %v8910_v28, %v9608_v41  ;;  %v1169_v21 = vrot.slane %v8910_v28, %v9611_v15  ;;  %v1345_v30 = vld [vmem:[#allocation13 + $0xf8] sm:$0xff] }
 0x4a2   :  { %v1173_v26 = vrot.slane %v8910_v28, %v13707_v11  ;;  %v13708_v55 = vsub.s32 5, %v9567_v38  ;;  %v3695_v15 = vand.u32 4294901760, %v1345_v30  ;;  %v1340_v11 = vld [vmem:[#allocation13 + $0xd0] sm:$0xff]  ;;  %v1185_v23 = vrot.slane %v8910_v28, %v13711_v4  ;;  %v9786_v4 = vld [vmem:[#allocation13 + $0x138] sm:$0xff] }
 0x4a3   :  { %v1194_v39 = vmul.f32 %v9627_v12, %v1157_v49  ;;  %v1195_v48 = vmul.f32 %v9629_v13, %v1161_v14  ;;  %v1552_v49 = vand.u32 4294901760, %v1339_v52  ;;  %v1556_v12 = vand.u32 4294901760, %v1343_v61  ;;  %v1342_v13 = vld [vmem:[#allocation13 + $0xe0] sm:$0xff] }
 0x4a4   :  { %v1177_v45 = vrot.slane %v8910_v28, %v13708_v55  ;;  %v13709_v14 = vsub.s32 6, %v9567_v38  ;;  %v1558_v6 = vand.u32 4294901760, %v1342_v13  ;;  %v1196_v10 = vmul.f32 %v9635_v51, %v1165_v36  ;;  %v9789_v36 = vld [vmem:[#allocation13 + $0x100] sm:$0xff] }
 0x4a5   :  { %1204 = vperm.xlu0 %8876, %v1194_v39   ;;  %v3691_v39 = vand.u32 4294901760, %v1341_v3  ;;  %v3693_v25 = vand.u32 4294901760, %v1340_v11  ;;  %v3697_v55 = vand.u32 4294901760, %v1344_v19  ;;  %v1197_v46 = vmul.f32 %v9638_v58, %v1169_v21  ;;  %v9791_v21 = vld [vmem:[#allocation13 + $0x120] sm:$0xff] }
 0x4a6   :  { %v1181_v41 = vrot.slane %v8910_v28, %v13709_v14  ;;  %v9773_v17 = vpack.c.bf16 %v1558_v6, %v1554_v40  ;;  %v9775_v14 = vld [vmem:[#allocation13 + $0x108] sm:$0xff]  ;;  %v1198_v54 = vmul.f32 %v9641_v60, %v1173_v26  ;;  %v9804_v28 = vmul.f32 %v9644_v62, %v1177_v45 }
 0x4a7   :  { %v9771_v5 = vpack.c.bf16 %v3695_v15, %v3691_v39  ;;  %v9782_v51 = vpack.c.bf16 %v3697_v55, %v3693_v25  ;;  %v13715_v60 = vand.u32 4294901760, %v9775_v14  ;;  %v13716_v26 = vand.u32 4294901760, %v9777_v34 }
 0x4a8   :  { %13713 = vst [vmem:[#allocation72_spill] sm:$0xff] %v9773_v17  ;;  %v3705_v58 = vand.u32 4294901760, %v9801_v50  ;;  %v9816_v38 = vmul.f32 %v9647_v63, %v1181_v41  ;;  %v9819_v24 = vmul.f32 %v9650_v18, %v1185_v23  ;;  %v13718_v45 = vand.u32 4294901760, %v9779_v29 }
 0x4a9   :  { %1209 = vperm.xlu0 %8876, %v1195_v48   ;;  %v9766_v48 = vpack.c.bf16 %v1556_v12, %v1552_v49  ;;  %13712 = vst [vmem:[#allocation71_spill] sm:$0xff] %v9771_v5  ;;  %13714 = vst [vmem:[#allocation73_spill] sm:$0xff] %v9782_v51  ;;  %8043 = vmatprep.subr.bf16.mxu0 %v9771_v5  ;;  %v13721_v44 = vand.u32 4294901760, %v9791_v21  ;;  %v9837_v41 = vsub.f32 %v1339_v52, %v1552_v49  ;;  %v9875_v49 = vld [vmem:[#allocation13 + $0x188] sm:$0xff] }
 0x4aa   :  { %8045 = vmatpush1.bf16.msra.mxu0 %v9782_v51  ;;  %v13720_v51 = vand.u32 4294901760, %v9789_v36  ;;  %v9839_v63 = vsub.f32 %v1343_v61, %v1556_v12  ;;  %v9841_v18 = vsub.f32 %v1341_v3, %v3691_v39  ;;  %v9843_v23 = vsub.f32 %v1345_v30, %v3695_v15  ;;  %v9860_v61 = vld [vmem:[#allocation13 + $0x150] sm:$0xff]  ;;  %v9877_v12 = vld [vmem:[#allocation13 + $0x1a8] sm:$0xff] }
 0x4ab   :  { %13710 = vst [vmem:[#allocation70_spill] sm:$0xff] %v9766_v48  ;;  %7467 = vmatprep.subr.bf16.mxu1 %v9766_v48  ;;  %v9799_v48 = vld [vmem:[#allocation13 + $0x110] sm:$0xff]  ;;  %13723 = vst [vmem:[#allocation77_spill] sm:$0xff] %v9837_v41  ;;  %v9853_v16 = vsub.f32 %v1342_v13, %v1558_v6  ;;  %v9855_v7 = vsub.f32 %v1340_v11, %v3693_v25  ;;  %v3707_v25 = vand.u32 4294901760, %v9835_v42  ;;  %v1570_v6 = vand.u32 4294901760, %v9847_v47 }
 0x4ac   :  { %7469 = vmatpush1.bf16.msra.mxu1 %v9773_v17  ;;  %v9811_v17 = vpack.c.bf16 %v13716_v26, %v13715_v60  ;;  %v3701_v5 = vand.u32 4294901760, %v9799_v48  ;;  %v9829_v60 = vpack.c.bf16 %v13721_v44, %v13720_v51  ;;  %v9831_v26 = vld [vmem:[#allocation13 + $0x148] sm:$0xff]  ;;  %13724 = vst [vmem:[#allocation78_spill] sm:$0xff] %v9839_v63  ;;  %13725 = vst [vmem:[#allocation79_spill] sm:$0xff] %v9841_v18  ;;  %v9849_v44 = vld [vmem:[#allocation13 + $0x160] sm:$0xff]  ;;  %v3709_v3 = vand.u32 4294901760, %v9860_v61 }
 0x4ad   :  { %1214 = vperm.xlu0 %8876, %v1196_v10   ;;  %v3703_v10 = vand.u32 4294901760, %v9786_v4  ;;  %13726 = vst [vmem:[#allocation80_spill] sm:$0xff] %v9843_v23  ;;  %v9851_v51 = vsub.f32 %v1338_v31, %v1554_v40  ;;  %13728 = vst [vmem:[#allocation82_spill] sm:$0xff] %v9853_v16  ;;  %v9862_v30 = vld [vmem:[#allocation13 + $0x170] sm:$0xff]  ;;  %v1568_v31 = vand.u32 4294901760, %v9831_v26  ;;  %v1572_v40 = vand.u32 4294901760, %v9833_v20 }
 0x4ae   :  { %13717 = vst [vmem:[#allocation74_spill] sm:$0xff] %v9811_v17  ;;  %13722 = vst [vmem:[#allocation76_spill] sm:$0xff] %v9829_v60  ;;  %7471 = vmatprep.subr.bf16.mxu1 %v9811_v17  ;;  %v9866_v15 = vpack.c.bf16 %v3705_v58, %v3701_v5  ;;  %v1574_v52 = vand.u32 4294901760, %v9849_v44  ;;  %v3713_v13 = vand.u32 4294901760, %v9862_v30  ;;  %v1576_v11 = vand.u32 4294901760, %v9875_v49 }
 0x4af   :  { %v9823_v62 = vpack.c.bf16 %v3703_v10, %v13718_v45  ;;  %v9845_v45 = vld [vmem:[#allocation13 + $0x178] sm:$0xff]  ;;  %13727 = vst [vmem:[#allocation81_spill] sm:$0xff] %v9851_v51  ;;  %13729 = vst [vmem:[#allocation83_spill] sm:$0xff] %v9855_v7  ;;  %v9880_v39 = vpack.c.bf16 %v1572_v40, %v1568_v31  ;;  %v1362_v51 = vld [vmem:[#allocation13 + $0x180] sm:$0xff]  ;;  %v13737_v23 = vand.u32 4294901760, %v9777_v34  ;;  %v13739_v63 = vand.u32 4294901760, %v9779_v29 }
 0x4b0   :  { %7473 = vmatpush1.bf16.msra.mxu1 %v9829_v60  ;;  %13731 = vst [vmem:[#allocation85_spill] sm:$0xff] %v9866_v15  ;;  %v1365_v60 = vld [vmem:[#allocation13 + $0x198] sm:$0xff]  ;;  %v9905_v1 = vsub.f32 %v9786_v4, %v3703_v10  ;;  %v9922_v4 = vsub.f32 %v9801_v50, %v3705_v58  ;;  %v9925_v10 = vld [vmem:[#allocation13 + $0x1c8] sm:$0xff]  ;;  %v3721_v50 = vand.u32 4294901760, %v1368_v43 }
 0x4b1   :  { %13719 = vst [vmem:[#allocation75_spill] sm:$0xff] %v9823_v62  ;;  %1219 = vperm.xlu0 %8876, %v1197_v46   ;;  %v9857_v46 = vsub.f32 %v1344_v19, %v3697_v55  ;;  %8047 = vmatprep.subr.bf16.mxu0 %v9823_v62  ;;  %v3711_v19 = vand.u32 4294901760, %v9845_v45  ;;  %13732 = vst [vmem:[#allocation86_spill] sm:$0xff] %v9880_v39  ;;  %v1580_v55 = vand.u32 4294901760, %v9877_v12  ;;  %v1369_v62 = vld [vmem:[#allocation13 + $0x1b8] sm:$0xff]  ;;  %v3715_v7 = vand.u32 4294901760, %v1365_v60 }
 0x4b2   :  { %8049 = vmatpush1.bf16.msra.mxu0 %v9866_v15  ;;  %v3719_v16 = vand.u32 4294901760, %v1369_v62  ;;  %v9897_v18 = vsub.f32 %v9777_v34, %v13737_v23  ;;  %v9902_v41 = vsub.f32 %v9779_v29, %v13739_v63  ;;  %13741 = vst [vmem:[#allocation92_spill] sm:$0xff] %v9905_v1  ;;  %7475 = vmatprep.subr.bf16.mxu1 %v9880_v39  ;;  %v13744_v34 = vand.u32 4294901760, %v9791_v21  ;;  %v1377_v39 = vld [vmem:[#allocation13 + $0x1f8] sm:$0xff]  ;;  %v1372_v1 = vld [vmem:[#allocation13 + $0x1d0] sm:$0xff] }
 0x4b3   :  { %13730 = vst [vmem:[#allocation84_spill] sm:$0xff] %v9857_v46  ;;  %v9885_v17 = vpack.c.bf16 %v3711_v19, %v3707_v25  ;;  %v9887_v46 = vpack.c.bf16 %v1574_v52, %v1570_v6  ;;  %v9919_v29 = vsub.f32 %v9799_v48, %v3701_v5  ;;  %13747 = vst [vmem:[#allocation96_spill] sm:$0xff] %v9922_v4  ;;  %v1375_v5 = vld [vmem:[#allocation13 + $0x1e8] sm:$0xff]  ;;  %v1582_v48 = vand.u32 4294901760, %v1366_v9 }
 0x4b4   :  { %13738 = vst [vmem:[#allocation90_spill] sm:$0xff] %v9897_v18  ;;  %13740 = vst [vmem:[#allocation91_spill] sm:$0xff] %v9902_v41  ;;  %v9916_v23 = vsub.f32 %v9791_v21, %v13744_v34  ;;  %v9931_v63 = vpack.c.bf16 %v1580_v55, %v1576_v11  ;;  %v9933_v21 = vpack.c.bf16 %v3719_v16, %v3715_v7  ;;  %v3717_v34 = vand.u32 4294901760, %v1364_v8 }
 0x4b5   :  { %1224 = vperm.xlu0 %8876, %v1198_v54   ;;  %13733 = vst [vmem:[#allocation87_spill] sm:$0xff] %v9885_v17  ;;  %13734 = vst [vmem:[#allocation88_spill] sm:$0xff] %v9887_v46  ;;  %v13735_v54 = vand.u32 4294901760, %v9775_v14  ;;  %8051 = vmatprep.subr.bf16.mxu0 %v9885_v17  ;;  %v1584_v58 = vand.u32 4294901760, %v9925_v10  ;;  %v1373_v17 = vld [vmem:[#allocation13 + $0x1d8] sm:$0xff]  ;;  %v9937_v4 = vsub.f32 %v9831_v26, %v1568_v31 }
 0x4b6   :  { %13745 = vst [vmem:[#allocation94_spill] sm:$0xff] %v9916_v23  ;;  %13746 = vst [vmem:[#allocation95_spill] sm:$0xff] %v9919_v29  ;;  %7477 = vmatpush1.bf16.msra.mxu1 %v9887_v46  ;;  %v9943_v46 = vsub.f32 %v9835_v42, %v3707_v25  ;;  %v9946_v29 = vsub.f32 %v9845_v45, %v3711_v19  ;;  %v1370_v23 = vld [vmem:[#allocation13 + $0x1c0] sm:$0xff]  ;;  %v9950_v41 = vsub.f32 %v9847_v47, %v1570_v6 }
 0x4b7   :  { %v9892_v15 = vsub.f32 %v9775_v14, %v13735_v54  ;;  %v13742_v14 = vand.u32 4294901760, %v9789_v36  ;;  %13749 = vst [vmem:[#allocation98_spill] sm:$0xff] %v9931_v63  ;;  %13750 = vst [vmem:[#allocation99_spill] sm:$0xff] %v9933_v21  ;;  %v9953_v26 = vsub.f32 %v9849_v44, %v1574_v52  ;;  %v9959_v42 = vsub.f32 %v9862_v30, %v3713_v13  ;;  %v1379_v52 = vld [vmem:[#allocation13 + $0x208] sm:$0xff] }
 0x4b8   :  { %13751 = vst [vmem:[#allocation100_spill] sm:$0xff] %v9937_v4  ;;  %13753 = vst [vmem:[#allocation102_spill] sm:$0xff] %v9943_v46  ;;  %7479 = vmatprep.subr.bf16.mxu1 %v9931_v63  ;;  %v9966_v31 = vpack.c.bf16 %v3721_v50, %v3717_v34  ;;  %v1588_v47 = vand.u32 4294901760, %v1375_v5  ;;  %v3727_v44 = vand.u32 4294901760, %v1377_v39  ;;  %v1586_v25 = vand.u32 4294901760, %v1370_v23  ;;  %v1381_v63 = vld [vmem:[#allocation13 + $0x218] sm:$0xff] }
 0x4b9   :  { %13736 = vst [vmem:[#allocation89_spill] sm:$0xff] %v9892_v15  ;;  %v9911_v54 = vsub.f32 %v9789_v36, %v13742_v14  ;;  %1229 = vperm.xlu0 %8876, %v9804_v28   ;;  %v9929_v36 = vpack.c.bf16 %v3713_v13, %v3709_v3  ;;  %v1578_v14 = vand.u32 4294901760, %v1362_v51  ;;  %v9940_v28 = vsub.f32 %v9833_v20, %v1572_v40 }
 0x4ba   :  { %13754 = vst [vmem:[#allocation103_spill] sm:$0xff] %v9946_v29  ;;  %13755 = vst [vmem:[#allocation104_spill] sm:$0xff] %v9950_v41  ;;  %v9956_v20 = vsub.f32 %v9860_v61, %v3709_v3  ;;  %v3723_v40 = vand.u32 4294901760, %v1373_v17  ;;  %v1376_v61 = vld [vmem:[#allocation13 + $0x1f0] sm:$0xff]  ;;  %v3725_v6 = vand.u32 4294901760, %v1372_v1  ;;  %v9969_v30 = vsub.f32 %v9875_v49, %v1576_v11 }
 0x4bb   :  { %13743 = vst [vmem:[#allocation93_spill] sm:$0xff] %v9911_v54  ;;  %13748 = vst [vmem:[#allocation97_spill] sm:$0xff] %v9929_v36  ;;  %8053 = vmatpush1.bf16.msra.mxu0 %v9929_v36  ;;  %v1374_v54 = vld [vmem:[#allocation13 + $0x1e0] sm:$0xff]  ;;  %v9964_v45 = vpack.c.bf16 %v1582_v48, %v1578_v14  ;;  %v9972_v3 = vsub.f32 %v9877_v12, %v1580_v55  ;;  %v9976_v13 = vsub.f32 %v1369_v62, %v3719_v16  ;;  %v1385_v36 = vld [vmem:[#allocation13 + $0x238] sm:$0xff] }
 0x4bc   :  { %13752 = vst [vmem:[#allocation101_spill] sm:$0xff] %v9940_v28  ;;  %13756 = vst [vmem:[#allocation105_spill] sm:$0xff] %v9953_v26  ;;  %8055 = vmatprep.subr.bf16.mxu0 %v9933_v21  ;;  %v1590_v19 = vand.u32 4294901760, %v1374_v54  ;;  %v1383_v21 = vld [vmem:[#allocation13 + $0x228] sm:$0xff]  ;;  %v9984_v49 = vsub.f32 %v1364_v8, %v3717_v34  ;;  %v9986_v11 = vsub.f32 %v1368_v43, %v3721_v50  ;;  %v1378_v12 = vld [vmem:[#allocation13 + $0x200] sm:$0xff] }
 0x4bd   :  { %13757 = vst [vmem:[#allocation106_spill] sm:$0xff] %v9956_v20  ;;  %13758 = vst [vmem:[#allocation107_spill] sm:$0xff] %v9959_v42  ;;  %1234 = vperm.xlu0 %8876, %v9816_v38   ;;  %v9974_v38 = vsub.f32 %v1365_v60, %v3715_v7  ;;  %7481 = vmatpush1.bf16.msra.mxu1 %v9964_v45  ;;  %v9979_v42 = vsub.f32 %v1362_v51, %v1578_v14  ;;  %v3729_v60 = vand.u32 4294901760, %v1376_v61  ;;  %v1380_v50 = vld [vmem:[#allocation13 + $0x210] sm:$0xff] }
 0x4be   :  { %13759 = vst [vmem:[#allocation108_spill] sm:$0xff] %v9964_v45  ;;  %13760 = vst [vmem:[#allocation109_spill] sm:$0xff] %v9966_v31  ;;  %v9981_v20 = vsub.f32 %v1366_v9, %v1582_v48  ;;  %v9989_v7 = vpack.c.bf16 %v1588_v47, %v1584_v58  ;;  %v9991_v16 = vpack.c.bf16 %v3727_v44, %v3723_v40  ;;  %v1592_v51 = vand.u32 4294901760, %v1379_v52  ;;  %v1382_v48 = vld [vmem:[#allocation13 + $0x220] sm:$0xff]  ;;  %v1387_v45 = vld [vmem:[#allocation13 + $0x248] sm:$0xff] }
 0x4bf   :  { %13761 = vst [vmem:[#allocation110_spill] sm:$0xff] %v9969_v30  ;;  %13762 = vst [vmem:[#allocation111_spill] sm:$0xff] %v9972_v3  ;;  %8057 = vmatpush1.bf16.msra.mxu0 %v9966_v31  ;;  %v9993_v62 = vpack.c.bf16 %v1590_v19, %v1586_v25  ;;  %v1596_v55 = vand.u32 4294901760, %v1383_v21  ;;  %v3731_v9 = vand.u32 4294901760, %v1381_v63  ;;  %v3735_v14 = vand.u32 4294901760, %v1385_v36  ;;  %v1384_v31 = vld [vmem:[#allocation13 + $0x230] sm:$0xff] }
 0x4c0   :  { %13763 = vst [vmem:[#allocation112_spill] sm:$0xff] %v9974_v38  ;;  %13764 = vst [vmem:[#allocation113_spill] sm:$0xff] %v9976_v13  ;;  %7483 = vmatprep.subr.bf16.mxu1 %v9989_v7  ;;  %v9997_v43 = vsub.f32 %v9925_v10, %v1584_v58  ;;  %v9999_v8 = vsub.f32 %v1375_v5, %v1588_v47  ;;  %8059 = vmatprep.subr.bf16.mxu0 %v9991_v16  ;;  %v1594_v34 = vand.u32 4294901760, %v1378_v12  ;;  %v1391_v5 = vld [vmem:[#allocation13 + $0x268] sm:$0xff] }
 0x4c1   :  { %13765 = vst [vmem:[#allocation114_spill] sm:$0xff] %v9979_v42  ;;  %13766 = vst [vmem:[#allocation115_spill] sm:$0xff] %v9981_v20  ;;  %1239 = vperm.xlu0 %8876, %v9819_v24   ;;  %v10002_v24 = vsub.f32 %v1373_v17, %v3723_v40  ;;  %7485 = vmatpush1.bf16.msra.mxu1 %v9993_v62  ;;  %v10011_v10 = vpack.c.bf16 %v3729_v60, %v3725_v6 }
 0x4c2   :  { %13767 = vst [vmem:[#allocation116_spill] sm:$0xff] %v9984_v49  ;;  %13768 = vst [vmem:[#allocation117_spill] sm:$0xff] %v9986_v11  ;;  %v10004_v11 = vsub.f32 %v1377_v39, %v3727_v44  ;;  %v10007_v49 = vsub.f32 %v1370_v23, %v1586_v25  ;;  %v10013_v58 = vsub.f32 %v1372_v1, %v3725_v6  ;;  %v1598_v39 = vand.u32 4294901760, %v1382_v48  ;;  %v1389_v25 = vld [vmem:[#allocation13 + $0x258] sm:$0xff] }
 0x4c3   :  { %13769 = vst [vmem:[#allocation118_spill] sm:$0xff] %v9989_v7  ;;  %13770 = vst [vmem:[#allocation119_spill] sm:$0xff] %v9991_v16  ;;  %v10009_v7 = vsub.f32 %v1374_v54, %v1590_v19  ;;  %v10015_v47 = vsub.f32 %v1376_v61, %v3729_v60  ;;  %v10017_v17 = vpack.c.bf16 %v1596_v55, %v1592_v51  ;;  %8061 = vmatpush1.bf16.msra.mxu0 %v10011_v10  ;;  %v1393_v6 = vld [vmem:[#allocation13 + $0x278] sm:$0xff]  ;;  %v1386_v60 = vld [vmem:[#allocation13 + $0x240] sm:$0xff] }
 0x4c4   :  { %13771 = vst [vmem:[#allocation120_spill] sm:$0xff] %v9993_v62  ;;  %13772 = vst [vmem:[#allocation121_spill] sm:$0xff] %v9997_v43  ;;  %v10019_v40 = vpack.c.bf16 %v3735_v14, %v3731_v9  ;;  %v3733_v44 = vand.u32 4294901760, %v1380_v50  ;;  %v3737_v62 = vand.u32 4294901760, %v1384_v31  ;;  %v1600_v23 = vand.u32 4294901760, %v1387_v45  ;;  %v1390_v16 = vld [vmem:[#allocation13 + $0x260] sm:$0xff] }
 0x4c5   :  { %13773 = vst [vmem:[#allocation122_spill] sm:$0xff] %v9999_v8  ;;  %13774 = vst [vmem:[#allocation123_spill] sm:$0xff] %v10002_v24  ;;  %7487 = vmatprep.subr.bf16.mxu1 %v10017_v17  ;;  %v10023_v54 = vsub.f32 %v1379_v52, %v1592_v51  ;;  %v10025_v19 = vsub.f32 %v1383_v21, %v1596_v55  ;;  %v10028_v1 = vsub.f32 %v1381_v63, %v3731_v9  ;;  %v1388_v52 = vld [vmem:[#allocation13 + $0x250] sm:$0xff] }
 0x4c6   :  { %13775 = vst [vmem:[#allocation124_spill] sm:$0xff] %v10004_v11  ;;  %13776 = vst [vmem:[#allocation125_spill] sm:$0xff] %v10007_v49  ;;  %8063 = vmatprep.subr.bf16.mxu0 %v10019_v40  ;;  %v1604_v61 = vand.u32 4294901760, %v1391_v5  ;;  %v1392_v51 = vld [vmem:[#allocation13 + $0x270] sm:$0xff]  ;;  %v10038_v21 = vpack.c.bf16 %v3737_v62, %v3733_v44  ;;  %v10040_v55 = vsub.f32 %v1380_v50, %v3733_v44  ;;  %v3741_v50 = vand.u32 4294901760, %v1388_v52  ;;  %v1401_v44 = vld [vmem:[#allocation13 + $0x2b8] sm:$0xff] }
 0x4c7   :  { %13777 = vst [vmem:[#allocation126_spill] sm:$0xff] %v10009_v7  ;;  %13778 = vst [vmem:[#allocation127_spill] sm:$0xff] %v10011_v10  ;;  %v10030_v10 = vsub.f32 %v1385_v36, %v3735_v14  ;;  %v10036_v7 = vsub.f32 %v1382_v48, %v1598_v39  ;;  %v10042_v63 = vsub.f32 %v1384_v31, %v3737_v62  ;;  %v3739_v36 = vand.u32 4294901760, %v1389_v25  ;;  %v1399_v62 = vld [vmem:[#allocation13 + $0x2a8] sm:$0xff] }
 0x4c8   :  { %13779 = vst [vmem:[#allocation128_spill] sm:$0xff] %v10013_v58  ;;  %13780 = vst [vmem:[#allocation129_spill] sm:$0xff] %v10015_v47  ;;  %v10032_v47 = vpack.c.bf16 %v1598_v39, %v1594_v34  ;;  %v10034_v58 = vsub.f32 %v1378_v12, %v1594_v34  ;;  %v10044_v9 = vpack.c.bf16 %v1604_v61, %v1600_v23  ;;  %v3743_v14 = vand.u32 4294901760, %v1393_v6  ;;  %v1395_v12 = vld [vmem:[#allocation13 + $0x288] sm:$0xff]  ;;  %v1397_v39 = vld [vmem:[#allocation13 + $0x298] sm:$0xff] }
 0x4c9   :  { %13781 = vst [vmem:[#allocation130_spill] sm:$0xff] %v10017_v17  ;;  %13782 = vst [vmem:[#allocation131_spill] sm:$0xff] %v10019_v40  ;;  %v1602_v40 = vand.u32 4294901760, %v1386_v60  ;;  %v1606_v17 = vand.u32 4294901760, %v1390_v16  ;;  %8065 = vmatpush1.bf16.msra.mxu0 %v10038_v21  ;;  %v10049_v48 = vsub.f32 %v1387_v45, %v1600_v23  ;;  %v10051_v34 = vsub.f32 %v1391_v5, %v1604_v61 }
 0x4ca   :  { %13783 = vst [vmem:[#allocation132_spill] sm:$0xff] %v10023_v54  ;;  %13784 = vst [vmem:[#allocation133_spill] sm:$0xff] %v10025_v19  ;;  %7489 = vmatpush1.bf16.msra.mxu1 %v10032_v47  ;;  %v3745_v31 = vand.u32 4294901760, %v1392_v51  ;;  %v10067_v61 = vsub.f32 %v1388_v52, %v3741_v50  ;;  %v1406_v54 = vld [vmem:[#allocation13 + $0x2e0] sm:$0xff] }
 0x4cb   :  { %13785 = vst [vmem:[#allocation134_spill] sm:$0xff] %v10028_v1  ;;  %13786 = vst [vmem:[#allocation135_spill] sm:$0xff] %v10030_v10  ;;  %7491 = vmatprep.subr.bf16.mxu1 %v10044_v9  ;;  %v10061_v45 = vsub.f32 %v1386_v60, %v1602_v40  ;;  %v10063_v5 = vsub.f32 %v1390_v16, %v1606_v17  ;;  %v1407_v10 = vld [vmem:[#allocation13 + $0x2e8] sm:$0xff]  ;;  %v1409_v60 = vld [vmem:[#allocation13 + $0x2f8] sm:$0xff]  ;;  %v3751_v16 = vand.u32 4294901760, %v1401_v44 }
 0x4cc   :  { %13787 = vst [vmem:[#allocation136_spill] sm:$0xff] %v10032_v47  ;;  %13788 = vst [vmem:[#allocation137_spill] sm:$0xff] %v10034_v58  ;;  %v10055_v47 = vsub.f32 %v1389_v25, %v3739_v36  ;;  %v1398_v58 = vld [vmem:[#allocation13 + $0x2a0] sm:$0xff]  ;;  %v10065_v23 = vpack.c.bf16 %v3745_v31, %v3741_v50  ;;  %v10071_v25 = vsub.f32 %v1392_v51, %v3745_v31 }
 0x4cd   :  { %13789 = vst [vmem:[#allocation138_spill] sm:$0xff] %v10036_v7  ;;  %13790 = vst [vmem:[#allocation139_spill] sm:$0xff] %v10038_v21  ;;  %v10059_v7 = vpack.c.bf16 %v1606_v17, %v1602_v40  ;;  %v1394_v21 = vld [vmem:[#allocation13 + $0x280] sm:$0xff]  ;;  %v1405_v40 = vld [vmem:[#allocation13 + $0x2d8] sm:$0xff]  ;;  %v1614_v52 = vand.u32 4294901760, %v1398_v58  ;;  %v10087_v19 = vsub.f32 %v1401_v44, %v3751_v16 }
 0x4ce   :  { %13791 = vst [vmem:[#allocation140_spill] sm:$0xff] %v10040_v55  ;;  %13792 = vst [vmem:[#allocation141_spill] sm:$0xff] %v10042_v63  ;;  %v10053_v63 = vpack.c.bf16 %v3743_v14, %v3739_v36  ;;  %v10057_v55 = vsub.f32 %v1393_v6, %v3743_v14  ;;  %v1608_v6 = vand.u32 4294901760, %v1395_v12  ;;  %v1612_v36 = vand.u32 4294901760, %v1399_v62 }
 0x4cf   :  { %13793 = vst [vmem:[#allocation142_spill] sm:$0xff] %v10044_v9  ;;  %13794 = vst [vmem:[#allocation143_spill] sm:$0xff] %v10049_v48  ;;  %v1396_v9 = vld [vmem:[#allocation13 + $0x290] sm:$0xff]  ;;  %v1403_v48 = vld [vmem:[#allocation13 + $0x2c8] sm:$0xff]  ;;  %7493 = vmatpush1.bf16.msra.mxu1 %v10059_v7  ;;  %v3747_v14 = vand.u32 4294901760, %v1397_v39  ;;  %v1610_v17 = vand.u32 4294901760, %v1394_v21  ;;  %v10093_v11 = vsub.f32 %v1398_v58, %v1614_v52 }
 0x4d0   :  { %13795 = vst [vmem:[#allocation144_spill] sm:$0xff] %v10051_v34  ;;  %13796 = vst [vmem:[#allocation145_spill] sm:$0xff] %v10053_v63  ;;  %v1400_v34 = vld [vmem:[#allocation13 + $0x2b0] sm:$0xff]  ;;  %8067 = vmatprep.subr.bf16.mxu0 %v10053_v63  ;;  %v3749_v50 = vand.u32 4294901760, %v1396_v9  ;;  %v1620_v63 = vand.u32 4294901760, %v1407_v10  ;;  %v3755_v31 = vand.u32 4294901760, %v1405_v40 }
 0x4d1   :  { %13797 = vst [vmem:[#allocation146_spill] sm:$0xff] %v10055_v47  ;;  %13798 = vst [vmem:[#allocation147_spill] sm:$0xff] %v10057_v55  ;;  %8069 = vmatpush1.bf16.msra.mxu0 %v10065_v23  ;;  %v1402_v55 = vld [vmem:[#allocation13 + $0x2c0] sm:$0xff]  ;;  %v10078_v51 = vpack.c.bf16 %v1614_v52, %v1610_v17  ;;  %v10081_v47 = vsub.f32 %v1395_v12, %v1608_v6  ;;  %v10085_v1 = vsub.f32 %v1397_v39, %v3747_v14  ;;  %v1404_v12 = vld [vmem:[#allocation13 + $0x2d0] sm:$0xff] }
 0x4d2   :  { %13799 = vst [vmem:[#allocation148_spill] sm:$0xff] %v10059_v7  ;;  %13800 = vst [vmem:[#allocation149_spill] sm:$0xff] %v10061_v45  ;;  %v1616_v45 = vand.u32 4294901760, %v1403_v48  ;;  %v10076_v7 = vpack.c.bf16 %v3751_v16, %v3747_v14  ;;  %v10091_v49 = vsub.f32 %v1394_v21, %v1610_v17  ;;  %v1415_v16 = vld [vmem:[#allocation13 + $0x328] sm:$0xff]  ;;  %v1417_v21 = vld [vmem:[#allocation13 + $0x338] sm:$0xff]  ;;  %v10106_v58 = vsub.f32 %v1407_v10, %v1620_v63 }
 0x4d3   :  { %13801 = vst [vmem:[#allocation150_spill] sm:$0xff] %v10063_v5  ;;  %13802 = vst [vmem:[#allocation151_spill] sm:$0xff] %v10065_v23  ;;  %v3753_v5 = vand.u32 4294901760, %v1400_v34  ;;  %v10083_v23 = vsub.f32 %v1399_v62, %v1612_v36  ;;  %v1411_v62 = vld [vmem:[#allocation13 + $0x308] sm:$0xff]  ;;  %v10110_v52 = vsub.f32 %v1405_v40, %v3755_v31  ;;  %v3767_v10 = vand.u32 4294901760, %v1417_v21 }
 0x4d4   :  { %13803 = vst [vmem:[#allocation152_spill] sm:$0xff] %v10067_v61  ;;  %13804 = vst [vmem:[#allocation153_spill] sm:$0xff] %v10071_v25  ;;  %v10074_v61 = vpack.c.bf16 %v1612_v36, %v1608_v6  ;;  %v3759_v25 = vand.u32 4294901760, %v1409_v60  ;;  %8071 = vmatprep.subr.bf16.mxu0 %v10076_v7  ;;  %v1408_v6 = vld [vmem:[#allocation13 + $0x2f0] sm:$0xff]  ;;  %v10097_v36 = vsub.f32 %v1396_v9, %v3749_v50  ;;  %v1622_v9 = vand.u32 4294901760, %v1406_v54 }
 0x4d5   :  { %13806 = vst [vmem:[#allocation155_spill] sm:$0xff] %v10076_v7  ;;  %13807 = vst [vmem:[#allocation156_spill] sm:$0xff] %v10078_v51  ;;  %v10095_v24 = vpack.c.bf16 %v3753_v5, %v3749_v50  ;;  %v10099_v39 = vsub.f32 %v1400_v34, %v3753_v5  ;;  %v10101_v44 = vpack.c.bf16 %v1620_v63, %v1616_v45  ;;  %v1624_v5 = vand.u32 4294901760, %v1411_v62  ;;  %v1410_v63 = vld [vmem:[#allocation13 + $0x300] sm:$0xff] }
 0x4d6   :  { %13805 = vst [vmem:[#allocation154_spill] sm:$0xff] %v10074_v61  ;;  %7495 = vmatprep.subr.bf16.mxu1 %v10074_v61  ;;  %v1618_v61 = vand.u32 4294901760, %v1402_v55  ;;  %13809 = vst [vmem:[#allocation158_spill] sm:$0xff] %v10097_v36  ;;  %v10103_v14 = vsub.f32 %v1403_v48, %v1616_v45  ;;  %v10108_v17 = vpack.c.bf16 %v3759_v25, %v3755_v31  ;;  %v3757_v48 = vand.u32 4294901760, %v1404_v12  ;;  %v1416_v31 = vld [vmem:[#allocation13 + $0x330] sm:$0xff]  ;;  %v1425_v36 = vld [vmem:[#allocation13 + $0x378] sm:$0xff] }
 0x4d7   :  { %7497 = vmatpush1.bf16.msra.mxu1 %v10078_v51  ;;  %13808 = vst [vmem:[#allocation157_spill] sm:$0xff] %v10095_v24  ;;  %13810 = vst [vmem:[#allocation159_spill] sm:$0xff] %v10099_v39  ;;  %v1413_v51 = vld [vmem:[#allocation13 + $0x318] sm:$0xff]  ;;  %8073 = vmatpush1.bf16.msra.mxu0 %v10095_v24  ;;  %v10112_v7 = vsub.f32 %v1409_v60, %v3759_v25  ;;  %v3761_v45 = vand.u32 4294901760, %v1408_v6  ;;  %v1628_v50 = vand.u32 4294901760, %v1415_v16  ;;  %v1423_v39 = vld [vmem:[#allocation13 + $0x368] sm:$0xff] }
 0x4d8   :  { %13811 = vst [vmem:[#allocation160_spill] sm:$0xff] %v10101_v44  ;;  %13812 = vst [vmem:[#allocation161_spill] sm:$0xff] %v10103_v14  ;;  %7499 = vmatprep.subr.bf16.mxu1 %v10101_v44  ;;  %v10115_v34 = vsub.f32 %v1402_v55, %v1618_v61  ;;  %8075 = vmatprep.subr.bf16.mxu0 %v10108_v17  ;;  %v3763_v24 = vand.u32 4294901760, %v1413_v51  ;;  %v10118_v14 = vpack.c.bf16 %v1622_v9, %v1618_v61  ;;  %v1412_v55 = vld [vmem:[#allocation13 + $0x310] sm:$0xff]  ;;  %v1419_v44 = vld [vmem:[#allocation13 + $0x348] sm:$0xff] }
 0x4d9   :  { %13813 = vst [vmem:[#allocation162_spill] sm:$0xff] %v10106_v58  ;;  %13814 = vst [vmem:[#allocation163_spill] sm:$0xff] %v10108_v17  ;;  %v1414_v58 = vld [vmem:[#allocation13 + $0x320] sm:$0xff]  ;;  %v10120_v40 = vsub.f32 %v1406_v54, %v1622_v9  ;;  %v10122_v25 = vpack.c.bf16 %v3761_v45, %v3757_v48  ;;  %v10124_v60 = vsub.f32 %v1404_v12, %v3757_v48  ;;  %v1421_v61 = vld [vmem:[#allocation13 + $0x358] sm:$0xff]  ;;  %v3765_v48 = vand.u32 4294901760, %v1412_v55 }
 0x4da   :  { %13815 = vst [vmem:[#allocation164_spill] sm:$0xff] %v10110_v52  ;;  %13816 = vst [vmem:[#allocation165_spill] sm:$0xff] %v10112_v7  ;;  %v10128_v17 = vpack.c.bf16 %v1628_v50, %v1624_v5  ;;  %v10130_v7 = vsub.f32 %v1411_v62, %v1624_v5  ;;  %v10132_v52 = vsub.f32 %v1415_v16, %v1628_v50  ;;  %v1630_v62 = vand.u32 4294901760, %v1414_v58 }
 0x4db   :  { %13817 = vst [vmem:[#allocation166_spill] sm:$0xff] %v10115_v34  ;;  %13818 = vst [vmem:[#allocation167_spill] sm:$0xff] %v10118_v14  ;;  %v10126_v34 = vsub.f32 %v1408_v6, %v3761_v45  ;;  %7501 = vmatpush1.bf16.msra.mxu1 %v10118_v14  ;;  %8077 = vmatpush1.bf16.msra.mxu0 %v10122_v25  ;;  %v10136_v54 = vpack.c.bf16 %v3767_v10, %v3763_v24  ;;  %v1626_v6 = vand.u32 4294901760, %v1410_v63 }
 0x4dc   :  { %13819 = vst [vmem:[#allocation168_spill] sm:$0xff] %v10120_v40  ;;  %13820 = vst [vmem:[#allocation169_spill] sm:$0xff] %v10122_v25  ;;  %v10138_v12 = vsub.f32 %v1413_v51, %v3763_v24  ;;  %v10140_v9 = vsub.f32 %v1417_v21, %v3767_v10  ;;  %7503 = vmatprep.subr.bf16.mxu1 %v10128_v17  ;;  %v3769_v16 = vand.u32 4294901760, %v1416_v31  ;;  %v1632_v45 = vand.u32 4294901760, %v1419_v44  ;;  %v1433_v40 = vld [vmem:[#allocation13 + $0x3b8] sm:$0xff] }
 0x4dd   :  { %13821 = vst [vmem:[#allocation170_spill] sm:$0xff] %v10124_v60  ;;  %13822 = vst [vmem:[#allocation171_spill] sm:$0xff] %v10126_v34  ;;  %8079 = vmatprep.subr.bf16.mxu0 %v10136_v54  ;;  %v10144_v5 = vsub.f32 %v1410_v63, %v1626_v6  ;;  %v1636_v50 = vand.u32 4294901760, %v1423_v39  ;;  %v3771_v14 = vand.u32 4294901760, %v1421_v61  ;;  %v3775_v25 = vand.u32 4294901760, %v1425_v36  ;;  %v1431_v60 = vld [vmem:[#allocation13 + $0x3a8] sm:$0xff] }
 0x4de   :  { %13823 = vst [vmem:[#allocation172_spill] sm:$0xff] %v10128_v17  ;;  %13824 = vst [vmem:[#allocation173_spill] sm:$0xff] %v10130_v7  ;;  %v1422_v7 = vld [vmem:[#allocation13 + $0x360] sm:$0xff]  ;;  %v10146_v24 = vpack.c.bf16 %v1630_v62, %v1626_v6  ;;  %v10148_v51 = vsub.f32 %v1414_v58, %v1630_v62  ;;  %v10150_v21 = vpack.c.bf16 %v3769_v16, %v3765_v48  ;;  %v1420_v17 = vld [vmem:[#allocation13 + $0x350] sm:$0xff] }
 0x4df   :  { %13825 = vst [vmem:[#allocation174_spill] sm:$0xff] %v10132_v52  ;;  %13826 = vst [vmem:[#allocation175_spill] sm:$0xff] %v10136_v54  ;;  %v1418_v52 = vld [vmem:[#allocation13 + $0x340] sm:$0xff]  ;;  %v10152_v10 = vsub.f32 %v1412_v55, %v3765_v48  ;;  %v10154_v34 = vsub.f32 %v1416_v31, %v3769_v16  ;;  %v10156_v63 = vpack.c.bf16 %v1636_v50, %v1632_v45  ;;  %v1429_v6 = vld [vmem:[#allocation13 + $0x398] sm:$0xff]  ;;  %v3773_v48 = vand.u32 4294901760, %v1420_v17 }
 0x4e0   :  { %13827 = vst [vmem:[#allocation176_spill] sm:$0xff] %v10138_v12  ;;  %13828 = vst [vmem:[#allocation177_spill] sm:$0xff] %v10140_v9  ;;  %v1424_v9 = vld [vmem:[#allocation13 + $0x370] sm:$0xff]  ;;  %v1427_v12 = vld [vmem:[#allocation13 + $0x388] sm:$0xff]  ;;  %v10158_v54 = vsub.f32 %v1419_v44, %v1632_v45  ;;  %7505 = vmatpush1.bf16.msra.mxu1 %v10146_v24  ;;  %8081 = vmatpush1.bf16.msra.mxu0 %v10150_v21  ;;  %v10164_v58 = vpack.c.bf16 %v3775_v25, %v3771_v14  ;;  %v1634_v31 = vand.u32 4294901760, %v1418_v52 }
 0x4e1   :  { %13829 = vst [vmem:[#allocation178_spill] sm:$0xff] %v10144_v5  ;;  %13830 = vst [vmem:[#allocation179_spill] sm:$0xff] %v10146_v24  ;;  %v10160_v5 = vsub.f32 %v1423_v39, %v1636_v50  ;;  %v10166_v55 = vsub.f32 %v1421_v61, %v3771_v14  ;;  %v10168_v62 = vsub.f32 %v1425_v36, %v3775_v25  ;;  %7507 = vmatprep.subr.bf16.mxu1 %v10156_v63 }
 0x4e2   :  { %13831 = vst [vmem:[#allocation180_spill] sm:$0xff] %v10148_v51  ;;  %13832 = vst [vmem:[#allocation181_spill] sm:$0xff] %v10150_v21  ;;  %v1638_v44 = vand.u32 4294901760, %v1422_v7  ;;  %v3777_v39 = vand.u32 4294901760, %v1424_v9  ;;  %v1640_v16 = vand.u32 4294901760, %v1427_v12  ;;  %8083 = vmatprep.subr.bf16.mxu0 %v10164_v58  ;;  %v10172_v45 = vsub.f32 %v1418_v52, %v1634_v31  ;;  %v1441_v51 = vld [vmem:[#allocation13 + $0x3f8] sm:$0xff] }
 0x4e3   :  { %13833 = vst [vmem:[#allocation182_spill] sm:$0xff] %v10152_v10  ;;  %13834 = vst [vmem:[#allocation183_spill] sm:$0xff] %v10154_v34  ;;  %v1644_v50 = vand.u32 4294901760, %v1431_v60  ;;  %v3779_v24 = vand.u32 4294901760, %v1429_v6  ;;  %v3783_v21 = vand.u32 4294901760, %v1433_v40  ;;  %v10180_v61 = vsub.f32 %v1420_v17, %v3773_v48  ;;  %v1439_v10 = vld [vmem:[#allocation13 + $0x3e8] sm:$0xff] }
 0x4e4   :  { %13835 = vst [vmem:[#allocation184_spill] sm:$0xff] %v10156_v63  ;;  %13836 = vst [vmem:[#allocation185_spill] sm:$0xff] %v10158_v54  ;;  %v1430_v54 = vld [vmem:[#allocation13 + $0x3a0] sm:$0xff]  ;;  %v10174_v14 = vpack.c.bf16 %v1638_v44, %v1634_v31  ;;  %v10176_v36 = vsub.f32 %v1422_v7, %v1638_v44  ;;  %v10178_v25 = vpack.c.bf16 %v3777_v39, %v3773_v48  ;;  %v1428_v63 = vld [vmem:[#allocation13 + $0x390] sm:$0xff] }
 0x4e5   :  { %13837 = vst [vmem:[#allocation186_spill] sm:$0xff] %v10160_v5  ;;  %13838 = vst [vmem:[#allocation187_spill] sm:$0xff] %v10164_v58  ;;  %v1426_v5 = vld [vmem:[#allocation13 + $0x380] sm:$0xff]  ;;  %v10182_v34 = vsub.f32 %v1424_v9, %v3777_v39  ;;  %v10184_v52 = vpack.c.bf16 %v1644_v50, %v1640_v16  ;;  %v10186_v58 = vsub.f32 %v1427_v12, %v1640_v16  ;;  %v1437_v31 = vld [vmem:[#allocation13 + $0x3d8] sm:$0xff]  ;;  %v1646_v12 = vand.u32 4294901760, %v1430_v54 }
 0x4e6   :  { %13839 = vst [vmem:[#allocation188_spill] sm:$0xff] %v10166_v55  ;;  %13840 = vst [vmem:[#allocation189_spill] sm:$0xff] %v10168_v62  ;;  %v1432_v62 = vld [vmem:[#allocation13 + $0x3b0] sm:$0xff]  ;;  %v1435_v55 = vld [vmem:[#allocation13 + $0x3c8] sm:$0xff]  ;;  %7509 = vmatpush1.bf16.msra.mxu1 %v10174_v14  ;;  %8085 = vmatpush1.bf16.msra.mxu0 %v10178_v25  ;;  %v10192_v7 = vpack.c.bf16 %v3783_v21, %v3779_v24  ;;  %v10194_v17 = vsub.f32 %v1429_v6, %v3779_v24  ;;  %v1642_v9 = vand.u32 4294901760, %v1426_v5 }
 0x4e7   :  { %13841 = vst [vmem:[#allocation190_spill] sm:$0xff] %v10172_v45  ;;  %13842 = vst [vmem:[#allocation191_spill] sm:$0xff] %v10174_v14  ;;  %v10188_v45 = vsub.f32 %v1431_v60, %v1644_v50  ;;  %v10196_v44 = vsub.f32 %v1433_v40, %v3783_v21  ;;  %7511 = vmatprep.subr.bf16.mxu1 %v10184_v52  ;;  %v3781_v48 = vand.u32 4294901760, %v1428_v63  ;;  %v3785_v60 = vand.u32 4294901760, %v1432_v62  ;;  %v1438_v6 = vld [vmem:[#allocation13 + $0x3e0] sm:$0xff] }
 0x4e8   :  { %13843 = vst [vmem:[#allocation192_spill] sm:$0xff] %v10178_v25  ;;  %13844 = vst [vmem:[#allocation193_spill] sm:$0xff] %v10180_v61  ;;  %v1648_v39 = vand.u32 4294901760, %v1435_v55  ;;  %8087 = vmatprep.subr.bf16.mxu0 %v10192_v7  ;;  %v10200_v16 = vsub.f32 %v1426_v5, %v1642_v9  ;;  %v1652_v50 = vand.u32 4294901760, %v1439_v10  ;;  %v3787_v14 = vand.u32 4294901760, %v1437_v31 }
 0x4e9   :  { %13845 = vst [vmem:[#allocation194_spill] sm:$0xff] %v10182_v34  ;;  %13846 = vst [vmem:[#allocation195_spill] sm:$0xff] %v10184_v52  ;;  %v3791_v25 = vand.u32 4294901760, %v1441_v51  ;;  %v10204_v24 = vsub.f32 %v1430_v54, %v1646_v12  ;;  %v10206_v40 = vpack.c.bf16 %v3785_v60, %v3781_v48  ;;  %v10208_v21 = vsub.f32 %v1428_v63, %v3781_v48  ;;  %v1436_v52 = vld [vmem:[#allocation13 + $0x3d0] sm:$0xff] }
 0x4ea   :  { %13847 = vst [vmem:[#allocation196_spill] sm:$0xff] %v10186_v58  ;;  %13848 = vst [vmem:[#allocation197_spill] sm:$0xff] %v10188_v45  ;;  %v1434_v45 = vld [vmem:[#allocation13 + $0x3c0] sm:$0xff]  ;;  %v10202_v58 = vpack.c.bf16 %v1646_v12, %v1642_v9  ;;  %v10214_v5 = vsub.f32 %v1435_v55, %v1648_v39  ;;  %v10222_v9 = vsub.f32 %v1437_v31, %v3787_v14  ;;  %v3789_v48 = vand.u32 4294901760, %v1436_v52 }
 0x4eb   :  { %13849 = vst [vmem:[#allocation198_spill] sm:$0xff] %v10192_v7  ;;  %13850 = vst [vmem:[#allocation199_spill] sm:$0xff] %v10194_v17  ;;  %v10210_v17 = vsub.f32 %v1432_v62, %v3785_v60  ;;  %v10212_v7 = vpack.c.bf16 %v1652_v50, %v1648_v39  ;;  %8089 = vmatpush1.bf16.msra.mxu0 %v10206_v40  ;;  %v10220_v54 = vpack.c.bf16 %v3791_v25, %v3787_v14 }
 0x4ec   :  { %13851 = vst [vmem:[#allocation200_spill] sm:$0xff] %v10196_v44  ;;  %13852 = vst [vmem:[#allocation201_spill] sm:$0xff] %v10200_v16  ;;  %v1440_v44 = vld [vmem:[#allocation13 + $0x3f0] sm:$0xff]  ;;  %v10216_v16 = vsub.f32 %v1439_v10, %v1652_v50  ;;  %7513 = vmatpush1.bf16.msra.mxu1 %v10202_v58  ;;  %v10224_v63 = vsub.f32 %v1441_v51, %v3791_v25  ;;  %v1650_v12 = vand.u32 4294901760, %v1434_v45  ;;  %v1654_v62 = vand.u32 4294901760, %v1438_v6 }
 0x4ed   :  { %13853 = vst [vmem:[#allocation202_spill] sm:$0xff] %v10202_v58  ;;  %13854 = vst [vmem:[#allocation203_spill] sm:$0xff] %v10204_v24  ;;  %7515 = vmatprep.subr.bf16.mxu1 %v10212_v7  ;;  %v3793_v60 = vand.u32 4294901760, %v1440_v44  ;;  %v13193_v55 = vand.u32 4294901760, %v9671_v0  ;;  %8091 = vmatprep.subr.bf16.mxu0 %v10220_v54  ;;  %v13192_v39 = vand.u32 4294901760, %v9673_v59  ;;  %v13870_v14 = vand.u32 4294901760, %v9675_v2 }
 0x4ee   :  { %13855 = vst [vmem:[#allocation204_spill] sm:$0xff] %v10206_v40  ;;  %13856 = vst [vmem:[#allocation205_spill] sm:$0xff] %v10208_v21  ;;  %v10229_v10 = vsub.f32 %v1434_v45, %v1650_v12  ;;  %v10234_v51 = vpack.c.bf16 %v1654_v62, %v1650_v12  ;;  %v10236_v25 = vsub.f32 %v1438_v6, %v1654_v62  ;;  %v138_v6 = vld [vmem:[%s12960_s0] sm:$0xff] }
 0x4ef   :  { %13857 = vst [vmem:[#allocation206_spill] sm:$0xff] %v10210_v17  ;;  %13858 = vst [vmem:[#allocation207_spill] sm:$0xff] %v10212_v7  ;;  %v10238_v31 = vpack.c.bf16 %v3793_v60, %v3789_v48  ;;  %v10240_v7 = vsub.f32 %v1436_v52, %v3789_v48  ;;  %v10242_v40 = vsub.f32 %v1440_v44, %v3793_v60  ;;  %v13871_v52 = vand.u32 4294901760, %v9679_v32 }
 0x4f0   :  { %13859 = vst [vmem:[#allocation208_spill] sm:$0xff] %v10214_v5  ;;  %13860 = vst [vmem:[#allocation209_spill] sm:$0xff] %v10216_v16  ;;  %v1676_v45 = vsub.f32 %v9671_v0, %v13193_v55  ;;  %v1688_v50 = vsub.f32 %v9673_v59, %v13192_v39  ;;  %v3815_v12 = vsub.f32 %v9675_v2, %v13870_v14  ;;  %7517 = vmatpush1.bf16.msra.mxu1 %v10234_v51  ;;  %v13886_v2 = vld [vmem:[#allocation60_spill] sm:$0xff]  ;;  %v13887_v59 = vld [vmem:[#allocation62_spill] sm:$0xff] }
 0x4f1   :  { %13861 = vst [vmem:[#allocation210_spill] sm:$0xff] %v10220_v54  ;;  %13862 = vst [vmem:[#allocation211_spill] sm:$0xff] %v10222_v9  ;;  %8093 = vmatpush1.bf16.msra.mxu0 %v10238_v31  ;;  %v3827_v44 = vsub.f32 %v9679_v32, %v13871_v52  ;;  %v10261_v54 = vand.u32 4294901760, %v138_v6  ;;  %v13208_v52 = vand.u32 4294901760, %v9692_v53 }
 0x4f2   :  { %13863 = vst [vmem:[#allocation212_spill] sm:$0xff] %v10224_v63  ;;  %13864 = vst [vmem:[#allocation213_spill] sm:$0xff] %v10229_v10  ;;  %v1677_v62 = vand.u32 4294901760, %v1676_v45  ;;  %v1689_v48 = vand.u32 4294901760, %v1688_v50  ;;  %v3816_v60 = vand.u32 4294901760, %v3815_v12  ;;  %v13213_v12 = vand.u32 4294901760, %v9694_v56 }
 0x4f3   :  { %13865 = vst [vmem:[#allocation214_spill] sm:$0xff] %v10234_v51  ;;  %13866 = vst [vmem:[#allocation215_spill] sm:$0xff] %v10236_v25  ;;  %v3828_v39 = vand.u32 4294901760, %v3827_v44  ;;  %v13202_v51 = vand.u32 4294901760, %v9686_v37  ;;  %v10267_v58 = vsub.f32 %v138_v6, %v10261_v54  ;;  %v13877_v6 = vand.u32 4294901760, %v9696_v57  ;;  %v13890_v25 = vld [vmem:[#allocation66_spill] sm:$0xff] }
 0x4f4   :  { %13867 = vst [vmem:[#allocation216_spill] sm:$0xff] %v10238_v31  ;;  %13868 = vst [vmem:[#allocation217_spill] sm:$0xff] %v10240_v7  ;;  %v7518_v55 = vpack.c.bf16 %v1689_v48, %v1677_v62  ;;  %v13203_v31 = vand.u32 4294901760, %v9683_v35  ;;  %v3833_v44 = vsub.f32 %v9694_v56, %v13213_v12  ;;  %v13878_v48 = vand.u32 4294901760, %v9700_v22 }
 0x4f5   :  { %13869 = vst [vmem:[#allocation218_spill] sm:$0xff] %v10242_v40  ;;  %13872 = vst [vmem:[#allocation219_spill] sm:$0xff] %v10261_v54  ;;  %v8094_v14 = vpack.c.bf16 %v3828_v39, %v3816_v60  ;;  %v1694_v45 = vsub.f32 %v9686_v37, %v13202_v51  ;;  %v10279_v39 = vand.u32 4294901760, %v10267_v58  ;;  %v13875_v60 = vld [vmem:[#allocation52_spill] sm:$0xff]  ;;  %v13876_v51 = vld [vmem:[#allocation54_spill] sm:$0xff]  ;;  %v1700_v62 = vsub.f32 %v9696_v57, %v13877_v6 }
 0x4f6   :  { %7519 = vmatprep.subr.bf16.mxu1 %v7518_v55  ;;  %13873 = vst [vmem:[#allocation220_spill] sm:$0xff] %v10267_v58  ;;  %v1682_v50 = vsub.f32 %v9683_v35, %v13203_v31  ;;  %v3821_v55 = vsub.f32 %v9692_v53, %v13208_v52  ;;  %v13879_v31 = vand.u32 4294901760, %v9704_v27  ;;  %v13883_v6 = vand.u32 4294901760, %v13876_v51  ;;  %v13884_v35 = vld [vmem:[#allocation57_spill] sm:$0xff] }
 0x4f7   :  { %8095 = vmatprep.subr.bf16.mxu0 %v8094_v14  ;;  %13874 = vst [vmem:[#allocation221_spill] sm:$0xff] %v10279_v39  ;;  %v1695_v37 = vand.u32 4294901760, %v1694_v45  ;;  %v1665_v53 = vsub.f32 %v10267_v58, %v10279_v39  ;;  %v1712_v14 = vsub.f32 %v9700_v22, %v13878_v48  ;;  %v13880_v45 = vand.u32 4294901760, %v9707_v33  ;;  %v13882_v58 = vld [vmem:[#allocation55_spill] sm:$0xff]  ;;  %v13889_v40 = vld [vmem:[#allocation65_spill] sm:$0xff] }
 0x4f8   :  { %v1683_v54 = vand.u32 4294901760, %v1682_v50  ;;  %v3822_v52 = vand.u32 4294901760, %v3821_v55  ;;  %v3839_v50 = vsub.f32 %v9704_v27, %v13879_v31  ;;  %v13881_v39 = vand.u32 4294901760, %v13875_v60  ;;  %v13885_v22 = vld [vmem:[#allocation59_spill] sm:$0xff] }
 0x4f9   :  { %v3851_v55 = vsub.f32 %v9707_v33, %v13880_v45  ;;  %v1718_v57 = vsub.f32 %v13876_v51, %v13883_v6  ;;  %v13888_v33 = vld [vmem:[#allocation63_spill] sm:$0xff]  ;;  %v1701_v56 = vand.u32 4294901760, %v1700_v62  ;;  %v1713_v7 = vand.u32 4294901760, %v1712_v14 }
 0x4fa   :  { %v1706_v12 = vsub.f32 %v13875_v60, %v13881_v39  ;;  %v10315_v27 = vpack.c.bf16 %v1695_v37, %v1683_v54  ;;  %v13249_v39 = vand.u32 4294901760, %v13889_v40  ;;  %v3834_v60 = vand.u32 4294901760, %v3833_v44 }
 0x4fb   :  { %v3840_v6 = vand.u32 4294901760, %v3839_v50  ;;  %v3852_v51 = vand.u32 4294901760, %v3851_v55  ;;  %v13891_v32 = vand.u32 4294901760, %v13882_v58  ;;  %v1719_v37 = vand.u32 4294901760, %v1718_v57 }
 0x4fc   :  { %v1707_v48 = vand.u32 4294901760, %v1706_v12  ;;  %v13892_v54 = vand.u32 4294901760, %v13884_v35  ;;  %v13893_v0 = vand.u32 4294901760, %v13885_v22  ;;  %v13894_v62 = vand.u32 4294901760, %v13886_v2 }
 0x4fd   :  { %v3845_v31 = vsub.f32 %v13882_v58, %v13891_v32  ;;  %v10333_v50 = vand.u32 4294901760, %v1665_v53  ;;  %v13895_v12 = vand.u32 4294901760, %v13887_v59  ;;  %v13896_v32 = vand.u32 4294901760, %v13888_v33  ;;  %v13898_v53 = vld [vmem:[#allocation68_spill] sm:$0xff] }
 0x4fe   :  { %v3857_v45 = vsub.f32 %v13884_v35, %v13892_v54  ;;  %v1724_v44 = vsub.f32 %v13885_v22, %v13893_v0  ;;  %v1736_v14 = vsub.f32 %v13886_v2, %v13894_v62  ;;  %v1730_v54 = vsub.f32 %v13889_v40, %v13249_v39  ;;  %v13899_v22 = vld [vmem:[#allocation69_spill] sm:$0xff] }
 0x4ff   :  { %v3863_v55 = vsub.f32 %v13887_v59, %v13895_v12  ;;  %v3875_v57 = vsub.f32 %v13888_v33, %v13896_v32  ;;  %v10344_v10 = vpack.c.bf16 %v3834_v60, %v3822_v52  ;;  %v13897_v0 = vand.u32 4294901760, %v13890_v25  ;;  %v13900_v32 = vld [vmem:[#allocation77_spill] sm:$0xff] }
 0x500   :  { %v10351_v58 = vpack.c.bf16 %v1713_v7, %v1701_v56  ;;  %v10353_v12 = vpack.c.bf16 %v3852_v51, %v3840_v6  ;;  %v3846_v59 = vand.u32 4294901760, %v3845_v31  ;;  %v13256_v33 = vand.u32 4294901760, %v13900_v32  ;;  %v13904_v31 = vld [vmem:[#allocation79_spill] sm:$0xff]  ;;  %v13905_v6 = vld [vmem:[#allocation80_spill] sm:$0xff] }
 0x501   :  { %v1742_v62 = vsub.f32 %v13890_v25, %v13897_v0  ;;  %v10356_v63 = vpack.c.bf16 %v1719_v37, %v1707_v48  ;;  %v3858_v39 = vand.u32 4294901760, %v3857_v45  ;;  %v1725_v52 = vand.u32 4294901760, %v1724_v44  ;;  %v13901_v0 = vld [vmem:[#allocation78_spill] sm:$0xff]  ;;  %v13906_v44 = vld [vmem:[#allocation81_spill] sm:$0xff]  ;;  %v13909_v25 = vld [vmem:[#allocation84_spill] sm:$0xff] }
 0x502   :  { %v1737_v60 = vand.u32 4294901760, %v1736_v14  ;;  %v3864_v40 = vand.u32 4294901760, %v3863_v55  ;;  %v3876_v9 = vand.u32 4294901760, %v3875_v57  ;;  %v1731_v16 = vand.u32 4294901760, %v1730_v54  ;;  %v13907_v55 = vld [vmem:[#allocation82_spill] sm:$0xff] }
 0x503   :  { %v1743_v2 = vand.u32 4294901760, %v1742_v62  ;;  %v13902_v35 = vand.u32 4294901760, %v13898_v53  ;;  %v13903_v7 = vand.u32 4294901760, %v13899_v22  ;;  %v1748_v45 = vsub.f32 %v13900_v32, %v13256_v33  ;;  %v13908_v62 = vld [vmem:[#allocation83_spill] sm:$0xff] }
 0x504   :  { %v10372_v54 = vpack.c.bf16 %v3858_v39, %v3846_v59  ;;  %v10379_v48 = vpack.c.bf16 %v3876_v9, %v3864_v40  ;;  %v13911_v33 = vand.u32 4294901760, %v13901_v0  ;;  %v13915_v9 = vand.u32 4294901760, %v13906_v44 }
 0x505   :  { %v3869_v56 = vsub.f32 %v13898_v53, %v13902_v35  ;;  %v3881_v51 = vsub.f32 %v13899_v22, %v13903_v7  ;;  %v13268_v7 = vand.u32 4294901760, %v9892_v15  ;;  %v10377_v22 = vpack.c.bf16 %v1737_v60, %v1725_v52 }
 0x506   :  { %13910 = vst [vmem:[#allocation222_spill] sm:$0xff] %v10379_v48  ;;  %v1760_v37 = vsub.f32 %v13901_v0, %v13911_v33  ;;  %v10385_v32 = vpack.c.bf16 %v1743_v2, %v1731_v16  ;;  %v13913_v35 = vand.u32 4294901760, %v13904_v31  ;;  %v1749_v57 = vand.u32 4294901760, %v1748_v45 }
 0x507   :  { %v3870_v59 = vand.u32 4294901760, %v3869_v56  ;;  %v3882_v39 = vand.u32 4294901760, %v3881_v51  ;;  %v13914_v52 = vand.u32 4294901760, %v13905_v6  ;;  %v1754_v60 = vsub.f32 %v13906_v44, %v13915_v9 }
 0x508   :  { %13912 = vst [vmem:[#allocation223_spill] sm:$0xff] %v10385_v32  ;;  %v3887_v53 = vsub.f32 %v13904_v31, %v13913_v35  ;;  %v13916_v33 = vand.u32 4294901760, %v13907_v55  ;;  %v13917_v16 = vand.u32 4294901760, %v13908_v62  ;;  %v13918_v51 = vand.u32 4294901760, %v13909_v25  ;;  %v13922_v31 = vld [vmem:[#allocation93_spill] sm:$0xff]  ;;  %v13924_v32 = vld [vmem:[#allocation95_spill] sm:$0xff] }
 0x509   :  { %v3899_v40 = vsub.f32 %v13905_v6, %v13914_v52  ;;  %v1772_v35 = vsub.f32 %v9892_v15, %v13268_v7  ;;  %v13919_v52 = vld [vmem:[#allocation91_spill] sm:$0xff]  ;;  %v1761_v6 = vand.u32 4294901760, %v1760_v37  ;;  %v13920_v9 = vand.u32 4294901760, %v9897_v18 }
 0x50a   :  { %v1766_v2 = vsub.f32 %v13907_v55, %v13916_v33  ;;  %v3893_v56 = vsub.f32 %v13908_v62, %v13917_v16  ;;  %v3905_v45 = vsub.f32 %v13909_v25, %v13918_v51  ;;  %v13921_v33 = vld [vmem:[#allocation92_spill] sm:$0xff]  ;;  %v3888_v16 = vand.u32 4294901760, %v3887_v53  ;;  %v13923_v62 = vld [vmem:[#allocation94_spill] sm:$0xff] }
 0x50b   :  { %v1784_v44 = vsub.f32 %v9897_v18, %v13920_v9  ;;  %v13925_v25 = vld [vmem:[#allocation96_spill] sm:$0xff]  ;;  %v3900_v21 = vand.u32 4294901760, %v3899_v40  ;;  %v1755_v7 = vand.u32 4294901760, %v1754_v60  ;;  %v1773_v48 = vand.u32 4294901760, %v1772_v35  ;;  %v13968_v18 = vld [vmem:[#allocation135_spill] sm:$0xff] }
 0x50c   :  { %v13274_v17 = vand.u32 4294901760, %v13925_v25  ;;  %v1767_v15 = vand.u32 4294901760, %v1766_v2  ;;  %v3894_v14 = vand.u32 4294901760, %v3893_v56  ;;  %v3906_v24 = vand.u32 4294901760, %v3905_v45 }
 0x50d   :  { %v13926_v9 = vand.u32 4294901760, %v13919_v52  ;;  %v1785_v0 = vand.u32 4294901760, %v1784_v44  ;;  %v13927_v53 = vand.u32 4294901760, %v13921_v33  ;;  %v13928_v51 = vand.u32 4294901760, %v13922_v31 }
 0x50e   :  { %v10428_v2 = vpack.c.bf16 %v3882_v39, %v3870_v59  ;;  %v13929_v56 = vand.u32 4294901760, %v13923_v62  ;;  %v13930_v35 = vand.u32 4294901760, %v13924_v32  ;;  %v10441_v37 = vpack.c.bf16 %v3900_v21, %v3888_v16 }
 0x50f   :  { %v3911_v55 = vsub.f32 %v13919_v52, %v13926_v9  ;;  %v3923_v5 = vsub.f32 %v13921_v33, %v13927_v53  ;;  %v1778_v40 = vsub.f32 %v13922_v31, %v13928_v51  ;;  %v3929_v9 = vsub.f32 %v13925_v25, %v13274_v17  ;;  %v144_v52 = vld [vmem:[#allocation9 + $0x18] sm:$0xff] }
 0x510   :  { %v1790_v45 = vsub.f32 %v13923_v62, %v13929_v56  ;;  %v3917_v44 = vsub.f32 %v13924_v32, %v13930_v35  ;;  %v10439_v53 = vpack.c.bf16 %v1761_v6, %v1749_v57  ;;  %v13931_v51 = vand.u32 4294901760, %v9937_v4 }
 0x511   :  { %v10447_v60 = vpack.c.bf16 %v1767_v15, %v1755_v7  ;;  %v10449_v56 = vpack.c.bf16 %v3906_v24, %v3894_v14  ;;  %v3912_v62 = vand.u32 4294901760, %v3911_v55  ;;  %v13276_v35 = vand.u32 4294901760, %v9946_v29  ;;  %v13935_v7 = vld [vmem:[#allocation107_spill] sm:$0xff] }
 0x512   :  { %v1796_v59 = vsub.f32 %v9937_v4, %v13931_v51  ;;  %v10452_v32 = vpack.c.bf16 %v1785_v0, %v1773_v48  ;;  %v3924_v17 = vand.u32 4294901760, %v3923_v5  ;;  %v1779_v6 = vand.u32 4294901760, %v1778_v40  ;;  %v13934_v0 = vld [vmem:[#allocation106_spill] sm:$0xff] }
 0x513   :  { %v13932_v21 = vand.u32 4294901760, %v9940_v28  ;;  %v1791_v16 = vand.u32 4294901760, %v1790_v45  ;;  %v3918_v25 = vand.u32 4294901760, %v3917_v44  ;;  %v3930_v51 = vand.u32 4294901760, %v3929_v9 }
 0x514   :  { %v13277_v39 = vand.u32 4294901760, %v9950_v41  ;;  %v1797_v15 = vand.u32 4294901760, %v1796_v59  ;;  %v13933_v24 = vand.u32 4294901760, %v9943_v46  ;;  %v3947_v5 = vsub.f32 %v9946_v29, %v13276_v35 }
 0x515   :  { %v1808_v57 = vsub.f32 %v9940_v28, %v13932_v21  ;;  %v10472_v55 = vpack.c.bf16 %v3924_v17, %v3912_v62  ;;  %v10474_v48 = vpack.c.bf16 %v1791_v16, %v1779_v6  ;;  %v10480_v45 = vpack.c.bf16 %v3930_v51, %v3918_v25 }
 0x516   :  { %v3935_v14 = vsub.f32 %v9943_v46, %v13933_v24  ;;  %v1802_v35 = vsub.f32 %v9950_v41, %v13277_v39  ;;  %v13937_v21 = vand.u32 4294901760, %v13934_v0  ;;  %v3948_v62 = vand.u32 4294901760, %v3947_v5 }
 0x517   :  { %v1809_v9 = vand.u32 4294901760, %v1808_v57  ;;  %v13936_v57 = vand.u32 4294901760, %v9953_v26  ;;  %v13938_v6 = vand.u32 4294901760, %v13935_v7  ;;  %v13939_v39 = vand.u32 4294901760, %v9969_v30 }
 0x518   :  { %v3936_v44 = vand.u32 4294901760, %v3935_v14  ;;  %v3941_v17 = vsub.f32 %v13934_v0, %v13937_v21  ;;  %v13940_v25 = vand.u32 4294901760, %v9972_v3  ;;  %v13942_v5 = vand.u32 4294901760, %v9976_v13 }
 0x519   :  { %v1814_v59 = vsub.f32 %v9953_v26, %v13936_v57  ;;  %v3953_v16 = vsub.f32 %v13935_v7, %v13938_v6  ;;  %v1820_v40 = vsub.f32 %v9969_v30, %v13939_v39  ;;  %v10497_v14 = vpack.c.bf16 %v1809_v9, %v1797_v15  ;;  %v13946_v9 = vld [vmem:[#allocation117_spill] sm:$0xff]  ;;  %v141_v26 = vld [vmem:[#allocation9] sm:$0xff] }
 0x51a   :  { %v1832_v51 = vsub.f32 %v9972_v3, %v13940_v25  ;;  %v13941_v57 = vand.u32 4294901760, %v9974_v38  ;;  %v3971_v21 = vsub.f32 %v9976_v13, %v13942_v5  ;;  %v13943_v6 = vand.u32 4294901760, %v9979_v42  ;;  %v13945_v25 = vld [vmem:[#allocation116_spill] sm:$0xff] }
 0x51b   :  { %v1803_v0 = vand.u32 4294901760, %v1802_v35  ;;  %v13944_v39 = vand.u32 4294901760, %v9981_v20  ;;  %v1815_v41 = vand.u32 4294901760, %v1814_v59  ;;  %v13306_v5 = vand.u32 4294901760, %v9999_v8 }
 0x51c   :  { %v3959_v24 = vsub.f32 %v9974_v38, %v13941_v57  ;;  %v1826_v7 = vsub.f32 %v9979_v42, %v13943_v6  ;;  %v3942_v57 = vand.u32 4294901760, %v3941_v17  ;;  %v3954_v13 = vand.u32 4294901760, %v3953_v16  ;;  %v13947_v6 = vld [vmem:[#allocation123_spill] sm:$0xff] }
 0x51d   :  { %v1838_v30 = vsub.f32 %v9981_v20, %v13944_v39  ;;  %v1821_v29 = vand.u32 4294901760, %v1820_v40  ;;  %v1833_v46 = vand.u32 4294901760, %v1832_v51  ;;  %v3972_v4 = vand.u32 4294901760, %v3971_v21  ;;  %v13948_v20 = vld [vmem:[#allocation124_spill] sm:$0xff] }
 0x51e   :  { %v3960_v28 = vand.u32 4294901760, %v3959_v24  ;;  %v1827_v39 = vand.u32 4294901760, %v1826_v7  ;;  %v13949_v59 = vand.u32 4294901760, %v13945_v25  ;;  %v13950_v38 = vand.u32 4294901760, %v13946_v9  ;;  %v142_v40 = vld [vmem:[#allocation9 + $0x8] sm:$0xff] }
 0x51f   :  { %v1839_v3 = vand.u32 4294901760, %v1838_v30  ;;  %v10523_v51 = vpack.c.bf16 %v3948_v62, %v3936_v44  ;;  %v13951_v35 = vand.u32 4294901760, %v9997_v43  ;;  %v10532_v21 = vpack.c.bf16 %v1815_v41, %v1803_v0 }
 0x520   :  { %v3965_v17 = vsub.f32 %v13945_v25, %v13949_v59  ;;  %v3977_v16 = vsub.f32 %v13946_v9, %v13950_v38  ;;  %v10534_v59 = vpack.c.bf16 %v3954_v13, %v3942_v57  ;;  %v13953_v38 = vand.u32 4294901760, %v13947_v6  ;;  %v143_v25 = vld [vmem:[#allocation9 + $0x10] sm:$0xff] }
 0x521   :  { %v1844_v24 = vsub.f32 %v9997_v43, %v13951_v35  ;;  %v10539_v15 = vpack.c.bf16 %v1833_v46, %v1821_v29  ;;  %v10541_v9 = vpack.c.bf16 %v3972_v4, %v3960_v28  ;;  %v13954_v35 = vand.u32 4294901760, %v13948_v20 }
 0x522   :  { %v3983_v44 = vsub.f32 %v13947_v6, %v13953_v38  ;;  %v10547_v41 = vpack.c.bf16 %v1839_v3, %v1827_v39  ;;  %v3966_v13 = vand.u32 4294901760, %v3965_v17  ;;  %v3978_v0 = vand.u32 4294901760, %v3977_v16  ;;  %v13959_v6 = vld [vmem:[#allocation128_spill] sm:$0xff] }
 0x523   :  { %v1845_v33 = vand.u32 4294901760, %v1844_v24  ;;  %v13963_v17 = vld [vmem:[#allocation132_spill] sm:$0xff]  ;;  %v13964_v24 = vld [vmem:[#allocation133_spill] sm:$0xff]  ;;  %v13969_v16 = vand.u32 4294901760, %v13959_v6 }
 0x524   :  { %v1205_v42 = vpop.permute.xlu0 %1204  ;;  %13956 = vst [vmem:[#allocation224_spill] sm:$0xff] %v10547_v41  ;;  %v3984_v28 = vand.u32 4294901760, %v3983_v44  ;;  %v13966_v44 = vld [vmem:[#allocation134_spill] sm:$0xff] }
 0x525   :  { %v1242_v31 = vmul.f32 %v1205_v42, %v141_v26  ;;  %v1856_v26 = vsub.f32 %v9999_v8, %v13306_v5  ;;  %v13952_v42 = vld [vmem:[#allocation125_spill] sm:$0xff]  ;;  %v3995_v5 = vsub.f32 %v13948_v20, %v13954_v35  ;;  %v13955_v8 = vld [vmem:[#allocation126_spill] sm:$0xff] }
 0x526   :  { %v13957_v46 = vand.u32 4294901760, %v13952_v42  ;;  %v13960_v20 = vld [vmem:[#allocation129_spill] sm:$0xff]  ;;  %v13961_v39 = vand.u32 4294901760, %v13955_v8 }
 0x527   :  { %v1250_v7 = vrot.slane %v1242_v31, 4  ;;  %v1857_v38 = vand.u32 4294901760, %v1856_v26  ;;  %v3996_v3 = vand.u32 4294901760, %v3995_v5  ;;  %v10573_v26 = vsub.f32 %v13959_v6, %v13969_v16 }
 0x528   :  { %v1210_v62 = vpop.permute.xlu0 %1209  ;;  %v10552_v29 = vsub.f32 %v13952_v42, %v13957_v46  ;;  %v10563_v46 = vpack.c.bf16 %v3978_v0, %v3966_v13 }
 0x529   :  { %v1243_v43 = vmul.f32 %v1210_v62, %v142_v40  ;;  %v1251_v57 = vadd.f32 %v1250_v7, %v1242_v31  ;;  %v10559_v31 = vsub.f32 %v13955_v8, %v13961_v39  ;;  %v10566_v30 = vpack.c.bf16 %v1857_v38, %v1845_v33  ;;  %13970 = vst [vmem:[#allocation229_spill] sm:$0xff] %v10573_v26  ;;  %v145_v33 = vld [vmem:[#allocation9 + $0x20] sm:$0xff]  ;;  %v147_v26 = vld [vmem:[#allocation9 + $0x30] sm:$0xff] }
 0x52a   :  { %13958 = vst [vmem:[#allocation225_spill] sm:$0xff] %v10552_v29  ;;  %13965 = vst [vmem:[#allocation227_spill] sm:$0xff] %v10563_v46  ;;  %v10580_v0 = vpack.c.bf16 %v3996_v3, %v3984_v28  ;;  %v13974_v38 = vand.u32 4294901760, %v13963_v17 }
 0x52b   :  { %v1256_v4 = vrot.slane %v1243_v43, 4  ;;  %13962 = vst [vmem:[#allocation226_spill] sm:$0xff] %v10559_v31  ;;  %v1252_v35 = vrot.slane %v1251_v57, 2  ;;  %13967 = vst [vmem:[#allocation228_spill] sm:$0xff] %v10566_v30  ;;  %v146_v30 = vld [vmem:[#allocation9 + $0x28] sm:$0xff] }
 0x52c   :  { %v1215_v40 = vpop.permute.xlu0 %1214  ;;  %13973 = vst [vmem:[#allocation231_spill] sm:$0xff] %v10580_v0  ;;  %v13983_v0 = vld [vmem:[#allocation138_spill] sm:$0xff] }
 0x52d   :  { %v1257_v7 = vadd.f32 %v1256_v4, %v1243_v43  ;;  %v1244_v62 = vmul.f32 %v1215_v40, %v143_v25  ;;  %v13971_v43 = vand.u32 4294901760, %v13960_v20  ;;  %v10586_v4 = vsub.f32 %v13963_v17, %v13974_v38  ;;  %v13982_v17 = vld [vmem:[#allocation137_spill] sm:$0xff] }
 0x52e   :  { %v13976_v40 = vand.u32 4294901760, %v13964_v24  ;;  %v1253_v3 = vadd.f32 %v1252_v35, %v1251_v57  ;;  %v13987_v57 = vand.u32 4294901760, %v13983_v0 }
 0x52f   :  { %v1258_v39 = vrot.slane %v1257_v7, 2  ;;  %v1262_v8 = vrot.slane %v1244_v62, 4  ;;  %v10578_v25 = vsub.f32 %v13960_v20, %v13971_v43  ;;  %13975 = vst [vmem:[#allocation232_spill] sm:$0xff] %v10586_v4  ;;  %v13978_v43 = vand.u32 4294901760, %v13966_v44 }
 0x530   :  { %v1220_v13 = vpop.permute.xlu0 %1219  ;;  %v10591_v16 = vsub.f32 %v13964_v24, %v13976_v40  ;;  %v13980_v20 = vand.u32 4294901760, %v13968_v18  ;;  %v1254_v40 = vrot.slane %v1253_v3, 1  ;;  %v10620_v35 = vsub.f32 %v13983_v0, %v13987_v57  ;;  %v13994_v0 = vld [vmem:[#allocation146_spill] sm:$0xff] }
 0x531   :  { %13972 = vst [vmem:[#allocation230_spill] sm:$0xff] %v10578_v25  ;;  %v1259_v5 = vadd.f32 %v1258_v39, %v1257_v7  ;;  %v1263_v41 = vadd.f32 %v1262_v8, %v1244_v62  ;;  %v1245_v42 = vmul.f32 %v1220_v13, %v144_v52  ;;  %v10596_v28 = vsub.f32 %v13966_v44, %v13978_v43  ;;  %v13984_v13 = vld [vmem:[#allocation140_spill] sm:$0xff] }
 0x532   :  { %13977 = vst [vmem:[#allocation233_spill] sm:$0xff] %v10591_v16  ;;  %v10601_v38 = vsub.f32 %v13968_v18, %v13980_v20  ;;  %v13985_v8 = vand.u32 4294901760, %v13982_v17  ;;  %13988 = vst [vmem:[#allocation237_spill] sm:$0xff] %v10620_v35  ;;  %v13990_v6 = vand.u32 4294901760, %v13984_v13  ;;  %v1255_v4 = vadd.f32 %v1254_v40, %v1253_v3 }
 0x533   :  { %13979 = vst [vmem:[#allocation234_spill] sm:$0xff] %v10596_v28  ;;  %v1264_v24 = vrot.slane %v1263_v41, 2  ;;  %v1268_v7 = vrot.slane %v1245_v42, 4  ;;  %v1260_v62 = vrot.slane %v1259_v5, 1 }
 0x534   :  { %13981 = vst [vmem:[#allocation235_spill] sm:$0xff] %v10601_v38  ;;  %v1225_v39 = vpop.permute.xlu0 %1224  ;;  %v10615_v52 = vsub.f32 %v13982_v17, %v13985_v8  ;;  %v10626_v46 = vsub.f32 %v13984_v13, %v13990_v6  ;;  %v13992_v38 = vld [vmem:[#allocation143_spill] sm:$0xff]  ;;  %v13993_v17 = vld [vmem:[#allocation144_spill] sm:$0xff]  ;;  %v13996_v13 = vld [vmem:[#allocation149_spill] sm:$0xff] }
 0x535   :  { %v1265_v20 = vadd.f32 %v1264_v24, %v1263_v41  ;;  %v1269_v18 = vadd.f32 %v1268_v7, %v1245_v42  ;;  %v1246_v44 = vmul.f32 %v1225_v39, %v145_v33  ;;  %v13989_v24 = vld [vmem:[#allocation141_spill] sm:$0xff]  ;;  %v1261_v7 = vadd.f32 %v1260_v62, %v1259_v5  ;;  %v13995_v33 = vld [vmem:[#allocation147_spill] sm:$0xff] }
 0x536   :  { %13986 = vst [vmem:[#allocation236_spill] sm:$0xff] %v10615_v52  ;;  %13991 = vst [vmem:[#allocation238_spill] sm:$0xff] %v10626_v46  ;;  %v13337_v62 = vand.u32 4294901760, %v10081_v47 }
 0x537   :  { %v1266_v43 = vrot.slane %v1265_v20, 1  ;;  %v1270_v41 = vrot.slane %v1269_v18, 2  ;;  %v1274_v42 = vrot.slane %v1246_v44, 4  ;;  %v1306_v8 = vsel %vm993_vm1, %v1261_v7, %v1255_v4 }
 0x538   :  { %v1230_v39 = vpop.permute.xlu0 %1229 }
 0x539   :  { %v1271_v52 = vadd.f32 %v1270_v41, %v1269_v18  ;;  %v1275_v16 = vadd.f32 %v1274_v42, %v1246_v44  ;;  %v1247_v57 = vmul.f32 %v1230_v39, %v146_v30  ;;  %v1267_v25 = vadd.f32 %v1266_v43, %v1265_v20  ;;  %v148_v42 = vld [vmem:[#allocation9 + $0x38] sm:$0xff] }
 0x53a   :  { %v1916_v18 = vsub.f32 %v10081_v47, %v13337_v62  ;;  %v13339_v30 = vand.u32 4294901760, %v10083_v23  ;;  %v13338_v44 = vand.u32 4294901760, %v10085_v1 }
 0x53b   :  { %v1272_v31 = vrot.slane %v1271_v52, 1  ;;  %v1276_v29 = vrot.slane %v1275_v16, 2  ;;  %v1280_v6 = vrot.slane %v1247_v57, 4  ;;  %v1307_v41 = vsel %vm995_vm2, %v1267_v25, %v1306_v8 }
 0x53c   :  { %v1235_v28 = vpop.permute.xlu0 %1234  ;;  %v1917_v39 = vand.u32 4294901760, %v1916_v18  ;;  %v1928_v4 = vsub.f32 %v10083_v23, %v13339_v30  ;;  %v4055_v7 = vsub.f32 %v10085_v1, %v13338_v44  ;;  %v13341_v25 = vand.u32 4294901760, %v10087_v19 }
 0x53d   :  { %v1273_v3 = vadd.f32 %v1272_v31, %v1271_v52  ;;  %v1277_v40 = vadd.f32 %v1276_v29, %v1275_v16  ;;  %v1281_v43 = vadd.f32 %v1280_v6, %v1247_v57  ;;  %v1248_v20 = vmul.f32 %v1235_v28, %v147_v26 }
 0x53e   :  { %v1929_v16 = vand.u32 4294901760, %v1928_v4  ;;  %v4056_v26 = vand.u32 4294901760, %v4055_v7  ;;  %v13340_v28 = vand.u32 4294901760, %v10091_v49  ;;  %v13342_v4 = vand.u32 4294901760, %v10093_v11 }
 0x53f   :  { %v1308_v62 = vsel %vm997_vm3, %v1273_v3, %v1307_v41  ;;  %v1278_v46 = vrot.slane %v1277_v40, 1  ;;  %v1282_v5 = vrot.slane %v1281_v43, 2  ;;  %v1286_v31 = vrot.slane %v1248_v20, 4 }
 0x540   :  { %v1240_v29 = vpop.permute.xlu0 %1239  ;;  %v10650_v18 = vpack.c.bf16 %v1929_v16, %v1917_v39  ;;  %v4067_v3 = vsub.f32 %v10087_v19, %v13341_v25  ;;  %v1922_v41 = vsub.f32 %v10091_v49, %v13340_v28  ;;  %v13999_v16 = vld [vmem:[#allocation159_spill] sm:$0xff] }
 0x541   :  { %v1279_v52 = vadd.f32 %v1278_v46, %v1277_v40  ;;  %v1283_v8 = vadd.f32 %v1282_v5, %v1281_v43  ;;  %v1287_v57 = vadd.f32 %v1286_v31, %v1248_v20  ;;  %v1249_v6 = vmul.f32 %v1240_v29, %v148_v42  ;;  %v13998_v20 = vld [vmem:[#allocation158_spill] sm:$0xff] }
 0x542   :  { %13997 = vst [vmem:[#allocation239_spill] sm:$0xff] %v10650_v18  ;;  %v4068_v5 = vand.u32 4294901760, %v4067_v3  ;;  %v1923_v40 = vand.u32 4294901760, %v1922_v41  ;;  %v1934_v43 = vsub.f32 %v10093_v11, %v13342_v4  ;;  %v13343_v42 = vand.u32 4294901760, %v13998_v20 }
 0x543   :  { %v1309_v7 = vsel %vm999_vm4, %v1279_v52, %v1308_v62  ;;  %v1284_v44 = vrot.slane %v1283_v8, 1  ;;  %v1288_v30 = vrot.slane %v1287_v57, 2  ;;  %v1292_v46 = vrot.slane %v1249_v6, 4  ;;  %v14001_v52 = vld [vmem:[#allocation161_spill] sm:$0xff] }
 0x544   :  { %v13344_v28 = vand.u32 4294901760, %v13999_v16  ;;  %v10665_v25 = vpack.c.bf16 %v4068_v5, %v4056_v26  ;;  %v1935_v35 = vand.u32 4294901760, %v1934_v43  ;;  %v4061_v62 = vsub.f32 %v13998_v20, %v13343_v42  ;;  %v14004_v42 = vld [vmem:[#allocation164_spill] sm:$0xff] }
 0x545   :  { %v1285_v39 = vadd.f32 %v1284_v44, %v1283_v8  ;;  %v1289_v31 = vadd.f32 %v1288_v30, %v1287_v57  ;;  %v1293_v29 = vadd.f32 %v1292_v46, %v1249_v6  ;;  %v13346_v3 = vand.u32 4294901760, %v14001_v52  ;;  %v14003_v57 = vld [vmem:[#allocation162_spill] sm:$0xff] }
 0x546   :  { %14000 = vst [vmem:[#allocation158_spill] sm:$0xff] %v10665_v25  ;;  %v4073_v30 = vsub.f32 %v13999_v16, %v13344_v28  ;;  %v10675_v44 = vpack.c.bf16 %v1935_v35, %v1923_v40  ;;  %v4062_v8 = vand.u32 4294901760, %v4061_v62  ;;  %v13347_v6 = vand.u32 4294901760, %v14003_v57  ;;  %v14005_v28 = vld [vmem:[#allocation165_spill] sm:$0xff]  ;;  %v14006_v40 = vld [vmem:[#allocation166_spill] sm:$0xff] }
 0x547   :  { %v1310_v41 = vsel %vm1001_vm5, %v1285_v39, %v1309_v7  ;;  %v1290_v18 = vrot.slane %v1289_v31, 1  ;;  %v1294_v4 = vrot.slane %v1293_v29, 2  ;;  %v1940_v26 = vsub.f32 %v14001_v52, %v13346_v3 }
 0x548   :  { %14002 = vst [vmem:[#allocation161_spill] sm:$0xff] %v10675_v44  ;;  %v4074_v43 = vand.u32 4294901760, %v4073_v30  ;;  %v13349_v7 = vand.u32 4294901760, %v14004_v42  ;;  %v1952_v25 = vsub.f32 %v14003_v57, %v13347_v6  ;;  %v13350_v35 = vand.u32 4294901760, %v14005_v28  ;;  %v14008_v30 = vld [vmem:[#allocation168_spill] sm:$0xff] }
 0x549   :  { %v1291_v46 = vadd.f32 %v1290_v18, %v1289_v31  ;;  %v1295_v5 = vadd.f32 %v1294_v4, %v1293_v29  ;;  %v1941_v39 = vand.u32 4294901760, %v1940_v26  ;;  %v13352_v62 = vand.u32 4294901760, %v14006_v40 }
 0x54a   :  { %v10688_v3 = vpack.c.bf16 %v4074_v43, %v4062_v8  ;;  %v4079_v18 = vsub.f32 %v14004_v42, %v13349_v7  ;;  %v1953_v4 = vand.u32 4294901760, %v1952_v25  ;;  %v4091_v31 = vsub.f32 %v14005_v28, %v13350_v35  ;;  %v14010_v43 = vld [vmem:[#allocation171_spill] sm:$0xff] }
 0x54b   :  { %v1311_v44 = vsel %vm1003_vm6, %v1291_v46, %v1310_v41  ;;  %v1296_v16 = vrot.slane %v1295_v5, 1  ;;  %v1946_v29 = vsub.f32 %v14006_v40, %v13352_v62  ;;  %v13353_v26 = vand.u32 4294901760, %v14008_v30  ;;  %v14009_v46 = vld [vmem:[#allocation170_spill] sm:$0xff] }
 0x54c   :  { %14007 = vst [vmem:[#allocation240_spill] sm:$0xff] %v10688_v3  ;;  %v4080_v41 = vand.u32 4294901760, %v4079_v18  ;;  %v13355_v8 = vand.u32 4294901760, %v14009_v46  ;;  %v13357_v3 = vand.u32 4294901760, %v14010_v43  ;;  %v10702_v57 = vpack.c.bf16 %v1953_v4, %v1941_v39 }
 0x54d   :  { %v1297_v6 = vadd.f32 %v1296_v16, %v1295_v5  ;;  %v4092_v7 = vand.u32 4294901760, %v4091_v31  ;;  %v1947_v25 = vand.u32 4294901760, %v1946_v29  ;;  %v1958_v35 = vsub.f32 %v14008_v30, %v13353_v26  ;;  %v14012_v5 = vld [vmem:[#allocation173_spill] sm:$0xff]  ;;  %v14015_v29 = vld [vmem:[#allocation174_spill] sm:$0xff] }
 0x54e   :  { %14011 = vst [vmem:[#allocation241_spill] sm:$0xff] %v10702_v57  ;;  %v4085_v62 = vsub.f32 %v14009_v46, %v13355_v8  ;;  %v4097_v16 = vsub.f32 %v14010_v43, %v13357_v3  ;;  %v13358_v18 = vand.u32 4294901760, %v14012_v5  ;;  %v13360_v57 = vand.u32 4294901760, %v14015_v29 }
 0x54f   :  { %v1312_v28 = vsel %vm1005_vm7, %v1297_v6, %v1311_v44  ;;  %v10717_v4 = vpack.c.bf16 %v4092_v7, %v4080_v41  ;;  %v1959_v31 = vand.u32 4294901760, %v1958_v35  ;;  %v14016_v6 = vld [vmem:[#allocation176_spill] sm:$0xff]  ;;  %v14019_v35 = vld [vmem:[#allocation177_spill] sm:$0xff] }
 0x550   :  { %v10715_v39 = vand.u32 4294901760, %v1312_v28  ;;  %v4086_v26 = vand.u32 4294901760, %v4085_v62  ;;  %v4098_v30 = vand.u32 4294901760, %v4097_v16  ;;  %v1964_v44 = vsub.f32 %v14012_v5, %v13358_v18  ;;  %v14021_v18 = vld [vmem:[#allocation178_spill] sm:$0xff] }
 0x551   :  { %14014 = vst [vmem:[#allocation243_spill] sm:$0xff] %v10717_v4  ;;  %v13362_v8 = vand.u32 4294901760, %v14016_v6  ;;  %v10727_v3 = vpack.c.bf16 %v1959_v31, %v1947_v25  ;;  %v1976_v7 = vsub.f32 %v14015_v29, %v13360_v57  ;;  %v13365_v41 = vand.u32 4294901760, %v14019_v35  ;;  %v14023_v57 = vld [vmem:[#allocation180_spill] sm:$0xff] }
 0x552   :  { %14013 = vst [vmem:[#allocation242_spill] sm:$0xff] %v10715_v39  ;;  %v10725_v46 = vsub.f32 %v1312_v28, %v10715_v39  ;;  %v10733_v4 = vpack.c.bf16 %v4098_v30, %v4086_v26  ;;  %v1965_v62 = vand.u32 4294901760, %v1964_v44  ;;  %v13367_v5 = vand.u32 4294901760, %v14021_v18  ;;  %v14024_v26 = vld [vmem:[#allocation182_spill] sm:$0xff] }
 0x553   :  { %14018 = vst [vmem:[#allocation245_spill] sm:$0xff] %v10727_v3  ;;  %v4103_v16 = vsub.f32 %v14016_v6, %v13362_v8  ;;  %v1977_v25 = vand.u32 4294901760, %v1976_v7  ;;  %v4115_v31 = vsub.f32 %v14019_v35, %v13365_v41  ;;  %v13375_v3 = vand.u32 4294901760, %v14023_v57  ;;  %v14025_v8 = vld [vmem:[#allocation183_spill] sm:$0xff] }
 0x554   :  { %14017 = vst [vmem:[#allocation244_spill] sm:$0xff] %v10725_v46  ;;  %14020 = vst [vmem:[#allocation246_spill] sm:$0xff] %v10733_v4  ;;  %v10740_v28 = vand.u32 4294901760, %v10725_v46  ;;  %v1970_v30 = vsub.f32 %v14021_v18, %v13367_v5  ;;  %v13376_v44 = vand.u32 4294901760, %v14024_v26  ;;  %v13377_v4 = vand.u32 4294901760, %v14025_v8  ;;  %v14027_v18 = vld [vmem:[#allocation185_spill] sm:$0xff] }
 0x555   :  { %v4104_v29 = vand.u32 4294901760, %v4103_v16  ;;  %v10753_v43 = vpack.c.bf16 %v1977_v25, %v1965_v62  ;;  %v4116_v7 = vand.u32 4294901760, %v4115_v31  ;;  %v1982_v41 = vsub.f32 %v14023_v57, %v13375_v3  ;;  %v14030_v31 = vld [vmem:[#allocation186_spill] sm:$0xff] }
 0x556   :  { %14022 = vst [vmem:[#allocation247_spill] sm:$0xff] %v10740_v28  ;;  %v1659_v6 = vsub.f32 %v10725_v46, %v10740_v28  ;;  %v1971_v35 = vand.u32 4294901760, %v1970_v30  ;;  %v4109_v16 = vsub.f32 %v14024_v26, %v13376_v44  ;;  %v4121_v5 = vsub.f32 %v14025_v8, %v13377_v4  ;;  %v14031_v44 = vld [vmem:[#allocation188_spill] sm:$0xff] }
 0x557   :  { %14026 = vst [vmem:[#allocation180_spill] sm:$0xff] %v10753_v43  ;;  %v13378_v40 = vand.u32 4294901760, %v14027_v18  ;;  %v10767_v62 = vpack.c.bf16 %v4116_v7, %v4104_v29  ;;  %v1983_v25 = vand.u32 4294901760, %v1982_v41  ;;  %v13379_v28 = vand.u32 4294901760, %v14030_v31  ;;  %v14034_v7 = vld [vmem:[#allocation190_spill] sm:$0xff] }
 0x558   :  { %v10765_v42 = vand.u32 4294901760, %v1659_v6  ;;  %v4110_v46 = vand.u32 4294901760, %v4109_v16  ;;  %v4122_v3 = vand.u32 4294901760, %v4121_v5  ;;  %v13380_v43 = vand.u32 4294901760, %v14031_v44  ;;  %v14033_v6 = vld [vmem:[#allocation189_spill] sm:$0xff] }
 0x559   :  { %14029 = vst [vmem:[#allocation183_spill] sm:$0xff] %v10767_v62  ;;  %v1988_v30 = vsub.f32 %v14027_v18, %v13378_v40  ;;  %v10776_v4 = vpack.c.bf16 %v1983_v25, %v1971_v35  ;;  %v2000_v29 = vsub.f32 %v14030_v31, %v13379_v28  ;;  %v13381_v41 = vand.u32 4294901760, %v14033_v6 }
 0x55a   :  { %14028 = vst [vmem:[#allocation182_spill] sm:$0xff] %v10765_v42  ;;  %1661 = vmatprep.mubr.f32.mxu1 %v10765_v42  ;;  %3800 = vmatprep.mubr.f32.mxu0 %v10765_v42  ;;  %v10785_v16 = vpack.c.bf16 %v4122_v3, %v4110_v46  ;;  %v4127_v35 = vsub.f32 %v14031_v44, %v13380_v43  ;;  %v13385_v25 = vand.u32 4294901760, %v10176_v36  ;;  %v14039_v42 = vand.u32 4294901760, %v10180_v61 }
 0x55b   :  { %14032 = vst [vmem:[#allocation185_spill] sm:$0xff] %v10776_v4  ;;  %1667 = vmatmul.mubr.f32.vlgmr.msra.gmra.mrb[0].mxu1 %v10333_v50  ;;  %3806 = vmatmul.mubr.f32.vlgmr.msra.gmra.mrb[2].mxu0 %v10333_v50  ;;  %v1989_v40 = vand.u32 4294901760, %v1988_v30  ;;  %v2001_v28 = vand.u32 4294901760, %v2000_v29  ;;  %v4139_v5 = vsub.f32 %v14033_v6, %v13381_v41  ;;  %v14036_v50 = vand.u32 4294901760, %v14034_v7  ;;  %v14037_v29 = vld [vmem:[#allocation196_spill] sm:$0xff] }
 0x55c   :  { %14035 = vst [vmem:[#allocation186_spill] sm:$0xff] %v10785_v16  ;;  %7521 = vmatpush1.bf16.msra.mxu1 %v10315_v27  ;;  %8097 = vmatpush1.bf16.msra.mxu0 %v10344_v10  ;;  %v4128_v30 = vand.u32 4294901760, %v4127_v35  ;;  %v2006_v27 = vsub.f32 %v10176_v36, %v13385_v25  ;;  %v13386_v10 = vand.u32 4294901760, %v10182_v34  ;;  %v13387_v43 = vand.u32 4294901760, %v14037_v29 }
 0x55d   :  { %v1994_v3 = vsub.f32 %v14034_v7, %v14036_v50  ;;  %2058 = vmatprep.mubr.f32.mxu1 %v10715_v39  ;;  %4197 = vmatprep.mubr.f32.mxu0 %v10715_v39  ;;  %v10809_v50 = vpack.c.bf16 %v2001_v28, %v1989_v40  ;;  %v4140_v41 = vand.u32 4294901760, %v4139_v5  ;;  %v4133_v35 = vsub.f32 %v10180_v61, %v14039_v42  ;;  %v14042_v28 = vld [vmem:[#allocation199_spill] sm:$0xff]  ;;  %v14043_v5 = vld [vmem:[#allocation200_spill] sm:$0xff] }
 0x55e   :  { %7523 = vmatprep.subr.bf16.mxu1 %v10351_v58  ;;  %8099 = vmatprep.subr.bf16.mxu0 %v10353_v12  ;;  %v2007_v39 = vand.u32 4294901760, %v2006_v27  ;;  %v4145_v25 = vsub.f32 %v10182_v34, %v13386_v10  ;;  %v2012_v16 = vsub.f32 %v14037_v29, %v13387_v43  ;;  %v14040_v58 = vld [vmem:[#allocation197_spill] sm:$0xff]  ;;  %v13389_v42 = vand.u32 4294901760, %v14042_v28  ;;  %v14044_v27 = vld [vmem:[#allocation222_spill] sm:$0xff] }
 0x55f   :  { %14038 = vst [vmem:[#allocation188_spill] sm:$0xff] %v10809_v50  ;;  %v1995_v46 = vand.u32 4294901760, %v1994_v3  ;;  %v13388_v4 = vand.u32 4294901760, %v14040_v58  ;;  %v10823_v12 = vpack.c.bf16 %v4140_v41, %v4128_v30  ;;  %v4134_v40 = vand.u32 4294901760, %v4133_v35  ;;  %v14046_v30 = vld [vmem:[#allocation201_spill] sm:$0xff]  ;;  %v14047_v35 = vld [vmem:[#allocation203_spill] sm:$0xff] }
 0x560   :  { %7525 = vmatpush1.bf16.msra.mxu1 %v10356_v63  ;;  %8101 = vmatpush1.bf16.msra.mxu0 %v10372_v54  ;;  %v13390_v3 = vand.u32 4294901760, %v14043_v5  ;;  %v4146_v43 = vand.u32 4294901760, %v4145_v25  ;;  %v2013_v50 = vand.u32 4294901760, %v2012_v16  ;;  %v4151_v54 = vsub.f32 %v14042_v28, %v13389_v42  ;;  %v14049_v16 = vld [vmem:[#allocation205_spill] sm:$0xff] }
 0x561   :  { %14041 = vst [vmem:[#allocation189_spill] sm:$0xff] %v10823_v12  ;;  %7527 = vmatprep.subr.bf16.mxu1 %v10377_v22  ;;  %8103 = vmatprep.subr.bf16.mxu0 %v14044_v27  ;;  %v10829_v10 = vpack.c.bf16 %v2007_v39, %v1995_v46  ;;  %v2024_v63 = vsub.f32 %v14040_v58, %v13388_v4  ;;  %v13391_v22 = vand.u32 4294901760, %v14046_v30  ;;  %v13392_v27 = vand.u32 4294901760, %v14047_v35  ;;  %v14051_v4 = vld [vmem:[#allocation223_spill] sm:$0xff] }
 0x562   :  { %v4163_v41 = vsub.f32 %v14043_v5, %v13390_v3  ;;  %v10842_v39 = vpack.c.bf16 %v4146_v43, %v4134_v40  ;;  %v13394_v46 = vand.u32 4294901760, %v14049_v16  ;;  %v4152_v42 = vand.u32 4294901760, %v4151_v54 }
 0x563   :  { %14045 = vst [vmem:[#allocation190_spill] sm:$0xff] %v10829_v10  ;;  %v2025_v25 = vand.u32 4294901760, %v2024_v63  ;;  %v14050_v10 = vld [vmem:[#allocation206_spill] sm:$0xff]  ;;  %v2018_v3 = vsub.f32 %v14046_v30, %v13391_v22  ;;  %v2030_v43 = vsub.f32 %v14047_v35, %v13392_v27  ;;  %v14053_v63 = vld [vmem:[#allocation208_spill] sm:$0xff] }
 0x564   :  { %14048 = vst [vmem:[#allocation222_spill] sm:$0xff] %v10842_v39  ;;  %v13395_v12 = vand.u32 4294901760, %v14050_v10  ;;  %7529 = vmatpush1.bf16.msra.mxu1 %v14051_v4  ;;  %8105 = vmatpush1.bf16.msra.mxu0 %v10428_v2  ;;  %v4164_v62 = vand.u32 4294901760, %v4163_v41  ;;  %v4157_v2 = vsub.f32 %v14049_v16, %v13394_v46  ;;  %v13396_v54 = vand.u32 4294901760, %v14053_v63  ;;  %v14055_v39 = vld [vmem:[#allocation209_spill] sm:$0xff] }
 0x565   :  { %7531 = vmatprep.subr.bf16.mxu1 %v10439_v53  ;;  %8107 = vmatprep.subr.bf16.mxu0 %v10441_v37  ;;  %v10856_v40 = vpack.c.bf16 %v2025_v25, %v2013_v50  ;;  %v2019_v22 = vand.u32 4294901760, %v2018_v3  ;;  %v2031_v27 = vand.u32 4294901760, %v2030_v43  ;;  %v13397_v53 = vand.u32 4294901760, %v14055_v39  ;;  %v14056_v25 = vld [vmem:[#allocation211_spill] sm:$0xff]  ;;  %v14059_v43 = vld [vmem:[#allocation213_spill] sm:$0xff] }
 0x566   :  { %v4169_v4 = vsub.f32 %v14050_v10, %v13395_v12  ;;  %v10865_v41 = vpack.c.bf16 %v4164_v62, %v4152_v42  ;;  %v4158_v35 = vand.u32 4294901760, %v4157_v2  ;;  %v2036_v50 = vsub.f32 %v14053_v63, %v13396_v54  ;;  %v14058_v42 = vld [vmem:[#allocation212_spill] sm:$0xff] }
 0x567   :  { %14052 = vst [vmem:[#allocation223_spill] sm:$0xff] %v10856_v40  ;;  %v13398_v46 = vand.u32 4294901760, %v14056_v25  ;;  %v10874_v12 = vpack.c.bf16 %v2031_v27, %v2019_v22  ;;  %v2048_v62 = vsub.f32 %v14055_v39, %v13397_v53  ;;  %v13399_v3 = vand.u32 4294901760, %v14058_v42 }
 0x568   :  { %14054 = vst [vmem:[#allocation248_spill] sm:$0xff] %v10865_v41  ;;  %v4170_v37 = vand.u32 4294901760, %v4169_v4  ;;  %7533 = vmatpush1.bf16.msra.mxu1 %v10447_v60  ;;  %8109 = vmatpush1.bf16.msra.mxu0 %v10449_v56  ;;  %v13400_v2 = vand.u32 4294901760, %v14059_v43  ;;  %v2037_v54 = vand.u32 4294901760, %v2036_v50  ;;  %v14061_v56 = vld [vmem:[#allocation215_spill] sm:$0xff] }
 0x569   :  { %14057 = vst [vmem:[#allocation249_spill] sm:$0xff] %v10874_v12  ;;  %7535 = vmatprep.subr.bf16.mxu1 %v10452_v32  ;;  %8111 = vmatprep.subr.bf16.mxu0 %v10472_v55  ;;  %v4175_v60 = vsub.f32 %v14056_v25, %v13398_v46  ;;  %v13401_v22 = vand.u32 4294901760, %v14061_v56  ;;  %v2049_v27 = vand.u32 4294901760, %v2048_v62  ;;  %v4187_v53 = vsub.f32 %v14058_v42, %v13399_v3  ;;  %v14062_v12 = vld [vmem:[#allocation217_spill] sm:$0xff] }
 0x56a   :  { %v10883_v4 = vpack.c.bf16 %v4170_v37, %v4158_v35  ;;  %v2042_v32 = vsub.f32 %v14059_v43, %v13400_v2  ;;  %v13403_v55 = vand.u32 4294901760, %v14062_v12  ;;  %v14063_v35 = vld [vmem:[#allocation150_spill] sm:$0xff]  ;;  %v14067_v37 = vld [vmem:[#allocation153_spill] sm:$0xff]  ;;  %v14156_v43 = vld [vmem:[#allocation219_spill] sm:$0xff] }
 0x56b   :  { %v4176_v50 = vand.u32 4294901760, %v4175_v60  ;;  %v2054_v46 = vsub.f32 %v14061_v56, %v13401_v22  ;;  %v10903_v62 = vpack.c.bf16 %v2049_v27, %v2037_v54  ;;  %v4188_v3 = vand.u32 4294901760, %v4187_v53  ;;  %v14066_v60 = vld [vmem:[#allocation152_spill] sm:$0xff] }
 0x56c   :  { %14060 = vst [vmem:[#allocation250_spill] sm:$0xff] %v10883_v4  ;;  %v14064_v4 = vld [vmem:[#allocation218_spill] sm:$0xff]  ;;  %7537 = vmatpush1.bf16.msra.mxu1 %v10474_v48  ;;  %8113 = vmatpush1.bf16.msra.mxu0 %v10480_v45  ;;  %v2043_v40 = vand.u32 4294901760, %v2042_v32  ;;  %v4181_v2 = vsub.f32 %v14062_v12, %v13403_v55  ;;  %v14069_v54 = vand.u32 4294901760, %v13989_v24  ;;  %v14070_v27 = vand.u32 4294901760, %v13992_v38 }
 0x56d   :  { %14065 = vst [vmem:[#allocation251_spill] sm:$0xff] %v10903_v62  ;;  %7539 = vmatprep.subr.bf16.mxu1 %v10497_v14  ;;  %8115 = vmatprep.subr.bf16.mxu0 %v10523_v51  ;;  %v2055_v56 = vand.u32 4294901760, %v2054_v46  ;;  %v14068_v48 = vand.u32 4294901760, %v14064_v4  ;;  %v10921_v14 = vpack.c.bf16 %v4188_v3, %v4176_v50  ;;  %v14072_v55 = vand.u32 4294901760, %v13993_v17 }
 0x56e   :  { %v4025_v53 = vsub.f32 %v13989_v24, %v14069_v54  ;;  %v1892_v32 = vsub.f32 %v13992_v38, %v14070_v27  ;;  %v4182_v51 = vand.u32 4294901760, %v4181_v2  ;;  %v14073_v46 = vand.u32 4294901760, %v13994_v0  ;;  %v14091_v24 = vld [vmem:[#allocation233_spill] sm:$0xff] }
 0x56f   :  { %v4193_v45 = vsub.f32 %v14064_v4, %v14068_v48  ;;  %14071 = vst [vmem:[#allocation252_spill] sm:$0xff] %v10921_v14  ;;  %v1904_v41 = vsub.f32 %v13993_v17, %v14072_v55  ;;  %v10929_v48 = vpack.c.bf16 %v2055_v56, %v2043_v40  ;;  %v14075_v54 = vand.u32 4294901760, %v13995_v33  ;;  %v14089_v17 = vld [vmem:[#allocation232_spill] sm:$0xff] }
 0x570   :  { %v4031_v22 = vsub.f32 %v13994_v0, %v14073_v46  ;;  %7541 = vmatpush1.bf16.msra.mxu1 %v10532_v21  ;;  %8117 = vmatpush1.bf16.msra.mxu0 %v10534_v59  ;;  %v14076_v2 = vand.u32 4294901760, %v13996_v13  ;;  %v14077_v55 = vand.u32 4294901760, %v14063_v35  ;;  %v14078_v21 = vand.u32 4294901760, %v14066_v60  ;;  %v14081_v46 = vld [vmem:[#allocation225_spill] sm:$0xff]  ;;  %v14100_v4 = vld [vmem:[#allocation224_spill] sm:$0xff] }
 0x571   :  { %14074 = vst [vmem:[#allocation253_spill] sm:$0xff] %v10929_v48  ;;  %v4194_v62 = vand.u32 4294901760, %v4193_v45  ;;  %v4043_v3 = vsub.f32 %v13995_v33, %v14075_v54  ;;  %7543 = vmatprep.subr.bf16.mxu1 %v10539_v15  ;;  %8119 = vmatprep.subr.bf16.mxu0 %v10541_v9  ;;  %v14079_v40 = vand.u32 4294901760, %v14067_v37  ;;  %v14082_v54 = vand.u32 4294901760, %v14081_v46  ;;  %v14087_v15 = vld [vmem:[#allocation230_spill] sm:$0xff]  ;;  %v14093_v48 = vld [vmem:[#allocation236_spill] sm:$0xff] }
 0x572   :  { %v1898_v50 = vsub.f32 %v13996_v13, %v14076_v2  ;;  %v1910_v27 = vsub.f32 %v14063_v35, %v14077_v55  ;;  %v4037_v59 = vsub.f32 %v14066_v60, %v14078_v21  ;;  %v14083_v2 = vld [vmem:[#allocation226_spill] sm:$0xff]  ;;  %v14085_v55 = vld [vmem:[#allocation229_spill] sm:$0xff]  ;;  %v14088_v0 = vand.u32 4294901760, %v14087_v15  ;;  %v14102_v15 = vld [vmem:[#allocation228_spill] sm:$0xff] }
 0x573   :  { %v4049_v56 = vsub.f32 %v14067_v37, %v14079_v40  ;;  %v10950_v45 = vpack.c.bf16 %v4194_v62, %v4182_v51  ;;  %v14084_v13 = vand.u32 4294901760, %v14083_v2  ;;  %v14086_v35 = vand.u32 4294901760, %v14085_v55  ;;  %v14094_v40 = vld [vmem:[#allocation234_spill] sm:$0xff]  ;;  %v14096_v51 = vld [vmem:[#allocation235_spill] sm:$0xff] }
 0x574   :  { %v14090_v38 = vand.u32 4294901760, %v14089_v17  ;;  %v14092_v21 = vand.u32 4294901760, %v14091_v24  ;;  %v1875_v14 = vand.u32 4294901760, %v14093_v48  ;;  %v14095_v62 = vand.u32 4294901760, %v14094_v40  ;;  %7545 = vmatpush1.bf16.msra.mxu1 %v14100_v4  ;;  %v14103_v48 = vld [vmem:[#allocation231_spill] sm:$0xff] }
 0x575   :  { %14080 = vst [vmem:[#allocation254_spill] sm:$0xff] %v10950_v45  ;;  %v7548_v33 = vpack.c.bf16 %v14084_v13, %v14082_v54  ;;  %v8124_v9 = vpack.c.bf16 %v14088_v0, %v14086_v35  ;;  %v14097_v37 = vand.u32 4294901760, %v14096_v51  ;;  %v14098_v45 = vld [vmem:[#allocation237_spill] sm:$0xff]  ;;  %v14099_v13 = vld [vmem:[#allocation238_spill] sm:$0xff]  ;;  %v4026_v55 = vand.u32 4294901760, %v4025_v53  ;;  %v14101_v0 = vld [vmem:[#allocation227_spill] sm:$0xff]  ;;  %7547 = vmatprep.subr.bf16.mxu1 %v14102_v15 }
 0x576   :  { %v7550_v60 = vpack.c.bf16 %v14092_v21, %v14090_v38  ;;  %v1887_v2 = vand.u32 4294901760, %v14098_v45  ;;  %v4014_v54 = vand.u32 4294901760, %v14099_v13  ;;  %8121 = vmatpush1.bf16.msra.mxu0 %v14101_v0  ;;  %v1893_v17 = vand.u32 4294901760, %v1892_v32  ;;  %v14115_v15 = vld [vmem:[#allocation177_spill] sm:$0xff]  ;;  %v14120_v0 = vld [vmem:[#allocation239_spill] sm:$0xff] }
 0x577   :  { %v8126_v46 = vpack.c.bf16 %v14097_v37, %v14095_v62  ;;  %v1905_v35 = vand.u32 4294901760, %v1904_v41  ;;  %v4032_v24 = vand.u32 4294901760, %v4031_v22  ;;  %v4044_v38 = vand.u32 4294901760, %v4043_v3  ;;  %8123 = vmatprep.subr.bf16.mxu0 %v14103_v48  ;;  %v14122_v13 = vld [vmem:[#allocation161_spill] sm:$0xff]  ;;  %v14152_v22 = vld [vmem:[#allocation46_spill] sm:$0xff] }
 0x578   :  { %v1899_v21 = vand.u32 4294901760, %v1898_v50  ;;  %v1911_v40 = vand.u32 4294901760, %v1910_v27  ;;  %v4038_v37 = vand.u32 4294901760, %v4037_v59  ;;  %v4050_v62 = vand.u32 4294901760, %v4049_v56  ;;  %7549 = vmatpush1.bf16.msra.mxu1 %v7548_v33  ;;  %v14104_v33 = vld [vmem:[#allocation159_spill] sm:$0xff]  ;;  %v14107_v56 = vld [vmem:[#allocation165_spill] sm:$0xff] }
 0x579   :  { %v7552_v45 = vpack.c.bf16 %v1887_v2, %v1875_v14  ;;  %v8128_v53 = vpack.c.bf16 %v4026_v55, %v4014_v54  ;;  %v7554_v51 = vpack.c.bf16 %v1905_v35, %v1893_v17  ;;  %7551 = vmatprep.subr.bf16.mxu1 %v7550_v60  ;;  %v8130_v4 = vpack.c.bf16 %v4044_v38, %v4032_v24  ;;  %v14105_v14 = vld [vmem:[#allocation162_spill] sm:$0xff]  ;;  %v14106_v60 = vld [vmem:[#allocation164_spill] sm:$0xff]  ;;  %v14111_v55 = vld [vmem:[#allocation171_spill] sm:$0xff] }
 0x57a   :  { %8125 = vmatpush1.bf16.msra.mxu0 %v8124_v9  ;;  %v7556_v32 = vpack.c.bf16 %v1911_v40, %v1899_v21  ;;  %v8132_v41 = vpack.c.bf16 %v4050_v62, %v4038_v37  ;;  %v14109_v2 = vld [vmem:[#allocation168_spill] sm:$0xff]  ;;  %v14110_v54 = vld [vmem:[#allocation170_spill] sm:$0xff]  ;;  %v14112_v17 = vld [vmem:[#allocation173_spill] sm:$0xff] }
 0x57b   :  { %8127 = vmatprep.subr.bf16.mxu0 %v8126_v46  ;;  %v14108_v46 = vld [vmem:[#allocation166_spill] sm:$0xff]  ;;  %v14114_v38 = vld [vmem:[#allocation176_spill] sm:$0xff]  ;;  %v14125_v9 = vld [vmem:[#allocation243_spill] sm:$0xff] }
 0x57c   :  { %7553 = vmatpush1.bf16.msra.mxu1 %v7552_v45  ;;  %v14113_v35 = vld [vmem:[#allocation174_spill] sm:$0xff]  ;;  %v14123_v62 = vld [vmem:[#allocation240_spill] sm:$0xff]  ;;  %v14124_v45 = vld [vmem:[#allocation241_spill] sm:$0xff] }
 0x57d   :  { %v14116_v21 = vld [vmem:[#allocation178_spill] sm:$0xff]  ;;  %7555 = vmatprep.subr.bf16.mxu1 %v7554_v51  ;;  %v14128_v40 = vld [vmem:[#allocation180_spill] sm:$0xff]  ;;  %v14130_v51 = vld [vmem:[#allocation185_spill] sm:$0xff] }
 0x57e   :  { %8129 = vmatpush1.bf16.msra.mxu0 %v8128_v53  ;;  %v14121_v37 = vld [vmem:[#allocation158_spill] sm:$0xff]  ;;  %v14129_v53 = vld [vmem:[#allocation183_spill] sm:$0xff]  ;;  %v14146_v50 = vld [vmem:[#allocation253_spill] sm:$0xff] }
 0x57f   :  { %8131 = vmatprep.subr.bf16.mxu0 %v8130_v4  ;;  %v14117_v4 = vld [vmem:[#allocation203_spill] sm:$0xff]  ;;  %v14154_v24 = vld [vmem:[#allocation50_spill] sm:$0xff] }
 0x580   :  { %7557 = vmatpush1.bf16.msra.mxu1 %v7556_v32  ;;  %v14126_v32 = vld [vmem:[#allocation245_spill] sm:$0xff]  ;;  %v14145_v27 = vld [vmem:[#allocation39_spill] sm:$0xff]  ;;  %v14171_v48 = vld [vmem:[#allocation78_spill] sm:$0xff] }
 0x581   :  { %7559 = vmatprep.subr.bf16.mxu1 %v14120_v0  ;;  %v14131_v0 = vld [vmem:[#allocation186_spill] sm:$0xff] }
 0x582   :  { %8133 = vmatpush1.bf16.msra.mxu0 %v8132_v41  ;;  %v14127_v41 = vld [vmem:[#allocation246_spill] sm:$0xff] }
 0x583   :  { %8135 = vmatprep.subr.bf16.mxu0 %v14121_v37  ;;  %v14132_v37 = vld [vmem:[#allocation188_spill] sm:$0xff] }
 0x584   :  { %7561 = vmatpush1.bf16.msra.mxu1 %v14122_v13  ;;  %v14133_v13 = vld [vmem:[#allocation189_spill] sm:$0xff] }
 0x585   :  { %7563 = vmatprep.subr.bf16.mxu1 %v14124_v45  ;;  %v14135_v45 = vld [vmem:[#allocation222_spill] sm:$0xff] }
 0x586   :  { %8137 = vmatpush1.bf16.msra.mxu0 %v14123_v62  ;;  %v14134_v62 = vld [vmem:[#allocation190_spill] sm:$0xff] }
 0x587   :  { %8139 = vmatprep.subr.bf16.mxu0 %v14125_v9  ;;  %v14136_v9 = vld [vmem:[#allocation223_spill] sm:$0xff] }
 0x588   :  { %7565 = vmatpush1.bf16.msra.mxu1 %v14126_v32  ;;  %v14137_v32 = vld [vmem:[#allocation248_spill] sm:$0xff] }
 0x589   :  { %7567 = vmatprep.subr.bf16.mxu1 %v14128_v40  ;;  %v14139_v40 = vld [vmem:[#allocation250_spill] sm:$0xff] }
 0x58a   :  { %8141 = vmatpush1.bf16.msra.mxu0 %v14127_v41  ;;  %v14138_v41 = vld [vmem:[#allocation249_spill] sm:$0xff] }
 0x58b   :  { %8143 = vmatprep.subr.bf16.mxu0 %v14129_v53  ;;  %v14140_v53 = vld [vmem:[#allocation251_spill] sm:$0xff] }
 0x58c   :  { %7569 = vmatpush1.bf16.msra.mxu1 %v14130_v51  ;;  %v14141_v51 = vld [vmem:[#allocation252_spill] sm:$0xff] }
 0x58d   :  { %7571 = vmatprep.subr.bf16.mxu1 %v14132_v37  ;;  %v14143_v37 = vld [vmem:[#allocation36_spill] sm:$0xff] }
 0x58e   :  { %8145 = vmatpush1.bf16.msra.mxu0 %v14131_v0  ;;  %v14142_v0 = vld [vmem:[#allocation35_spill] sm:$0xff] }
 0x58f   :  { %8147 = vmatprep.subr.bf16.mxu0 %v14133_v13  ;;  %v7582_v59 = vpack.c.bf16 %v14143_v37, %v14142_v0  ;;  %v14144_v13 = vld [vmem:[#allocation37_spill] sm:$0xff]  ;;  %v14155_v37 = vld [vmem:[#allocation51_spill] sm:$0xff] }
 0x590   :  { %7573 = vmatpush1.bf16.msra.mxu1 %v14134_v62  ;;  %v8158_v62 = vpack.c.bf16 %v14145_v27, %v14144_v13  ;;  %v8162_v0 = vpack.c.bf16 %v14155_v37, %v14154_v24  ;;  %v14164_v37 = vld [vmem:[#allocation62_spill] sm:$0xff]  ;;  %v14165_v24 = vld [vmem:[#allocation63_spill] sm:$0xff] }
 0x591   :  { %7575 = vmatprep.subr.bf16.mxu1 %v14136_v9  ;;  %v14148_v9 = vld [vmem:[#allocation41_spill] sm:$0xff]  ;;  %v14167_v27 = vld [vmem:[#allocation66_spill] sm:$0xff] }
 0x592   :  { %8149 = vmatpush1.bf16.msra.mxu0 %v14135_v45  ;;  %v14147_v45 = vld [vmem:[#allocation254_spill] sm:$0xff] }
 0x593   :  { %8151 = vmatprep.subr.bf16.mxu0 %v14137_v32  ;;  %v14149_v32 = vld [vmem:[#allocation42_spill] sm:$0xff] }
 0x594   :  { %7577 = vmatpush1.bf16.msra.mxu1 %v14138_v41  ;;  %v7584_v3 = vpack.c.bf16 %v14149_v32, %v14148_v9  ;;  %v14150_v41 = vld [vmem:[#allocation44_spill] sm:$0xff]  ;;  %v14159_v32 = vld [vmem:[#allocation54_spill] sm:$0xff] }
 0x595   :  { %7579 = vmatprep.subr.bf16.mxu1 %v14140_v53 }
 0x596   :  { %8153 = vmatpush1.bf16.msra.mxu0 %v14139_v40  ;;  %v14151_v40 = vld [vmem:[#allocation45_spill] sm:$0xff] }
 0x597   :  { %8155 = vmatprep.subr.bf16.mxu0 %v14141_v51  ;;  %v8160_v53 = vpack.c.bf16 %v14151_v40, %v14150_v41  ;;  %v14153_v51 = vld [vmem:[#allocation48_spill] sm:$0xff]  ;;  %v14161_v40 = vld [vmem:[#allocation57_spill] sm:$0xff] }
 0x598   :  { %7581 = vmatpush1.bf16.msra.mxu1 %v14146_v50  ;;  %v7586_v12 = vpack.c.bf16 %v14153_v51, %v14152_v22  ;;  %v14157_v50 = vld [vmem:[#allocation244_spill] sm:$0xff]  ;;  %v14162_v51 = vld [vmem:[#allocation59_spill] sm:$0xff] }
 0x599   :  { %7583 = vmatprep.subr.bf16.mxu1 %v7582_v59  ;;  %v14163_v22 = vld [vmem:[#allocation60_spill] sm:$0xff] }
 0x59a   :  { %8157 = vmatpush1.bf16.msra.mxu0 %v14147_v45  ;;  %v14158_v45 = vld [vmem:[#allocation52_spill] sm:$0xff]  ;;  %v7590_v9 = vpack.c.bf16 %v14163_v22, %v14162_v51  ;;  %v14175_v51 = vld [vmem:[#allocation82_spill] sm:$0xff] }
 0x59b   :  { %8159 = vmatprep.subr.bf16.mxu0 %v8158_v62  ;;  %2060 = vmatmul.mubr.f32.vlgmr.msra.gmra.mrb[0].mxu1 %v14156_v43  ;;  %v7588_v59 = vpack.c.bf16 %v14159_v32, %v14158_v45  ;;  %v14160_v62 = vld [vmem:[#allocation55_spill] sm:$0xff]  ;;  %v14169_v32 = vld [vmem:[#allocation69_spill] sm:$0xff]  ;;  %v14173_v22 = vld [vmem:[#allocation80_spill] sm:$0xff] }
 0x59c   :  { %7585 = vmatpush1.bf16.msra.mxu1 %v7584_v3  ;;  %2260 = vmatprep.mubr.f32.mxu1 %v14157_v50  ;;  %v8164_v41 = vpack.c.bf16 %v14161_v40, %v14160_v62  ;;  %v14166_v3 = vld [vmem:[#allocation65_spill] sm:$0xff]  ;;  %v14172_v62 = vld [vmem:[#allocation79_spill] sm:$0xff] }
 0x59d   :  { %4199 = vmatmul.mubr.f32.vlgmr.msra.gmra.mrb[2].mxu0 %v14156_v43  ;;  %7587 = vmatprep.subr.bf16.mxu1 %v7586_v12  ;;  %v8166_v43 = vpack.c.bf16 %v14165_v24, %v14164_v37  ;;  %v7592_v13 = vpack.c.bf16 %v14167_v27, %v14166_v3  ;;  %v14170_v45 = vld [vmem:[#allocation77_spill] sm:$0xff]  ;;  %v8170_v12 = vpack.c.bf16 %v14173_v22, %v14172_v62  ;;  %v14177_v27 = vld [vmem:[#allocation84_spill] sm:$0xff]  ;;  %v14179_v3 = vld [vmem:[#allocation90_spill] sm:$0xff] }
 0x59e   :  { %8161 = vmatpush1.bf16.msra.mxu0 %v8160_v53  ;;  %4399 = vmatprep.mubr.f32.mxu0 %v14157_v50  ;;  %v14168_v53 = vld [vmem:[#allocation68_spill] sm:$0xff]  ;;  %v7594_v40 = vpack.c.bf16 %v14171_v48, %v14170_v45  ;;  %v14183_v45 = vld [vmem:[#allocation94_spill] sm:$0xff] }
 0x59f   :  { %8163 = vmatprep.subr.bf16.mxu0 %v8162_v0  ;;  %v8168_v50 = vpack.c.bf16 %v14169_v32, %v14168_v53  ;;  %v14174_v0 = vld [vmem:[#allocation81_spill] sm:$0xff]  ;;  %v14180_v32 = vld [vmem:[#allocation91_spill] sm:$0xff]  ;;  %v14181_v53 = vld [vmem:[#allocation92_spill] sm:$0xff] }
 0x5a0   :  { %7589 = vmatpush1.bf16.msra.mxu1 %v7588_v59  ;;  %v7596_v24 = vpack.c.bf16 %v14175_v51, %v14174_v0  ;;  %v14176_v59 = vld [vmem:[#allocation83_spill] sm:$0xff]  ;;  %v8174_v48 = vpack.c.bf16 %v14181_v53, %v14180_v32  ;;  %v14185_v51 = vld [vmem:[#allocation96_spill] sm:$0xff]  ;;  %v14187_v0 = vld [vmem:[#allocation101_spill] sm:$0xff] }
 0x5a1   :  { %7591 = vmatprep.subr.bf16.mxu1 %v7590_v9  ;;  %v14178_v9 = vld [vmem:[#allocation89_spill] sm:$0xff] }
 0x5a2   :  { %8165 = vmatpush1.bf16.msra.mxu0 %v8164_v41  ;;  %v8172_v41 = vpack.c.bf16 %v14177_v27, %v14176_v59  ;;  %v7598_v37 = vpack.c.bf16 %v14179_v3, %v14178_v9  ;;  %v14188_v27 = vld [vmem:[#allocation102_spill] sm:$0xff]  ;;  %v14189_v59 = vld [vmem:[#allocation103_spill] sm:$0xff]  ;;  %v14191_v9 = vld [vmem:[#allocation105_spill] sm:$0xff] }
 0x5a3   :  { %8167 = vmatprep.subr.bf16.mxu0 %v8166_v43  ;;  %v14182_v43 = vld [vmem:[#allocation93_spill] sm:$0xff]  ;;  %v8178_v3 = vpack.c.bf16 %v14189_v59, %v14188_v27 }
 0x5a4   :  { %7593 = vmatpush1.bf16.msra.mxu1 %v7592_v13  ;;  %v7600_v22 = vpack.c.bf16 %v14183_v45, %v14182_v43  ;;  %v14184_v13 = vld [vmem:[#allocation95_spill] sm:$0xff] }
 0x5a5   :  { %7595 = vmatprep.subr.bf16.mxu1 %v7594_v40  ;;  %v14186_v40 = vld [vmem:[#allocation100_spill] sm:$0xff]  ;;  %v14193_v45 = vld [vmem:[#allocation107_spill] sm:$0xff] }
 0x5a6   :  { %8169 = vmatpush1.bf16.msra.mxu0 %v8168_v50  ;;  %v8176_v50 = vpack.c.bf16 %v14185_v51, %v14184_v13  ;;  %v7602_v62 = vpack.c.bf16 %v14187_v0, %v14186_v40  ;;  %v14195_v43 = vld [vmem:[#allocation111_spill] sm:$0xff]  ;;  %v14196_v51 = vld [vmem:[#allocation112_spill] sm:$0xff]  ;;  %v14197_v13 = vld [vmem:[#allocation113_spill] sm:$0xff] }
 0x5a7   :  { %8171 = vmatprep.subr.bf16.mxu0 %v8170_v12  ;;  %v14190_v12 = vld [vmem:[#allocation104_spill] sm:$0xff]  ;;  %v8182_v0 = vpack.c.bf16 %v14197_v13, %v14196_v51  ;;  %v14199_v40 = vld [vmem:[#allocation115_spill] sm:$0xff] }
 0x5a8   :  { %7597 = vmatpush1.bf16.msra.mxu1 %v7596_v24  ;;  %v7604_v53 = vpack.c.bf16 %v14191_v9, %v14190_v12  ;;  %v14192_v24 = vld [vmem:[#allocation106_spill] sm:$0xff]  ;;  %v14201_v9 = vld [vmem:[#allocation117_spill] sm:$0xff] }
 0x5a9   :  { %7599 = vmatprep.subr.bf16.mxu1 %v7598_v37  ;;  %v14194_v37 = vld [vmem:[#allocation110_spill] sm:$0xff] }
 0x5aa   :  { %8173 = vmatpush1.bf16.msra.mxu0 %v8172_v41  ;;  %v8180_v41 = vpack.c.bf16 %v14193_v45, %v14192_v24  ;;  %v7606_v32 = vpack.c.bf16 %v14195_v43, %v14194_v37  ;;  %v14203_v12 = vld [vmem:[#allocation122_spill] sm:$0xff]  ;;  %v14204_v45 = vld [vmem:[#allocation123_spill] sm:$0xff]  ;;  %v14205_v24 = vld [vmem:[#allocation124_spill] sm:$0xff] }
 0x5ab   :  { %8175 = vmatprep.subr.bf16.mxu0 %v8174_v48  ;;  %v14198_v48 = vld [vmem:[#allocation114_spill] sm:$0xff]  ;;  %v8186_v43 = vpack.c.bf16 %v14205_v24, %v14204_v45 }
 0x5ac   :  { %7601 = vmatpush1.bf16.msra.mxu1 %v7600_v22  ;;  %v7608_v59 = vpack.c.bf16 %v14199_v40, %v14198_v48  ;;  %v14200_v22 = vld [vmem:[#allocation116_spill] sm:$0xff]  ;;  %v14207_v37 = vld [vmem:[#allocation126_spill] sm:$0xff]  ;;  %v14209_v40 = vld [vmem:[#allocation129_spill] sm:$0xff] }
 0x5ad   :  { %7603 = vmatprep.subr.bf16.mxu1 %v7602_v62  ;;  %v14202_v62 = vld [vmem:[#allocation121_spill] sm:$0xff] }
 0x5ae   :  { %8177 = vmatpush1.bf16.msra.mxu0 %v8176_v50  ;;  %v8184_v50 = vpack.c.bf16 %v14201_v9, %v14200_v22  ;;  %v7610_v27 = vpack.c.bf16 %v14203_v12, %v14202_v62  ;;  %v14211_v48 = vld [vmem:[#allocation133_spill] sm:$0xff]  ;;  %v14212_v9 = vld [vmem:[#allocation134_spill] sm:$0xff]  ;;  %v14213_v22 = vld [vmem:[#allocation135_spill] sm:$0xff] }
 0x5af   :  { %8179 = vmatprep.subr.bf16.mxu0 %v8178_v3  ;;  %v14206_v3 = vld [vmem:[#allocation125_spill] sm:$0xff]  ;;  %v8190_v12 = vpack.c.bf16 %v14213_v22, %v14212_v9  ;;  %v14215_v62 = vld [vmem:[#allocation138_spill] sm:$0xff] }
 0x5b0   :  { %7605 = vmatpush1.bf16.msra.mxu1 %v7604_v53  ;;  %v7612_v13 = vpack.c.bf16 %v14207_v37, %v14206_v3  ;;  %v14208_v53 = vld [vmem:[#allocation128_spill] sm:$0xff]  ;;  %v14217_v37 = vld [vmem:[#allocation141_spill] sm:$0xff] }
 0x5b1   :  { %7607 = vmatprep.subr.bf16.mxu1 %v7606_v32  ;;  %v14210_v32 = vld [vmem:[#allocation132_spill] sm:$0xff] }
 0x5b2   :  { %8181 = vmatpush1.bf16.msra.mxu0 %v8180_v41  ;;  %v8188_v41 = vpack.c.bf16 %v14209_v40, %v14208_v53  ;;  %v7614_v51 = vpack.c.bf16 %v14211_v48, %v14210_v32  ;;  %v14219_v3 = vld [vmem:[#allocation144_spill] sm:$0xff]  ;;  %v14220_v40 = vld [vmem:[#allocation146_spill] sm:$0xff]  ;;  %v14221_v53 = vld [vmem:[#allocation147_spill] sm:$0xff] }
 0x5b3   :  { %8183 = vmatprep.subr.bf16.mxu0 %v8182_v0  ;;  %v14214_v0 = vld [vmem:[#allocation137_spill] sm:$0xff]  ;;  %v8194_v48 = vpack.c.bf16 %v14221_v53, %v14220_v40  ;;  %v14223_v32 = vld [vmem:[#allocation150_spill] sm:$0xff] }
 0x5b4   :  { %7609 = vmatpush1.bf16.msra.mxu1 %v7608_v59  ;;  %v7616_v24 = vpack.c.bf16 %v14215_v62, %v14214_v0  ;;  %v14216_v59 = vld [vmem:[#allocation140_spill] sm:$0xff]  ;;  %v14225_v62 = vld [vmem:[#allocation153_spill] sm:$0xff] }
 0x5b5   :  { %7611 = vmatprep.subr.bf16.mxu1 %v7610_v27  ;;  %v14218_v27 = vld [vmem:[#allocation143_spill] sm:$0xff] }
 0x5b6   :  { %8185 = vmatpush1.bf16.msra.mxu0 %v8184_v50  ;;  %v8192_v50 = vpack.c.bf16 %v14217_v37, %v14216_v59  ;;  %v7618_v45 = vpack.c.bf16 %v14219_v3, %v14218_v27 }
 0x5b7   :  { %8187 = vmatprep.subr.bf16.mxu0 %v8186_v43  ;;  %v14222_v43 = vld [vmem:[#allocation149_spill] sm:$0xff] }
 0x5b8   :  { %7613 = vmatpush1.bf16.msra.mxu1 %v7612_v13  ;;  %v7620_v22 = vpack.c.bf16 %v14223_v32, %v14222_v43  ;;  %v14224_v13 = vld [vmem:[#allocation152_spill] sm:$0xff] }
 0x5b9   :  { %7615 = vmatprep.subr.bf16.mxu1 %v7614_v51  ;;  %v14226_v51 = vpack.c.bf16 %v10083_v23, %v10081_v47 }
 0x5ba   :  { %8189 = vmatpush1.bf16.msra.mxu0 %v8188_v41  ;;  %v8196_v41 = vpack.c.bf16 %v14225_v62, %v14224_v13 }
 0x5bb   :  { %8191 = vmatprep.subr.bf16.mxu0 %v8190_v12  ;;  %v14227_v12 = vpack.c.bf16 %v10087_v19, %v10085_v1 }
 0x5bc   :  { %7617 = vmatpush1.bf16.msra.mxu1 %v7616_v24  ;;  %v14228_v24 = vpack.c.bf16 %v10093_v11, %v10091_v49 }
 0x5bd   :  { %7619 = vmatprep.subr.bf16.mxu1 %v7618_v45  ;;  %v14229_v45 = vpack.c.bf16 %v14104_v33, %v13998_v20 }
 0x5be   :  { %8193 = vmatpush1.bf16.msra.mxu0 %v8192_v50  ;;  %v14232_v50 = vpack.c.bf16 %v14109_v2, %v14108_v46 }
 0x5bf   :  { %8195 = vmatprep.subr.bf16.mxu0 %v8194_v48  ;;  %v14230_v48 = vpack.c.bf16 %v14105_v14, %v14001_v52 }
 0x5c0   :  { %7621 = vmatpush1.bf16.msra.mxu1 %v7620_v22  ;;  %v14231_v22 = vpack.c.bf16 %v14107_v56, %v14106_v60 }
 0x5c1   :  { %7623 = vmatprep.subr.bf16.mxu1 %v14226_v51  ;;  %v14234_v51 = vpack.c.bf16 %v14113_v35, %v14112_v17 }
 0x5c2   :  { %8197 = vmatpush1.bf16.msra.mxu0 %v8196_v41  ;;  %v14233_v41 = vpack.c.bf16 %v14111_v55, %v14110_v54 }
 0x5c3   :  { %8199 = vmatprep.subr.bf16.mxu0 %v14227_v12  ;;  %v14235_v12 = vpack.c.bf16 %v14115_v15, %v14114_v38 }
 0x5c4   :  { %7625 = vmatpush1.bf16.msra.mxu1 %v14228_v24  ;;  %v14236_v24 = vpack.c.bf16 %v14023_v57, %v14116_v21 }
 0x5c5   :  { %7627 = vmatprep.subr.bf16.mxu1 %v14230_v48  ;;  %v14238_v48 = vpack.c.bf16 %v14030_v31, %v14027_v18 }
 0x5c6   :  { %8201 = vmatpush1.bf16.msra.mxu0 %v14229_v45  ;;  %v14237_v45 = vpack.c.bf16 %v14025_v8, %v14024_v26 }
 0x5c7   :  { %8203 = vmatprep.subr.bf16.mxu0 %v14231_v22  ;;  %v14239_v22 = vpack.c.bf16 %v14033_v6, %v14031_v44 }
 0x5c8   :  { %7629 = vmatpush1.bf16.msra.mxu1 %v14232_v50  ;;  %v14240_v50 = vpack.c.bf16 %v10176_v36, %v14034_v7 }
 0x5c9   :  { %7631 = vmatprep.subr.bf16.mxu1 %v14234_v51  ;;  %v14242_v51 = vpack.c.bf16 %v14040_v58, %v14037_v29 }
 0x5ca   :  { %8205 = vmatpush1.bf16.msra.mxu0 %v14233_v41  ;;  %v14241_v41 = vpack.c.bf16 %v10182_v34, %v10180_v61 }
 0x5cb   :  { %8207 = vmatprep.subr.bf16.mxu0 %v14235_v12  ;;  %v14243_v12 = vpack.c.bf16 %v14043_v5, %v14042_v28  ;;  %v14252_v5 = vld [vmem:[#allocation217_spill] sm:$0xff] }
 0x5cc   :  { %7633 = vmatpush1.bf16.msra.mxu1 %v14236_v24  ;;  %v14244_v24 = vpack.c.bf16 %v14117_v4, %v14046_v30  ;;  %v14329_v30 = vld [vmem:[#allocation42_spill] sm:$0xff] }
 0x5cd   :  { %7635 = vmatprep.subr.bf16.mxu1 %v14238_v48  ;;  %v14246_v48 = vpack.c.bf16 %v14055_v39, %v14053_v63 }
 0x5ce   :  { %8209 = vmatpush1.bf16.msra.mxu0 %v14237_v45  ;;  %v14245_v45 = vpack.c.bf16 %v14050_v10, %v14049_v16  ;;  %v14255_v10 = vld [vmem:[#allocation38_spill] sm:$0xff] }
 0x5cf   :  { %8211 = vmatprep.subr.bf16.mxu0 %v14239_v22  ;;  %v14247_v22 = vpack.c.bf16 %v14058_v42, %v14056_v25  ;;  %v14258_v42 = vld [vmem:[#allocation247_spill] sm:$0xff]  ;;  %v14326_v16 = vld [vmem:[#allocation214_spill] sm:$0xff] }
 0x5d0   :  { %7637 = vmatpush1.bf16.msra.mxu1 %v14240_v50  ;;  %v14248_v50 = vld [vmem:[#allocation215_spill] sm:$0xff] }
 0x5d1   :  { %7639 = vmatprep.subr.bf16.mxu1 %v14242_v51 }
 0x5d2   :  { %8213 = vmatpush1.bf16.msra.mxu0 %v14241_v41  ;;  %v14249_v41 = vld [vmem:[#allocation213_spill] sm:$0xff] }
 0x5d3   :  { %8215 = vmatprep.subr.bf16.mxu0 %v14243_v12  ;;  %v14250_v51 = vpack.c.bf16 %v14248_v50, %v14249_v41  ;;  %v14251_v12 = vld [vmem:[#allocation218_spill] sm:$0xff]  ;;  %v14319_v41 = vld [vmem:[#allocation36_spill] sm:$0xff] }
 0x5d4   :  { %7641 = vmatpush1.bf16.msra.mxu1 %v14244_v24  ;;  %v14253_v4 = vpack.c.bf16 %v14251_v12, %v14252_v5  ;;  %v14254_v24 = vld [vmem:[#allocation34_spill] sm:$0xff]  ;;  %v14261_v12 = vld [vmem:[#allocation49_spill] sm:$0xff] }
 0x5d5   :  { %7643 = vmatprep.subr.bf16.mxu1 %v14246_v48  ;;  %v14257_v48 = vld [vmem:[#allocation40_spill] sm:$0xff]  ;;  %v14265_v5 = vld [vmem:[#allocation61_spill] sm:$0xff]  ;;  %v14268_v50 = vld [vmem:[#allocation70_spill] sm:$0xff] }
 0x5d6   :  { %8217 = vmatpush1.bf16.msra.mxu0 %v14245_v45  ;;  %v14256_v45 = vld [vmem:[#allocation220_spill] sm:$0xff] }
 0x5d7   :  { %8219 = vmatprep.subr.bf16.mxu0 %v14247_v22  ;;  %v14259_v22 = vld [vmem:[#allocation43_spill] sm:$0xff] }
 0x5d8   :  { %7645 = vmatpush1.bf16.msra.mxu1 %v14250_v51  ;;  %v14260_v51 = vld [vmem:[#allocation47_spill] sm:$0xff] }
 0x5d9   :  { %7647 = vmatprep.subr.bf16.mxu1 %v14254_v24  ;;  %v14263_v24 = vld [vmem:[#allocation56_spill] sm:$0xff] }
 0x5da   :  { %8221 = vmatpush1.bf16.msra.mxu0 %v14253_v4  ;;  %v14262_v4 = vld [vmem:[#allocation53_spill] sm:$0xff] }
 0x5db   :  { %8223 = vmatprep.subr.bf16.mxu0 %v14255_v10  ;;  %2263 = vmatmul.mubr.f32.vlgmr.msra.gmra.mrb[0].mxu1 %v14256_v45  ;;  %v14264_v10 = vld [vmem:[#allocation58_spill] sm:$0xff] }
 0x5dc   :  { %7649 = vmatpush1.bf16.msra.mxu1 %v14257_v48  ;;  %2400 = vmatprep.mubr.f32.mxu1 %v14258_v42  ;;  %v14267_v48 = vld [vmem:[#allocation67_spill] sm:$0xff] }
 0x5dd   :  { %4402 = vmatmul.mubr.f32.vlgmr.msra.gmra.mrb[2].mxu0 %v14256_v45  ;;  %7651 = vmatprep.subr.bf16.mxu1 %v14260_v51  ;;  %v14266_v45 = vld [vmem:[#allocation64_spill] sm:$0xff]  ;;  %v14271_v51 = vld [vmem:[#allocation73_spill] sm:$0xff] }
 0x5de   :  { %8225 = vmatpush1.bf16.msra.mxu0 %v14259_v22  ;;  %4539 = vmatprep.mubr.f32.mxu0 %v14258_v42  ;;  %v14269_v22 = vld [vmem:[#allocation71_spill] sm:$0xff]  ;;  %v14270_v42 = vld [vmem:[#allocation72_spill] sm:$0xff] }
 0x5df   :  { %8227 = vmatprep.subr.bf16.mxu0 %v14261_v12  ;;  %v14272_v12 = vld [vmem:[#allocation74_spill] sm:$0xff] }
 0x5e0   :  { %7653 = vmatpush1.bf16.msra.mxu1 %v14262_v4  ;;  %v14273_v4 = vld [vmem:[#allocation75_spill] sm:$0xff] }
 0x5e1   :  { %7655 = vmatprep.subr.bf16.mxu1 %v14264_v10  ;;  %v14275_v10 = vld [vmem:[#allocation85_spill] sm:$0xff] }
 0x5e2   :  { %8229 = vmatpush1.bf16.msra.mxu0 %v14263_v24  ;;  %v14274_v24 = vld [vmem:[#allocation76_spill] sm:$0xff] }
 0x5e3   :  { %8231 = vmatprep.subr.bf16.mxu0 %v14265_v5  ;;  %v14276_v5 = vld [vmem:[#allocation86_spill] sm:$0xff] }
 0x5e4   :  { %7657 = vmatpush1.bf16.msra.mxu1 %v14266_v45  ;;  %v14277_v45 = vld [vmem:[#allocation87_spill] sm:$0xff] }
 0x5e5   :  { %7659 = vmatprep.subr.bf16.mxu1 %v14268_v50  ;;  %v14279_v50 = vld [vmem:[#allocation97_spill] sm:$0xff] }
 0x5e6   :  { %8233 = vmatpush1.bf16.msra.mxu0 %v14267_v48  ;;  %v14278_v48 = vld [vmem:[#allocation88_spill] sm:$0xff] }
 0x5e7   :  { %8235 = vmatprep.subr.bf16.mxu0 %v14269_v22  ;;  %v14280_v22 = vld [vmem:[#allocation98_spill] sm:$0xff] }
 0x5e8   :  { %7661 = vmatpush1.bf16.msra.mxu1 %v14270_v42  ;;  %v14281_v42 = vld [vmem:[#allocation99_spill] sm:$0xff] }
 0x5e9   :  { %7663 = vmatprep.subr.bf16.mxu1 %v14272_v12  ;;  %v14283_v12 = vld [vmem:[#allocation109_spill] sm:$0xff] }
 0x5ea   :  { %8237 = vmatpush1.bf16.msra.mxu0 %v14271_v51  ;;  %v14282_v51 = vld [vmem:[#allocation108_spill] sm:$0xff] }
 0x5eb   :  { %8239 = vmatprep.subr.bf16.mxu0 %v14273_v4  ;;  %v14284_v4 = vld [vmem:[#allocation118_spill] sm:$0xff] }
 0x5ec   :  { %7665 = vmatpush1.bf16.msra.mxu1 %v14274_v24  ;;  %v14285_v24 = vld [vmem:[#allocation119_spill] sm:$0xff] }
 0x5ed   :  { %7667 = vmatprep.subr.bf16.mxu1 %v14276_v5  ;;  %v14287_v5 = vld [vmem:[#allocation127_spill] sm:$0xff] }
 0x5ee   :  { %8241 = vmatpush1.bf16.msra.mxu0 %v14275_v10  ;;  %v14286_v10 = vld [vmem:[#allocation120_spill] sm:$0xff] }
 0x5ef   :  { %8243 = vmatprep.subr.bf16.mxu0 %v14277_v45  ;;  %v14288_v45 = vld [vmem:[#allocation130_spill] sm:$0xff] }
 0x5f0   :  { %7669 = vmatpush1.bf16.msra.mxu1 %v14278_v48  ;;  %v14289_v48 = vld [vmem:[#allocation131_spill] sm:$0xff] }
 0x5f1   :  { %7671 = vmatprep.subr.bf16.mxu1 %v14280_v22  ;;  %v14291_v22 = vld [vmem:[#allocation139_spill] sm:$0xff] }
 0x5f2   :  { %8245 = vmatpush1.bf16.msra.mxu0 %v14279_v50  ;;  %v14290_v50 = vld [vmem:[#allocation136_spill] sm:$0xff] }
 0x5f3   :  { %8247 = vmatprep.subr.bf16.mxu0 %v14281_v42  ;;  %v14292_v42 = vld [vmem:[#allocation142_spill] sm:$0xff] }
 0x5f4   :  { %7673 = vmatpush1.bf16.msra.mxu1 %v14282_v51  ;;  %v14293_v51 = vld [vmem:[#allocation145_spill] sm:$0xff] }
 0x5f5   :  { %7675 = vmatprep.subr.bf16.mxu1 %v14284_v4  ;;  %v14295_v4 = vld [vmem:[#allocation151_spill] sm:$0xff] }
 0x5f6   :  { %8249 = vmatpush1.bf16.msra.mxu0 %v14283_v12  ;;  %v14294_v12 = vld [vmem:[#allocation148_spill] sm:$0xff] }
 0x5f7   :  { %8251 = vmatprep.subr.bf16.mxu0 %v14285_v24  ;;  %v14296_v24 = vld [vmem:[#allocation154_spill] sm:$0xff] }
 0x5f8   :  { %7677 = vmatpush1.bf16.msra.mxu1 %v14286_v10  ;;  %v14297_v10 = vld [vmem:[#allocation155_spill] sm:$0xff] }
 0x5f9   :  { %7679 = vmatprep.subr.bf16.mxu1 %v14288_v45  ;;  %v14299_v45 = vld [vmem:[#allocation157_spill] sm:$0xff] }
 0x5fa   :  { %8253 = vmatpush1.bf16.msra.mxu0 %v14287_v5  ;;  %v14298_v5 = vld [vmem:[#allocation156_spill] sm:$0xff] }
 0x5fb   :  { %8255 = vmatprep.subr.bf16.mxu0 %v14289_v48  ;;  %v14300_v48 = vld [vmem:[#allocation160_spill] sm:$0xff] }
 0x5fc   :  { %7681 = vmatpush1.bf16.msra.mxu1 %v14290_v50  ;;  %v14301_v50 = vld [vmem:[#allocation163_spill] sm:$0xff] }
 0x5fd   :  { %7683 = vmatprep.subr.bf16.mxu1 %v14292_v42  ;;  %v14303_v42 = vld [vmem:[#allocation169_spill] sm:$0xff] }
 0x5fe   :  { %8257 = vmatpush1.bf16.msra.mxu0 %v14291_v22  ;;  %v14302_v22 = vld [vmem:[#allocation167_spill] sm:$0xff] }
 0x5ff   :  { %8259 = vmatprep.subr.bf16.mxu0 %v14293_v51  ;;  %v14304_v51 = vld [vmem:[#allocation172_spill] sm:$0xff] }
 0x600   :  { %7685 = vmatpush1.bf16.msra.mxu1 %v14294_v12  ;;  %v14305_v12 = vld [vmem:[#allocation175_spill] sm:$0xff] }
 0x601   :  { %7687 = vmatprep.subr.bf16.mxu1 %v14296_v24  ;;  %v14307_v24 = vld [vmem:[#allocation181_spill] sm:$0xff] }
 0x602   :  { %8261 = vmatpush1.bf16.msra.mxu0 %v14295_v4  ;;  %v14306_v4 = vld [vmem:[#allocation179_spill] sm:$0xff] }
 0x603   :  { %8263 = vmatprep.subr.bf16.mxu0 %v14297_v10  ;;  %v14308_v10 = vld [vmem:[#allocation184_spill] sm:$0xff] }
 0x604   :  { %7689 = vmatpush1.bf16.msra.mxu1 %v14298_v5  ;;  %v14309_v5 = vld [vmem:[#allocation187_spill] sm:$0xff] }
 0x605   :  { %7691 = vmatprep.subr.bf16.mxu1 %v14300_v48  ;;  %v14311_v48 = vld [vmem:[#allocation192_spill] sm:$0xff] }
 0x606   :  { %8265 = vmatpush1.bf16.msra.mxu0 %v14299_v45  ;;  %v14310_v45 = vld [vmem:[#allocation191_spill] sm:$0xff] }
 0x607   :  { %8267 = vmatprep.subr.bf16.mxu0 %v14301_v50  ;;  %v14312_v50 = vld [vmem:[#allocation195_spill] sm:$0xff] }
 0x608   :  { %7693 = vmatpush1.bf16.msra.mxu1 %v14302_v22  ;;  %v14313_v22 = vld [vmem:[#allocation198_spill] sm:$0xff] }
 0x609   :  { %7695 = vmatprep.subr.bf16.mxu1 %v14304_v51  ;;  %v14315_v51 = vld [vmem:[#allocation204_spill] sm:$0xff] }
 0x60a   :  { %8269 = vmatpush1.bf16.msra.mxu0 %v14303_v42  ;;  %v14314_v42 = vld [vmem:[#allocation202_spill] sm:$0xff] }
 0x60b   :  { %8271 = vmatprep.subr.bf16.mxu0 %v14305_v12  ;;  %v14316_v12 = vld [vmem:[#allocation207_spill] sm:$0xff] }
 0x60c   :  { %7697 = vmatpush1.bf16.msra.mxu1 %v14306_v4  ;;  %v14317_v4 = vld [vmem:[#allocation35_spill] sm:$0xff] }
 0x60d   :  { %7699 = vmatprep.subr.bf16.mxu1 %v14308_v10  ;;  %v14320_v10 = vand.u32 4294901760, %v14319_v41 }
 0x60e   :  { %8273 = vmatpush1.bf16.msra.mxu0 %v14307_v24  ;;  %v14318_v24 = vand.u32 4294901760, %v14317_v4  ;;  %v14332_v4 = vld [vmem:[#allocation44_spill] sm:$0xff] }
 0x60f   :  { %8275 = vmatprep.subr.bf16.mxu0 %v14309_v5  ;;  %v14321_v5 = vld [vmem:[#allocation210_spill] sm:$0xff]  ;;  %v14333_v41 = vand.u32 4294901760, %v14332_v4 }
 0x610   :  { %7701 = vmatpush1.bf16.msra.mxu1 %v14310_v45  ;;  %v7710_v25 = vpack.c.bf16 %v14320_v10, %v14318_v24  ;;  %v14322_v45 = vld [vmem:[#allocation37_spill] sm:$0xff] }
 0x611   :  { %7703 = vmatprep.subr.bf16.mxu1 %v14312_v50  ;;  %v14323_v39 = vand.u32 4294901760, %v14322_v45  ;;  %v14334_v10 = vld [vmem:[#allocation45_spill] sm:$0xff]  ;;  %v14336_v45 = vld [vmem:[#allocation46_spill] sm:$0xff] }
 0x612   :  { %8277 = vmatpush1.bf16.msra.mxu0 %v14311_v48  ;;  %v14324_v48 = vld [vmem:[#allocation39_spill] sm:$0xff]  ;;  %v14335_v24 = vand.u32 4294901760, %v14334_v10  ;;  %v14337_v58 = vand.u32 4294901760, %v14336_v45  ;;  %v14347_v10 = vld [vmem:[#allocation54_spill] sm:$0xff] }
 0x613   :  { %8279 = vmatprep.subr.bf16.mxu0 %v14313_v22  ;;  %v14325_v63 = vand.u32 4294901760, %v14324_v48  ;;  %v14327_v22 = vld [vmem:[#allocation41_spill] sm:$0xff]  ;;  %v14338_v48 = vld [vmem:[#allocation48_spill] sm:$0xff]  ;;  %v14350_v45 = vld [vmem:[#allocation55_spill] sm:$0xff] }
 0x614   :  { %7705 = vmatpush1.bf16.msra.mxu1 %v14314_v42  ;;  %v14328_v42 = vand.u32 4294901760, %v14327_v22  ;;  %v14341_v22 = vld [vmem:[#allocation50_spill] sm:$0xff] }
 0x615   :  { %7707 = vmatprep.subr.bf16.mxu1 %v14316_v12  ;;  %v8286_v50 = vpack.c.bf16 %v14325_v63, %v14323_v39  ;;  %v14331_v12 = vld [vmem:[#allocation216_spill] sm:$0xff]  ;;  %v14339_v39 = vand.u32 4294901760, %v14338_v48  ;;  %v14342_v29 = vand.u32 4294901760, %v14341_v22  ;;  %v14352_v48 = vld [vmem:[#allocation57_spill] sm:$0xff]  ;;  %v14354_v22 = vld [vmem:[#allocation59_spill] sm:$0xff] }
 0x616   :  { %8281 = vmatpush1.bf16.msra.mxu0 %v14315_v51  ;;  %v14330_v51 = vand.u32 4294901760, %v14329_v30  ;;  %v14343_v30 = vld [vmem:[#allocation51_spill] sm:$0xff]  ;;  %v14355_v34 = vand.u32 4294901760, %v14354_v22 }
 0x617   :  { %8283 = vmatprep.subr.bf16.mxu0 %v14321_v5  ;;  %v8288_v5 = vpack.c.bf16 %v14335_v24, %v14333_v41  ;;  %v7714_v63 = vpack.c.bf16 %v14339_v39, %v14337_v58  ;;  %v14348_v41 = vand.u32 4294901760, %v14347_v10  ;;  %v14349_v24 = vld [vmem:[#allocation242_spill] sm:$0xff]  ;;  %v14351_v58 = vand.u32 4294901760, %v14350_v45 }
 0x618   :  { %7709 = vmatpush1.bf16.msra.mxu1 %v14326_v16  ;;  %v7712_v28 = vpack.c.bf16 %v14330_v51, %v14328_v42  ;;  %v14340_v16 = vld [vmem:[#allocation221_spill] sm:$0xff]  ;;  %v14344_v42 = vand.u32 4294901760, %v14343_v30  ;;  %v14353_v39 = vand.u32 4294901760, %v14352_v48  ;;  %v14356_v30 = vld [vmem:[#allocation60_spill] sm:$0xff]  ;;  %v14364_v45 = vld [vmem:[#allocation66_spill] sm:$0xff] }
 0x619   :  { %7711 = vmatprep.subr.bf16.mxu1 %v7710_v25  ;;  %v14345_v25 = vld [vmem:[#allocation52_spill] sm:$0xff]  ;;  %v14365_v48 = vand.u32 4294901760, %v14364_v45 }
 0x61a   :  { %8285 = vmatpush1.bf16.msra.mxu0 %v14331_v12  ;;  %v8290_v51 = vpack.c.bf16 %v14344_v42, %v14342_v29  ;;  %v14346_v4 = vand.u32 4294901760, %v14345_v25  ;;  %v8292_v12 = vpack.c.bf16 %v14353_v39, %v14351_v58  ;;  %v14357_v29 = vand.u32 4294901760, %v14356_v30  ;;  %v14360_v25 = vld [vmem:[#allocation63_spill] sm:$0xff]  ;;  %v14366_v39 = vld [vmem:[#allocation68_spill] sm:$0xff] }
 0x61b   :  { %8287 = vmatprep.subr.bf16.mxu0 %v8286_v50  ;;  %2404 = vmatmul.mubr.f32.vlgmr.msra.gmra.mrb[0].mxu1 %v14340_v16  ;;  %v14367_v22 = vand.u32 4294901760, %v14366_v39  ;;  %v14382_v39 = vld [vmem:[#allocation83_spill] sm:$0xff] }
 0x61c   :  { %7713 = vmatpush1.bf16.msra.mxu1 %v7712_v28  ;;  %v7716_v50 = vpack.c.bf16 %v14348_v41, %v14346_v4  ;;  %2667 = vmatprep.mubr.f32.mxu1 %v14349_v24  ;;  %v7718_v42 = vpack.c.bf16 %v14357_v29, %v14355_v34  ;;  %v14358_v28 = vld [vmem:[#allocation62_spill] sm:$0xff]  ;;  %v14361_v4 = vand.u32 4294901760, %v14360_v25  ;;  %v14368_v34 = vld [vmem:[#allocation69_spill] sm:$0xff] }
 0x61d   :  { %4543 = vmatmul.mubr.f32.vlgmr.msra.gmra.mrb[2].mxu0 %v14340_v16  ;;  %7715 = vmatprep.subr.bf16.mxu1 %v7714_v63  ;;  %v14359_v16 = vand.u32 4294901760, %v14358_v28  ;;  %v14369_v30 = vand.u32 4294901760, %v14368_v34  ;;  %v14370_v63 = vld [vmem:[#allocation77_spill] sm:$0xff]  ;;  %v14372_v28 = vld [vmem:[#allocation78_spill] sm:$0xff]  ;;  %v14384_v34 = vld [vmem:[#allocation84_spill] sm:$0xff] }
 0x61e   :  { %8289 = vmatpush1.bf16.msra.mxu0 %v8288_v5  ;;  %4806 = vmatprep.mubr.f32.mxu0 %v14349_v24  ;;  %v14362_v5 = vld [vmem:[#allocation65_spill] sm:$0xff]  ;;  %v14371_v24 = vand.u32 4294901760, %v14370_v63  ;;  %v14373_v61 = vand.u32 4294901760, %v14372_v28 }
 0x61f   :  { %v8294_v10 = vpack.c.bf16 %v14361_v4, %v14359_v16  ;;  %8291 = vmatprep.subr.bf16.mxu0 %v8290_v51  ;;  %v14363_v41 = vand.u32 4294901760, %v14362_v5  ;;  %v8296_v29 = vpack.c.bf16 %v14369_v30, %v14367_v22  ;;  %v14374_v51 = vld [vmem:[#allocation79_spill] sm:$0xff]  ;;  %v14376_v16 = vld [vmem:[#allocation80_spill] sm:$0xff]  ;;  %v14383_v22 = vand.u32 4294901760, %v14382_v39 }
 0x620   :  { %7717 = vmatpush1.bf16.msra.mxu1 %v7716_v50  ;;  %v7722_v25 = vpack.c.bf16 %v14373_v61, %v14371_v24  ;;  %v14375_v50 = vand.u32 4294901760, %v14374_v51  ;;  %v14377_v4 = vand.u32 4294901760, %v14376_v16  ;;  %v14385_v30 = vand.u32 4294901760, %v14384_v34  ;;  %v14386_v61 = vld [vmem:[#allocation89_spill] sm:$0xff]  ;;  %v14392_v16 = vld [vmem:[#allocation92_spill] sm:$0xff]  ;;  %v14398_v39 = vld [vmem:[#allocation95_spill] sm:$0xff] }
 0x621   :  { %v7720_v58 = vpack.c.bf16 %v14365_v48, %v14363_v41  ;;  %7719 = vmatprep.subr.bf16.mxu1 %v7718_v42  ;;  %v14378_v41 = vld [vmem:[#allocation81_spill] sm:$0xff]  ;;  %v14380_v42 = vld [vmem:[#allocation82_spill] sm:$0xff]  ;;  %v14387_v24 = vand.u32 4294901760, %v14386_v61  ;;  %v14400_v34 = vld [vmem:[#allocation96_spill] sm:$0xff] }
 0x622   :  { %8293 = vmatpush1.bf16.msra.mxu0 %v8292_v12  ;;  %v8298_v5 = vpack.c.bf16 %v14377_v4, %v14375_v50  ;;  %v14379_v12 = vand.u32 4294901760, %v14378_v41  ;;  %v14381_v45 = vand.u32 4294901760, %v14380_v42  ;;  %v8300_v63 = vpack.c.bf16 %v14385_v30, %v14383_v22  ;;  %v14390_v50 = vld [vmem:[#allocation91_spill] sm:$0xff] }
 0x623   :  { %8295 = vmatprep.subr.bf16.mxu0 %v8294_v10  ;;  %v14388_v10 = vld [vmem:[#allocation90_spill] sm:$0xff]  ;;  %v14393_v4 = vand.u32 4294901760, %v14392_v16  ;;  %v14399_v22 = vand.u32 4294901760, %v14398_v39  ;;  %v14401_v30 = vand.u32 4294901760, %v14400_v34  ;;  %v14408_v16 = vld [vmem:[#allocation103_spill] sm:$0xff] }
 0x624   :  { %7721 = vmatpush1.bf16.msra.mxu1 %v7720_v58  ;;  %v7724_v48 = vpack.c.bf16 %v14381_v45, %v14379_v12  ;;  %v14389_v28 = vand.u32 4294901760, %v14388_v10  ;;  %v14391_v58 = vand.u32 4294901760, %v14390_v50  ;;  %v14394_v12 = vld [vmem:[#allocation93_spill] sm:$0xff]  ;;  %v14414_v39 = vld [vmem:[#allocation106_spill] sm:$0xff]  ;;  %v14416_v34 = vld [vmem:[#allocation107_spill] sm:$0xff] }
 0x625   :  { %7723 = vmatprep.subr.bf16.mxu1 %v7722_v25  ;;  %v14396_v25 = vld [vmem:[#allocation94_spill] sm:$0xff]  ;;  %v8304_v61 = vpack.c.bf16 %v14401_v30, %v14399_v22  ;;  %v14404_v10 = vld [vmem:[#allocation101_spill] sm:$0xff]  ;;  %v14415_v22 = vand.u32 4294901760, %v14414_v39  ;;  %v14417_v30 = vand.u32 4294901760, %v14416_v34  ;;  %v14430_v39 = vld [vmem:[#allocation116_spill] sm:$0xff] }
 0x626   :  { %8297 = vmatpush1.bf16.msra.mxu0 %v8296_v29  ;;  %v7726_v51 = vpack.c.bf16 %v14389_v28, %v14387_v24  ;;  %v8302_v41 = vpack.c.bf16 %v14393_v4, %v14391_v58  ;;  %v14395_v29 = vand.u32 4294901760, %v14394_v12  ;;  %v14397_v42 = vand.u32 4294901760, %v14396_v25  ;;  %v14402_v24 = vld [vmem:[#allocation100_spill] sm:$0xff]  ;;  %v14406_v58 = vld [vmem:[#allocation102_spill] sm:$0xff]  ;;  %v14432_v34 = vld [vmem:[#allocation117_spill] sm:$0xff] }
 0x627   :  { %8299 = vmatprep.subr.bf16.mxu0 %v8298_v5  ;;  %v14403_v5 = vand.u32 4294901760, %v14402_v24  ;;  %v14405_v28 = vand.u32 4294901760, %v14404_v10  ;;  %v14409_v4 = vand.u32 4294901760, %v14408_v16  ;;  %v8308_v24 = vpack.c.bf16 %v14417_v30, %v14415_v22  ;;  %v14420_v10 = vld [vmem:[#allocation111_spill] sm:$0xff]  ;;  %v14424_v16 = vld [vmem:[#allocation113_spill] sm:$0xff] }
 0x628   :  { %7725 = vmatpush1.bf16.msra.mxu1 %v7724_v48  ;;  %v7728_v45 = vpack.c.bf16 %v14397_v42, %v14395_v29  ;;  %v14407_v48 = vand.u32 4294901760, %v14406_v58  ;;  %v14410_v29 = vld [vmem:[#allocation104_spill] sm:$0xff]  ;;  %v14431_v22 = vand.u32 4294901760, %v14430_v39  ;;  %v14433_v30 = vand.u32 4294901760, %v14432_v34  ;;  %v14448_v34 = vld [vmem:[#allocation129_spill] sm:$0xff] }
 0x629   :  { %7727 = vmatprep.subr.bf16.mxu1 %v7726_v51  ;;  %v7730_v50 = vpack.c.bf16 %v14405_v28, %v14403_v5  ;;  %v14412_v51 = vld [vmem:[#allocation105_spill] sm:$0xff]  ;;  %v14418_v5 = vld [vmem:[#allocation110_spill] sm:$0xff]  ;;  %v14421_v28 = vand.u32 4294901760, %v14420_v10  ;;  %v14446_v39 = vld [vmem:[#allocation128_spill] sm:$0xff] }
 0x62a   :  { %8301 = vmatpush1.bf16.msra.mxu0 %v8300_v63  ;;  %v8306_v12 = vpack.c.bf16 %v14409_v4, %v14407_v48  ;;  %v14411_v63 = vand.u32 4294901760, %v14410_v29  ;;  %v14413_v25 = vand.u32 4294901760, %v14412_v51  ;;  %v14422_v48 = vld [vmem:[#allocation112_spill] sm:$0xff]  ;;  %v14425_v4 = vand.u32 4294901760, %v14424_v16  ;;  %v14436_v10 = vld [vmem:[#allocation122_spill] sm:$0xff] }
 0x62b   :  { %8303 = vmatprep.subr.bf16.mxu0 %v8302_v41  ;;  %v14419_v41 = vand.u32 4294901760, %v14418_v5  ;;  %v8312_v5 = vpack.c.bf16 %v14433_v30, %v14431_v22  ;;  %v14440_v16 = vld [vmem:[#allocation124_spill] sm:$0xff]  ;;  %v14447_v22 = vand.u32 4294901760, %v14446_v39  ;;  %v14449_v30 = vand.u32 4294901760, %v14448_v34 }
 0x62c   :  { %7729 = vmatpush1.bf16.msra.mxu1 %v7728_v45  ;;  %v7732_v42 = vpack.c.bf16 %v14413_v25, %v14411_v63  ;;  %v14423_v45 = vand.u32 4294901760, %v14422_v48  ;;  %v14426_v63 = vld [vmem:[#allocation114_spill] sm:$0xff] }
 0x62d   :  { %7731 = vmatprep.subr.bf16.mxu1 %v7730_v50  ;;  %v7734_v58 = vpack.c.bf16 %v14421_v28, %v14419_v41  ;;  %v14428_v50 = vld [vmem:[#allocation115_spill] sm:$0xff]  ;;  %v14434_v41 = vld [vmem:[#allocation121_spill] sm:$0xff]  ;;  %v14437_v28 = vand.u32 4294901760, %v14436_v10 }
 0x62e   :  { %8305 = vmatpush1.bf16.msra.mxu0 %v8304_v61  ;;  %v8310_v29 = vpack.c.bf16 %v14425_v4, %v14423_v45  ;;  %v14427_v61 = vand.u32 4294901760, %v14426_v63  ;;  %v14429_v51 = vand.u32 4294901760, %v14428_v50  ;;  %v14438_v45 = vld [vmem:[#allocation123_spill] sm:$0xff]  ;;  %v14441_v4 = vand.u32 4294901760, %v14440_v16  ;;  %v14452_v10 = vld [vmem:[#allocation133_spill] sm:$0xff] }
 0x62f   :  { %8307 = vmatprep.subr.bf16.mxu0 %v8306_v12  ;;  %v14435_v12 = vand.u32 4294901760, %v14434_v41  ;;  %v8316_v41 = vpack.c.bf16 %v14449_v30, %v14447_v22  ;;  %v14466_v30 = vand.u32 4294901760, %v14222_v43  ;;  %v14473_v43 = vand.u32 4294901760, %v10087_v19 }
 0x630   :  { %7733 = vmatpush1.bf16.msra.mxu1 %v7732_v42  ;;  %v7736_v25 = vpack.c.bf16 %v14429_v51, %v14427_v61  ;;  %v14439_v42 = vand.u32 4294901760, %v14438_v45  ;;  %v14442_v61 = vld [vmem:[#allocation125_spill] sm:$0xff]  ;;  %v14480_v19 = vand.u32 4294901760, %v14106_v60  ;;  %v14487_v60 = vand.u32 4294901760, %v14113_v35 }
 0x631   :  { %7735 = vmatprep.subr.bf16.mxu1 %v7734_v58  ;;  %v7738_v48 = vpack.c.bf16 %v14437_v28, %v14435_v12  ;;  %v14444_v58 = vld [vmem:[#allocation126_spill] sm:$0xff]  ;;  %v14450_v12 = vld [vmem:[#allocation132_spill] sm:$0xff]  ;;  %v14453_v28 = vand.u32 4294901760, %v14452_v10 }
 0x632   :  { %8309 = vmatpush1.bf16.msra.mxu0 %v8308_v24  ;;  %v8314_v63 = vpack.c.bf16 %v14441_v4, %v14439_v42  ;;  %v14443_v24 = vand.u32 4294901760, %v14442_v61  ;;  %v14445_v50 = vand.u32 4294901760, %v14444_v58  ;;  %v14455_v42 = vld [vmem:[#allocation135_spill] sm:$0xff]  ;;  %v14460_v58 = vand.u32 4294901760, %v14216_v59 }
 0x633   :  { %8311 = vmatprep.subr.bf16.mxu0 %v8310_v29  ;;  %v14451_v29 = vand.u32 4294901760, %v14450_v12  ;;  %v14456_v16 = vand.u32 4294901760, %v14455_v42  ;;  %v14470_v12 = vand.u32 4294901760, %v10081_v47  ;;  %v14477_v47 = vand.u32 4294901760, %v14104_v33 }
 0x634   :  { %7737 = vmatpush1.bf16.msra.mxu1 %v7736_v25  ;;  %v7740_v51 = vpack.c.bf16 %v14445_v50, %v14443_v24  ;;  %v14454_v25 = vand.u32 4294901760, %v14212_v9  ;;  %v14461_v50 = vand.u32 4294901760, %v14217_v37  ;;  %v14463_v9 = vand.u32 4294901760, %v14219_v3 }
 0x635   :  { %7739 = vmatprep.subr.bf16.mxu1 %v7738_v48  ;;  %v7742_v45 = vpack.c.bf16 %v14453_v28, %v14451_v29  ;;  %v14458_v48 = vld [vmem:[#allocation138_spill] sm:$0xff]  ;;  %v14468_v37 = vand.u32 4294901760, %v14224_v13  ;;  %v14475_v28 = vand.u32 4294901760, %v10093_v11  ;;  %v14482_v11 = vand.u32 4294901760, %v14108_v46 }
 0x636   :  { %8313 = vmatpush1.bf16.msra.mxu0 %v8312_v5  ;;  %v8318_v4 = vpack.c.bf16 %v14456_v16, %v14454_v25  ;;  %v14457_v5 = vand.u32 4294901760, %v14214_v0  ;;  %v14459_v61 = vand.u32 4294901760, %v14458_v48  ;;  %v8320_v39 = vpack.c.bf16 %v14461_v50, %v14460_v58 }
 0x637   :  { %8315 = vmatprep.subr.bf16.mxu0 %v8314_v63  ;;  %v14462_v63 = vand.u32 4294901760, %v14218_v27  ;;  %v14465_v0 = vand.u32 4294901760, %v14221_v53  ;;  %v14469_v27 = vand.u32 4294901760, %v14225_v62  ;;  %v14472_v53 = vand.u32 4294901760, %v10085_v1 }
 0x638   :  { %7741 = vmatpush1.bf16.msra.mxu1 %v7740_v51  ;;  %v7744_v24 = vpack.c.bf16 %v14459_v61, %v14457_v5  ;;  %v14464_v51 = vand.u32 4294901760, %v14220_v40  ;;  %v14471_v40 = vand.u32 4294901760, %v10083_v23  ;;  %v14476_v62 = vand.u32 4294901760, %v13998_v20 }
 0x639   :  { %7743 = vmatprep.subr.bf16.mxu1 %v7742_v45  ;;  %v7746_v22 = vpack.c.bf16 %v14463_v9, %v14462_v63  ;;  %v8324_v3 = vpack.c.bf16 %v14469_v27, %v14468_v37  ;;  %v8326_v10 = vpack.c.bf16 %v14473_v43, %v14472_v53  ;;  %v14478_v45 = vand.u32 4294901760, %v14001_v52  ;;  %v14514_v27 = vld [vmem:[#allocation203_spill] sm:$0xff]  ;;  %v14518_v53 = vld [vmem:[#allocation206_spill] sm:$0xff] }
 0x63a   :  { %8317 = vmatpush1.bf16.msra.mxu0 %v8316_v41  ;;  %v8322_v34 = vpack.c.bf16 %v14465_v0, %v14464_v51  ;;  %v14467_v41 = vand.u32 4294901760, %v14223_v32  ;;  %v7750_v29 = vpack.c.bf16 %v14471_v40, %v14470_v12  ;;  %v14474_v32 = vand.u32 4294901760, %v10091_v49  ;;  %v14506_v0 = vld [vmem:[#allocation197_spill] sm:$0xff] }
 0x63b   :  { %8319 = vmatprep.subr.bf16.mxu0 %v8318_v4  ;;  %v8328_v23 = vpack.c.bf16 %v14477_v47, %v14476_v62  ;;  %v14479_v1 = vand.u32 4294901760, %v14105_v14  ;;  %v14481_v49 = vand.u32 4294901760, %v14107_v56  ;;  %v14483_v16 = vand.u32 4294901760, %v14109_v2  ;;  %v14516_v40 = vld [vmem:[#allocation205_spill] sm:$0xff] }
 0x63c   :  { %7745 = vmatpush1.bf16.msra.mxu1 %v7744_v24  ;;  %v7748_v59 = vpack.c.bf16 %v14467_v41, %v14466_v30  ;;  %v7752_v13 = vpack.c.bf16 %v14475_v28, %v14474_v32  ;;  %v14484_v33 = vand.u32 4294901760, %v14110_v54  ;;  %v14485_v52 = vand.u32 4294901760, %v14111_v55  ;;  %v14510_v41 = vld [vmem:[#allocation200_spill] sm:$0xff] }
 0x63d   :  { %7747 = vmatprep.subr.bf16.mxu1 %v7746_v22  ;;  %v7754_v25 = vpack.c.bf16 %v14479_v1, %v14478_v45  ;;  %v8330_v42 = vpack.c.bf16 %v14481_v49, %v14480_v19  ;;  %v7756_v20 = vpack.c.bf16 %v14483_v16, %v14482_v11  ;;  %v14486_v4 = vand.u32 4294901760, %v14112_v17  ;;  %v14504_v22 = vld [vmem:[#allocation196_spill] sm:$0xff]  ;;  %v14528_v49 = vld [vmem:[#allocation213_spill] sm:$0xff]  ;;  %v14530_v11 = vld [vmem:[#allocation215_spill] sm:$0xff] }
 0x63e   :  { %8321 = vmatpush1.bf16.msra.mxu0 %v8320_v39  ;;  %v8332_v14 = vpack.c.bf16 %v14485_v52, %v14484_v33  ;;  %v14488_v56 = vand.u32 4294901760, %v14114_v38  ;;  %v14489_v46 = vand.u32 4294901760, %v14115_v15  ;;  %v14490_v2 = vand.u32 4294901760, %v14116_v21  ;;  %v14520_v32 = vld [vmem:[#allocation208_spill] sm:$0xff]  ;;  %v14532_v33 = vld [vmem:[#allocation217_spill] sm:$0xff] }
 0x63f   :  { %8323 = vmatprep.subr.bf16.mxu0 %v8322_v34  ;;  %v7758_v5 = vpack.c.bf16 %v14487_v60, %v14486_v4  ;;  %v14491_v61 = vand.u32 4294901760, %v14023_v57  ;;  %v14492_v55 = vand.u32 4294901760, %v14024_v26  ;;  %v14493_v17 = vand.u32 4294901760, %v14025_v8  ;;  %v14500_v8 = vld [vmem:[#allocation193_spill] sm:$0xff]  ;;  %v14526_v1 = vld [vmem:[#allocation212_spill] sm:$0xff] }
 0x640   :  { %7749 = vmatpush1.bf16.msra.mxu1 %v7748_v59  ;;  %v8334_v48 = vpack.c.bf16 %v14489_v46, %v14488_v56  ;;  %v14494_v24 = vand.u32 4294901760, %v14027_v18  ;;  %v14495_v38 = vand.u32 4294901760, %v14030_v31  ;;  %v14496_v15 = vand.u32 4294901760, %v14031_v44  ;;  %v14502_v18 = vld [vmem:[#allocation194_spill] sm:$0xff]  ;;  %v14538_v46 = vld [vmem:[#allocation219_spill] sm:$0xff] }
 0x641   :  { %7751 = vmatprep.subr.bf16.mxu1 %v7750_v29  ;;  %v7760_v54 = vpack.c.bf16 %v14491_v61, %v14490_v2  ;;  %v8336_v35 = vpack.c.bf16 %v14493_v17, %v14492_v55  ;;  %v14497_v21 = vand.u32 4294901760, %v14033_v6  ;;  %v14498_v57 = vand.u32 4294901760, %v14034_v7  ;;  %v14508_v6 = vld [vmem:[#allocation199_spill] sm:$0xff]  ;;  %v14537_v56 = vld [vmem:[#allocation38_spill] sm:$0xff]  ;;  %v14543_v55 = vld [vmem:[#allocation49_spill] sm:$0xff] }
 0x642   :  { %8325 = vmatpush1.bf16.msra.mxu0 %v8324_v3  ;;  %v7762_v58 = vpack.c.bf16 %v14495_v38, %v14494_v24  ;;  %v14499_v39 = vand.u32 4294901760, %v10176_v36  ;;  %v14501_v63 = vand.u32 4294901760, %v14500_v8  ;;  %v14503_v9 = vand.u32 4294901760, %v14502_v18  ;;  %v14512_v36 = vld [vmem:[#allocation201_spill] sm:$0xff]  ;;  %v14540_v2 = vld [vmem:[#allocation242_spill] sm:$0xff]  ;;  %v14541_v61 = vld [vmem:[#allocation43_spill] sm:$0xff] }
 0x643   :  { %8327 = vmatprep.subr.bf16.mxu0 %v8326_v10  ;;  %v8338_v50 = vpack.c.bf16 %v14497_v21, %v14496_v15  ;;  %v14505_v51 = vand.u32 4294901760, %v14504_v22  ;;  %v14507_v44 = vand.u32 4294901760, %v14506_v0  ;;  %v14509_v30 = vand.u32 4294901760, %v14508_v6  ;;  %v14544_v17 = vld [vmem:[#allocation53_spill] sm:$0xff]  ;;  %v14546_v24 = vld [vmem:[#allocation58_spill] sm:$0xff]  ;;  %v14549_v15 = vld [vmem:[#allocation67_spill] sm:$0xff] }
 0x644   :  { %7753 = vmatpush1.bf16.msra.mxu1 %v7752_v13  ;;  %v7764_v26 = vpack.c.bf16 %v14499_v39, %v14498_v57  ;;  %v8340_v31 = vpack.c.bf16 %v14503_v9, %v14501_v63  ;;  %v14511_v7 = vand.u32 4294901760, %v14510_v41  ;;  %v14513_v37 = vand.u32 4294901760, %v14512_v36  ;;  %v14522_v13 = vld [vmem:[#allocation209_spill] sm:$0xff]  ;;  %v14550_v21 = vld [vmem:[#allocation70_spill] sm:$0xff]  ;;  %v14552_v57 = vld [vmem:[#allocation72_spill] sm:$0xff] }
 0x645   :  { %7755 = vmatprep.subr.bf16.mxu1 %v7754_v25  ;;  %v7766_v34 = vpack.c.bf16 %v14507_v44, %v14505_v51  ;;  %v14515_v3 = vand.u32 4294901760, %v14514_v27  ;;  %v14517_v29 = vand.u32 4294901760, %v14516_v40  ;;  %v14519_v43 = vand.u32 4294901760, %v14518_v53  ;;  %v14547_v38 = vld [vmem:[#allocation61_spill] sm:$0xff]  ;;  %v1443_v8 = vld [vmem:[#allocation13 + $0x408] sm:$0xff]  ;;  %v14555_v18 = vld [vmem:[#allocation75_spill] sm:$0xff] }
 0x646   :  { %8329 = vmatpush1.bf16.msra.mxu0 %v8328_v23  ;;  %v8342_v59 = vpack.c.bf16 %v14511_v7, %v14509_v30  ;;  %v14521_v28 = vand.u32 4294901760, %v14520_v32  ;;  %v14523_v62 = vand.u32 4294901760, %v14522_v13  ;;  %v14524_v23 = vld [vmem:[#allocation211_spill] sm:$0xff]  ;;  %v14527_v25 = vand.u32 4294901760, %v14526_v1  ;;  %v14553_v39 = vld [vmem:[#allocation73_spill] sm:$0xff]  ;;  %v1447_v63 = vld [vmem:[#allocation13 + $0x428] sm:$0xff] }
 0x647   :  { %8331 = vmatprep.subr.bf16.mxu0 %v8330_v42  ;;  %v7768_v12 = vpack.c.bf16 %v14515_v3, %v14513_v37  ;;  %v8344_v10 = vpack.c.bf16 %v14519_v43, %v14517_v29  ;;  %v14525_v45 = vand.u32 4294901760, %v14524_v23  ;;  %v14529_v42 = vand.u32 4294901760, %v14528_v49  ;;  %v1445_v9 = vld [vmem:[#allocation13 + $0x418] sm:$0xff]  ;;  %v14556_v22 = vld [vmem:[#allocation76_spill] sm:$0xff]  ;;  %v1442_v44 = vld [vmem:[#allocation13 + $0x400] sm:$0xff] }
 0x648   :  { %7757 = vmatpush1.bf16.msra.mxu1 %v7756_v20  ;;  %v7770_v47 = vpack.c.bf16 %v14523_v62, %v14521_v28  ;;  %v14531_v16 = vand.u32 4294901760, %v14530_v11  ;;  %v14533_v52 = vand.u32 4294901760, %v14532_v33  ;;  %v2812_v51 = vand.u32 4294901760, %v1443_v8  ;;  %v14557_v6 = vld [vmem:[#allocation85_spill] sm:$0xff]  ;;  %v14558_v30 = vld [vmem:[#allocation86_spill] sm:$0xff]  ;;  %v14559_v37 = vld [vmem:[#allocation87_spill] sm:$0xff] }
 0x649   :  { %7759 = vmatprep.subr.bf16.mxu1 %v7758_v5  ;;  %v8346_v19 = vpack.c.bf16 %v14527_v25, %v14525_v45  ;;  %v14536_v5 = vld [vmem:[#allocation34_spill] sm:$0xff]  ;;  %v2816_v0 = vand.u32 4294901760, %v1447_v63  ;;  %v4951_v41 = vand.u32 4294901760, %v1445_v9  ;;  %v1448_v36 = vld [vmem:[#allocation13 + $0x430] sm:$0xff]  ;;  %v2814_v27 = vand.u32 4294901760, %v1442_v44  ;;  %v1455_v40 = vld [vmem:[#allocation13 + $0x468] sm:$0xff] }
 0x64a   :  { %8333 = vmatpush1.bf16.msra.mxu0 %v8332_v14  ;;  %v7772_v20 = vpack.c.bf16 %v14531_v16, %v14529_v42  ;;  %v14534_v14 = vld [vmem:[#allocation218_spill] sm:$0xff]  ;;  %v14560_v29 = vld [vmem:[#allocation88_spill] sm:$0xff]  ;;  %v14562_v13 = vld [vmem:[#allocation97_spill] sm:$0xff]  ;;  %v2824_v16 = vand.u32 4294901760, %v1455_v40 }
 0x64b   :  { %8335 = vmatprep.subr.bf16.mxu0 %v8334_v48  ;;  %v14535_v4 = vand.u32 4294901760, %v14534_v14  ;;  %v14539_v48 = vld [vmem:[#allocation40_spill] sm:$0xff]  ;;  %v11558_v53 = vpack.c.bf16 %v2816_v0, %v2812_v51  ;;  %v1453_v32 = vld [vmem:[#allocation13 + $0x458] sm:$0xff]  ;;  %v11564_v23 = vsub.f32 %v1447_v63, %v2816_v0  ;;  %v1450_v1 = vld [vmem:[#allocation13 + $0x440] sm:$0xff]  ;;  %v11569_v49 = vsub.f32 %v1445_v9, %v4951_v41 }
 0x64c   :  { %7761 = vmatpush1.bf16.msra.mxu1 %v7760_v54  ;;  %v14542_v54 = vld [vmem:[#allocation47_spill] sm:$0xff]  ;;  %v1457_v28 = vld [vmem:[#allocation13 + $0x478] sm:$0xff]  ;;  %v1456_v33 = vld [vmem:[#allocation13 + $0x470] sm:$0xff]  ;;  %v11575_v14 = vsub.f32 %v1442_v44, %v2814_v27  ;;  %v11593_v9 = vsub.f32 %v1455_v40, %v2824_v16 }
 0x64d   :  { %7763 = vmatprep.subr.bf16.mxu1 %v7762_v58  ;;  %v8348_v60 = vpack.c.bf16 %v14535_v4, %v14533_v52  ;;  %v14548_v58 = vld [vmem:[#allocation64_spill] sm:$0xff]  ;;  %14561 = vst [vmem:[#allocation225_spill] sm:$0xff] %v11558_v53  ;;  %v14563_v62 = vld [vmem:[#allocation98_spill] sm:$0xff]  ;;  %14565 = vst [vmem:[#allocation229_spill] sm:$0xff] %v11564_v23  ;;  %v4959_v4 = vand.u32 4294901760, %v1453_v32 }
 0x64e   :  { %8337 = vmatpush1.bf16.msra.mxu0 %v8336_v35  ;;  %v14545_v35 = vld [vmem:[#allocation56_spill] sm:$0xff]  ;;  %v1454_v25 = vld [vmem:[#allocation13 + $0x460] sm:$0xff]  ;;  %14568 = vst [vmem:[#allocation232_spill] sm:$0xff] %v11569_v49  ;;  %14579 = vst [vmem:[#allocation224_spill] sm:$0xff] %v11593_v9 }
 0x64f   :  { %8339 = vmatprep.subr.bf16.mxu0 %v8338_v50  ;;  %v14551_v50 = vld [vmem:[#allocation71_spill] sm:$0xff] }
 0x650   :  { %7765 = vmatpush1.bf16.msra.mxu1 %v7764_v26  ;;  %v14554_v26 = vld [vmem:[#allocation74_spill] sm:$0xff]  ;;  %v1458_v0 = vld [vmem:[#allocation13 + $0x480] sm:$0xff] }
 0x651   :  { %7767 = vmatprep.subr.bf16.mxu1 %v7766_v34  ;;  %v1446_v34 = vld [vmem:[#allocation13 + $0x420] sm:$0xff] }
 0x652   :  { %8341 = vmatpush1.bf16.msra.mxu0 %v8340_v31  ;;  %v1449_v31 = vld [vmem:[#allocation13 + $0x438] sm:$0xff]  ;;  %v2818_v3 = vand.u32 4294901760, %v1446_v34  ;;  %v1462_v44 = vld [vmem:[#allocation13 + $0x4a0] sm:$0xff] }
 0x653   :  { %8343 = vmatprep.subr.bf16.mxu0 %v8342_v59  ;;  %v4955_v7 = vand.u32 4294901760, %v1449_v31  ;;  %v1444_v59 = vld [vmem:[#allocation13 + $0x410] sm:$0xff] }
 0x654   :  { %7769 = vmatpush1.bf16.msra.mxu1 %v7768_v12  ;;  %v1451_v12 = vld [vmem:[#allocation13 + $0x448] sm:$0xff]  ;;  %v4953_v43 = vand.u32 4294901760, %v1444_v59  ;;  %v11573_v52 = vpack.c.bf16 %v2818_v3, %v2814_v27  ;;  %v14587_v27 = vld [vmem:[#allocation130_spill] sm:$0xff] }
 0x655   :  { %7771 = vmatprep.subr.bf16.mxu1 %v7770_v47  ;;  %v11562_v47 = vsub.f32 %v1443_v8, %v2812_v51  ;;  %v11566_v45 = vpack.c.bf16 %v4955_v7, %v4951_v41  ;;  %v11571_v42 = vsub.f32 %v1449_v31, %v4955_v7  ;;  %v2820_v11 = vand.u32 4294901760, %v1451_v12 }
 0x656   :  { %8345 = vmatpush1.bf16.msra.mxu0 %v8344_v10  ;;  %v4957_v10 = vand.u32 4294901760, %v1448_v36  ;;  %14570 = vst [vmem:[#allocation236_spill] sm:$0xff] %v11573_v52 }
 0x657   :  { %8347 = vmatprep.subr.bf16.mxu0 %v8346_v19  ;;  %14564 = vst [vmem:[#allocation226_spill] sm:$0xff] %v11562_v47  ;;  %14566 = vst [vmem:[#allocation230_spill] sm:$0xff] %v11566_v45  ;;  %v14567_v19 = vld [vmem:[#allocation99_spill] sm:$0xff]  ;;  %v11591_v8 = vsub.f32 %v1451_v12, %v2820_v11 }
 0x658   :  { %7773 = vmatpush1.bf16.msra.mxu1 %v7772_v20  ;;  %14569 = vst [vmem:[#allocation233_spill] sm:$0xff] %v11571_v42  ;;  %v1452_v20 = vld [vmem:[#allocation13 + $0x450] sm:$0xff] }
 0x659   :  { %7775 = vmatprep.subr.bf16.mxu1 %v14536_v5  ;;  %v1459_v5 = vld [vmem:[#allocation13 + $0x488] sm:$0xff] }
 0x65a   :  { %8349 = vmatpush1.bf16.msra.mxu0 %v8348_v60  ;;  %v4963_v60 = vand.u32 4294901760, %v1457_v28  ;;  %v2828_v63 = vand.u32 4294901760, %v1459_v5 }
 0x65b   :  { %8351 = vmatprep.subr.bf16.mxu0 %v14537_v56  ;;  %2669 = vmatmul.mubr.f32.vlgmr.msra.gmra.mrb[0].mxu1 %v14538_v46  ;;  %v1463_v56 = vld [vmem:[#allocation13 + $0x4a8] sm:$0xff] }
 0x65c   :  { %7777 = vmatpush1.bf16.msra.mxu1 %v14539_v48  ;;  %2804 = vmatprep.mubr.f32.mxu1 %v14540_v2  ;;  %v14571_v48 = vld [vmem:[#allocation108_spill] sm:$0xff]  ;;  %v11595_v31 = vpack.c.bf16 %v4963_v60, %v4959_v4  ;;  %v11599_v51 = vsub.f32 %v1457_v28, %v4963_v60  ;;  %v1470_v60 = vld [vmem:[#allocation13 + $0x4e0] sm:$0xff] }
 0x65d   :  { %4808 = vmatmul.mubr.f32.vlgmr.msra.gmra.mrb[2].mxu0 %v14538_v46  ;;  %7779 = vmatprep.subr.bf16.mxu1 %v14542_v54  ;;  %v11580_v54 = vpack.c.bf16 %v4957_v10, %v4953_v43 }
 0x65e   :  { %8353 = vmatpush1.bf16.msra.mxu0 %v14541_v61  ;;  %4943 = vmatprep.mubr.f32.mxu0 %v14540_v2  ;;  %v11578_v61 = vsub.f32 %v1446_v34, %v2818_v3  ;;  %14580 = vst [vmem:[#allocation227_spill] sm:$0xff] %v11595_v31  ;;  %14582 = vst [vmem:[#allocation231_spill] sm:$0xff] %v11599_v51  ;;  %v14583_v34 = vld [vmem:[#allocation120_spill] sm:$0xff] }
 0x65f   :  { %8355 = vmatprep.subr.bf16.mxu0 %v14543_v55  ;;  %14572 = vst [vmem:[#allocation234_spill] sm:$0xff] %v11580_v54  ;;  %v2822_v55 = vand.u32 4294901760, %v1450_v1 }
 0x660   :  { %7781 = vmatpush1.bf16.msra.mxu1 %v14544_v17  ;;  %v2826_v17 = vand.u32 4294901760, %v1454_v25 }
 0x661   :  { %7783 = vmatprep.subr.bf16.mxu1 %v14546_v24  ;;  %v14574_v24 = vld [vmem:[#allocation118_spill] sm:$0xff] }
 0x662   :  { %8357 = vmatpush1.bf16.msra.mxu0 %v14545_v35  ;;  %v14573_v35 = vld [vmem:[#allocation109_spill] sm:$0xff]  ;;  %v11608_v3 = vsub.f32 %v1454_v25, %v2826_v17 }
 0x663   :  { %8359 = vmatprep.subr.bf16.mxu0 %v14547_v38  ;;  %v11584_v38 = vsub.f32 %v1444_v59, %v4953_v43  ;;  %v1460_v59 = vld [vmem:[#allocation13 + $0x490] sm:$0xff]  ;;  %v1471_v43 = vld [vmem:[#allocation13 + $0x4e8] sm:$0xff] }
 0x664   :  { %7785 = vmatpush1.bf16.msra.mxu1 %v14548_v58  ;;  %v11586_v58 = vsub.f32 %v1448_v36, %v4957_v10  ;;  %v1464_v36 = vld [vmem:[#allocation13 + $0x4b0] sm:$0xff]  ;;  %14588 = vst [vmem:[#allocation164_spill] sm:$0xff] %v11608_v3  ;;  %v14591_v10 = vld [vmem:[#allocation131_spill] sm:$0xff] }
 0x665   :  { %7787 = vmatprep.subr.bf16.mxu1 %v14550_v21  ;;  %14575 = vst [vmem:[#allocation235_spill] sm:$0xff] %v11584_v38  ;;  %v4965_v21 = vand.u32 4294901760, %v1456_v33 }
 0x666   :  { %8361 = vmatpush1.bf16.msra.mxu0 %v14549_v15  ;;  %14576 = vst [vmem:[#allocation237_spill] sm:$0xff] %v11586_v58  ;;  %v4961_v15 = vand.u32 4294901760, %v1452_v20 }
 0x667   :  { %8363 = vmatprep.subr.bf16.mxu0 %v14551_v50  ;;  %v1461_v50 = vld [vmem:[#allocation13 + $0x498] sm:$0xff] }
 0x668   :  { %7789 = vmatpush1.bf16.msra.mxu1 %v14552_v57  ;;  %v1465_v57 = vld [vmem:[#allocation13 + $0x4b8] sm:$0xff]  ;;  %v4967_v41 = vand.u32 4294901760, %v1461_v50  ;;  %v11610_v12 = vpack.c.bf16 %v4965_v21, %v4961_v15  ;;  %v11612_v40 = vsub.f32 %v1452_v20, %v4961_v15  ;;  %v1466_v20 = vld [vmem:[#allocation13 + $0x4c0] sm:$0xff]  ;;  %v1472_v15 = vld [vmem:[#allocation13 + $0x4f0] sm:$0xff] }
 0x669   :  { %7791 = vmatprep.subr.bf16.mxu1 %v14554_v26  ;;  %v11589_v26 = vpack.c.bf16 %v2824_v16, %v2820_v11  ;;  %v4971_v7 = vand.u32 4294901760, %v1465_v57  ;;  %v11619_v11 = vsub.f32 %v1459_v5, %v2828_v63  ;;  %v4969_v16 = vand.u32 4294901760, %v1460_v59  ;;  %v14600_v5 = vld [vmem:[#allocation142_spill] sm:$0xff] }
 0x66a   :  { %8365 = vmatpush1.bf16.msra.mxu0 %v14553_v39  ;;  %v14577_v39 = vld [vmem:[#allocation119_spill] sm:$0xff]  ;;  %14589 = vst [vmem:[#allocation165_spill] sm:$0xff] %v11610_v12  ;;  %14590 = vst [vmem:[#allocation166_spill] sm:$0xff] %v11612_v40 }
 0x66b   :  { %8367 = vmatprep.subr.bf16.mxu0 %v14555_v18  ;;  %14578 = vst [vmem:[#allocation238_spill] sm:$0xff] %v11589_v26  ;;  %v2832_v18 = vand.u32 4294901760, %v1463_v56  ;;  %14594 = vst [vmem:[#allocation171_spill] sm:$0xff] %v11619_v11 }
 0x66c   :  { %7793 = vmatpush1.bf16.msra.mxu1 %v14556_v22  ;;  %v11597_v22 = vsub.f32 %v1453_v32, %v4959_v4  ;;  %v11615_v32 = vsub.f32 %v1456_v33, %v4965_v21  ;;  %v4973_v4 = vand.u32 4294901760, %v1464_v36  ;;  %v11626_v33 = vsub.f32 %v1461_v50, %v4967_v41  ;;  %v14599_v21 = vld [vmem:[#allocation139_spill] sm:$0xff] }
 0x66d   :  { %7795 = vmatprep.subr.bf16.mxu1 %v14558_v30  ;;  %v11604_v30 = vsub.f32 %v1450_v1, %v2822_v55  ;;  %v11617_v28 = vpack.c.bf16 %v2832_v18, %v2828_v63  ;;  %v1469_v1 = vld [vmem:[#allocation13 + $0x4d8] sm:$0xff]  ;;  %v11621_v25 = vsub.f32 %v1463_v56, %v2832_v18  ;;  %v11630_v56 = vsub.f32 %v1465_v57, %v4971_v7 }
 0x66e   :  { %8369 = vmatpush1.bf16.msra.mxu0 %v14557_v6  ;;  %14581 = vst [vmem:[#allocation228_spill] sm:$0xff] %v11597_v22  ;;  %v11602_v6 = vpack.c.bf16 %v2826_v17, %v2822_v55  ;;  %14592 = vst [vmem:[#allocation168_spill] sm:$0xff] %v11615_v32  ;;  %v11624_v55 = vpack.c.bf16 %v4971_v7, %v4967_v41  ;;  %v4975_v63 = vand.u32 4294901760, %v1469_v1  ;;  %v2838_v41 = vand.u32 4294901760, %v1466_v20 }
 0x66f   :  { %8371 = vmatprep.subr.bf16.mxu0 %v14559_v37  ;;  %14585 = vst [vmem:[#allocation162_spill] sm:$0xff] %v11604_v30  ;;  %v14586_v37 = vld [vmem:[#allocation127_spill] sm:$0xff]  ;;  %14593 = vst [vmem:[#allocation170_spill] sm:$0xff] %v11617_v28  ;;  %v11639_v2 = vpack.c.bf16 %v4973_v4, %v4969_v16  ;;  %v4981_v7 = vand.u32 4294901760, %v1472_v15 }
 0x670   :  { %7797 = vmatpush1.bf16.msra.mxu1 %v14560_v29  ;;  %14584 = vst [vmem:[#allocation159_spill] sm:$0xff] %v11602_v6  ;;  %v1467_v29 = vld [vmem:[#allocation13 + $0x4c8] sm:$0xff]  ;;  %14595 = vst [vmem:[#allocation173_spill] sm:$0xff] %v11621_v25 }
 0x671   :  { %7799 = vmatprep.subr.bf16.mxu1 %v14563_v62  ;;  %v2834_v62 = vand.u32 4294901760, %v1462_v44  ;;  %14597 = vst [vmem:[#allocation174_spill] sm:$0xff] %v11624_v55  ;;  %14598 = vst [vmem:[#allocation176_spill] sm:$0xff] %v11626_v33  ;;  %v2836_v17 = vand.u32 4294901760, %v1467_v29 }
 0x672   :  { %8373 = vmatpush1.bf16.msra.mxu0 %v14562_v13  ;;  %v2830_v13 = vand.u32 4294901760, %v1458_v0  ;;  %14601 = vst [vmem:[#allocation177_spill] sm:$0xff] %v11630_v56  ;;  %14606 = vst [vmem:[#allocation161_spill] sm:$0xff] %v11639_v2  ;;  %v14614_v2 = vld [vmem:[#allocation154_spill] sm:$0xff]  ;;  %v1486_v56 = vld [vmem:[#allocation13 + $0x560] sm:$0xff] }
 0x673   :  { %8375 = vmatprep.subr.bf16.mxu0 %v14567_v19  ;;  %v1473_v19 = vld [vmem:[#allocation13 + $0x4f8] sm:$0xff]  ;;  %v11637_v50 = vsub.f32 %v1462_v44, %v2834_v62 }
 0x674   :  { %7801 = vmatpush1.bf16.msra.mxu1 %v14571_v48  ;;  %v14596_v48 = vld [vmem:[#allocation136_spill] sm:$0xff]  ;;  %v4979_v18 = vand.u32 4294901760, %v1473_v19 }
 0x675   :  { %7803 = vmatprep.subr.bf16.mxu1 %v14574_v24  ;;  %v1468_v24 = vld [vmem:[#allocation13 + $0x4d0] sm:$0xff]  ;;  %14605 = vst [vmem:[#allocation158_spill] sm:$0xff] %v11637_v50  ;;  %v14613_v50 = vld [vmem:[#allocation151_spill] sm:$0xff] }
 0x676   :  { %8377 = vmatpush1.bf16.msra.mxu0 %v14573_v35  ;;  %v2840_v35 = vand.u32 4294901760, %v1471_v43  ;;  %v4977_v57 = vand.u32 4294901760, %v1468_v24 }
 0x677   :  { %8379 = vmatprep.subr.bf16.mxu0 %v14577_v39  ;;  %v11632_v39 = vsub.f32 %v1458_v0, %v2830_v13  ;;  %v14608_v0 = vld [vmem:[#allocation148_spill] sm:$0xff] }
 0x678   :  { %7805 = vmatpush1.bf16.msra.mxu1 %v14583_v34  ;;  %v14603_v34 = vld [vmem:[#allocation145_spill] sm:$0xff]  ;;  %v11650_v44 = vsub.f32 %v1471_v43, %v2840_v35  ;;  %v11659_v43 = vsub.f32 %v1473_v19, %v4979_v18 }
 0x679   :  { %7807 = vmatprep.subr.bf16.mxu1 %v14587_v27  ;;  %14602 = vst [vmem:[#allocation178_spill] sm:$0xff] %v11632_v39  ;;  %v2842_v27 = vand.u32 4294901760, %v1470_v60  ;;  %v11646_v39 = vpack.c.bf16 %v2840_v35, %v2836_v17  ;;  %v11663_v35 = vsub.f32 %v1466_v20, %v2838_v41  ;;  %v14625_v20 = vld [vmem:[#allocation157_spill] sm:$0xff] }
 0x67a   :  { %8381 = vmatpush1.bf16.msra.mxu0 %v14586_v37  ;;  %v11635_v37 = vpack.c.bf16 %v2834_v62, %v2830_v13  ;;  %v11648_v13 = vsub.f32 %v1467_v29, %v2836_v17  ;;  %14612 = vst [vmem:[#allocation246_spill] sm:$0xff] %v11650_v44  ;;  %v1477_v62 = vld [vmem:[#allocation13 + $0x518] sm:$0xff]  ;;  %v14617_v29 = vld [vmem:[#allocation155_spill] sm:$0xff]  ;;  %14618 = vst [vmem:[#allocation185_spill] sm:$0xff] %v11659_v43  ;;  %v11669_v44 = vsub.f32 %v1468_v24, %v4977_v57 }
 0x67b   :  { %8383 = vmatprep.subr.bf16.mxu0 %v14591_v10  ;;  %v1475_v10 = vld [vmem:[#allocation13 + $0x508] sm:$0xff]  ;;  %14610 = vst [vmem:[#allocation243_spill] sm:$0xff] %v11646_v39  ;;  %v1480_v39 = vld [vmem:[#allocation13 + $0x530] sm:$0xff]  ;;  %v11661_v17 = vpack.c.bf16 %v2842_v27, %v2838_v41  ;;  %14620 = vst [vmem:[#allocation188_spill] sm:$0xff] %v11663_v35  ;;  %v11674_v41 = vsub.f32 %v1472_v15, %v4981_v7 }
 0x67c   :  { %7809 = vmatpush1.bf16.msra.mxu1 %v14596_v48  ;;  %14604 = vst [vmem:[#allocation239_spill] sm:$0xff] %v11635_v37  ;;  %v1479_v48 = vld [vmem:[#allocation13 + $0x528] sm:$0xff]  ;;  %14611 = vst [vmem:[#allocation245_spill] sm:$0xff] %v11648_v13  ;;  %v1474_v37 = vld [vmem:[#allocation13 + $0x500] sm:$0xff] }
 0x67d   :  { %7811 = vmatprep.subr.bf16.mxu1 %v14600_v5  ;;  %v11644_v5 = vsub.f32 %v1464_v36, %v4973_v4  ;;  %v2848_v36 = vand.u32 4294901760, %v1479_v48  ;;  %v1478_v4 = vld [vmem:[#allocation13 + $0x520] sm:$0xff]  ;;  %14619 = vst [vmem:[#allocation186_spill] sm:$0xff] %v11661_v17  ;;  %14623 = vst [vmem:[#allocation222_spill] sm:$0xff] %v11669_v44  ;;  %v1487_v13 = vld [vmem:[#allocation13 + $0x568] sm:$0xff] }
 0x67e   :  { %8385 = vmatpush1.bf16.msra.mxu0 %v14599_v21  ;;  %v11641_v21 = vsub.f32 %v1460_v59, %v4969_v16  ;;  %v11654_v59 = vpack.c.bf16 %v4979_v18, %v4975_v63  ;;  %v11656_v16 = vsub.f32 %v1469_v1, %v4975_v63  ;;  %v4983_v1 = vand.u32 4294901760, %v1477_v62  ;;  %v1485_v43 = vld [vmem:[#allocation13 + $0x558] sm:$0xff]  ;;  %14627 = vst [vmem:[#allocation223_spill] sm:$0xff] %v11674_v41  ;;  %v1488_v41 = vld [vmem:[#allocation13 + $0x570] sm:$0xff] }
 0x67f   :  { %8387 = vmatprep.subr.bf16.mxu0 %v14603_v34  ;;  %14609 = vst [vmem:[#allocation241_spill] sm:$0xff] %v11644_v5  ;;  %v1481_v34 = vld [vmem:[#allocation13 + $0x538] sm:$0xff]  ;;  %v1476_v5 = vld [vmem:[#allocation13 + $0x510] sm:$0xff]  ;;  %v4989_v18 = vand.u32 4294901760, %v1480_v39  ;;  %v11681_v44 = vsub.f32 %v1479_v48, %v2848_v36  ;;  %v2856_v35 = vand.u32 4294901760, %v1487_v13  ;;  %v4991_v15 = vand.u32 4294901760, %v1485_v43 }
 0x680   :  { %14607 = vst [vmem:[#allocation240_spill] sm:$0xff] %v11641_v21  ;;  %7813 = vmatpush1.bf16.msra.mxu1 %v14608_v0  ;;  %14615 = vst [vmem:[#allocation180_spill] sm:$0xff] %v11654_v59  ;;  %v2844_v0 = vand.u32 4294901760, %v1475_v10  ;;  %v4987_v63 = vand.u32 4294901760, %v1481_v34  ;;  %v14624_v59 = vld [vmem:[#allocation156_spill] sm:$0xff]  ;;  %v2846_v21 = vand.u32 4294901760, %v1474_v37 }
 0x681   :  { %7815 = vmatprep.subr.bf16.mxu1 %v14614_v2  ;;  %14616 = vst [vmem:[#allocation183_spill] sm:$0xff] %v11656_v16  ;;  %v11667_v2 = vpack.c.bf16 %v4981_v7, %v4977_v57  ;;  %v1483_v16 = vld [vmem:[#allocation13 + $0x548] sm:$0xff]  ;;  %v4985_v19 = vand.u32 4294901760, %v1476_v5  ;;  %v1489_v17 = vld [vmem:[#allocation13 + $0x578] sm:$0xff]  ;;  %v14630_v57 = vld [vmem:[#allocation163_spill] sm:$0xff] }
 0x682   :  { %8389 = vmatpush1.bf16.msra.mxu0 %v14613_v50  ;;  %v11665_v50 = vsub.f32 %v1470_v60, %v2842_v27  ;;  %v14626_v60 = vld [vmem:[#allocation160_spill] sm:$0xff]  ;;  %v11676_v24 = vpack.c.bf16 %v2848_v36, %v2844_v0  ;;  %v11678_v27 = vsub.f32 %v1475_v10, %v2844_v0  ;;  %14631 = vst [vmem:[#allocation250_spill] sm:$0xff] %v11681_v44  ;;  %v4995_v7 = vand.u32 4294901760, %v1489_v17  ;;  %v14635_v10 = vld [vmem:[#allocation167_spill] sm:$0xff] }
 0x683   :  { %8391 = vmatprep.subr.bf16.mxu0 %v14617_v29  ;;  %14622 = vst [vmem:[#allocation190_spill] sm:$0xff] %v11667_v2  ;;  %v2850_v29 = vand.u32 4294901760, %v1478_v4  ;;  %v1482_v2 = vld [vmem:[#allocation13 + $0x540] sm:$0xff]  ;;  %v11685_v33 = vpack.c.bf16 %v4987_v63, %v4983_v1  ;;  %v11692_v48 = vsub.f32 %v1474_v37, %v2846_v21  ;;  %v11696_v36 = vpack.c.bf16 %v4989_v18, %v4985_v19 }
 0x684   :  { %14621 = vst [vmem:[#allocation189_spill] sm:$0xff] %v11665_v50  ;;  %7817 = vmatpush1.bf16.msra.mxu1 %v14624_v59  ;;  %14628 = vst [vmem:[#allocation248_spill] sm:$0xff] %v11676_v24  ;;  %v11683_v59 = vsub.f32 %v1477_v62, %v4983_v1  ;;  %v2852_v50 = vand.u32 4294901760, %v1483_v16  ;;  %v14640_v1 = vld [vmem:[#allocation169_spill] sm:$0xff]  ;;  %v2854_v44 = vand.u32 4294901760, %v1482_v2  ;;  %v14644_v37 = vld [vmem:[#allocation175_spill] sm:$0xff] }
 0x685   :  { %7819 = vmatprep.subr.bf16.mxu1 %v14626_v60  ;;  %14629 = vst [vmem:[#allocation249_spill] sm:$0xff] %v11678_v27  ;;  %14633 = vst [vmem:[#allocation252_spill] sm:$0xff] %v11685_v33  ;;  %v1484_v60 = vld [vmem:[#allocation13 + $0x550] sm:$0xff]  ;;  %v11690_v0 = vpack.c.bf16 %v2850_v29, %v2846_v21  ;;  %v11694_v62 = vsub.f32 %v1478_v4, %v2850_v29  ;;  %v1493_v27 = vld [vmem:[#allocation13 + $0x598] sm:$0xff] }
 0x686   :  { %8393 = vmatpush1.bf16.msra.mxu0 %v14625_v20  ;;  %14632 = vst [vmem:[#allocation251_spill] sm:$0xff] %v11683_v59  ;;  %v11687_v20 = vsub.f32 %v1481_v34, %v4987_v63  ;;  %14637 = vst [vmem:[#allocation134_spill] sm:$0xff] %v11692_v48  ;;  %v1495_v59 = vld [vmem:[#allocation13 + $0x5a8] sm:$0xff]  ;;  %v11700_v63 = vsub.f32 %v1476_v5, %v4985_v19  ;;  %v11705_v21 = vpack.c.bf16 %v2856_v35, %v2852_v50  ;;  %v1490_v48 = vld [vmem:[#allocation13 + $0x580] sm:$0xff] }
 0x687   :  { %8395 = vmatprep.subr.bf16.mxu0 %v14630_v57  ;;  %14636 = vst [vmem:[#allocation254_spill] sm:$0xff] %v11690_v0  ;;  %14638 = vst [vmem:[#allocation137_spill] sm:$0xff] %v11694_v62  ;;  %v1491_v57 = vld [vmem:[#allocation13 + $0x588] sm:$0xff]  ;;  %v1497_v0 = vld [vmem:[#allocation13 + $0x5b8] sm:$0xff]  ;;  %v11707_v4 = vsub.f32 %v1483_v16, %v2852_v50  ;;  %v4993_v29 = vand.u32 4294901760, %v1484_v60  ;;  %v4997_v62 = vand.u32 4294901760, %v1488_v41  ;;  %v11711_v5 = vpack.c.bf16 %v4995_v7, %v4991_v15 }
 0x688   :  { %14634 = vst [vmem:[#allocation253_spill] sm:$0xff] %v11687_v20  ;;  %7821 = vmatpush1.bf16.msra.mxu1 %v14635_v10  ;;  %14639 = vst [vmem:[#allocation140_spill] sm:$0xff] %v11696_v36  ;;  %v14641_v34 = vld [vmem:[#allocation172_spill] sm:$0xff]  ;;  %v11702_v20 = vsub.f32 %v1480_v39, %v4989_v18  ;;  %v2858_v10 = vand.u32 4294901760, %v1486_v56  ;;  %v11709_v36 = vsub.f32 %v1487_v13, %v2856_v35  ;;  %v2860_v39 = vand.u32 4294901760, %v1491_v57  ;;  %v1492_v18 = vld [vmem:[#allocation13 + $0x590] sm:$0xff] }
 0x689   :  { %7823 = vmatprep.subr.bf16.mxu1 %v14641_v34  ;;  %14642 = vst [vmem:[#allocation141_spill] sm:$0xff] %v11700_v63  ;;  %14645 = vst [vmem:[#allocation144_spill] sm:$0xff] %v11705_v21  ;;  %v2864_v19 = vand.u32 4294901760, %v1495_v59  ;;  %v1496_v34 = vld [vmem:[#allocation13 + $0x5b0] sm:$0xff]  ;;  %v11714_v63 = vsub.f32 %v1485_v43, %v4991_v15  ;;  %v4999_v16 = vand.u32 4294901760, %v1493_v27  ;;  %v5003_v50 = vand.u32 4294901760, %v1497_v0 }
 0x68a   :  { %8397 = vmatpush1.bf16.msra.mxu0 %v14640_v1  ;;  %14643 = vst [vmem:[#allocation143_spill] sm:$0xff] %v11702_v20  ;;  %14646 = vst [vmem:[#allocation146_spill] sm:$0xff] %v11707_v4  ;;  %v1494_v1 = vld [vmem:[#allocation13 + $0x5a0] sm:$0xff]  ;;  %v14650_v4 = vld [vmem:[#allocation181_spill] sm:$0xff]  ;;  %v11720_v13 = vpack.c.bf16 %v2858_v10, %v2854_v44  ;;  %v11722_v35 = vsub.f32 %v1482_v2, %v2854_v44  ;;  %v11725_v24 = vsub.f32 %v1486_v56, %v2858_v10 }
 0x68b   :  { %8399 = vmatprep.subr.bf16.mxu0 %v14644_v37  ;;  %14647 = vst [vmem:[#allocation147_spill] sm:$0xff] %v11709_v36  ;;  %14648 = vst [vmem:[#allocation149_spill] sm:$0xff] %v11711_v5  ;;  %v14649_v20 = vld [vmem:[#allocation179_spill] sm:$0xff]  ;;  %v11716_v37 = vsub.f32 %v1489_v17, %v4995_v7  ;;  %v14651_v21 = vld [vmem:[#allocation184_spill] sm:$0xff]  ;;  %v2862_v36 = vand.u32 4294901760, %v1490_v48  ;;  %v2866_v5 = vand.u32 4294901760, %v1494_v1  ;;  %v11727_v43 = vpack.c.bf16 %v4997_v62, %v4993_v29 }
 0x68c   :  { %7825 = vmatpush1.bf16.msra.mxu1 %v14649_v20  ;;  %14652 = vst [vmem:[#allocation150_spill] sm:$0xff] %v11720_v13  ;;  %14653 = vst [vmem:[#allocation152_spill] sm:$0xff] %v11722_v35  ;;  %v14654_v33 = vld [vmem:[#allocation187_spill] sm:$0xff]  ;;  %v5001_v17 = vand.u32 4294901760, %v1492_v18  ;;  %v5005_v20 = vand.u32 4294901760, %v1496_v34  ;;  %v11729_v15 = vsub.f32 %v1484_v60, %v4993_v29  ;;  %v11731_v7 = vsub.f32 %v1488_v41, %v4997_v62  ;;  %v1499_v10 = vld [vmem:[#allocation13 + $0x5c8] sm:$0xff] }
 0x68d   :  { %7827 = vmatprep.subr.bf16.mxu1 %v14651_v21  ;;  %14655 = vst [vmem:[#allocation153_spill] sm:$0xff] %v11725_v24  ;;  %14656 = vst [vmem:[#allocation220_spill] sm:$0xff] %v11727_v43  ;;  %v11735_v21 = vsub.f32 %v1491_v57, %v2860_v39  ;;  %v14661_v44 = vld [vmem:[#allocation191_spill] sm:$0xff]  ;;  %v11738_v2 = vsub.f32 %v1495_v59, %v2864_v19  ;;  %v11740_v35 = vpack.c.bf16 %v5003_v50, %v4999_v16  ;;  %v14666_v24 = vld [vmem:[#allocation192_spill] sm:$0xff] }
 0x68e   :  { %8401 = vmatpush1.bf16.msra.mxu0 %v14650_v4  ;;  %14657 = vst [vmem:[#allocation35_spill] sm:$0xff] %v11729_v15  ;;  %14658 = vst [vmem:[#allocation36_spill] sm:$0xff] %v11731_v7  ;;  %v11733_v4 = vpack.c.bf16 %v2864_v19, %v2860_v39  ;;  %v11744_v56 = vsub.f32 %v1497_v0, %v5003_v50  ;;  %v14667_v60 = vld [vmem:[#allocation195_spill] sm:$0xff]  ;;  %v11748_v41 = vpack.c.bf16 %v2866_v5, %v2862_v36  ;;  %v1503_v29 = vld [vmem:[#allocation13 + $0x5e8] sm:$0xff] }
 0x68f   :  { %8403 = vmatprep.subr.bf16.mxu0 %v14654_v33  ;;  %14660 = vst [vmem:[#allocation39_spill] sm:$0xff] %v11735_v21  ;;  %14662 = vst [vmem:[#allocation41_spill] sm:$0xff] %v11738_v2  ;;  %v11742_v33 = vsub.f32 %v1493_v27, %v4999_v16  ;;  %v11750_v62 = vsub.f32 %v1490_v48, %v2862_v36  ;;  %v11752_v57 = vsub.f32 %v1494_v1, %v2866_v5  ;;  %v14671_v59 = vld [vmem:[#allocation198_spill] sm:$0xff]  ;;  %v14691_v21 = vld [vmem:[#allocation216_spill] sm:$0xff] }
 0x690   :  { %14659 = vst [vmem:[#allocation37_spill] sm:$0xff] %v11733_v4  ;;  %7829 = vmatpush1.bf16.msra.mxu1 %v14661_v44  ;;  %14663 = vst [vmem:[#allocation42_spill] sm:$0xff] %v11740_v35  ;;  %v11755_v39 = vpack.c.bf16 %v5005_v20, %v5001_v17  ;;  %v1501_v27 = vld [vmem:[#allocation13 + $0x5d8] sm:$0xff]  ;;  %v2868_v50 = vand.u32 4294901760, %v1499_v10  ;;  %v1498_v44 = vld [vmem:[#allocation13 + $0x5c0] sm:$0xff]  ;;  %v14681_v16 = vand.u32 4294901760, %v11564_v23 }
 0x691   :  { %14664 = vst [vmem:[#allocation44_spill] sm:$0xff] %v11742_v33  ;;  %14665 = vst [vmem:[#allocation45_spill] sm:$0xff] %v11744_v56  ;;  %7831 = vmatprep.subr.bf16.mxu1 %v14667_v60  ;;  %v1505_v19 = vld [vmem:[#allocation13 + $0x5f8] sm:$0xff]  ;;  %v11764_v60 = vsub.f32 %v1492_v18, %v5001_v17  ;;  %v11770_v56 = vsub.f32 %v1496_v34, %v5005_v20  ;;  %v5007_v36 = vand.u32 4294901760, %v1501_v27  ;;  %v2870_v18 = vand.u32 4294901760, %v1498_v44  ;;  %v1500_v17 = vld [vmem:[#allocation13 + $0x5d0] sm:$0xff] }
 0x692   :  { %8405 = vmatpush1.bf16.msra.mxu0 %v14666_v24  ;;  %14668 = vst [vmem:[#allocation46_spill] sm:$0xff] %v11748_v41  ;;  %14669 = vst [vmem:[#allocation48_spill] sm:$0xff] %v11750_v62  ;;  %v14673_v5 = vld [vmem:[#allocation202_spill] sm:$0xff]  ;;  %v14675_v62 = vld [vmem:[#allocation204_spill] sm:$0xff]  ;;  %v11772_v48 = vsub.f32 %v1499_v10, %v2868_v50  ;;  %v5011_v1 = vand.u32 4294901760, %v1505_v19 }
 0x693   :  { %14670 = vst [vmem:[#allocation221_spill] sm:$0xff] %v11752_v57  ;;  %8407 = vmatprep.subr.bf16.mxu0 %v14671_v59  ;;  %14672 = vst [vmem:[#allocation50_spill] sm:$0xff] %v11755_v39  ;;  %v2872_v59 = vand.u32 4294901760, %v1503_v29  ;;  %v1502_v57 = vld [vmem:[#allocation13 + $0x5e0] sm:$0xff]  ;;  %v14679_v33 = vld [vmem:[#allocation210_spill] sm:$0xff] }
 0x694   :  { %7833 = vmatpush1.bf16.msra.mxu1 %v14673_v5  ;;  %14674 = vst [vmem:[#allocation51_spill] sm:$0xff] %v11764_v60  ;;  %v14676_v24 = vld [vmem:[#allocation207_spill] sm:$0xff]  ;;  %14677 = vst [vmem:[#allocation52_spill] sm:$0xff] %v11770_v56  ;;  %v14680_v5 = vand.u32 4294901760, %v11562_v47  ;;  %v2874_v20 = vand.u32 4294901760, %v1502_v57  ;;  %v1504_v10 = vld [vmem:[#allocation13 + $0x5f0] sm:$0xff] }
 0x695   :  { %7835 = vmatprep.subr.bf16.mxu1 %v14676_v24  ;;  %14678 = vst [vmem:[#allocation54_spill] sm:$0xff] %v11772_v48  ;;  %v14682_v24 = vand.u32 4294901760, %v11569_v49  ;;  %v14683_v48 = vand.u32 4294901760, %v11571_v42  ;;  %v14684_v56 = vand.u32 4294901760, %v11575_v14  ;;  %v14686_v2 = vld [vmem:[#allocation214_spill] sm:$0xff] }
 0x696   :  { %8409 = vmatpush1.bf16.msra.mxu0 %v14675_v62  ;;  %v2923_v0 = vsub.f32 %v11562_v47, %v14680_v5  ;;  %v2935_v62 = vsub.f32 %v11564_v23, %v14681_v16  ;;  %v14685_v5 = vand.u32 4294901760, %v11578_v61  ;;  %v11794_v16 = vpack.c.bf16 %v2872_v59, %v2868_v50 }
 0x697   :  { %8411 = vmatprep.subr.bf16.mxu0 %v14679_v33  ;;  %v5062_v34 = vsub.f32 %v11569_v49, %v14682_v24  ;;  %v5074_v33 = vsub.f32 %v11571_v42, %v14683_v48  ;;  %v2929_v60 = vsub.f32 %v11575_v14, %v14684_v56  ;;  %v11796_v23 = vsub.f32 %v1503_v29, %v2872_v59 }
 0x698   :  { %v2941_v47 = vsub.f32 %v11578_v61, %v14685_v5  ;;  %7837 = vmatpush1.bf16.msra.mxu1 %v14686_v2  ;;  %14687 = vst [vmem:[#allocation55_spill] sm:$0xff] %v11794_v16  ;;  %v14689_v24 = vand.u32 4294901760, %v11584_v38  ;;  %v14690_v48 = vand.u32 4294901760, %v11586_v58  ;;  %v11806_v56 = vpack.c.bf16 %v5011_v1, %v5007_v36 }
 0x699   :  { %14688 = vst [vmem:[#allocation57_spill] sm:$0xff] %v11796_v23  ;;  %7839 = vmatprep.subr.bf16.mxu1 %v11558_v53  ;;  %v11808_v5 = vsub.f32 %v1501_v27, %v5007_v36  ;;  %v11810_v2 = vsub.f32 %v1505_v19, %v5011_v1  ;;  %v5009_v29 = vand.u32 4294901760, %v1500_v17  ;;  %v5013_v50 = vand.u32 4294901760, %v1504_v10 }
 0x69a   :  { %v5068_v49 = vsub.f32 %v11584_v38, %v14689_v24  ;;  %v5080_v42 = vsub.f32 %v11586_v58, %v14690_v48  ;;  %8413 = vmatpush1.bf16.msra.mxu0 %v14691_v21  ;;  %14692 = vst [vmem:[#allocation59_spill] sm:$0xff] %v11806_v56  ;;  %v2924_v59 = vand.u32 4294901760, %v2923_v0  ;;  %v2936_v24 = vand.u32 4294901760, %v2935_v62 }
 0x69b   :  { %14693 = vst [vmem:[#allocation60_spill] sm:$0xff] %v11808_v5  ;;  %8415 = vmatprep.subr.bf16.mxu0 %v11566_v45  ;;  %v5063_v38 = vand.u32 4294901760, %v5062_v34  ;;  %2806 = vmatmul.mubr.f32.vlgmr.msra.gmra.mrb[0].mxu1 %v14538_v46  ;;  %v5075_v48 = vand.u32 4294901760, %v5074_v33  ;;  %v2930_v58 = vand.u32 4294901760, %v2929_v60  ;;  %v2942_v21 = vand.u32 4294901760, %v2941_v47 }
 0x69c   :  { %v13498_v53 = vand.u32 4294901760, %v11591_v8  ;;  %7841 = vmatpush1.bf16.msra.mxu1 %v11573_v52  ;;  %v11817_v27 = vpack.c.bf16 %v2874_v20, %v2870_v18  ;;  %v5069_v19 = vand.u32 4294901760, %v5068_v49  ;;  %v5081_v36 = vand.u32 4294901760, %v5080_v42 }
 0x69d   :  { %4945 = vmatmul.mubr.f32.vlgmr.msra.gmra.mrb[2].mxu0 %v14538_v46  ;;  %v13497_v1 = vand.u32 4294901760, %v11593_v9  ;;  %7843 = vmatprep.subr.bf16.mxu1 %v11589_v26  ;;  %v11822_v0 = vsub.f32 %v1498_v44, %v2870_v18  ;;  %v11824_v60 = vsub.f32 %v1502_v57, %v2874_v20  ;;  %v13496_v47 = vand.u32 4294901760, %v11597_v22  ;;  %v14710_v26 = vld [vmem:[#allocation180_spill] sm:$0xff] }
 0x69e   :  { %14694 = vst [vmem:[#allocation62_spill] sm:$0xff] %v11817_v27  ;;  %8417 = vmatpush1.bf16.msra.mxu0 %v11580_v54  ;;  %v13499_v62 = vand.u32 4294901760, %v11599_v51  ;;  %v11829_v46 = vpack.c.bf16 %v5013_v50, %v5009_v29  ;;  %v11831_v49 = vsub.f32 %v1500_v17, %v5009_v29  ;;  %v11833_v42 = vsub.f32 %v1504_v10, %v5013_v50 }
 0x69f   :  { %8419 = vmatprep.subr.bf16.mxu0 %v11595_v31  ;;  %v14696_v34 = vmov 0.0   ;;  %v11836_v33 = vpack.c.bf16 %v2936_v24, %v2924_v59  ;;  %v11839_v57 = vpack.c.bf16 %v5075_v48, %v5063_v38  ;;  %v11841_v44 = vpack.c.bf16 %v2942_v21, %v2930_v58  ;;  %v14697_v21 = vld [vmem:[#allocation176_spill] sm:$0xff]  ;;  %v14707_v38 = vld [vmem:[#allocation243_spill] sm:$0xff] }
 0x6a0   :  { %14695 = vst [vmem:[#allocation63_spill] sm:$0xff] %v11829_v46  ;;  %2908 = vmatprep.mubr.f32.mxu1 %v14696_v34  ;;  %5047 = vmatprep.mubr.f32.mxu0 %v14696_v34  ;;  %v11846_v18 = vsub.f32 %v11591_v8, %v13498_v53  ;;  %v11849_v17 = vpack.c.bf16 %v5081_v36, %v5069_v19  ;;  %v14698_v36 = vld [vmem:[#allocation177_spill] sm:$0xff]  ;;  %v14699_v53 = vld [vmem:[#allocation178_spill] sm:$0xff]  ;;  %v14703_v24 = vand.u32 4294901760, %v11604_v30  ;;  %v14704_v19 = vand.u32 4294901760, %v11608_v3 }
 0x6a1   :  { %7845 = vmatpush1.bf16.msra.mxu1 %v11602_v6  ;;  %v11854_v20 = vsub.f32 %v11593_v9, %v13497_v1  ;;  %v11863_v58 = vsub.f32 %v11597_v22, %v13496_v47  ;;  %v11868_v29 = vsub.f32 %v11599_v51, %v13499_v62  ;;  %v14700_v62 = vld [vmem:[#allocation158_spill] sm:$0xff]  ;;  %v14706_v6 = vld [vmem:[#allocation161_spill] sm:$0xff]  ;;  %v14726_v51 = vld [vmem:[#allocation252_spill] sm:$0xff] }
 0x6a2   :  { %8421 = vmatpush1.bf16.msra.mxu0 %v11610_v12  ;;  %7847 = vmatprep.subr.bf16.mxu1 %v11617_v28  ;;  %v2948_v1 = vand.u32 4294901760, %v11846_v18  ;;  %v14701_v28 = vld [vmem:[#allocation240_spill] sm:$0xff]  ;;  %v14702_v12 = vld [vmem:[#allocation239_spill] sm:$0xff]  ;;  %v2953_v48 = vsub.f32 %v11604_v30, %v14703_v24  ;;  %v2965_v47 = vsub.f32 %v11608_v3, %v14704_v19  ;;  %v14709_v24 = vand.u32 4294901760, %v11615_v32 }
 0x6a3   :  { %8423 = vmatprep.subr.bf16.mxu0 %v11624_v55  ;;  %v2960_v59 = vand.u32 4294901760, %v11854_v20  ;;  %v14705_v55 = vld [vmem:[#allocation241_spill] sm:$0xff]  ;;  %v5087_v50 = vand.u32 4294901760, %v11863_v58  ;;  %v5099_v10 = vand.u32 4294901760, %v11868_v29  ;;  %v14708_v20 = vand.u32 4294901760, %v11612_v40  ;;  %v14723_v3 = vld [vmem:[#allocation248_spill] sm:$0xff] }
 0x6a4   :  { %v5104_v31 = vsub.f32 %v11615_v32, %v14709_v24  ;;  %v14711_v19 = vand.u32 4294901760, %v11619_v11  ;;  %v14713_v29 = vand.u32 4294901760, %v14697_v21  ;;  %v14715_v24 = vand.u32 4294901760, %v14699_v53  ;;  %v14719_v32 = vld [vmem:[#allocation186_spill] sm:$0xff]  ;;  %v14724_v30 = vld [vmem:[#allocation183_spill] sm:$0xff] }
 0x6a5   :  { %7849 = vmatpush1.bf16.msra.mxu1 %v14702_v12  ;;  %v5092_v12 = vsub.f32 %v11612_v40, %v14708_v20  ;;  %v14714_v20 = vand.u32 4294901760, %v14698_v36  ;;  %v14716_v52 = vand.u32 4294901760, %v14700_v62  ;;  %v14717_v45 = vand.u32 4294901760, %v14701_v28  ;;  %v14721_v40 = vld [vmem:[#allocation246_spill] sm:$0xff] }
 0x6a6   :  { %8425 = vmatpush1.bf16.msra.mxu0 %v14706_v6  ;;  %7851 = vmatprep.subr.bf16.mxu1 %v14707_v38  ;;  %v2971_v18 = vsub.f32 %v11619_v11, %v14711_v19  ;;  %v14712_v38 = vand.u32 4294901760, %v11621_v25  ;;  %v5110_v6 = vsub.f32 %v14697_v21, %v14713_v29  ;;  %v2954_v29 = vand.u32 4294901760, %v2953_v48 }
 0x6a7   :  { %8427 = vmatprep.subr.bf16.mxu0 %v14710_v26  ;;  %v5122_v54 = vsub.f32 %v14698_v36, %v14714_v20  ;;  %v2977_v26 = vsub.f32 %v14699_v53, %v14715_v24  ;;  %v2989_v19 = vsub.f32 %v14700_v62, %v14716_v52  ;;  %v2966_v21 = vand.u32 4294901760, %v2965_v47  ;;  %v14722_v53 = vld [vmem:[#allocation190_spill] sm:$0xff] }
 0x6a8   :  { %v2983_v58 = vsub.f32 %v11621_v25, %v14712_v38  ;;  %v5116_v38 = vsub.f32 %v14701_v28, %v14717_v45  ;;  %v14718_v25 = vld [vmem:[#allocation245_spill] sm:$0xff]  ;;  %v14720_v20 = vand.u32 4294901760, %v14705_v55  ;;  %v5093_v52 = vand.u32 4294901760, %v5092_v12  ;;  %v14730_v45 = vld [vmem:[#allocation188_spill] sm:$0xff] }
 0x6a9   :  { %7853 = vmatpush1.bf16.msra.mxu1 %v14719_v32  ;;  %v5105_v62 = vand.u32 4294901760, %v5104_v31  ;;  %v14725_v28 = vld [vmem:[#allocation185_spill] sm:$0xff]  ;;  %v2972_v48 = vand.u32 4294901760, %v2971_v18  ;;  %v5111_v32 = vand.u32 4294901760, %v5110_v6  ;;  %v5123_v22 = vand.u32 4294901760, %v5122_v54  ;;  %v14732_v6 = vld [vmem:[#allocation140_spill] sm:$0xff] }
 0x6aa   :  { %v5128_v36 = vsub.f32 %v14705_v55, %v14720_v20  ;;  %8429 = vmatpush1.bf16.msra.mxu0 %v14722_v53  ;;  %7855 = vmatprep.subr.bf16.mxu1 %v14723_v3  ;;  %v2984_v47 = vand.u32 4294901760, %v2983_v58  ;;  %v2978_v9 = vand.u32 4294901760, %v2977_v26  ;;  %v2990_v20 = vand.u32 4294901760, %v2989_v19  ;;  %v14728_v3 = vld [vmem:[#allocation254_spill] sm:$0xff]  ;;  %v14731_v18 = vld [vmem:[#allocation189_spill] sm:$0xff]  ;;  %v14733_v54 = vld [vmem:[#allocation144_spill] sm:$0xff] }
 0x6ab   :  { %8431 = vmatprep.subr.bf16.mxu0 %v14726_v51  ;;  %v5117_v55 = vand.u32 4294901760, %v5116_v38  ;;  %v14727_v24 = vand.u32 4294901760, %v14718_v25  ;;  %v14729_v12 = vand.u32 4294901760, %v14721_v40  ;;  %v11944_v26 = vpack.c.bf16 %v2960_v59, %v2948_v1 }
 0x6ac   :  { %v5129_v31 = vand.u32 4294901760, %v5128_v36  ;;  %v14734_v19 = vand.u32 4294901760, %v14724_v30  ;;  %v14735_v36 = vand.u32 4294901760, %v14725_v28  ;;  %v11955_v51 = vpack.c.bf16 %v2966_v21, %v2954_v29 }
 0x6ad   :  { %v2995_v53 = vsub.f32 %v14718_v25, %v14727_v24  ;;  %7857 = vmatpush1.bf16.msra.mxu1 %v14728_v3  ;;  %v3007_v11 = vsub.f32 %v14721_v40, %v14729_v12  ;;  %v14736_v3 = vld [vmem:[#allocation149_spill] sm:$0xff]  ;;  %v11953_v12 = vpack.c.bf16 %v5099_v10, %v5087_v50  ;;  %v11957_v58 = vpack.c.bf16 %v5105_v62, %v5093_v52  ;;  %v14742_v52 = vld [vmem:[#allocation250_spill] sm:$0xff] }
 0x6ae   :  { %8433 = vmatpush1.bf16.msra.mxu0 %v14732_v6  ;;  %7859 = vmatprep.subr.bf16.mxu1 %v14733_v54  ;;  %v5134_v38 = vsub.f32 %v14724_v30, %v14734_v19  ;;  %v5146_v24 = vsub.f32 %v14725_v28, %v14735_v36  ;;  %v14737_v6 = vld [vmem:[#allocation222_spill] sm:$0xff]  ;;  %v11960_v1 = vpack.c.bf16 %v2984_v47, %v2972_v48  ;;  %v14738_v10 = vand.u32 4294901760, %v14730_v45  ;;  %v14743_v47 = vld [vmem:[#allocation251_spill] sm:$0xff] }
 0x6af   :  { %8435 = vmatprep.subr.bf16.mxu0 %v14736_v3  ;;  %v13547_v54 = vand.u32 4294901760, %v14737_v6  ;;  %v11962_v59 = vpack.c.bf16 %v5123_v22, %v5111_v32  ;;  %v11964_v40 = vpack.c.bf16 %v2990_v20, %v2978_v9  ;;  %v2996_v19 = vand.u32 4294901760, %v2995_v53  ;;  %v14740_v22 = vld [vmem:[#allocation223_spill] sm:$0xff] }
 0x6b0   :  { %v11967_v36 = vpack.c.bf16 %v5129_v31, %v5117_v55  ;;  %v3008_v3 = vand.u32 4294901760, %v3007_v11  ;;  %v11972_v50 = vsub.f32 %v14730_v45, %v14738_v10  ;;  %v14739_v62 = vand.u32 4294901760, %v14731_v18  ;;  %v14741_v55 = vld [vmem:[#allocation249_spill] sm:$0xff] }
 0x6b1   :  { %7861 = vmatpush1.bf16.msra.mxu1 %v11720_v13  ;;  %v5135_v53 = vand.u32 4294901760, %v5134_v38  ;;  %v5147_v9 = vand.u32 4294901760, %v5146_v24  ;;  %v11987_v29 = vsub.f32 %v14737_v6, %v13547_v54  ;;  %v14744_v31 = vld [vmem:[#allocation253_spill] sm:$0xff]  ;;  %v13558_v32 = vand.u32 4294901760, %v11808_v5 }
 0x6b2   :  { %v11977_v21 = vsub.f32 %v14731_v18, %v14739_v62  ;;  %8437 = vmatpush1.bf16.msra.mxu0 %v11727_v43  ;;  %7863 = vmatprep.subr.bf16.mxu1 %v11733_v4  ;;  %v14745_v62 = vld [vmem:[#allocation134_spill] sm:$0xff]  ;;  %v14746_v24 = vld [vmem:[#allocation137_spill] sm:$0xff]  ;;  %v14748_v4 = vand.u32 4294901760, %v14740_v22  ;;  %v14749_v10 = vand.u32 4294901760, %v14741_v55  ;;  %v14751_v43 = vand.u32 4294901760, %v11810_v2 }
 0x6b3   :  { %8439 = vmatprep.subr.bf16.mxu0 %v11740_v35  ;;  %v11997_v35 = vpack.c.bf16 %v3008_v3, %v2996_v19  ;;  %v14747_v54 = vld [vmem:[#allocation141_spill] sm:$0xff]  ;;  %v14750_v3 = vld [vmem:[#allocation143_spill] sm:$0xff]  ;;  %v14753_v20 = vand.u32 4294901760, %v14742_v52  ;;  %v14755_v19 = vand.u32 4294901760, %v11824_v60  ;;  %v14757_v13 = vand.u32 4294901760, %v14743_v47 }
 0x6b4   :  { %v5152_v38 = vsub.f32 %v14740_v22, %v14748_v4  ;;  %v3019_v11 = vsub.f32 %v14741_v55, %v14749_v10  ;;  %v12015_v48 = vpack.c.bf16 %v14751_v43, %v13558_v32  ;;  %v14754_v10 = vand.u32 4294901760, %v11822_v0 }
 0x6b5   :  { %7865 = vmatpush1.bf16.msra.mxu1 %v11748_v41  ;;  %v5158_v43 = vsub.f32 %v14743_v47, %v14757_v13  ;;  %v14758_v32 = vand.u32 4294901760, %v14744_v31 }
 0x6b6   :  { %8441 = vmatpush1.bf16.msra.mxu0 %v11755_v39  ;;  %7867 = vmatprep.subr.bf16.mxu1 %v11794_v16  ;;  %14752 = vst [vmem:[#allocation65_spill] sm:$0xff] %v12015_v48  ;;  %v3031_v16 = vsub.f32 %v14742_v52, %v14753_v20  ;;  %v12027_v41 = vpack.c.bf16 %v14755_v19, %v14754_v10  ;;  %v14759_v20 = vand.u32 4294901760, %v14745_v62  ;;  %v14760_v39 = vand.u32 4294901760, %v14746_v24 }
 0x6b7   :  { %8443 = vmatprep.subr.bf16.mxu0 %v11806_v56  ;;  %v5170_v48 = vsub.f32 %v14744_v31, %v14758_v32  ;;  %v3002_v19 = vand.u32 4294901760, %v11972_v50  ;;  %v14761_v10 = vand.u32 4294901760, %v14747_v54  ;;  %v14763_v32 = vand.u32 4294901760, %v11831_v49 }
 0x6b8   :  { %14756 = vst [vmem:[#allocation66_spill] sm:$0xff] %v12027_v41  ;;  %v3025_v4 = vsub.f32 %v14745_v62, %v14759_v20  ;;  %v3037_v56 = vsub.f32 %v14746_v24, %v14760_v39  ;;  %v14762_v41 = vld [vmem:[#allocation146_spill] sm:$0xff]  ;;  %v14764_v31 = vand.u32 4294901760, %v11833_v42  ;;  %v12055_v39 = vpack.c.bf16 %v5147_v9, %v5135_v53 }
 0x6b9   :  { %7869 = vmatpush1.bf16.msra.mxu1 %v11817_v27  ;;  %v5164_v13 = vsub.f32 %v14747_v54, %v14761_v10  ;;  %v3014_v50 = vand.u32 4294901760, %v11977_v21  ;;  %v14766_v20 = vand.u32 4294901760, %v14750_v3  ;;  %v14767_v27 = vld [vmem:[#allocation147_spill] sm:$0xff]  ;;  %v5141_v54 = vand.u32 4294901760, %v11987_v29  ;;  %v14773_v29 = vld [vmem:[#allocation41_spill] sm:$0xff] }
 0x6ba   :  { %v12051_v52 = vpack.c.bf16 %v14764_v31, %v14763_v32  ;;  %8445 = vmatpush1.bf16.msra.mxu0 %v11829_v46  ;;  %7871 = vmatprep.subr.bf16.mxu1 %v11836_v33  ;;  %v13570_v47 = vand.u32 4294901760, %v14767_v27  ;;  %v5153_v31 = vand.u32 4294901760, %v5152_v38  ;;  %v3020_v32 = vand.u32 4294901760, %v3019_v11  ;;  %v14768_v46 = vld [vmem:[#allocation29_spill] sm:$0xff] }
 0x6bb   :  { %v5176_v10 = vsub.f32 %v14750_v3, %v14766_v20  ;;  %8447 = vmatprep.subr.bf16.mxu0 %v11839_v57  ;;  %v5159_v33 = vand.u32 4294901760, %v5158_v43  ;;  %v5171_v53 = vand.u32 4294901760, %v5170_v48  ;;  %v3026_v9 = vand.u32 4294901760, %v3025_v4  ;;  %v14771_v48 = vld [vmem:[#allocation153_spill] sm:$0xff] }
 0x6bc   :  { %14765 = vst [vmem:[#allocation68_spill] sm:$0xff] %v12051_v52  ;;  %v3032_v52 = vand.u32 4294901760, %v3031_v16  ;;  %2914 = vmatmul.mubr.f32.vlgmr.msra.gmra.mrb[0].mxu1 %v14768_v46  ;;  %v3038_v24 = vand.u32 4294901760, %v3037_v56  ;;  %v5165_v21 = vand.u32 4294901760, %v5164_v13  ;;  %v14769_v20 = vand.u32 4294901760, %v14762_v41 }
 0x6bd   :  { %7873 = vmatpush1.bf16.msra.mxu1 %v11841_v44  ;;  %5053 = vmatmul.mubr.f32.vlgmr.msra.gmra.mrb[2].mxu0 %v14768_v46  ;;  %v5177_v16 = vand.u32 4294901760, %v5176_v10  ;;  %v3055_v56 = vsub.f32 %v14767_v27, %v13570_v47  ;;  %v14770_v44 = vld [vmem:[#allocation152_spill] sm:$0xff]  ;;  %v7884_v4 = vpack.c.bf16 %v3014_v50, %v3002_v19  ;;  %v8460_v43 = vpack.c.bf16 %v5153_v31, %v5141_v54  ;;  %v14772_v10 = vld [vmem:[#allocation39_spill] sm:$0xff] }
 0x6be   :  { %v3043_v57 = vsub.f32 %v14762_v41, %v14769_v20  ;;  %8449 = vmatpush1.bf16.msra.mxu0 %v11849_v17  ;;  %7875 = vmatprep.subr.bf16.mxu1 %v11944_v26  ;;  %v13573_v46 = vand.u32 4294901760, %v14770_v44  ;;  %v13571_v13 = vand.u32 4294901760, %v11729_v15  ;;  %v13572_v20 = vand.u32 4294901760, %v11731_v7 }
 0x6bf   :  { %8451 = vmatprep.subr.bf16.mxu0 %v11953_v12  ;;  %3144 = vmatprep.mubr.f32.mxu1 %v14696_v34  ;;  %v7886_v17 = vpack.c.bf16 %v3032_v52, %v3020_v32  ;;  %v8462_v26 = vpack.c.bf16 %v5171_v53, %v5159_v33  ;;  %v13576_v11 = vand.u32 4294901760, %v14772_v10  ;;  %v13580_v47 = vand.u32 4294901760, %v14773_v29 }
 0x6c0   :  { %5283 = vmatprep.mubr.f32.mxu0 %v14696_v34  ;;  %v7888_v38 = vpack.c.bf16 %v3038_v24, %v3026_v9  ;;  %v3044_v12 = vand.u32 4294901760, %v3043_v57  ;;  %v14774_v54 = vand.u32 4294901760, %v11714_v63  ;;  %v14775_v50 = vand.u32 4294901760, %v11716_v37 }
 0x6c1   :  { %7877 = vmatpush1.bf16.msra.mxu1 %v11955_v51  ;;  %v8464_v52 = vpack.c.bf16 %v5177_v16, %v5165_v21  ;;  %v3056_v32 = vand.u32 4294901760, %v3055_v56  ;;  %v3049_v51 = vsub.f32 %v14770_v44, %v13573_v46  ;;  %v14776_v24 = vand.u32 4294901760, %v14771_v48  ;;  %v14778_v21 = vld [vmem:[#allocation45_spill] sm:$0xff]  ;;  %v14779_v56 = vld [vmem:[#allocation48_spill] sm:$0xff]  ;;  %v14781_v46 = vld [vmem:[#allocation51_spill] sm:$0xff] }
 0x6c2   :  { %v5182_v19 = vsub.f32 %v11714_v63, %v14774_v54  ;;  %v5194_v31 = vsub.f32 %v11716_v37, %v14775_v50  ;;  %8453 = vmatpush1.bf16.msra.mxu0 %v11957_v58  ;;  %7879 = vmatprep.subr.bf16.mxu1 %v11960_v1  ;;  %v5188_v53 = vsub.f32 %v11729_v15, %v13571_v13  ;;  %v14777_v1 = vld [vmem:[#allocation44_spill] sm:$0xff]  ;;  %v14780_v50 = vld [vmem:[#allocation221_spill] sm:$0xff]  ;;  %v14783_v15 = vld [vmem:[#allocation54_spill] sm:$0xff]  ;;  %v14785_v57 = vand.u32 4294901760, %v14778_v21 }
 0x6c3   :  { %v3061_v33 = vsub.f32 %v14771_v48, %v14776_v24  ;;  %8455 = vmatprep.subr.bf16.mxu0 %v11962_v59  ;;  %v5200_v58 = vsub.f32 %v11731_v7, %v13572_v20  ;;  %v3067_v16 = vsub.f32 %v14772_v10, %v13576_v11  ;;  %v3079_v59 = vsub.f32 %v14773_v29, %v13580_v47  ;;  %v14782_v7 = vld [vmem:[#allocation52_spill] sm:$0xff] }
 0x6c4   :  { %v5183_v13 = vand.u32 4294901760, %v5182_v19  ;;  %v5195_v20 = vand.u32 4294901760, %v5194_v31  ;;  %v3050_v11 = vand.u32 4294901760, %v3049_v51  ;;  %v5189_v24 = vand.u32 4294901760, %v5188_v53 }
 0x6c5   :  { %7881 = vmatpush1.bf16.msra.mxu1 %v11964_v40  ;;  %v3062_v10 = vand.u32 4294901760, %v3061_v33  ;;  %v5201_v40 = vand.u32 4294901760, %v5200_v58  ;;  %v14784_v19 = vand.u32 4294901760, %v14777_v1  ;;  %v3068_v9 = vand.u32 4294901760, %v3067_v16 }
 0x6c6   :  { %8457 = vmatpush1.bf16.msra.mxu0 %v11967_v36  ;;  %7883 = vmatprep.subr.bf16.mxu1 %v11997_v35  ;;  %v5218_v36 = vsub.f32 %v14778_v21, %v14785_v57  ;;  %v3080_v35 = vand.u32 4294901760, %v3079_v59  ;;  %v14786_v51 = vand.u32 4294901760, %v14779_v56  ;;  %v14787_v54 = vand.u32 4294901760, %v14780_v50 }
 0x6c7   :  { %8459 = vmatprep.subr.bf16.mxu0 %v12055_v39  ;;  %v5206_v31 = vsub.f32 %v14777_v1, %v14784_v19  ;;  %v7890_v53 = vpack.c.bf16 %v3056_v32, %v3044_v12  ;;  %v8466_v58 = vpack.c.bf16 %v5195_v20, %v5183_v13  ;;  %v14788_v47 = vand.u32 4294901760, %v14781_v46 }
 0x6c8   :  { %v3073_v33 = vsub.f32 %v14779_v56, %v14786_v51  ;;  %v3085_v39 = vsub.f32 %v14780_v50, %v14787_v54  ;;  %v14789_v1 = vand.u32 4294901760, %v14782_v7  ;;  %v7892_v16 = vpack.c.bf16 %v3062_v10, %v3050_v11 }
 0x6c9   :  { %7885 = vmatpush1.bf16.msra.mxu1 %v7884_v4  ;;  %v5212_v19 = vsub.f32 %v14781_v46, %v14788_v47  ;;  %v14790_v59 = vand.u32 4294901760, %v14783_v15  ;;  %v14791_v54 = vand.u32 4294901760, %v11796_v23  ;;  %v5207_v13 = vand.u32 4294901760, %v5206_v31 }
 0x6ca   :  { %v5224_v57 = vsub.f32 %v14782_v7, %v14789_v1  ;;  %8461 = vmatpush1.bf16.msra.mxu0 %v8460_v43  ;;  %7887 = vmatprep.subr.bf16.mxu1 %v7886_v17  ;;  %v5219_v20 = vand.u32 4294901760, %v5218_v36  ;;  %v14792_v47 = vand.u32 4294901760, %v11808_v5  ;;  %v14793_v32 = vand.u32 4294901760, %v11810_v2 }
 0x6cb   :  { %v3091_v51 = vsub.f32 %v14783_v15, %v14790_v59  ;;  %v3103_v4 = vsub.f32 %v11796_v23, %v14791_v54  ;;  %8463 = vmatprep.subr.bf16.mxu0 %v8462_v26  ;;  %v8468_v11 = vpack.c.bf16 %v5201_v40, %v5189_v24  ;;  %v7894_v17 = vpack.c.bf16 %v3080_v35, %v3068_v9 }
 0x6cc   :  { %v5230_v12 = vsub.f32 %v11808_v5, %v14792_v47  ;;  %v5242_v43 = vsub.f32 %v11810_v2, %v14793_v32  ;;  %v3074_v10 = vand.u32 4294901760, %v3073_v33  ;;  %v3086_v1 = vand.u32 4294901760, %v3085_v39 }
 0x6cd   :  { %7889 = vmatpush1.bf16.msra.mxu1 %v7888_v38  ;;  %v5213_v59 = vand.u32 4294901760, %v5212_v19  ;;  %v5225_v15 = vand.u32 4294901760, %v5224_v57  ;;  %v14794_v54 = vand.u32 4294901760, %v11822_v0  ;;  %v14795_v31 = vand.u32 4294901760, %v11824_v60 }
 0x6ce   :  { %8465 = vmatpush1.bf16.msra.mxu0 %v8464_v52  ;;  %7891 = vmatprep.subr.bf16.mxu1 %v7890_v53  ;;  %v3092_v47 = vand.u32 4294901760, %v3091_v51  ;;  %v3104_v5 = vand.u32 4294901760, %v3103_v4  ;;  %v14796_v24 = vand.u32 4294901760, %v11831_v49  ;;  %v14797_v38 = vand.u32 4294901760, %v11833_v42 }
 0x6cf   :  { %v3097_v26 = vsub.f32 %v11822_v0, %v14794_v54  ;;  %v3109_v36 = vsub.f32 %v11824_v60, %v14795_v31  ;;  %8467 = vmatprep.subr.bf16.mxu0 %v8466_v58  ;;  %v8470_v35 = vpack.c.bf16 %v5219_v20, %v5207_v13  ;;  %v5231_v33 = vand.u32 4294901760, %v5230_v12  ;;  %v14798_v13 = vld [vmem:[#allocation226_spill] sm:$0xff]  ;;  %v14799_v20 = vld [vmem:[#allocation229_spill] sm:$0xff] }
 0x6d0   :  { %v5236_v9 = vsub.f32 %v11831_v49, %v14796_v24  ;;  %v5248_v40 = vsub.f32 %v11833_v42, %v14797_v38  ;;  %v5243_v39 = vand.u32 4294901760, %v5242_v43  ;;  %v7896_v19 = vpack.c.bf16 %v3086_v1, %v3074_v10  ;;  %v14801_v43 = vld [vmem:[#allocation233_spill] sm:$0xff]  ;;  %v14804_v1 = vld [vmem:[#allocation224_spill] sm:$0xff]  ;;  %v14807_v24 = vld [vmem:[#allocation26_spill] sm:$0xff] }
 0x6d1   :  { %7893 = vmatpush1.bf16.msra.mxu1 %v7892_v16  ;;  %v3098_v57 = vand.u32 4294901760, %v3097_v26  ;;  %v3110_v32 = vand.u32 4294901760, %v3109_v36  ;;  %v8472_v52 = vpack.c.bf16 %v5225_v15, %v5213_v59  ;;  %v7898_v53 = vpack.c.bf16 %v3104_v5, %v3092_v47  ;;  %v14800_v16 = vld [vmem:[#allocation232_spill] sm:$0xff]  ;;  %v14802_v5 = vld [vmem:[#allocation235_spill] sm:$0xff] }
 0x6d2   :  { %8469 = vmatpush1.bf16.msra.mxu0 %v8468_v11  ;;  %7895 = vmatprep.subr.bf16.mxu1 %v7894_v17  ;;  %v5237_v51 = vand.u32 4294901760, %v5236_v9  ;;  %v5249_v4 = vand.u32 4294901760, %v5248_v40  ;;  %v8474_v54 = vpack.c.bf16 %v5243_v39, %v5231_v33  ;;  %v7902_v12 = vpack.c.bf16 %v14799_v20, %v14798_v13  ;;  %v14803_v11 = vld [vmem:[#allocation237_spill] sm:$0xff]  ;;  %v14805_v26 = vld [vmem:[#allocation228_spill] sm:$0xff]  ;;  %v14806_v36 = vld [vmem:[#allocation231_spill] sm:$0xff] }
 0x6d3   :  { %8471 = vmatprep.subr.bf16.mxu0 %v8470_v35  ;;  %v7900_v31 = vpack.c.bf16 %v3110_v32, %v3098_v57  ;;  %v8478_v10 = vpack.c.bf16 %v14801_v43, %v14800_v16  ;;  %v7904_v15 = vpack.c.bf16 %v11578_v61, %v11575_v14  ;;  %v8480_v17 = vpack.c.bf16 %v14803_v11, %v14802_v5  ;;  %v14808_v9 = vld [vmem:[#allocation162_spill] sm:$0xff]  ;;  %v14809_v38 = vld [vmem:[#allocation164_spill] sm:$0xff]  ;;  %v14813_v57 = vld [vmem:[#allocation173_spill] sm:$0xff] }
 0x6d4   :  { %v8476_v58 = vpack.c.bf16 %v5249_v4, %v5237_v51  ;;  %v7906_v59 = vpack.c.bf16 %v14804_v1, %v11591_v8  ;;  %v8482_v47 = vpack.c.bf16 %v14806_v36, %v14805_v26  ;;  %v7908_v40 = vpack.c.bf16 %v14809_v38, %v14808_v9  ;;  %v14810_v35 = vld [vmem:[#allocation166_spill] sm:$0xff]  ;;  %v14811_v33 = vld [vmem:[#allocation168_spill] sm:$0xff] }
 0x6d5   :  { %7897 = vmatpush1.bf16.msra.mxu1 %v7896_v19  ;;  %v8484_v39 = vpack.c.bf16 %v14811_v33, %v14810_v35  ;;  %v14812_v19 = vld [vmem:[#allocation171_spill] sm:$0xff]  ;;  %v14816_v4 = vld [vmem:[#allocation178_spill] sm:$0xff] }
 0x6d6   :  { %8473 = vmatpush1.bf16.msra.mxu0 %v8472_v52  ;;  %7899 = vmatprep.subr.bf16.mxu1 %v7898_v53  ;;  %v7910_v32 = vpack.c.bf16 %v14813_v57, %v14812_v19  ;;  %v14814_v52 = vld [vmem:[#allocation176_spill] sm:$0xff]  ;;  %v14815_v53 = vld [vmem:[#allocation177_spill] sm:$0xff] }
 0x6d7   :  { %8475 = vmatprep.subr.bf16.mxu0 %v8474_v54  ;;  %v8486_v51 = vpack.c.bf16 %v14815_v53, %v14814_v52  ;;  %v14817_v54 = vld [vmem:[#allocation158_spill] sm:$0xff] }
 0x6d9   :  { %7901 = vmatpush1.bf16.msra.mxu1 %v7900_v31  ;;  %v7912_v31 = vpack.c.bf16 %v14817_v54, %v14816_v4 }
 0x6da   :  { %8477 = vmatpush1.bf16.msra.mxu0 %v8476_v58  ;;  %7903 = vmatprep.subr.bf16.mxu1 %v7902_v12  ;;  %v14818_v58 = vld [vmem:[#allocation240_spill] sm:$0xff]  ;;  %v14819_v12 = vld [vmem:[#allocation241_spill] sm:$0xff] }
 0x6db   :  { %8479 = vmatprep.subr.bf16.mxu0 %v8478_v10  ;;  %v8488_v10 = vpack.c.bf16 %v14819_v12, %v14818_v58  ;;  %v14823_v12 = vld [vmem:[#allocation253_spill] sm:$0xff] }
 0x6dc   :  { %3146 = vmatmul.mubr.f32.vlgmr.msra.gmra.mrb[0].mxu1 %v14807_v24 }
 0x6dd   :  { %7905 = vmatpush1.bf16.msra.mxu1 %v7904_v15  ;;  %5285 = vmatmul.mubr.f32.vlgmr.msra.gmra.mrb[2].mxu0 %v14807_v24  ;;  %v14820_v15 = vld [vmem:[#allocation246_spill] sm:$0xff]  ;;  %v14822_v24 = vld [vmem:[#allocation251_spill] sm:$0xff] }
 0x6de   :  { %8481 = vmatpush1.bf16.msra.mxu0 %v8480_v17  ;;  %7907 = vmatprep.subr.bf16.mxu1 %v7906_v59  ;;  %v7914_v17 = vpack.c.bf16 %v14820_v15, %v14718_v25  ;;  %v8490_v59 = vpack.c.bf16 %v14725_v28, %v14724_v30  ;;  %v8494_v15 = vpack.c.bf16 %v14823_v12, %v14822_v24 }
 0x6df   :  { %8483 = vmatprep.subr.bf16.mxu0 %v8482_v47  ;;  %3280 = vmatprep.mubr.f32.mxu1 %v14696_v34  ;;  %v7916_v47 = vpack.c.bf16 %v14731_v18, %v14730_v45 }
 0x6e0   :  { %5419 = vmatprep.mubr.f32.mxu0 %v14696_v34 }
 0x6e1   :  { %7909 = vmatpush1.bf16.msra.mxu1 %v7908_v40  ;;  %v8492_v40 = vpack.c.bf16 %v14740_v22, %v14737_v6 }
 0x6e2   :  { %8485 = vmatpush1.bf16.msra.mxu0 %v8484_v39  ;;  %7911 = vmatprep.subr.bf16.mxu1 %v7910_v32  ;;  %v14821_v39 = vld [vmem:[#allocation250_spill] sm:$0xff] }
 0x6e3   :  { %8487 = vmatprep.subr.bf16.mxu0 %v8486_v51  ;;  %v7918_v32 = vpack.c.bf16 %v14821_v39, %v14741_v55  ;;  %v14824_v51 = vld [vmem:[#allocation137_spill] sm:$0xff]  ;;  %v8498_v39 = vpack.c.bf16 %v11716_v37, %v11714_v63 }
 0x6e4   :  { %v7920_v28 = vpack.c.bf16 %v14824_v51, %v14745_v62  ;;  %v14827_v51 = vld [vmem:[#allocation36_spill] sm:$0xff] }
 0x6e5   :  { %7913 = vmatpush1.bf16.msra.mxu1 %v7912_v31  ;;  %v14825_v31 = vld [vmem:[#allocation141_spill] sm:$0xff] }
 0x6e6   :  { %8489 = vmatpush1.bf16.msra.mxu0 %v8488_v10  ;;  %7915 = vmatprep.subr.bf16.mxu1 %v7914_v17  ;;  %v8496_v10 = vpack.c.bf16 %v14750_v3, %v14825_v31  ;;  %v7922_v17 = vpack.c.bf16 %v14767_v27, %v14762_v41  ;;  %v14829_v3 = vld [vmem:[#allocation44_spill] sm:$0xff] }
 0x6e7   :  { %8491 = vmatprep.subr.bf16.mxu0 %v8490_v59  ;;  %v7924_v59 = vpack.c.bf16 %v14771_v48, %v14770_v44  ;;  %v8502_v27 = vpack.c.bf16 %v14778_v21, %v14829_v3 }
 0x6e9   :  { %7917 = vmatpush1.bf16.msra.mxu1 %v7916_v47  ;;  %v14826_v47 = vld [vmem:[#allocation35_spill] sm:$0xff] }
 0x6ea   :  { %8493 = vmatpush1.bf16.msra.mxu0 %v8492_v40  ;;  %7919 = vmatprep.subr.bf16.mxu1 %v7918_v32  ;;  %v8500_v40 = vpack.c.bf16 %v14827_v51, %v14826_v47  ;;  %v14828_v32 = vld [vmem:[#allocation39_spill] sm:$0xff]  ;;  %v14831_v51 = vld [vmem:[#allocation60_spill] sm:$0xff] }
 0x6eb   :  { %8495 = vmatprep.subr.bf16.mxu0 %v8494_v15  ;;  %v7926_v62 = vpack.c.bf16 %v14773_v29, %v14828_v32  ;;  %v7928_v15 = vpack.c.bf16 %v14780_v50, %v14779_v56  ;;  %v8506_v29 = vpack.c.bf16 %v11810_v2, %v14831_v51  ;;  %v14836_v2 = vld [vmem:[#allocation234_spill] sm:$0xff] }
 0x6ec   :  { %v14842_v51 = vld [vmem:[#allocation174_spill] sm:$0xff] }
 0x6ed   :  { %7921 = vmatpush1.bf16.msra.mxu1 %v7920_v28  ;;  %v8504_v28 = vpack.c.bf16 %v14782_v7, %v14781_v46 }
 0x6ee   :  { %8497 = vmatpush1.bf16.msra.mxu0 %v8496_v10  ;;  %7923 = vmatprep.subr.bf16.mxu1 %v7922_v17  ;;  %v14830_v10 = vld [vmem:[#allocation54_spill] sm:$0xff] }
 0x6ef   :  { %8499 = vmatprep.subr.bf16.mxu0 %v8498_v39  ;;  %v7930_v17 = vpack.c.bf16 %v11796_v23, %v14830_v10  ;;  %v7932_v39 = vpack.c.bf16 %v11824_v60, %v11822_v0  ;;  %v14835_v23 = vld [vmem:[#allocation236_spill] sm:$0xff]  ;;  %v14837_v0 = vld [vmem:[#allocation238_spill] sm:$0xff]  ;;  %v14838_v60 = vld [vmem:[#allocation227_spill] sm:$0xff] }
 0x6f1   :  { %7925 = vmatpush1.bf16.msra.mxu1 %v7924_v59  ;;  %v8508_v59 = vpack.c.bf16 %v11833_v42, %v11831_v49  ;;  %v14839_v49 = vld [vmem:[#allocation159_spill] sm:$0xff]  ;;  %v14840_v42 = vld [vmem:[#allocation165_spill] sm:$0xff] }
 0x6f2   :  { %8501 = vmatpush1.bf16.msra.mxu0 %v8500_v40  ;;  %7927 = vmatprep.subr.bf16.mxu1 %v7926_v62  ;;  %v14832_v62 = vld [vmem:[#allocation225_spill] sm:$0xff]  ;;  %v14833_v40 = vld [vmem:[#allocation230_spill] sm:$0xff] }
 0x6f3   :  { %8503 = vmatprep.subr.bf16.mxu0 %v8502_v27  ;;  %v14834_v27 = vld [vmem:[#allocation27_spill] sm:$0xff] }
 0x6f5   :  { %7929 = vmatpush1.bf16.msra.mxu1 %v7928_v15  ;;  %v14843_v15 = vld [vmem:[#allocation239_spill] sm:$0xff] }
 0x6f6   :  { %8505 = vmatpush1.bf16.msra.mxu0 %v8504_v28  ;;  %7931 = vmatprep.subr.bf16.mxu1 %v7930_v17  ;;  %v14844_v28 = vld [vmem:[#allocation161_spill] sm:$0xff]  ;;  %v14845_v17 = vld [vmem:[#allocation243_spill] sm:$0xff] }
 0x6f7   :  { %8507 = vmatprep.subr.bf16.mxu0 %v8506_v29  ;;  %v14841_v29 = vld [vmem:[#allocation170_spill] sm:$0xff] }
 0x6f9   :  { %7933 = vmatpush1.bf16.msra.mxu1 %v7932_v39  ;;  %v14846_v39 = vld [vmem:[#allocation180_spill] sm:$0xff] }
 0x6fa   :  { %8509 = vmatpush1.bf16.msra.mxu0 %v8508_v59  ;;  %7935 = vmatprep.subr.bf16.mxu1 %v14832_v62  ;;  %v14847_v59 = vld [vmem:[#allocation186_spill] sm:$0xff] }
 0x6fb   :  { %8511 = vmatprep.subr.bf16.mxu0 %v14833_v40 }
 0x6fc   :  { %3283 = vmatmul.mubr.f32.vlgmr.msra.gmra.mrb[0].mxu1 %v14834_v27 }
 0x6fd   :  { %7937 = vmatpush1.bf16.msra.mxu1 %v14835_v23  ;;  %5422 = vmatmul.mubr.f32.vlgmr.msra.gmra.mrb[2].mxu0 %v14834_v27  ;;  %v14848_v27 = vld [vmem:[#allocation190_spill] sm:$0xff] }
 0x6fe   :  { %8513 = vmatpush1.bf16.msra.mxu0 %v14836_v2  ;;  %7939 = vmatprep.subr.bf16.mxu1 %v14837_v0  ;;  %v14867_v0 = vld [vmem:[#allocation62_spill] sm:$0xff] }
 0x6ff   :  { %8515 = vmatprep.subr.bf16.mxu0 %v14838_v60  ;;  %3385 = vmatprep.mubr.f32.mxu1 %v14696_v34  ;;  %v14849_v60 = vld [vmem:[#allocation248_spill] sm:$0xff] }
 0x700   :  { %5524 = vmatprep.mubr.f32.mxu0 %v14696_v34 }
 0x701   :  { %7941 = vmatpush1.bf16.msra.mxu1 %v14839_v49  ;;  %v14850_v49 = vld [vmem:[#allocation252_spill] sm:$0xff] }
 0x702   :  { %8517 = vmatpush1.bf16.msra.mxu0 %v14840_v42  ;;  %7943 = vmatprep.subr.bf16.mxu1 %v14841_v29  ;;  %v14851_v42 = vld [vmem:[#allocation254_spill] sm:$0xff]  ;;  %v14852_v29 = vld [vmem:[#allocation140_spill] sm:$0xff] }
 0x703   :  { %8519 = vmatprep.subr.bf16.mxu0 %v14842_v51  ;;  %v14853_v51 = vld [vmem:[#allocation144_spill] sm:$0xff] }
 0x705   :  { %7945 = vmatpush1.bf16.msra.mxu1 %v14843_v15  ;;  %v14854_v15 = vld [vmem:[#allocation149_spill] sm:$0xff] }
 0x706   :  { %8521 = vmatpush1.bf16.msra.mxu0 %v14844_v28  ;;  %7947 = vmatprep.subr.bf16.mxu1 %v14845_v17  ;;  %v14855_v28 = vld [vmem:[#allocation150_spill] sm:$0xff]  ;;  %v14856_v17 = vld [vmem:[#allocation220_spill] sm:$0xff] }
 0x707   :  { %8523 = vmatprep.subr.bf16.mxu0 %v14846_v39  ;;  %v14857_v39 = vld [vmem:[#allocation37_spill] sm:$0xff] }
 0x709   :  { %7949 = vmatpush1.bf16.msra.mxu1 %v14847_v59  ;;  %v14858_v59 = vld [vmem:[#allocation42_spill] sm:$0xff] }
 0x70a   :  { %8525 = vmatpush1.bf16.msra.mxu0 %v14848_v27  ;;  %7951 = vmatprep.subr.bf16.mxu1 %v14849_v60  ;;  %v14859_v27 = vld [vmem:[#allocation46_spill] sm:$0xff] }
 0x70b   :  { %8527 = vmatprep.subr.bf16.mxu0 %v14850_v49  ;;  %v14860_v60 = vld [vmem:[#allocation50_spill] sm:$0xff]  ;;  %v14861_v49 = vld [vmem:[#allocation55_spill] sm:$0xff] }
 0x70d   :  { %7953 = vmatpush1.bf16.msra.mxu1 %v14851_v42 }
 0x70e   :  { %8529 = vmatpush1.bf16.msra.mxu0 %v14852_v29  ;;  %7955 = vmatprep.subr.bf16.mxu1 %v14853_v51  ;;  %v14862_v29 = vand.u32 4294901760, %v14798_v13  ;;  %v14863_v51 = vand.u32 4294901760, %v14799_v20  ;;  %v14871_v13 = vand.u32 4294901760, %v14802_v5  ;;  %v14872_v20 = vand.u32 4294901760, %v14803_v11 }
 0x70f   :  { %8531 = vmatprep.subr.bf16.mxu0 %v14854_v15  ;;  %v14864_v15 = vld [vmem:[#allocation59_spill] sm:$0xff]  ;;  %v14878_v5 = vand.u32 4294901760, %v14808_v9  ;;  %v14879_v11 = vand.u32 4294901760, %v14809_v38  ;;  %v14885_v9 = vand.u32 4294901760, %v14815_v53  ;;  %v14886_v38 = vand.u32 4294901760, %v14816_v4 }
 0x710   :  { %v7966_v42 = vpack.c.bf16 %v14863_v51, %v14862_v29  ;;  %v8544_v29 = vpack.c.bf16 %v14872_v20, %v14871_v13  ;;  %v14891_v53 = vand.u32 4294901760, %v14718_v25  ;;  %v14892_v20 = vld [vmem:[#allocation246_spill] sm:$0xff]  ;;  %v14900_v25 = vand.u32 4294901760, %v14740_v22 }
 0x711   :  { %7957 = vmatpush1.bf16.msra.mxu1 %v14855_v28  ;;  %v14865_v28 = vand.u32 4294901760, %v14800_v16  ;;  %v14873_v16 = vand.u32 4294901760, %v11591_v8  ;;  %v14880_v8 = vand.u32 4294901760, %v14810_v35  ;;  %v14887_v35 = vand.u32 4294901760, %v14817_v54 }
 0x712   :  { %8533 = vmatpush1.bf16.msra.mxu0 %v14856_v17  ;;  %7959 = vmatprep.subr.bf16.mxu1 %v14857_v39  ;;  %v14866_v17 = vand.u32 4294901760, %v14801_v43  ;;  %v14874_v43 = vand.u32 4294901760, %v14804_v1  ;;  %v14881_v1 = vand.u32 4294901760, %v14811_v33  ;;  %v14897_v54 = vand.u32 4294901760, %v14730_v45 }
 0x713   :  { %8535 = vmatprep.subr.bf16.mxu0 %v14858_v59  ;;  %v7976_v33 = vpack.c.bf16 %v14887_v35, %v14886_v38  ;;  %v14905_v45 = vand.u32 4294901760, %v14823_v12  ;;  %v14910_v22 = vand.u32 4294901760, %v14825_v31  ;;  %v14916_v12 = vand.u32 4294901760, %v11714_v63 }
 0x714   :  { %v8542_v39 = vpack.c.bf16 %v14866_v17, %v14865_v28  ;;  %v7970_v51 = vpack.c.bf16 %v14874_v43, %v14873_v16  ;;  %v14875_v28 = vand.u32 4294901760, %v14805_v26  ;;  %v8548_v26 = vpack.c.bf16 %v14881_v1, %v14880_v8 }
 0x715   :  { %7961 = vmatpush1.bf16.msra.mxu1 %v14859_v27  ;;  %v14868_v27 = vand.u32 4294901760, %v11575_v14  ;;  %v14876_v14 = vand.u32 4294901760, %v14806_v36  ;;  %v14882_v36 = vand.u32 4294901760, %v14812_v19  ;;  %v14883_v17 = vand.u32 4294901760, %v14813_v57  ;;  %v14889_v57 = vld [vmem:[#allocation241_spill] sm:$0xff] }
 0x716   :  { %8537 = vmatpush1.bf16.msra.mxu0 %v14860_v60  ;;  %7963 = vmatprep.subr.bf16.mxu1 %v14861_v49  ;;  %v14869_v60 = vand.u32 4294901760, %v11578_v61  ;;  %v14870_v49 = vld [vmem:[#allocation63_spill] sm:$0xff]  ;;  %v14888_v19 = vand.u32 4294901760, %v14818_v58  ;;  %v14890_v13 = vand.u32 4294901760, %v14889_v57  ;;  %v14894_v43 = vand.u32 4294901760, %v14724_v30 }
 0x717   :  { %8539 = vmatprep.subr.bf16.mxu0 %v14864_v15  ;;  %v8546_v61 = vpack.c.bf16 %v14876_v14, %v14875_v28  ;;  %v14898_v14 = vand.u32 4294901760, %v14731_v18  ;;  %v14904_v8 = vand.u32 4294901760, %v14822_v24  ;;  %v14906_v18 = vld [vmem:[#allocation134_spill] sm:$0xff]  ;;  %v14917_v35 = vand.u32 4294901760, %v11716_v37 }
 0x718   :  { %v7968_v59 = vpack.c.bf16 %v14869_v60, %v14868_v27  ;;  %v14877_v60 = vld [vmem:[#allocation28_spill] sm:$0xff]  ;;  %v14919_v57 = vand.u32 4294901760, %v14771_v48  ;;  %v14926_v37 = vand.u32 4294901760, %v14829_v3  ;;  %v14928_v48 = vand.u32 4294901760, %v14779_v56  ;;  %v14936_v56 = vld [vmem:[#allocation66_spill] sm:$0xff] }
 0x719   :  { %7965 = vmatpush1.bf16.msra.mxu1 %v14867_v0  ;;  %v7980_v58 = vpack.c.bf16 %v14898_v14, %v14897_v54  ;;  %v8558_v1 = vpack.c.bf16 %v14905_v45, %v14904_v8  ;;  %v14932_v54 = vand.u32 4294901760, %v14830_v10  ;;  %v14933_v14 = vld [vmem:[#allocation57_spill] sm:$0xff]  ;;  %v14940_v10 = vld [vmem:[#allocation227_spill] sm:$0xff]  ;;  %v14953_v8 = vld [vmem:[#allocation254_spill] sm:$0xff] }
 0x71a   :  { %8541 = vmatpush1.bf16.msra.mxu0 %v14870_v49  ;;  %7967 = vmatprep.subr.bf16.mxu1 %v7966_v42  ;;  %v7972_v42 = vpack.c.bf16 %v14879_v11, %v14878_v5  ;;  %v14901_v5 = vand.u32 4294901760, %v14741_v55  ;;  %v14902_v11 = vld [vmem:[#allocation250_spill] sm:$0xff]  ;;  %v14911_v55 = vld [vmem:[#allocation143_spill] sm:$0xff]  ;;  %v14934_v3 = vand.u32 4294901760, %v14933_v14  ;;  %v14954_v45 = vld [vmem:[#allocation140_spill] sm:$0xff] }
 0x71b   :  { %8543 = vmatprep.subr.bf16.mxu0 %v8542_v39  ;;  %v7974_v39 = vpack.c.bf16 %v14883_v17, %v14882_v36  ;;  %v14903_v30 = vand.u32 4294901760, %v14902_v11  ;;  %v14908_v36 = vld [vmem:[#allocation137_spill] sm:$0xff]  ;;  %v14949_v11 = vld [vmem:[#allocation186_spill] sm:$0xff] }
 0x71c   :  { %3389 = vmatmul.mubr.f32.vlgmr.msra.gmra.mrb[0].mxu1 %v14877_v60  ;;  %v14909_v17 = vand.u32 4294901760, %v14908_v36  ;;  %v14958_v36 = vld [vmem:[#allocation220_spill] sm:$0xff]  ;;  %v5859_v14 = vld [vmem:[#allocation15 + $0xb8] sm:$0xff] }
 0x71d   :  { %7969 = vmatpush1.bf16.msra.mxu1 %v7968_v59  ;;  %5528 = vmatmul.mubr.f32.vlgmr.msra.gmra.mrb[2].mxu0 %v14877_v60  ;;  %v14884_v59 = vand.u32 4294901760, %v14814_v52  ;;  %v8552_v52 = vpack.c.bf16 %v14890_v13, %v14888_v19  ;;  %v14918_v19 = vand.u32 4294901760, %v14770_v44  ;;  %v14920_v13 = vand.u32 4294901760, %v14826_v47 }
 0x71e   :  { %8545 = vmatpush1.bf16.msra.mxu0 %v8544_v29  ;;  %7971 = vmatprep.subr.bf16.mxu1 %v7970_v51  ;;  %v14893_v29 = vand.u32 4294901760, %v14892_v20  ;;  %v14895_v51 = vld [vmem:[#allocation185_spill] sm:$0xff]  ;;  %v14923_v20 = vand.u32 4294901760, %v14828_v32  ;;  %v14927_v44 = vand.u32 4294901760, %v14778_v21  ;;  %v14931_v32 = vand.u32 4294901760, %v14782_v7  ;;  %v14938_v7 = vld [vmem:[#allocation26_spill] sm:$0xff] }
 0x71f   :  { %8547 = vmatprep.subr.bf16.mxu0 %v8546_v61  ;;  %v8550_v27 = vpack.c.bf16 %v14885_v9, %v14884_v59  ;;  %3555 = vmatprep.mubr.f32.mxu1 %v14696_v34  ;;  %v14896_v4 = vand.u32 4294901760, %v14895_v51  ;;  %v14899_v61 = vand.u32 4294901760, %v14737_v6  ;;  %v14913_v9 = vand.u32 4294901760, %v14762_v41  ;;  %v14921_v41 = vld [vmem:[#allocation36_spill] sm:$0xff]  ;;  %v14935_v21 = vld [vmem:[#allocation65_spill] sm:$0xff] }
 0x720   :  { %5694 = vmatprep.mubr.f32.mxu0 %v14696_v34  ;;  %v7978_v16 = vpack.c.bf16 %v14893_v29, %v14891_v53  ;;  %v7988_v31 = vpack.c.bf16 %v14919_v57, %v14918_v19  ;;  %v14924_v29 = vld [vmem:[#allocation41_spill] sm:$0xff]  ;;  %v14929_v51 = vand.u32 4294901760, %v14780_v50  ;;  %v14937_v50 = vld [vmem:[#allocation68_spill] sm:$0xff]  ;;  %v5855_v57 = vld [vmem:[#allocation15 + $0x98] sm:$0xff] }
 0x721   :  { %7973 = vmatpush1.bf16.msra.mxu1 %v7972_v42  ;;  %v8554_v28 = vpack.c.bf16 %v14896_v4, %v14894_v43  ;;  %v8556_v60 = vpack.c.bf16 %v14900_v25, %v14899_v61  ;;  %v7982_v42 = vpack.c.bf16 %v14903_v30, %v14901_v5  ;;  %v14925_v63 = vand.u32 4294901760, %v14924_v29  ;;  %v14941_v61 = vld [vmem:[#allocation159_spill] sm:$0xff]  ;;  %v14944_v25 = vld [vmem:[#allocation174_spill] sm:$0xff]  ;;  %v14948_v5 = vld [vmem:[#allocation180_spill] sm:$0xff] }
 0x722   :  { %8549 = vmatpush1.bf16.msra.mxu0 %v8548_v26  ;;  %7975 = vmatprep.subr.bf16.mxu1 %v7974_v39  ;;  %v14907_v26 = vand.u32 4294901760, %v14906_v18  ;;  %v14912_v39 = vand.u32 4294901760, %v14911_v55  ;;  %v8566_v43 = vpack.c.bf16 %v14927_v44, %v14926_v37  ;;  %v7992_v47 = vpack.c.bf16 %v14929_v51, %v14928_v48  ;;  %v14950_v30 = vld [vmem:[#allocation190_spill] sm:$0xff]  ;;  %v14956_v18 = vld [vmem:[#allocation149_spill] sm:$0xff]  ;;  %v5857_v37 = vld [vmem:[#allocation15 + $0xa8] sm:$0xff] }
 0x723   :  { %8551 = vmatprep.subr.bf16.mxu0 %v8550_v27  ;;  %v14914_v27 = vld [vmem:[#allocation147_spill] sm:$0xff]  ;;  %v14930_v4 = vand.u32 4294901760, %v14781_v46  ;;  %v14939_v46 = vld [vmem:[#allocation238_spill] sm:$0xff]  ;;  %v5854_v19 = vld [vmem:[#allocation15 + $0x90] sm:$0xff] }
 0x724   :  { %v7984_v6 = vpack.c.bf16 %v14909_v17, %v14907_v26  ;;  %v8560_v59 = vpack.c.bf16 %v14912_v39, %v14910_v22  ;;  %v14915_v24 = vand.u32 4294901760, %v14914_v27  ;;  %v14957_v26 = vld [vmem:[#allocation150_spill] sm:$0xff]  ;;  %v14959_v17 = vld [vmem:[#allocation37_spill] sm:$0xff]  ;;  %v14963_v39 = vld [vmem:[#allocation55_spill] sm:$0xff] }
 0x725   :  { %7977 = vmatpush1.bf16.msra.mxu1 %v7976_v33  ;;  %v8562_v33 = vpack.c.bf16 %v14917_v35, %v14916_v12  ;;  %v14961_v22 = vld [vmem:[#allocation46_spill] sm:$0xff]  ;;  %v12436_v27 = vld [vmem:[#allocation15 + $0x88] sm:$0xff]  ;;  %v5836_v12 = vld [vmem:[#allocation15] sm:$0xff] }
 0x726   :  { %8553 = vmatpush1.bf16.msra.mxu0 %v8552_v52  ;;  %7979 = vmatprep.subr.bf16.mxu1 %v7978_v16  ;;  %v7986_v38 = vpack.c.bf16 %v14915_v24, %v14913_v9  ;;  %v14922_v52 = vand.u32 4294901760, %v14921_v41  ;;  %v7990_v16 = vpack.c.bf16 %v14925_v63, %v14923_v20  ;;  %v14962_v55 = vld [vmem:[#allocation50_spill] sm:$0xff]  ;;  %v12434_v9 = vld [vmem:[#allocation15 + $0x80] sm:$0xff]  ;;  %v5876_v35 = vand.u32 4294901760, %v5836_v12  ;;  %v5838_v41 = vld [vmem:[#allocation15 + $0x10] sm:$0xff] }
 0x727   :  { %8555 = vmatprep.subr.bf16.mxu0 %v8554_v28  ;;  %v8568_v28 = vpack.c.bf16 %v14931_v32, %v14930_v4  ;;  %v5924_v24 = vand.u32 4294901760, %v12434_v9  ;;  %v5840_v48 = vld [vmem:[#allocation15 + $0x20] sm:$0xff]  ;;  %v5841_v51 = vld [vmem:[#allocation15 + $0x28] sm:$0xff] }
 0x728   :  { %v8564_v53 = vpack.c.bf16 %v14922_v52, %v14920_v13  ;;  %v5933_v13 = vand.u32 4294901760, %v5855_v57  ;;  %v5839_v52 = vld [vmem:[#allocation15 + $0x18] sm:$0xff]  ;;  %v5891_v4 = vand.u32 4294901760, %v5841_v51 }
 0x729   :  { %7981 = vmatpush1.bf16.msra.mxu1 %v7980_v58  ;;  %v7994_v58 = vpack.c.bf16 %v14934_v3, %v14932_v54  ;;  %v5885_v20 = vand.u32 4294901760, %v5839_v52  ;;  %v5858_v54 = vld [vmem:[#allocation15 + $0xb0] sm:$0xff] }
 0x72a   :  { %8557 = vmatpush1.bf16.msra.mxu0 %v8556_v60  ;;  %7983 = vmatprep.subr.bf16.mxu1 %v7982_v42  ;;  %v14946_v60 = vld [vmem:[#allocation161_spill] sm:$0xff]  ;;  %v14952_v42 = vld [vmem:[#allocation252_spill] sm:$0xff]  ;;  %v5942_v3 = vand.u32 4294901760, %v5858_v54 }
 0x72b   :  { %8559 = vmatprep.subr.bf16.mxu0 %v8558_v1  ;;  %v14955_v1 = vld [vmem:[#allocation144_spill] sm:$0xff] }
 0x72d   :  { %7985 = vmatpush1.bf16.msra.mxu1 %v7984_v6  ;;  %v14960_v6 = vld [vmem:[#allocation42_spill] sm:$0xff] }
 0x72e   :  { %8561 = vmatpush1.bf16.msra.mxu0 %v8560_v59  ;;  %7987 = vmatprep.subr.bf16.mxu1 %v7986_v38  ;;  %v14964_v59 = vld [vmem:[#allocation182_spill] sm:$0xff]  ;;  %v5927_v38 = vand.u32 4294901760, %v12436_v27 }
 0x72f   :  { %8563 = vmatprep.subr.bf16.mxu0 %v8562_v33 }
 0x730   :  { %v12440_v33 = vpack.c.bf16 %v5927_v38, %v5924_v24 }
 0x731   :  { %7989 = vmatpush1.bf16.msra.mxu1 %v7988_v31  ;;  %v5930_v31 = vand.u32 4294901760, %v5854_v19 }
 0x732   :  { %8565 = vmatpush1.bf16.msra.mxu0 %v8564_v53  ;;  %7991 = vmatprep.subr.bf16.mxu1 %v7990_v16  ;;  %14965 = vst [vmem:[#allocation69_spill] sm:$0xff] %v12440_v33  ;;  %v5882_v53 = vand.u32 4294901760, %v5838_v41  ;;  %v5856_v16 = vld [vmem:[#allocation15 + $0xa0] sm:$0xff] }
 0x733   :  { %8567 = vmatprep.subr.bf16.mxu0 %v8566_v43  ;;  %v12446_v29 = vpack.c.bf16 %v5933_v13, %v5930_v31  ;;  %v5936_v44 = vand.u32 4294901760, %v5856_v16  ;;  %v5939_v43 = vand.u32 4294901760, %v5857_v37 }
 0x734   :  { %v12448_v63 = vpack.c.bf16 %v5885_v20, %v5882_v53 }
 0x735   :  { %7993 = vmatpush1.bf16.msra.mxu1 %v7992_v47  ;;  %14967 = vst [vmem:[#allocation78_spill] sm:$0xff] %v12446_v29  ;;  %v5888_v47 = vand.u32 4294901760, %v5840_v48  ;;  %v12452_v32 = vpack.c.bf16 %v5939_v43, %v5936_v44 }
 0x736   :  { %8569 = vmatpush1.bf16.msra.mxu0 %v8568_v28  ;;  %7995 = vmatprep.subr.bf16.mxu1 %v7994_v58  ;;  %14968 = vst [vmem:[#allocation79_spill] sm:$0xff] %v12448_v63  ;;  %v5945_v58 = vand.u32 4294901760, %v5859_v14 }
 0x737   :  { %8571 = vmatprep.subr.bf16.mxu0 %v14935_v21  ;;  %14969 = vst [vmem:[#allocation80_spill] sm:$0xff] %v12452_v32  ;;  %v12454_v28 = vpack.c.bf16 %v5891_v4, %v5888_v47  ;;  %v5842_v21 = vld [vmem:[#allocation15 + $0x30] sm:$0xff] }
 0x739   :  { %7997 = vmatpush1.bf16.msra.mxu1 %v14936_v56  ;;  %14970 = vst [vmem:[#allocation81_spill] sm:$0xff] %v12454_v28  ;;  %v5843_v56 = vld [vmem:[#allocation15 + $0x38] sm:$0xff] }
 0x73a   :  { %8573 = vmatpush1.bf16.msra.mxu0 %v14937_v50  ;;  %7999 = vmatprep.subr.bf16.mxu1 %v14832_v62  ;;  %v14942_v62 = vld [vmem:[#allocation165_spill] sm:$0xff]  ;;  %v5894_v50 = vand.u32 4294901760, %v5842_v21 }
 0x73b   :  { %8575 = vmatprep.subr.bf16.mxu0 %v14833_v40  ;;  %v14943_v40 = vld [vmem:[#allocation170_spill] sm:$0xff] }
 0x73c   :  { %3557 = vmatmul.mubr.f32.vlgmr.msra.gmra.mrb[0].mxu1 %v14938_v7 }
 0x73d   :  { %8001 = vmatpush1.bf16.msra.mxu1 %v14835_v23  ;;  %5696 = vmatmul.mubr.f32.vlgmr.msra.gmra.mrb[2].mxu0 %v14938_v7  ;;  %v14945_v23 = vld [vmem:[#allocation239_spill] sm:$0xff] }
 0x73e   :  { %8577 = vmatpush1.bf16.msra.mxu0 %v14836_v2  ;;  %8003 = vmatprep.subr.bf16.mxu1 %v14939_v46  ;;  %v14947_v2 = vld [vmem:[#allocation243_spill] sm:$0xff]  ;;  %v12458_v46 = vpack.c.bf16 %v5945_v58, %v5942_v3 }
 0x73f   :  { %8579 = vmatprep.subr.bf16.mxu0 %v14940_v10  ;;  %3659 = vmatprep.mubr.f32.mxu1 %v14696_v34 }
 0x740   :  { %5798 = vmatprep.mubr.f32.mxu0 %v14696_v34  ;;  %v14951_v34 = vld [vmem:[#allocation248_spill] sm:$0xff]  ;;  %14971 = vst [vmem:[#allocation82_spill] sm:$0xff] %v12458_v46 }
 0x741   :  { %8005 = vmatpush1.bf16.msra.mxu1 %v14941_v61  ;;  %v5860_v61 = vld [vmem:[#allocation15 + $0xc0] sm:$0xff] }
 0x742   :  { %8581 = vmatpush1.bf16.msra.mxu0 %v14942_v62  ;;  %8007 = vmatprep.subr.bf16.mxu1 %v14943_v40  ;;  %v5861_v62 = vld [vmem:[#allocation15 + $0xc8] sm:$0xff]  ;;  %v5948_v40 = vand.u32 4294901760, %v5860_v61 }
 0x743   :  { %8583 = vmatprep.subr.bf16.mxu0 %v14944_v25  ;;  %v5951_v25 = vand.u32 4294901760, %v5861_v62 }
 0x745   :  { %8009 = vmatpush1.bf16.msra.mxu1 %v14945_v23  ;;  %v5844_v23 = vld [vmem:[#allocation15 + $0x40] sm:$0xff] }
 0x746   :  { %8585 = vmatpush1.bf16.msra.mxu0 %v14946_v60  ;;  %8011 = vmatprep.subr.bf16.mxu1 %v14947_v2  ;;  %v5845_v60 = vld [vmem:[#allocation15 + $0x48] sm:$0xff]  ;;  %v5900_v2 = vand.u32 4294901760, %v5844_v23 }
 0x747   :  { %8587 = vmatprep.subr.bf16.mxu0 %v14948_v5  ;;  %v5903_v5 = vand.u32 4294901760, %v5845_v60 }
 0x749   :  { %8013 = vmatpush1.bf16.msra.mxu1 %v14949_v11  ;;  %v12464_v11 = vpack.c.bf16 %v5951_v25, %v5948_v40 }
 0x74a   :  { %8589 = vmatpush1.bf16.msra.mxu0 %v14950_v30  ;;  %8015 = vmatprep.subr.bf16.mxu1 %v14951_v34  ;;  %v12466_v30 = vpack.c.bf16 %v5903_v5, %v5900_v2  ;;  %v5862_v34 = vld [vmem:[#allocation15 + $0xd0] sm:$0xff] }
 0x74b   :  { %8591 = vmatprep.subr.bf16.mxu0 %v14952_v42  ;;  %14973 = vst [vmem:[#allocation84_spill] sm:$0xff] %v12464_v11  ;;  %v5863_v42 = vld [vmem:[#allocation15 + $0xd8] sm:$0xff] }
 0x74c   :  { %14974 = vst [vmem:[#allocation89_spill] sm:$0xff] %v12466_v30 }
 0x74d   :  { %8017 = vmatpush1.bf16.msra.mxu1 %v14953_v8  ;;  %v5954_v8 = vand.u32 4294901760, %v5862_v34 }
 0x74e   :  { %8593 = vmatpush1.bf16.msra.mxu0 %v14954_v45  ;;  %8019 = vmatprep.subr.bf16.mxu1 %v14955_v1  ;;  %v5957_v45 = vand.u32 4294901760, %v5863_v42  ;;  %v12470_v1 = vsub.f32 %v12434_v9, %v5924_v24  ;;  %v12492_v9 = vsub.f32 %v5840_v48, %v5888_v47  ;;  %v5846_v24 = vld [vmem:[#allocation15 + $0x50] sm:$0xff] }
 0x74f   :  { %8595 = vmatprep.subr.bf16.mxu0 %v14956_v18  ;;  %v12473_v18 = vsub.f32 %v12436_v27, %v5927_v38  ;;  %v12494_v27 = vsub.f32 %v5841_v51, %v5891_v4  ;;  %v5847_v38 = vld [vmem:[#allocation15 + $0x58] sm:$0xff]  ;;  %v5906_v51 = vand.u32 4294901760, %v5846_v24 }
 0x750   :  { %v12516_v48 = vsub.f32 %v5863_v42, %v5957_v45  ;;  %v5909_v47 = vand.u32 4294901760, %v5847_v38 }
 0x751   :  { %8021 = vmatpush1.bf16.msra.mxu1 %v14957_v26  ;;  %v12475_v26 = vsub.f32 %v5836_v12, %v5876_v35  ;;  %v12496_v12 = vsub.f32 %v5858_v54, %v5942_v3  ;;  %v12519_v3 = vsub.f32 %v5846_v24, %v5906_v51 }
 0x752   :  { %8597 = vmatpush1.bf16.msra.mxu0 %v14958_v36  ;;  %8023 = vmatprep.subr.bf16.mxu1 %v14959_v17  ;;  %v12480_v17 = vsub.f32 %v5854_v19, %v5930_v31  ;;  %v5864_v19 = vld [vmem:[#allocation15 + $0xe0] sm:$0xff] }
 0x753   :  { %8599 = vmatprep.subr.bf16.mxu0 %v14960_v6  ;;  %v12482_v6 = vsub.f32 %v5855_v57, %v5933_v13  ;;  %v5865_v57 = vld [vmem:[#allocation15 + $0xe8] sm:$0xff]  ;;  %v5848_v31 = vld [vmem:[#allocation15 + $0x60] sm:$0xff]  ;;  %v12504_v13 = vsub.f32 %v5860_v61, %v5948_v40  ;;  %v5960_v4 = vand.u32 4294901760, %v5864_v19  ;;  %v12523_v61 = vsub.f32 %v5847_v38, %v5909_v47 }
 0x754   :  { %v5963_v54 = vand.u32 4294901760, %v5865_v57  ;;  %v13593_v38 = vand.u32 4294901760, %v12470_v1 }
 0x755   :  { %8025 = vmatpush1.bf16.msra.mxu1 %v14961_v22  ;;  %v12484_v22 = vsub.f32 %v5838_v41, %v5882_v53  ;;  %v12506_v41 = vsub.f32 %v5861_v62, %v5951_v25  ;;  %v12510_v53 = vsub.f32 %v5845_v60, %v5903_v5  ;;  %v12527_v40 = vsub.f32 %v5864_v19, %v5960_v4  ;;  %v5851_v25 = vld [vmem:[#allocation15 + $0x78] sm:$0xff] }
 0x756   :  { %8601 = vmatpush1.bf16.msra.mxu0 %v14962_v55  ;;  %8027 = vmatprep.subr.bf16.mxu1 %v14963_v39  ;;  %v12486_v55 = vsub.f32 %v5839_v52, %v5885_v20  ;;  %v12488_v39 = vsub.f32 %v5856_v16, %v5936_v44  ;;  %v12508_v52 = vsub.f32 %v5844_v23, %v5900_v2  ;;  %v5849_v20 = vld [vmem:[#allocation15 + $0x68] sm:$0xff]  ;;  %v5866_v16 = vld [vmem:[#allocation15 + $0xf0] sm:$0xff]  ;;  %v5921_v24 = vand.u32 4294901760, %v5851_v25 }
 0x757   :  { %8603 = vmatprep.subr.bf16.mxu0 %v14864_v15  ;;  %v5837_v15 = vld [vmem:[#allocation15 + $0x8] sm:$0xff]  ;;  %v12512_v44 = vpack.c.bf16 %v5957_v45, %v5954_v8  ;;  %v12525_v62 = vpack.c.bf16 %v5963_v54, %v5960_v4  ;;  %v12529_v23 = vsub.f32 %v5865_v57, %v5963_v54  ;;  %v13592_v19 = vand.u32 4294901760, %v12473_v18 }
 0x758   :  { %v13591_v57 = vand.u32 4294901760, %v12475_v26  ;;  %v6103_v4 = vsub.f32 %v12470_v1, %v13593_v38 }
 0x759   :  { %8029 = vmatpush1.bf16.msra.mxu1 %v14867_v0  ;;  %v5879_v0 = vand.u32 4294901760, %v5837_v15  ;;  %14975 = vst [vmem:[#allocation90_spill] sm:$0xff] %v12512_v44  ;;  %14977 = vst [vmem:[#allocation92_spill] sm:$0xff] %v12525_v62  ;;  %v6110_v54 = vsub.f32 %v12473_v18, %v13592_v19 }
 0x75a   :  { %8605 = vmatpush1.bf16.msra.mxu0 %v14870_v49  ;;  %8607 = vmatprep.subr.bf16.mxu1 %v12440_v33  ;;  %v14988_v33 = vld [vmem:[#allocation32_spill] sm:$0xff] }
 0x75b   :  { %v12442_v49 = vpack.c.bf16 %v5879_v0, %v5876_v35  ;;  %v12477_v36 = vsub.f32 %v5837_v15, %v5879_v0  ;;  %v12498_v15 = vsub.f32 %v5859_v14, %v5945_v58  ;;  %v12500_v35 = vsub.f32 %v5842_v21, %v5894_v50 }
 0x75c   :  { %3661 = vmatmul.mubr.f32.vlgmr.msra.gmra.mrb[0].mxu1 %v14938_v7  ;;  %v5912_v14 = vand.u32 4294901760, %v5848_v31  ;;  %v5915_v58 = vand.u32 4294901760, %v5849_v20  ;;  %v5966_v21 = vand.u32 4294901760, %v5866_v16 }
 0x75d   :  { %5800 = vmatmul.mubr.f32.vlgmr.msra.gmra.mrb[2].mxu0 %v14938_v7  ;;  %5976 = vmatprep.mubr.f32.mxu1 %v14964_v59  ;;  %14966 = vst [vmem:[#allocation77_spill] sm:$0xff] %v12442_v49  ;;  %v5897_v7 = vand.u32 4294901760, %v5843_v56  ;;  %v12490_v59 = vsub.f32 %v5857_v37, %v5939_v43  ;;  %v5867_v37 = vld [vmem:[#allocation15 + $0xf8] sm:$0xff]  ;;  %v12514_v43 = vsub.f32 %v5862_v34, %v5954_v8 }
 0x75e   :  { %8609 = vmatpush3.bf16.msra.mxu1 %v12442_v49  ;;  %v12531_v60 = vpack.c.bf16 %v5915_v58, %v5912_v14  ;;  %v12533_v2 = vsub.f32 %v5848_v31, %v5912_v14  ;;  %v12535_v5 = vsub.f32 %v5849_v20, %v5915_v58  ;;  %v12540_v42 = vsub.f32 %v5866_v16, %v5966_v21 }
 0x75f   :  { %8611 = vmatprep.subr.bf16.mxu1 %v12446_v29  ;;  %v12460_v10 = vpack.c.bf16 %v5897_v7, %v5894_v50  ;;  %v12502_v0 = vsub.f32 %v5843_v56, %v5897_v7  ;;  %v5969_v56 = vand.u32 4294901760, %v5867_v37  ;;  %v5850_v50 = vld [vmem:[#allocation15 + $0x70] sm:$0xff]  ;;  %v12521_v7 = vpack.c.bf16 %v5909_v47, %v5906_v51 }
 0x760   :  { %14978 = vst [vmem:[#allocation93_spill] sm:$0xff] %v12531_v60  ;;  %14980 = vst [vmem:[#allocation95_spill] sm:$0xff] %v12540_v42  ;;  %v5918_v45 = vand.u32 4294901760, %v5850_v50  ;;  %v13594_v20 = vand.u32 4294901760, %v12477_v36  ;;  %v13597_v51 = vand.u32 4294901760, %v12480_v17  ;;  %v13598_v16 = vand.u32 4294901760, %v12482_v6 }
 0x761   :  { %14972 = vst [vmem:[#allocation83_spill] sm:$0xff] %v12460_v10  ;;  %14976 = vst [vmem:[#allocation91_spill] sm:$0xff] %v12521_v7  ;;  %v12538_v34 = vpack.c.bf16 %v5969_v56, %v5966_v21  ;;  %v12542_v8 = vsub.f32 %v5867_v37, %v5969_v56  ;;  %v12555_v47 = vsub.f32 %v5851_v25, %v5921_v24  ;;  %v6111_v25 = vand.u32 4294901760, %v6110_v54 }
 0x762   :  { %8613 = vmatpush3.bf16.msra.mxu1 %v12448_v63  ;;  %v12548_v31 = vsub.f32 %v5850_v50, %v5918_v45  ;;  %v12553_v37 = vpack.c.bf16 %v5921_v24, %v5918_v45  ;;  %v5991_v14 = vsub.f32 %v12475_v26, %v13591_v57  ;;  %v5998_v58 = vsub.f32 %v12477_v36, %v13594_v20 }
 0x763   :  { %8615 = vmatprep.subr.bf16.mxu1 %v12452_v32  ;;  %14979 = vst [vmem:[#allocation94_spill] sm:$0xff] %v12538_v34  ;;  %14981 = vst [vmem:[#allocation96_spill] sm:$0xff] %v12542_v8  ;;  %v6117_v21 = vsub.f32 %v12480_v17, %v13597_v51  ;;  %v6124_v56 = vsub.f32 %v12482_v6, %v13598_v16  ;;  %v6104_v50 = vand.u32 4294901760, %v6103_v4  ;;  %v13603_v45 = vand.u32 4294901760, %v12484_v22 }
 0x764   :  { %14982 = vst [vmem:[#allocation100_spill] sm:$0xff] %v12548_v31  ;;  %14983 = vst [vmem:[#allocation101_spill] sm:$0xff] %v12553_v37  ;;  %v13602_v24 = vand.u32 4294901760, %v12486_v55  ;;  %v5992_v57 = vand.u32 4294901760, %v5991_v14  ;;  %v5999_v19 = vand.u32 4294901760, %v5998_v58  ;;  %v13601_v4 = vand.u32 4294901760, %v12488_v39 }
 0x765   :  { %14984 = vst [vmem:[#allocation102_spill] sm:$0xff] %v12555_v47  ;;  %v6118_v38 = vand.u32 4294901760, %v6117_v21  ;;  %v6125_v20 = vand.u32 4294901760, %v6124_v56  ;;  %v6005_v51 = vsub.f32 %v12484_v22, %v13603_v45  ;;  %v13604_v14 = vand.u32 4294901760, %v12490_v59 }
 0x766   :  { %8617 = vmatpush3.bf16.msra.mxu1 %v12454_v28  ;;  %v6012_v16 = vsub.f32 %v12486_v55, %v13602_v24  ;;  %v12587_v54 = vpack.c.bf16 %v5999_v19, %v5992_v57  ;;  %v13605_v58 = vand.u32 4294901760, %v12492_v9  ;;  %v13611_v57 = vand.u32 4294901760, %v12496_v12 }
 0x767   :  { %8619 = vmatprep.subr.bf16.mxu1 %v12458_v46  ;;  %v6006_v21 = vand.u32 4294901760, %v6005_v51  ;;  %v6138_v19 = vsub.f32 %v12490_v59, %v13604_v14  ;;  %v13648_v46 = vand.u32 4294901760, %v12548_v31 }
 0x768   :  { %v6013_v56 = vand.u32 4294901760, %v6012_v16  ;;  %v6145_v14 = vsub.f32 %v12496_v12, %v13611_v57 }
 0x769   :  { %v6139_v24 = vand.u32 4294901760, %v6138_v19 }
 0x76a   :  { %8621 = vmatpush3.bf16.msra.mxu1 %v12460_v10  ;;  %v6146_v19 = vand.u32 4294901760, %v6145_v14  ;;  %v13621_v14 = vand.u32 4294901760, %v12508_v52 }
 0x76b   :  { %8623 = vmatprep.subr.bf16.mxu1 %v12464_v11  ;;  %v13632_v11 = vand.u32 4294901760, %v12527_v40 }
 0x76e   :  { %8625 = vmatpush3.bf16.msra.mxu1 %v12466_v30 }
 0x76f   :  { %8627 = vmatprep.subr.bf16.mxu1 %v12512_v44 }
 0x772   :  { %8629 = vmatpush3.bf16.msra.mxu1 %v12521_v7 }
 0x773   :  { %8631 = vmatprep.subr.bf16.mxu1 %v12525_v62  ;;  %v13617_v62 = vand.u32 4294901760, %v12506_v41 }
 0x776   :  { %8633 = vmatpush3.bf16.msra.mxu1 %v12531_v60  ;;  %v8638_v60 = vpack.c.bf16 %v6111_v25, %v6104_v50  ;;  %v6131_v50 = vsub.f32 %v12488_v39, %v13601_v4  ;;  %v13608_v25 = vand.u32 4294901760, %v12494_v27  ;;  %v13614_v4 = vand.u32 4294901760, %v12500_v35 }
 0x777   :  { %8635 = vmatprep.subr.bf16.mxu1 %v12538_v34  ;;  %v12589_v34 = vpack.c.bf16 %v6125_v20, %v6118_v38  ;;  %v6019_v38 = vsub.f32 %v12492_v9, %v13605_v58  ;;  %v12605_v20 = vpack.c.bf16 %v6013_v56, %v6006_v21  ;;  %v13616_v56 = vand.u32 4294901760, %v12502_v0 }
 0x778   :  { %v6132_v51 = vand.u32 4294901760, %v6131_v50  ;;  %v6026_v16 = vsub.f32 %v12494_v27, %v13608_v25  ;;  %v6033_v21 = vsub.f32 %v12500_v35, %v13614_v4  ;;  %v13618_v50 = vand.u32 4294901760, %v12504_v13 }
 0x779   :  { %v6020_v45 = vand.u32 4294901760, %v6019_v38 }
 0x77a   :  { %8637 = vmatpush3.bf16.msra.mxu1 %v12553_v37  ;;  %v6027_v37 = vand.u32 4294901760, %v6026_v16  ;;  %v12622_v25 = vpack.c.bf16 %v6139_v24, %v6132_v51  ;;  %v6034_v7 = vand.u32 4294901760, %v6033_v21  ;;  %v6040_v16 = vsub.f32 %v12502_v0, %v13616_v56 }
 0x77b   :  { %8639 = vmatprep.subr.bf16.mxu1 %v8638_v60  ;;  %v13615_v60 = vand.u32 4294901760, %v12498_v15  ;;  %v6159_v4 = vsub.f32 %v12504_v13, %v13618_v50  ;;  %v6166_v24 = vsub.f32 %v12506_v41, %v13617_v62  ;;  %v13625_v51 = vand.u32 4294901760, %v12514_v43 }
 0x77c   :  { %v12625_v57 = vpack.c.bf16 %v6027_v37, %v6020_v45  ;;  %v13624_v37 = vand.u32 4294901760, %v12510_v53  ;;  %v6041_v45 = vand.u32 4294901760, %v6040_v16  ;;  %v13630_v21 = vand.u32 4294901760, %v12516_v48 }
 0x77d   :  { %v6152_v58 = vsub.f32 %v12498_v15, %v13615_v60  ;;  %v6167_v56 = vand.u32 4294901760, %v6166_v24  ;;  %v13633_v62 = vand.u32 4294901760, %v12519_v3  ;;  %v13631_v24 = vand.u32 4294901760, %v12523_v61 }
 0x77e   :  { %v12649_v50 = vpack.c.bf16 %v6041_v45, %v6034_v7  ;;  %v6180_v16 = vsub.f32 %v12516_v48, %v13630_v21 }
 0x77f   :  { %v6153_v38 = vand.u32 4294901760, %v6152_v58  ;;  %v6160_v58 = vand.u32 4294901760, %v6159_v4  ;;  %v6173_v4 = vsub.f32 %v12514_v43, %v13625_v51  ;;  %v6068_v51 = vsub.f32 %v12523_v61, %v13631_v24 }
 0x780   :  { %v6181_v45 = vand.u32 4294901760, %v6180_v16  ;;  %v13638_v16 = vand.u32 4294901760, %v12535_v5 }
 0x781   :  { %v12633_v60 = vpack.c.bf16 %v6153_v38, %v6146_v19  ;;  %v6047_v19 = vsub.f32 %v12508_v52, %v13621_v14  ;;  %v6054_v38 = vsub.f32 %v12510_v53, %v13624_v37  ;;  %v12658_v44 = vpack.c.bf16 %v6167_v56, %v6160_v58 }
 0x782   :  { %v6061_v37 = vsub.f32 %v12519_v3, %v13633_v62  ;;  %v6174_v7 = vand.u32 4294901760, %v6173_v4  ;;  %v13636_v56 = vand.u32 4294901760, %v12529_v23  ;;  %v13637_v58 = vand.u32 4294901760, %v12533_v2 }
 0x783   :  { %v6048_v14 = vand.u32 4294901760, %v6047_v19  ;;  %v6055_v30 = vand.u32 4294901760, %v6054_v38  ;;  %v6069_v38 = vand.u32 4294901760, %v6068_v51  ;;  %v6187_v4 = vsub.f32 %v12527_v40, %v13632_v11 }
 0x784   :  { %v6062_v21 = vand.u32 4294901760, %v6061_v37  ;;  %v12671_v19 = vpack.c.bf16 %v6181_v45, %v6174_v7  ;;  %v6194_v24 = vsub.f32 %v12529_v23, %v13636_v56  ;;  %v6082_v51 = vsub.f32 %v12535_v5, %v13638_v16 }
 0x785   :  { %v12667_v10 = vpack.c.bf16 %v6055_v30, %v6048_v14  ;;  %v6075_v30 = vsub.f32 %v12533_v2, %v13637_v58  ;;  %v6188_v37 = vand.u32 4294901760, %v6187_v4  ;;  %v13639_v7 = vand.u32 4294901760, %v12540_v42 }
 0x786   :  { %v12683_v14 = vpack.c.bf16 %v6069_v38, %v6062_v21  ;;  %v6195_v45 = vand.u32 4294901760, %v6194_v24  ;;  %v13644_v62 = vand.u32 4294901760, %v12542_v8  ;;  %v6083_v56 = vand.u32 4294901760, %v6082_v51 }
 0x787   :  { %v6076_v11 = vand.u32 4294901760, %v6075_v30  ;;  %v6201_v58 = vsub.f32 %v12540_v42, %v13639_v7  ;;  %v13647_v21 = vand.u32 4294901760, %v12555_v47  ;;  %v6089_v24 = vsub.f32 %v12548_v31, %v13648_v46 }
 0x788   :  { %v12695_v38 = vpack.c.bf16 %v6195_v45, %v6188_v37  ;;  %v6208_v4 = vsub.f32 %v12542_v8, %v13644_v62 }
 0x789   :  { %v12703_v30 = vpack.c.bf16 %v6083_v56, %v6076_v11  ;;  %v6202_v16 = vand.u32 4294901760, %v6201_v58  ;;  %v6096_v51 = vsub.f32 %v12555_v47, %v13647_v21  ;;  %v6090_v28 = vand.u32 4294901760, %v6089_v24  ;;  %v14985_v24 = vld [vmem:[#allocation30_spill] sm:$0xff] }
 0x78a   :  { %v6209_v7 = vand.u32 4294901760, %v6208_v4  ;;  %v14987_v4 = vld [vmem:[#allocation33_spill] sm:$0xff] }
 0x78b   :  { %v6097_v32 = vand.u32 4294901760, %v6096_v51 }
 0x78c   :  { %v12708_v37 = vpack.c.bf16 %v6209_v7, %v6202_v16  ;;  %v14986_v16 = vld [vmem:[#allocation31_spill] sm:$0xff] }
 0x78d   :  { %v12714_v63 = vpack.c.bf16 %v6097_v32, %v6090_v28  ;;  %v1506_v28 = vld [vmem:[%s12968_s8] sm:$0xf] }
 0x78e   :  { %v1511_v7 = vrot.slane %v1506_v28, %v14985_v24  ;;  %v1515_v51 = vrot.slane %v1506_v28, %v14986_v16  ;;  %v1523_v49 = vrot.slane %v1506_v28, %v14987_v4  ;;  %v1519_v31 = vrot.slane %v1506_v28, %v14988_v33 }
 0x82f   :  { %v3662_v58 = vpop.f32.mrb[0].mxu1 }
 0x830   :  { %v8798_v56 = vadd.f32 %v3662_v58, %v1511_v7  ;;  %v5801_v21 = vpop.f32.mrb[2].mxu0  ;;  %v3664_v11 = vpop.f32.mrb[1].mxu1 }
 0x831   :  { %v8799_v62 = vadd.f32 %v3664_v11, %v1515_v51  ;;  %v5803_v46 = vpop.f32.mrb[3].mxu0  ;;  %v8800_v42 = vadd.f32 %v5801_v21, %v1519_v31  ;;  %v14989_v51 = vld [vmem:[#allocation242_spill] sm:$0xff] }
 0x832   :  { %v6784_v45 = vmul.f32 -1.442695, %v8798_v56  ;;  %v8801_v32 = vadd.f32 %v5803_v46, %v1523_v49 }
 0x833   :  { %v6785_v29 = vmul.f32 -1.442695, %v8799_v62  ;;  %v140_v62 = vld [vmem:[#allocation7] sm:$0xff] }
 0x834   :  { %8911 = vpow2.f32 %v6784_v45  ;;  %v6786_v47 = vmul.f32 -1.442695, %v8801_v32 }
 0x835   :  { %8913 = vpow2.f32 %v6785_v29 }
 0x836   :  { %8915 = vpow2.f32 %v6786_v47 }
 0x837   :  { %8917 = vtanh.f32 %v8800_v42 }
 0x83e   :  { %v8912_v24 = vpop.eup %8911 }
 0x83f   :  { %v8914_v8 = vpop.eup %8913  ;;  %v5809_v16 = vadd.f32 1.0, %v8912_v24  ;;  %v15005_v24 = vld [vmem:[#allocation96_spill] sm:$0xff] }
 0x840   :  { %v5815_v58 = vadd.f32 1.0, %v8914_v8  ;;  %v8916_v11 = vpop.eup %8915 }
 0x841   :  { %8919 = vrcp.f32 %v5809_v16  ;;  %v8918_v56 = vpop.eup %8917  ;;  %v5822_v29 = vadd.f32 1.0, %v8916_v11  ;;  %v15006_v16 = vld [vmem:[#allocation95_spill] sm:$0xff]  ;;  %v15008_v11 = vld [vmem:[#allocation102_spill] sm:$0xff] }
 0x842   :  { %8921 = vrcp.f32 %v5815_v58  ;;  %v15007_v58 = vpack.c.bf16 %v15005_v24, %v15006_v16 }
 0x843   :  { %8923 = vrcp.f32 %v5822_v29  ;;  %v15014_v29 = vld [vmem:[#allocation78_spill] sm:$0xff] }
 0x84b   :  { %v8920_v7 = vpop.eup %8919 }
 0x84c   :  { %v8922_v4 = vpop.eup %8921  ;;  %v5826_v45 = vmul.f32 %v8920_v7, %v8918_v56  ;;  %v15009_v56 = vld [vmem:[#allocation100_spill] sm:$0xff]  ;;  %v15011_v7 = vld [vmem:[#allocation69_spill] sm:$0xff] }
 0x84d   :  { %v5825_v49 = vmul.f32 %v8922_v4, %v140_v62  ;;  %v8924_v33 = vpop.eup %8923  ;;  %v15010_v62 = vpack.c.bf16 %v15008_v11, %v15009_v56  ;;  %v15012_v4 = vld [vmem:[#allocation77_spill] sm:$0xff] }
 0x84f   :  { %v5827_v46 = vadd.f32 %v5826_v45, %v5825_v49  ;;  %v15013_v45 = vld [vmem:[#allocation247_spill] sm:$0xff] }
 0x850   :  { %v15015_v49 = vld [vmem:[#allocation79_spill] sm:$0xff] }
 0x851   :  { %8925 = vtanh.f32 %v5827_v46  ;;  %5833 = vst [vmem:[#allocation19] sm:$0xff] %v5827_v46  ;;  %v15016_v46 = vld [vmem:[#allocation80_spill] sm:$0xff] }
 0x85b   :  { %v8926_v31 = vpop.eup %8925 }
 0x85c   :  { %v5829_v21 = vmul.f32 %v8926_v31, %v8924_v33  ;;  %v15017_v33 = vld [vmem:[#allocation81_spill] sm:$0xff]  ;;  %v15018_v31 = vld [vmem:[#allocation82_spill] sm:$0xff] }
 0x85e   :  { %v12751_v47 = vand.u32 4294901760, %v5829_v21  ;;  %5832 = vst [vmem:[#allocation17] sm:$0xff] %v5829_v21 }
 0x860   :  { %v5978_v42 = vsub.f32 %v5829_v21, %v12751_v47  ;;  %v15019_v21 = vld [vmem:[#allocation83_spill] sm:$0xff] }
 0x862   :  { %v5979_v8 = vand.u32 4294901760, %v5978_v42 }
 0x864   :  { %v5980_v32 = vsub.f32 %v5978_v42, %v5979_v8 }
 0x866   :  { %v5981_v28 = vand.u32 4294901760, %v5980_v32  ;;  %v15020_v32 = vld [vmem:[#allocation84_spill] sm:$0xff] }
 0x868   :  { %5982 = vmatmul.mubr.f32.vlgmr.msra.gmra.mrb[2].mxu1 %v5981_v28  ;;  %v15021_v28 = vld [vmem:[#allocation89_spill] sm:$0xff] }
 0x869   :  { %8641 = vmatpush3.bf16.msra.mxu1 %v12587_v54  ;;  %6212 = vmatprep.mubr.f32.mxu1 %v14989_v51  ;;  %v14993_v54 = vpack.c.bf16 %v12482_v6, %v12480_v17 }
 0x86a   :  { %8643 = vmatprep.subr.bf16.mxu1 %v12589_v34  ;;  %v14990_v34 = vpack.c.bf16 %v12473_v18, %v12470_v1 }
 0x86d   :  { %8645 = vmatpush3.bf16.msra.mxu1 %v12605_v20  ;;  %v14998_v20 = vpack.c.bf16 %v12502_v0, %v12500_v35 }
 0x86e   :  { %8647 = vmatprep.subr.bf16.mxu1 %v12622_v25  ;;  %v14994_v25 = vpack.c.bf16 %v12486_v55, %v12484_v22 }
 0x871   :  { %8649 = vmatpush3.bf16.msra.mxu1 %v12625_v57  ;;  %v14996_v57 = vpack.c.bf16 %v12494_v27, %v12492_v9 }
 0x872   :  { %8651 = vmatprep.subr.bf16.mxu1 %v12633_v60  ;;  %v14997_v60 = vpack.c.bf16 %v12498_v15, %v12496_v12 }
 0x875   :  { %8653 = vmatpush3.bf16.msra.mxu1 %v12649_v50  ;;  %v14999_v50 = vpack.c.bf16 %v12506_v41, %v12504_v13 }
 0x876   :  { %8655 = vmatprep.subr.bf16.mxu1 %v12658_v44  ;;  %v14992_v44 = vld [vmem:[#allocation244_spill] sm:$0xff] }
 0x879   :  { %8657 = vmatpush3.bf16.msra.mxu1 %v12667_v10  ;;  %v14991_v10 = vpack.c.bf16 %v12477_v36, %v12475_v26 }
 0x87a   :  { %8659 = vmatprep.subr.bf16.mxu1 %v12671_v19  ;;  %v15000_v19 = vpack.c.bf16 %v12510_v53, %v12508_v52 }
 0x87d   :  { %8661 = vmatpush3.bf16.msra.mxu1 %v12683_v14  ;;  %v15001_v14 = vpack.c.bf16 %v12516_v48, %v12514_v43 }
 0x87e   :  { %8663 = vmatprep.subr.bf16.mxu1 %v12695_v38  ;;  %v15002_v38 = vpack.c.bf16 %v12523_v61, %v12519_v3 }
 0x881   :  { %8665 = vmatpush3.bf16.msra.mxu1 %v12703_v30  ;;  %v15003_v30 = vpack.c.bf16 %v12529_v23, %v12527_v40 }
 0x882   :  { %8667 = vmatprep.subr.bf16.mxu1 %v12708_v37  ;;  %v15004_v37 = vpack.c.bf16 %v12535_v5, %v12533_v2 }
 0x885   :  { %8669 = vmatpush3.bf16.msra.mxu1 %v12714_v63  ;;  %v14995_v63 = vpack.c.bf16 %v12490_v59, %v12488_v39 }
 0x886   :  { %8671 = vmatprep.subr.bf16.mxu1 %v14990_v34  ;;  %v15023_v34 = vld [vmem:[#allocation91_spill] sm:$0xff] }
 0x888   :  { %6214 = vmatmul.mubr.f32.vlgmr.msra.gmra.mrb[4].mxu1 %v12751_v47 }
 0x889   :  { %8673 = vmatpush3.bf16.msra.mxu1 %v14991_v10  ;;  %6349 = vmatprep.mubr.f32.mxu1 %v14992_v44  ;;  %v15024_v10 = vld [vmem:[#allocation92_spill] sm:$0xff]  ;;  %v15025_v44 = vld [vmem:[#allocation93_spill] sm:$0xff] }
 0x88a   :  { %8675 = vmatprep.subr.bf16.mxu1 %v14993_v54  ;;  %v15026_v54 = vld [vmem:[#allocation94_spill] sm:$0xff] }
 0x88d   :  { %8677 = vmatpush3.bf16.msra.mxu1 %v14994_v25  ;;  %v15027_v25 = vand.u32 4294901760, %v12470_v1  ;;  %v15034_v1 = vand.u32 4294901760, %v12484_v22  ;;  %v15041_v22 = vand.u32 4294901760, %v12498_v15  ;;  %v15048_v15 = vand.u32 4294901760, %v12514_v43 }
 0x88e   :  { %8679 = vmatprep.subr.bf16.mxu1 %v14995_v63  ;;  %v15028_v63 = vand.u32 4294901760, %v12473_v18  ;;  %v15035_v18 = vand.u32 4294901760, %v12486_v55  ;;  %v15042_v55 = vand.u32 4294901760, %v12500_v35  ;;  %v15049_v35 = vand.u32 4294901760, %v12516_v48 }
 0x88f   :  { %v15055_v43 = vand.u32 4294901760, %v12535_v5  ;;  %v15056_v48 = vand.u32 4294901760, %v15006_v16 }
 0x891   :  { %8681 = vmatpush3.bf16.msra.mxu1 %v14996_v57  ;;  %v8734_v57 = vpack.c.bf16 %v15028_v63, %v15027_v25 }
 0x892   :  { %8683 = vmatprep.subr.bf16.mxu1 %v14997_v60  ;;  %v15029_v60 = vld [vmem:[#allocation101_spill] sm:$0xff] }
 0x895   :  { %8685 = vmatpush3.bf16.msra.mxu1 %v14998_v20  ;;  %v15030_v20 = vand.u32 4294901760, %v12475_v26  ;;  %v15036_v26 = vand.u32 4294901760, %v12488_v39  ;;  %v15043_v39 = vand.u32 4294901760, %v12502_v0  ;;  %v15050_v0 = vand.u32 4294901760, %v12519_v3 }
 0x896   :  { %8687 = vmatprep.subr.bf16.mxu1 %v14999_v50  ;;  %v15031_v50 = vand.u32 4294901760, %v12477_v36  ;;  %v15037_v36 = vand.u32 4294901760, %v12490_v59  ;;  %v15044_v59 = vand.u32 4294901760, %v12504_v13  ;;  %v15051_v13 = vand.u32 4294901760, %v12523_v61 }
 0x897   :  { %v8748_v25 = vpack.c.bf16 %v15043_v39, %v15042_v55  ;;  %v15057_v3 = vand.u32 4294901760, %v15005_v24  ;;  %v15058_v61 = vand.u32 4294901760, %v15009_v56 }
 0x899   :  { %8689 = vmatpush3.bf16.msra.mxu1 %v15000_v19  ;;  %v8736_v19 = vpack.c.bf16 %v15031_v50, %v15030_v20  ;;  %v8754_v20 = vpack.c.bf16 %v15049_v35, %v15048_v15  ;;  %v8756_v50 = vpack.c.bf16 %v15051_v13, %v15050_v0 }
 0x89a   :  { %8691 = vmatprep.subr.bf16.mxu1 %v15001_v14  ;;  %v15032_v14 = vand.u32 4294901760, %v12480_v17  ;;  %v15038_v17 = vand.u32 4294901760, %v12492_v9  ;;  %v15045_v9 = vand.u32 4294901760, %v12506_v41  ;;  %v15052_v41 = vand.u32 4294901760, %v12527_v40 }
 0x89b   :  { %v15059_v40 = vand.u32 4294901760, %v15008_v11 }
 0x89c   :  { %v8750_v63 = vpack.c.bf16 %v15045_v9, %v15044_v59 }
 0x89d   :  { %8693 = vmatpush3.bf16.msra.mxu1 %v15002_v38  ;;  %v15033_v38 = vand.u32 4294901760, %v12482_v6  ;;  %v15039_v6 = vand.u32 4294901760, %v12494_v27  ;;  %v15046_v27 = vand.u32 4294901760, %v12508_v52  ;;  %v15053_v52 = vand.u32 4294901760, %v12529_v23 }
 0x89e   :  { %8695 = vmatprep.subr.bf16.mxu1 %v15003_v30 }
 0x89f   :  { %v8738_v30 = vpack.c.bf16 %v15033_v38, %v15032_v14  ;;  %v8762_v38 = vpack.c.bf16 %v15057_v3, %v15056_v48 }
 0x8a1   :  { %8697 = vmatpush3.bf16.msra.mxu1 %v15004_v37  ;;  %v8740_v37 = vpack.c.bf16 %v15035_v18, %v15034_v1 }
 0x8a2   :  { %8699 = vmatprep.subr.bf16.mxu1 %v15007_v58  ;;  %v8742_v58 = vpack.c.bf16 %v15037_v36, %v15036_v26 }
 0x8a5   :  { %8701 = vmatpush3.bf16.msra.mxu1 %v15010_v62  ;;  %v15040_v62 = vand.u32 4294901760, %v12496_v12  ;;  %v15047_v12 = vand.u32 4294901760, %v12510_v53  ;;  %v15054_v53 = vand.u32 4294901760, %v12533_v2 }
 0x8a6   :  { %8703 = vmatprep.subr.bf16.mxu1 %v15011_v7 }
 0x8a7   :  { %v8760_v14 = vpack.c.bf16 %v15055_v43, %v15054_v53 }
 0x8a8   :  { %6352 = vmatmul.mubr.f32.vlgmr.msra.gmra.mrb[6].mxu1 %v5978_v42  ;;  %v15022_v42 = vld [vmem:[#allocation90_spill] sm:$0xff] }
 0x8a9   :  { %8705 = vmatpush3.bf16.msra.mxu1 %v15012_v4  ;;  %6456 = vmatprep.mubr.f32.mxu1 %v15013_v45  ;;  %v8746_v45 = vpack.c.bf16 %v15041_v22, %v15040_v62 }
 0x8aa   :  { %8707 = vmatprep.subr.bf16.mxu1 %v15014_v29 }
 0x8ad   :  { %8709 = vmatpush3.bf16.msra.mxu1 %v15015_v49 }
 0x8ae   :  { %8711 = vmatprep.subr.bf16.mxu1 %v15016_v46 }
 0x8b1   :  { %8713 = vmatpush3.bf16.msra.mxu1 %v15017_v33 }
 0x8b2   :  { %8715 = vmatprep.subr.bf16.mxu1 %v15018_v31 }
 0x8b5   :  { %8717 = vmatpush3.bf16.msra.mxu1 %v15019_v21 }
 0x8b6   :  { %8719 = vmatprep.subr.bf16.mxu1 %v15020_v32 }
 0x8b9   :  { %8721 = vmatpush3.bf16.msra.mxu1 %v15021_v28 }
 0x8ba   :  { %8723 = vmatprep.subr.bf16.mxu1 %v15022_v42 }
 0x8bd   :  { %8725 = vmatpush3.bf16.msra.mxu1 %v15023_v34 }
 0x8be   :  { %8727 = vmatprep.subr.bf16.mxu1 %v15024_v10 }
 0x8c1   :  { %8729 = vmatpush3.bf16.msra.mxu1 %v15025_v44 }
 0x8c2   :  { %8731 = vmatprep.subr.bf16.mxu1 %v15026_v54 }
 0x8c5   :  { %8733 = vmatpush3.bf16.msra.mxu1 %v15029_v60 }
 0x8c6   :  { %8735 = vmatprep.subr.bf16.mxu1 %v8734_v57  ;;  %v8752_v57 = vpack.c.bf16 %v15047_v12, %v15046_v27 }
 0x8c8   :  { %6460 = vmatmul.mubr.f32.vlgmr.msra.gmra.mrb[8].mxu1 %v5979_v8  ;;  %v8744_v8 = vpack.c.bf16 %v15039_v6, %v15038_v17 }
 0x8c9   :  { %8737 = vmatpush3.bf16.msra.mxu1 %v8736_v19  ;;  %6626 = vmatprep.mubr.f32.mxu1 %v14989_v51  ;;  %v8758_v19 = vpack.c.bf16 %v15053_v52, %v15052_v41 }
 0x8ca   :  { %8739 = vmatprep.subr.bf16.mxu1 %v8738_v30  ;;  %v8764_v30 = vpack.c.bf16 %v15059_v40, %v15058_v61 }
 0x8cd   :  { %8741 = vmatpush3.bf16.msra.mxu1 %v8740_v37 }
 0x8ce   :  { %8743 = vmatprep.subr.bf16.mxu1 %v8742_v58 }
 0x8d1   :  { %8745 = vmatpush3.bf16.msra.mxu1 %v8744_v8 }
 0x8d2   :  { %8747 = vmatprep.subr.bf16.mxu1 %v8746_v45 }
 0x8d5   :  { %8749 = vmatpush3.bf16.msra.mxu1 %v8748_v25 }
 0x8d6   :  { %8751 = vmatprep.subr.bf16.mxu1 %v8750_v63 }
 0x8d9   :  { %8753 = vmatpush3.bf16.msra.mxu1 %v8752_v57 }
 0x8da   :  { %8755 = vmatprep.subr.bf16.mxu1 %v8754_v20 }
 0x8dd   :  { %8757 = vmatpush3.bf16.msra.mxu1 %v8756_v50 }
 0x8de   :  { %8759 = vmatprep.subr.bf16.mxu1 %v8758_v19 }
 0x8e1   :  { %8761 = vmatpush3.bf16.msra.mxu1 %v8760_v14 }
 0x8e2   :  { %8763 = vmatprep.subr.bf16.mxu1 %v8762_v38 }
 0x8e5   :  { %8765 = vmatpush3.bf16.msra.mxu1 %v8764_v30 }
 0x8e6   :  { %8767 = vmatprep.subr.bf16.mxu1 %v15011_v7 }
 0x8e8   :  { %6628 = vmatmul.mubr.f32.vlgmr.msra.gmra.mrb[10].mxu1 %v12751_v47 }
 0x8e9   :  { %8769 = vmatpush3.bf16.msra.mxu1 %v15012_v4  ;;  %6730 = vmatprep.mubr.f32.mxu1 %v14989_v51  ;;  %v6787_v51 = vld [vmem:[%s12970_s10] ss:$0 sm:$0xff] }
 0x8ea   :  { %8771 = vmatprep.subr.bf16.mxu1 %v15014_v29 }
 0x8ed   :  { %8773 = vmatpush3.bf16.msra.mxu1 %v15015_v49 }
 0x8ee   :  { %8775 = vmatprep.subr.bf16.mxu1 %v15016_v46 }
 0x8f1   :  { %8777 = vmatpush3.bf16.msra.mxu1 %v15017_v33 }
 0x8f2   :  { %8779 = vmatprep.subr.bf16.mxu1 %v15018_v31 }
 0x8f5   :  { %8781 = vmatpush3.bf16.msra.mxu1 %v15019_v21 }
 0x8f6   :  { %8783 = vmatprep.subr.bf16.mxu1 %v15020_v32 }
 0x8f9   :  { %8785 = vmatpush3.bf16.msra.mxu1 %v15021_v28 }
 0x8fa   :  { %8787 = vmatprep.subr.bf16.mxu1 %v15022_v42 }
 0x8fd   :  { %8789 = vmatpush3.bf16.msra.mxu1 %v15023_v34 }
 0x8fe   :  { %8791 = vmatprep.subr.bf16.mxu1 %v15024_v10 }
 0x901   :  { %8793 = vmatpush3.bf16.msra.mxu1 %v15025_v44 }
 0x902   :  { %8795 = vmatprep.subr.bf16.mxu1 %v15026_v54 }
 0x905   :  { %8797 = vmatpush3.bf16.msra.mxu1 %v15029_v60 }
 0x908   :  { %6732 = vmatmul.mubr.f32.vlgmr.msra.gmra.mrb[12].mxu1 %v12751_v47 }
 0x93b   :  { %v6922_v23 = vpop.f32.mrb[2].mxu1 }
 0x93c   :  { %v6923_v2 = vpop.f32.mrb[3].mxu1 }
 0x93d   :  { %v6924_v5 = vadd.f32 %v6923_v2, %v6922_v23 }
 0x93f   :  { %v5984_v11 = vadd.f32 %v6924_v5, %v6787_v51 }
 0x95b   :  { %v6957_v24 = vpop.f32.mrb[4].mxu1 }
 0x95c   :  { %v6958_v16 = vpop.f32.mrb[5].mxu1 }
 0x95d   :  { %v6959_v56 = vadd.f32 %v6958_v16, %v6957_v24 }
 0x95f   :  { %v6216_v7 = vadd.f32 %v6959_v56, %v5984_v11 }
 0x960   :  { %9092 = shalt.err (!%p9089_p4)
}
 0x961   :  { %s9093_s29 = scalar_lea.hbm %s12972_s12, 128 }
 0x962   :  { %p9094_p5 = scmp.ne.s32.totalorder %s12972_s12, %s9093_s29  ;;  %p9097_p6 = scmp.lt.u32.totalorder %s9093_s29, %s12972_s12 }
 0x964   :  { %p9099_p7 = pnand %p9097_p6, %p9094_p5 }
 0x966   :  { %9102 = shalt.err (!%p9099_p7)
}
 0x967   :  { %6757 = dma.vmem_to_hbm [thread:$0]  %s6755_s23, 128, %s12972_s12, [#allocation18]  }
 0x968   :  { %s9176_s18 = smov [#allocation19]  }
 0x969   :  { %s6764_s19 = sshll.u32 %s9176_s18, 4  ;;  %s6765_s19 = int_to_ptr.vmem [resolvable:$true] %s6764_s19 }
 0x96a   :  { %s9103_s1 = scalar_lea.vmem %s6765_s19, 128  ;;  %p9108_p9 = scmp.lt.s32.totalorder %s6765_s19, %s6765_s19 }
 0x96b   :  { %p9104_p8 = scmp.ne.s32.totalorder %s6765_s19, %s9103_s1  ;;  %p9109_p10 = scmp.lt.s32.totalorder %s9103_s1, %s9103_s1 }
 0x96d   :  { %p9110_p11 = por %p9109_p10, %p9108_p9 }
 0x96f   :  { %p9111_p12 = pnand %p9110_p11, %p9104_p8 }
 0x971   :  { %9114 = shalt.err (!%p9111_p12)
}
 0x972   :  { %s9115_s24 = scalar_lea.hbm %s12973_s13, 128 }
 0x973   :  { %p9116_p13 = scmp.ne.s32.totalorder %s12973_s13, %s9115_s24  ;;  %p9119_p0 = scmp.lt.u32.totalorder %s9115_s24, %s12973_s13 }
 0x975   :  { %p9121_p1 = pnand %p9119_p0, %p9116_p13 }
 0x977   :  { %9124 = shalt.err (!%p9121_p1)
}
 0x978   :  { %6767 = dma.vmem_to_hbm [thread:$0]  %s6765_s19, 128, %s12973_s13, [#allocation18]  }
 0x979   :  { %s9177_s15 = smov [#allocation16]  }
 0x97a   :  { %s6744_s0 = sshll.u32 %s9177_s15, 4  ;;  %s6745_s0 = int_to_ptr.vmem [resolvable:$true] %s6744_s0 }
 0x97b   :  { %v6992_v47 = vpop.f32.mrb[6].mxu1  ;;  %s9125_s13 = scalar_lea.vmem %s6745_s0, 128  ;;  %p9130_p3 = scmp.lt.s32.totalorder %s6745_s0, %s6745_s0 }
 0x97c   :  { %v6993_v4 = vpop.f32.mrb[7].mxu1  ;;  %p9126_p2 = scmp.ne.s32.totalorder %s6745_s0, %s9125_s13  ;;  %p9131_p4 = scmp.lt.s32.totalorder %s9125_s13, %s9125_s13 }
 0x97d   :  { %v6994_v29 = vadd.f32 %v6993_v4, %v6992_v47 }
 0x97e   :  { %p9132_p5 = por %p9131_p4, %p9130_p3 }
 0x97f   :  { %v6354_v49 = vadd.f32 %v6994_v29, %v6216_v7 }
 0x980   :  { %p9133_p6 = pnand %p9132_p5, %p9126_p2 }
 0x99b   :  { %v7027_v46 = vpop.f32.mrb[8].mxu1 }
 0x99c   :  { %v7028_v33 = vpop.f32.mrb[9].mxu1 }
 0x99d   :  { %v7029_v31 = vadd.f32 %v7028_v33, %v7027_v46 }
 0x99f   :  { %v6462_v21 = vadd.f32 %v7029_v31, %v6354_v49 }
 0x9bb   :  { %v7062_v32 = vpop.f32.mrb[10].mxu1 }
 0x9bc   :  { %v7063_v28 = vpop.f32.mrb[11].mxu1 }
 0x9bd   :  { %v7064_v42 = vadd.f32 %v7063_v28, %v7062_v32 }
 0x9bf   :  { %v6630_v34 = vadd.f32 %v7064_v42, %v6462_v21 }
 0x9db   :  { %v7097_v10 = vpop.f32.mrb[12].mxu1 }
 0x9dc   :  { %v7098_v44 = vpop.f32.mrb[13].mxu1 }
 0x9dd   :  { %v7099_v54 = vadd.f32 %v7098_v44, %v7097_v10 }
 0x9df   :  { %v6734_v60 = vadd.f32 %v7099_v54, %v6630_v34 }
 0x9e1   :  { %6737 = vst [vmem:[#allocation16] sm:$0xff] %v6734_v60 }
 0x9e2   :  { %9136 = shalt.err (!%p9133_p6)
}
 0x9e3   :  { %s9137_s27 = scalar_lea.hbm %s12971_s11, 128 }
 0x9e4   :  { %p9138_p7 = scmp.ne.s32.totalorder %s12971_s11, %s9137_s27  ;;  %p9141_p8 = scmp.lt.u32.totalorder %s9137_s27, %s12971_s11 }
 0x9e6   :  { %p9143_p9 = pnand %p9141_p8, %p9138_p7 }
 0x9e8   :  { %9146 = shalt.err (!%p9143_p9)
}
 0x9e9   :  { %6747 = dma.vmem_to_hbm [thread:$0]  %s6745_s0, 128, %s12971_s11, [#allocation6]  }
 0x9ea   :  { %9155 = dma.done.wait [#allocation6], 128  }
 0x9eb   :  { %9156 = vsyncadd [#allocation6], 4294967168 }
 0x9ec   :  { %9157 = dma.done.wait [#allocation18], 256  }
 0x9ed   :  { %9158 = vsyncadd [#allocation18], 4294967040 }
 0x9ee   :  { %6777 = vsyncpa [#allocation5], 1 }
 0x9ef   :  { %6778 = vsyncpa [#allocation8], 1 }
 0x9f0   :  { %6779 = vsyncpa [#allocation11], 1 }
 0x9f1   :  { %6780 = vsyncpa [#allocation14], 1 }
 0x9f2   :  { %6781 = vsyncpa [#allocation6], 1 }
 0x9f3   :  { %6782 = vsyncpa [#allocation18], 1 }

</bundles_post_ra>
